<compile_context>
chip_gen: v7x
topology: tpu7x:2x2x1
jax: 0.10.0
libtpu: 0.0.40
codegen_flags: <defaults>
</compile_context>

<pallas_src>
import functools

import jax
import jax.numpy as jnp
from jax.experimental import pallas as pl
from jax.experimental.pallas import tpu as pltpu


def _fused_add_relu_conv1x1_kernel(a_ref, b_ref, w_ref, o_ref):
    # a_ref, b_ref: (C_in, TS) f32 activation tiles for one batch element.
    # w_ref:        (C_out, C_in) f32, resident in VMEM (constant index map).
    # o_ref:        (C_out, TS) f32.
    x = jnp.maximum(a_ref[...] + b_ref[...], 0.0)             # f32 VPU
    y = jnp.dot(w_ref[...].astype(jnp.bfloat16),              # bf16 MXU,
                x.astype(jnp.bfloat16),                       # f32 accumulate
                preferred_element_type=jnp.float32)
    o_ref[...] = y.astype(o_ref.dtype)


def _pick_spatial_tile(hw, ts_max=512):
    """Pick spatial tile TS (multiple of 128, lane-dense stores).

    Prefers the largest 128-multiple tile that still yields >= 4 spatial grid
    steps: enough pipeline depth for DMA/compute overlap and >= 2 blocks per
    v7x TensorCore on the 'parallel' axis.  The grid uses cdiv, so the last
    block may overhang HW; Pallas masks the tail writes (no jnp.pad needed).
    """
    for ts in (ts_max, 256, 128):
        if pl.cdiv(hw, ts) >= 4:
            return ts
    # Small HW: a single lane-aligned block covering everything.
    return min(ts_max, max(128, pl.cdiv(hw, 128) * 128))


@functools.partial(jax.jit, static_argnames=("ts_max",))
def fused_add_relu_conv1x1(x260, x252, weight, *, ts_max=512):
    """out = conv2d_1x1(relu(x260 + x252), weight); all tensors NCHW.

    x260, x252: (N, C_in, H, W) f32
    weight:     (C_out, C_in, 1, 1) f32 (bias=False)
    returns:    (N, C_out, H, W) f32
    """
    n, c_in, h, w = x260.shape
    c_out = weight.shape[0]
    hw = h * w

    # NCHW -> (N, C_in, H*W): contiguous collapse, no data movement.
    a = x260.reshape(n, c_in, hw)
    b = x252.reshape(n, c_in, hw)
    # (C_out, C_in, 1, 1) -> (C_out, C_in): reshape only, stays f32 (the bf16
    # cast happens inside the kernel, on the VMEM-resident weight block).
    wt = weight.reshape(c_out, c_in)

    ts = _pick_spatial_tile(hw, ts_max)
    grid = (n, pl.cdiv(hw, ts))  # last spatial block may overhang; tail masked

    out = pl.pallas_call(
        _fused_add_relu_conv1x1_kernel,
        out_shape=jax.ShapeDtypeStruct((n, c_out, hw), x260.dtype),
        grid_spec=pltpu.PrefetchScalarGridSpec(
            num_scalar_prefetch=0,
            grid=grid,
            in_specs=[
                pl.BlockSpec((None, c_in, ts), lambda i, j: (i, 0, j)),
                pl.BlockSpec((None, c_in, ts), lambda i, j: (i, 0, j)),
                # Constant block index -> weight DMAed once, stays resident.
                pl.BlockSpec((c_out, c_in), lambda i, j: (0, 0)),
            ],
            out_specs=pl.BlockSpec((None, c_out, ts), lambda i, j: (i, 0, j)),
        ),
        compiler_params=pltpu.CompilerParams(
            # Both axes are independent: megacore can shard either on v7x.
            dimension_semantics=("parallel", "parallel"),
            # Footprint is ~7 MiB (2 x 1 MiB activations double-buffered +
            # 1 MiB weight + output); 32 MiB is safe on v5e/v6e/v7x.
            vmem_limit_bytes=32 * 1024 * 1024,
        ),
    )(a, b, wt)

    return out.reshape(n, c_out, h, w)


if __name__ == "__main__":
    # Module: Conv2d(1024, 256, kernel=1, bias=False) applied to (1,1024,28,28).
    N, C_IN, C_OUT, H, W = 1, 1024, 256, 28, 28

    key = jax.random.PRNGKey(0)
    k1, k2, k3 = jax.random.split(key, 3)
    x260 = jax.random.normal(k1, (N, C_IN, H, W), dtype=jnp.float32)
    x252 = jax.random.normal(k2, (N, C_IN, H, W), dtype=jnp.float32)
    weight = jax.random.normal(k3, (C_OUT, C_IN, 1, 1), dtype=jnp.float32) * (
        1.0 / jnp.sqrt(C_IN)
    )

    out = fused_add_relu_conv1x1(x260, x252, weight)
    out = jax.block_until_ready(out)
    assert out.shape == (N, C_OUT, H, W)

    # References.
    relu = jnp.maximum(x260 + x252, 0.0)
    w2d = weight.reshape(C_OUT, C_IN)
    # Reference with the same operand precision as the kernel (bf16 MXU
    # operands, f32 accumulation) -> tight tolerance.
    ref_bf16 = jnp.einsum(
        "oc,nchw->nohw",
        w2d.astype(jnp.bfloat16),
        relu.astype(jnp.bfloat16),
        preferred_element_type=jnp.float32,
    )
    # Full-f32 reference (PyTorch semantics) -> looser tolerance for bf16 dot.
    ref_f32 = jnp.einsum("oc,nchw->nohw", w2d, relu,
                         preferred_element_type=jnp.float32)
    ref_bf16, ref_f32 = jax.block_until_ready((ref_bf16, ref_f32))

    assert jnp.allclose(out, ref_bf16, atol=1e-2, rtol=1e-2)
    assert jnp.allclose(out, ref_f32, atol=5e-2, rtol=5e-2)
    print("KERNEL_OK")
</pallas_src>

<mosaic_0001>
module attributes {stable_mosaic.version = 11 : i64} {
  func.func @_fused_add_relu_conv1x1_kernel(%arg0: i32, %arg1: i32, %arg2: memref<1x1024x256xf32, #tpu.memory_space<vmem>>, %arg3: memref<1x1024x256xf32, #tpu.memory_space<vmem>>, %arg4: memref<256x1024xf32, #tpu.memory_space<vmem>>, %arg5: memref<1x256x256xf32, #tpu.memory_space<vmem>>) attributes {dimension_semantics = [#tpu.dimension_semantics<parallel>, #tpu.dimension_semantics<parallel>], iteration_bounds = array<i64: 1, 4>, scalar_prefetch = 0 : i64, scratch_operands = 0 : i64, tpu.core_type = #tpu.core_type<tc>, window_params = [{transform_indices = @transform_0, window_bounds = array<i64: 1, 1024, 256>}, {transform_indices = @transform_1, window_bounds = array<i64: 1, 1024, 256>}, {pipeline_mode = #tpu.pipeline_mode<synchronous>, transform_indices = @transform_2, window_bounds = array<i64: 256, 1024>}, {transform_indices = @transform_3, window_bounds = array<i64: 1, 256, 256>}]} {
    %c0 = arith.constant 0 : index
    %c0_0 = arith.constant 0 : index
    %c0_1 = arith.constant 0 : index
    %0 = vector.load %arg2[%c0, %c0_0, %c0_1] : memref<1x1024x256xf32, #tpu.memory_space<vmem>>, vector<1x1024x256xf32>
    %1 = vector.shape_cast %0 : vector<1x1024x256xf32> to vector<1024x256xf32>
    %c0_2 = arith.constant 0 : index
    %c0_3 = arith.constant 0 : index
    %c0_4 = arith.constant 0 : index
    %2 = vector.load %arg3[%c0_2, %c0_3, %c0_4] : memref<1x1024x256xf32, #tpu.memory_space<vmem>>, vector<1x1024x256xf32>
    %3 = vector.shape_cast %2 : vector<1x1024x256xf32> to vector<1024x256xf32>
    %4 = arith.addf %1, %3 : vector<1024x256xf32>
    %cst = arith.constant 0.000000e+00 : f32
    %5 = vector.broadcast %cst : f32 to vector<1024x256xf32>
    %6 = arith.maximumf %4, %5 : vector<1024x256xf32>
    %c0_5 = arith.constant 0 : index
    %c0_6 = arith.constant 0 : index
    %7 = vector.load %arg4[%c0_5, %c0_6] : memref<256x1024xf32, #tpu.memory_space<vmem>>, vector<256x1024xf32>
    %8 = arith.truncf %7 : vector<256x1024xf32> to vector<256x1024xbf16>
    %9 = arith.truncf %6 : vector<1024x256xf32> to vector<1024x256xbf16>
    %cst_7 = arith.constant dense<0.000000e+00> : vector<256x256xf32>
    %10 = tpu.matmul %8, %9, %cst_7 {dimension_numbers = #tpu.dot_dimension_numbers<[1], [0], [0], [1], [0, 0, 1, 1], [], []>} : vector<256x1024xbf16>, vector<1024x256xbf16>, vector<256x256xf32> -> vector<256x256xf32>
    %c0_8 = arith.constant 0 : index
    %c0_9 = arith.constant 0 : index
    %c0_10 = arith.constant 0 : index
    %11 = vector.load %arg5[%c0_8, %c0_9, %c0_10] : memref<1x256x256xf32, #tpu.memory_space<vmem>>, vector<1x256x256xf32>
    %12 = vector.shape_cast %11 : vector<1x256x256xf32> to vector<256x256xf32>
    %13 = vector.shape_cast %10 : vector<256x256xf32> to vector<1x256x256xf32>
    tpu.vector_store %arg5[%c0_8, %c0_9, %c0_10], %13 {strides = array<i32>} : memref<1x256x256xf32, #tpu.memory_space<vmem>>, vector<1x256x256xf32>,
    return
  }
  func.func @transform_0(%arg0: i32, %arg1: i32) -> (i32, i32, i32) {
    %c0_i32 = arith.constant 0 : i32
    %c0_i32_0 = arith.constant 0 : i32
    return %arg0, %c0_i32, %arg1 : i32, i32, i32
  }
  func.func @transform_1(%arg0: i32, %arg1: i32) -> (i32, i32, i32) {
    %c0_i32 = arith.constant 0 : i32
    %c0_i32_0 = arith.constant 0 : i32
    return %arg0, %c0_i32, %arg1 : i32, i32, i32
  }
  func.func @transform_2(%arg0: i32, %arg1: i32) -> (i32, i32) {
    %c0_i32 = arith.constant 0 : i32
    %c0_i32_0 = arith.constant 0 : i32
    %c0_i32_1 = arith.constant 0 : i32
    return %c0_i32, %c0_i32_0 : i32, i32
  }
  func.func @transform_3(%arg0: i32, %arg1: i32) -> (i32, i32, i32) {
    %c0_i32 = arith.constant 0 : i32
    %c0_i32_0 = arith.constant 0 : i32
    return %arg0, %c0_i32, %arg1 : i32, i32, i32
  }
}

</mosaic_0001>

<bundles_post_ra>
// kernel: fused_add_relu_conv1x1.1
= control target key start
LH: loop header
LB: loop body
LE: loop exit
PB: predicated region body
PF: predicated region fallthrough
CT: control target
= control target key end

     0   :  { %s6638_s12 = smov 0   ;;  %s6640_s13 = smov 0   ;;  %s12317_s0 = inlined_call_operand.vmem [shape: f32[1,1024,784], index: 0, kind: input, shape index: {}]   ;;  %s12318_s1 = inlined_call_operand.vmem [shape: f32[1,1024,784], index: 1, kind: input, shape index: {}]   ;;  %s12319_s2 = inlined_call_operand.vmem [shape: f32[256,1024], index: 2, kind: input, shape index: {}]   ;;  %s12320_s3 = inlined_call_operand.vmem [shape: f32[1,256,784], index: 3, kind: output, shape index: {}]  }
   0x1   :  { %s6642_s14 = smov 0   ;;  %s6644_s15 = smov 0  }
   0x2   :  { %s6646_s16 = smov 0  }
   0x3 LB: > { %s22_s17 = sadd.s32 1, %s6478_s15  ;;  %s5744_s18 = sadd.s32 4294967295, %s6482_s16   ;;  %s6482_s16 = sphi %s6646_s16, %s13_s16   ;;  %s6478_s15 = sphi %s6644_s15, %s12366_s15   ;;  %s6474_s14 = sphi %s6642_s14, %s12365_s14   ;;  %s6470_s13 = sphi %s6640_s13, %s12364_s13   ;;  %s6466_s12 = sphi %s6638_s12, %s12363_s12  }
   0x4   : > { %p23_p0 = scmp.ge.s32.totalorder %s22_s17, 4  ;;  %p41_p1 = scmp.ne.s32.totalorder %s6470_s13, %s6466_s12 }
   0x5   : > { %p42_p2 = scmp.eq.s32.totalorder %s6482_s16, 0  ;;  %p122_p4 = scmp.eq.s32.totalorder %s5744_s18, 3 }
   0x6   : > { %s12368_s17 = smov (%p23_p0, %s22_s17), 0  ;;  %s34_s21 = sadd.s32 1, %s6470_s13 }
   0x7   : > { %p6670_p3 = por %p42_p2, %p41_p1  ;;  %s30_s20 = ssub.s32 %s6478_s15, %s12368_s17 }
   0x8   : > { %p32_p5 = scmp.eq.s32.totalorder %s30_s20, 0  ;;  %p6677_p6 = por %p122_p4, %p41_p1 }
   0x9   : > { %p5747_p7 = scmp.ge.s32.totalorder %s6482_s16, 4 }
   0xa   : > { %s6682_s23 = scalar_select %p32_p5, %s6470_s13, %s34_s21  }
   0xb   : > { %147 = sbr.rel (%p5747_p7) target bundleno = 874 (0x36a), region = 20 }
  0x12   : > { %150 = sbr.rel (!%p6670_p3) target bundleno = 446 (0x1be), region = 24  ;;  %s152_s24 = sand.u32 (%p6670_p3), 1, %s6470_s13  }
  0x13   : > { %s5749_s25 = sshll.u32 (%p6670_p3), %s6478_s15, 1  ;;  %s5748_s26 = sshll.u32 (%p6670_p3), %s152_s24, 11 }
  0x14   : > { %s156_s27 = ssub.s32 (%p6670_p3), 7, %s5749_s25  ;;  %s5811_s28 = sshll.u32 (%p6670_p3), %s6478_s15, 4 }
  0x15   : > { %p157_p8 = scmp.lt.s32.totalorder (%p6670_p3), %s156_s27, 2  ;;  %s6693_s4 = scalar_lea.vmem (%p6670_p3), %s12317_s0, %s5811_s28  }
  0x16   : > { %s6697_s7 = scalar_lea.vmem (%p6670_p3), [#allocation2], %s5748_s26  }
  0x19   : > { %s12370_s27 = smov (!%p157_p8, %s156_s27), 2 }
  0x1a   : > { %s5750_s5 = sshll.u32 %s12370_s27, 14  ;;  %s6695_s6 = sshll.u32 %s12370_s27, 3 }
  0x1b   : > { %p5754_p9 = scmp.eq.s32.totalorder %s5750_s5, 0 }
  0x1c   : > { %p169_p10 = scmp.lt.u32.totalorder (!%p5754_p9), %s6695_s6, 8 }
  0x1d   : > { %168 = sbr.rel (%p5754_p9) target bundleno = 446 (0x1be), region = 28 }
  0x24   : > { %172 = sbr.rel (%p169_p10) target bundleno = 315 (0x13b), region = 32  ;;  %s6701_s8 = sand.u32 (!%p169_p10), 7, %s6695_s6  }
  0x25   : > { %p442_p11 = scmp.eq.s32.totalorder (!%p169_p10), %s6701_s8, 0  ;;  %p5755_p12 = scmp.ne.s32.totalorder (!%p169_p10), %s6701_s8, 0 }
  0x2b   : > { %445 = sbr.rel (%p5755_p12) target bundleno = 115 (0x73), region = 47  ;;  %s446_s9 = sshrl.u32 (!%p5755_p12), %s6695_s6, 3 }
  0x2c   : > { %s12323_s10 = smov (!%p5755_p12), %s6697_s7  ;;  %s12324_s11 = smov (!%p5755_p12), %s6693_s4 }
  0x2d   : > { %s6712_s18 = smov (!%p5755_p12), 0   ;;  %s6714_s20 = smov (!%p5755_p12), 0  }
  0x32 LB: >> { %v458_v0 = vld [vmem:[%s6490_s11] sm:$0xff]  ;;  %v460_v1 = vld [vmem:[%s6490_s11 + $0x38] sm:$0xff]  ;;  %v462_v2 = vld [vmem:[%s6490_s11 + $0x70] sm:$0xff]  ;;  %s714_s21 = sadd.s32 1, %s6494_s18  ;;  %s452_s20 = sadd.s32 1, %s6498_s20   ;;  %s6498_s20 = sphi %s6714_s20, %s452_s20   ;;  %s6494_s18 = sphi %s6712_s18, %s12327_s18   ;;  %s6490_s11 = sphi %s12324_s11, %s12326_s11   ;;  %s6486_s10 = sphi %s12323_s10, %s12325_s10  }
  0x33   : >> { %459 = vst [vmem:[%s6486_s10] sm:$0xff] %v458_v0  ;;  %461 = vst [vmem:[%s6486_s10 + $0x10] sm:$0xff] %v460_v1  ;;  %v464_v3 = vld [vmem:[%s6490_s11 + $0xa8] sm:$0xff]  ;;  %v466_v4 = vld [vmem:[%s6490_s11 + $0xe0] sm:$0xff]  ;;  %p715_p13 = scmp.ge.s32.totalorder %s714_s21, %s446_s9  ;;  %p451_p0 = scmp.ge.s32.totalorder %s452_s20, %s446_s9 }
  0x34   : >> { %463 = vst [vmem:[%s6486_s10 + $0x20] sm:$0xff] %v462_v2  ;;  %v468_v5 = vld [vmem:[%s6490_s11 + $0x118] sm:$0xff]  ;;  %465 = vst [vmem:[%s6486_s10 + $0x30] sm:$0xff] %v464_v3  ;;  %v470_v6 = vld [vmem:[%s6490_s11 + $0x150] sm:$0xff] }
  0x35   : >> { %467 = vst [vmem:[%s6486_s10 + $0x40] sm:$0xff] %v466_v4  ;;  %469 = vst [vmem:[%s6486_s10 + $0x50] sm:$0xff] %v468_v5  ;;  %v472_v7 = vld [vmem:[%s6490_s11 + $0x188] sm:$0xff]  ;;  %v474_v8 = vld [vmem:[%s6490_s11 + $0x1c0] sm:$0xff]  ;;  %s12372_s21 = smov (%p715_p13, %s714_s21), 0 }
  0x36   : >> { %471 = vst [vmem:[%s6486_s10 + $0x60] sm:$0xff] %v470_v6  ;;  %473 = vst [vmem:[%s6486_s10 + $0x70] sm:$0xff] %v472_v7  ;;  %v476_v9 = vld [vmem:[%s6490_s11 + $0x1f8] sm:$0xff]  ;;  %v478_v10 = vld [vmem:[%s6490_s11 + $0x230] sm:$0xff]  ;;  %s5757_s24 = sshll.u32 %s12372_s21, 3  ;;  %s12327_s18 = smov %s12372_s21 }
  0x37   : >> { %475 = vst [vmem:[%s6486_s10 + $0x80] sm:$0xff] %v474_v8  ;;  %v480_v11 = vld [vmem:[%s6490_s11 + $0x268] sm:$0xff]  ;;  %477 = vst [vmem:[%s6486_s10 + $0x90] sm:$0xff] %v476_v9  ;;  %v482_v12 = vld [vmem:[%s6490_s11 + $0x2a0] sm:$0xff]  ;;  %s6771_s25 = scalar_lea.vmem %s6693_s4, %s5757_s24   ;;  %s6774_s26 = scalar_lea.vmem %s6697_s7, %s5757_s24 [#allocation2]  }
  0x38   : >> { %479 = vst [vmem:[%s6486_s10 + $0xa0] sm:$0xff] %v478_v10  ;;  %481 = vst [vmem:[%s6486_s10 + $0xb0] sm:$0xff] %v480_v11  ;;  %v484_v13 = vld [vmem:[%s6490_s11 + $0x2d8] sm:$0xff]  ;;  %v486_v14 = vld [vmem:[%s6490_s11 + $0x310] sm:$0xff] }
  0x39   : >> { %483 = vst [vmem:[%s6486_s10 + $0xc0] sm:$0xff] %v482_v12  ;;  %485 = vst [vmem:[%s6486_s10 + $0xd0] sm:$0xff] %v484_v13  ;;  %v488_v15 = vld [vmem:[%s6490_s11 + $0x348] sm:$0xff]  ;;  %v490_v16 = vld [vmem:[%s6490_s11 + $0x380] sm:$0xff] }
  0x3a   : >> { %487 = vst [vmem:[%s6486_s10 + $0xe0] sm:$0xff] %v486_v14  ;;  %v492_v17 = vld [vmem:[%s6490_s11 + $0x3b8] sm:$0xff]  ;;  %489 = vst [vmem:[%s6486_s10 + $0xf0] sm:$0xff] %v488_v15  ;;  %v494_v18 = vld [vmem:[%s6490_s11 + $0x3f0] sm:$0xff] }
  0x3b   : >> { %491 = vst [vmem:[%s6486_s10 + $0x100] sm:$0xff] %v490_v16  ;;  %493 = vst [vmem:[%s6486_s10 + $0x110] sm:$0xff] %v492_v17  ;;  %v496_v19 = vld [vmem:[%s6490_s11 + $0x428] sm:$0xff]  ;;  %v498_v20 = vld [vmem:[%s6490_s11 + $0x460] sm:$0xff] }
  0x3c   : >> { %495 = vst [vmem:[%s6486_s10 + $0x120] sm:$0xff] %v494_v18  ;;  %497 = vst [vmem:[%s6486_s10 + $0x130] sm:$0xff] %v496_v19  ;;  %v500_v21 = vld [vmem:[%s6490_s11 + $0x498] sm:$0xff]  ;;  %v502_v22 = vld [vmem:[%s6490_s11 + $0x4d0] sm:$0xff] }
  0x3d   : >> { %499 = vst [vmem:[%s6486_s10 + $0x140] sm:$0xff] %v498_v20  ;;  %v504_v23 = vld [vmem:[%s6490_s11 + $0x508] sm:$0xff]  ;;  %501 = vst [vmem:[%s6486_s10 + $0x150] sm:$0xff] %v500_v21  ;;  %v506_v24 = vld [vmem:[%s6490_s11 + $0x540] sm:$0xff] }
  0x3e   : >> { %503 = vst [vmem:[%s6486_s10 + $0x160] sm:$0xff] %v502_v22  ;;  %505 = vst [vmem:[%s6486_s10 + $0x170] sm:$0xff] %v504_v23  ;;  %v508_v25 = vld [vmem:[%s6490_s11 + $0x578] sm:$0xff]  ;;  %v510_v26 = vld [vmem:[%s6490_s11 + $0x5b0] sm:$0xff] }
  0x3f   : >> { %507 = vst [vmem:[%s6486_s10 + $0x180] sm:$0xff] %v506_v24  ;;  %509 = vst [vmem:[%s6486_s10 + $0x190] sm:$0xff] %v508_v25  ;;  %v512_v27 = vld [vmem:[%s6490_s11 + $0x5e8] sm:$0xff]  ;;  %v514_v28 = vld [vmem:[%s6490_s11 + $0x620] sm:$0xff] }
  0x40   : >> { %511 = vst [vmem:[%s6486_s10 + $0x1a0] sm:$0xff] %v510_v26  ;;  %v516_v29 = vld [vmem:[%s6490_s11 + $0x658] sm:$0xff]  ;;  %513 = vst [vmem:[%s6486_s10 + $0x1b0] sm:$0xff] %v512_v27  ;;  %v518_v30 = vld [vmem:[%s6490_s11 + $0x690] sm:$0xff] }
  0x41   : >> { %515 = vst [vmem:[%s6486_s10 + $0x1c0] sm:$0xff] %v514_v28  ;;  %517 = vst [vmem:[%s6486_s10 + $0x1d0] sm:$0xff] %v516_v29  ;;  %v520_v31 = vld [vmem:[%s6490_s11 + $0x6c8] sm:$0xff]  ;;  %v522_v32 = vld [vmem:[%s6490_s11 + $0x700] sm:$0xff] }
  0x42   : >> { %519 = vst [vmem:[%s6486_s10 + $0x1e0] sm:$0xff] %v518_v30  ;;  %521 = vst [vmem:[%s6486_s10 + $0x1f0] sm:$0xff] %v520_v31  ;;  %v524_v33 = vld [vmem:[%s6490_s11 + $0x738] sm:$0xff]  ;;  %v526_v34 = vld [vmem:[%s6490_s11 + $0x770] sm:$0xff] }
  0x43   : >> { %523 = vst [vmem:[%s6486_s10 + $0x200] sm:$0xff] %v522_v32  ;;  %v528_v35 = vld [vmem:[%s6490_s11 + $0x7a8] sm:$0xff]  ;;  %525 = vst [vmem:[%s6486_s10 + $0x210] sm:$0xff] %v524_v33  ;;  %v530_v36 = vld [vmem:[%s6490_s11 + $0x7e0] sm:$0xff] }
  0x44   : >> { %527 = vst [vmem:[%s6486_s10 + $0x220] sm:$0xff] %v526_v34  ;;  %529 = vst [vmem:[%s6486_s10 + $0x230] sm:$0xff] %v528_v35  ;;  %v532_v37 = vld [vmem:[%s6490_s11 + $0x818] sm:$0xff]  ;;  %v534_v38 = vld [vmem:[%s6490_s11 + $0x850] sm:$0xff] }
  0x45   : >> { %531 = vst [vmem:[%s6486_s10 + $0x240] sm:$0xff] %v530_v36  ;;  %533 = vst [vmem:[%s6486_s10 + $0x250] sm:$0xff] %v532_v37  ;;  %v536_v39 = vld [vmem:[%s6490_s11 + $0x888] sm:$0xff]  ;;  %v538_v40 = vld [vmem:[%s6490_s11 + $0x8c0] sm:$0xff] }
  0x46   : >> { %535 = vst [vmem:[%s6486_s10 + $0x260] sm:$0xff] %v534_v38  ;;  %v540_v41 = vld [vmem:[%s6490_s11 + $0x8f8] sm:$0xff]  ;;  %537 = vst [vmem:[%s6486_s10 + $0x270] sm:$0xff] %v536_v39  ;;  %v542_v42 = vld [vmem:[%s6490_s11 + $0x930] sm:$0xff] }
  0x47   : >> { %539 = vst [vmem:[%s6486_s10 + $0x280] sm:$0xff] %v538_v40  ;;  %541 = vst [vmem:[%s6486_s10 + $0x290] sm:$0xff] %v540_v41  ;;  %v544_v43 = vld [vmem:[%s6490_s11 + $0x968] sm:$0xff]  ;;  %v546_v44 = vld [vmem:[%s6490_s11 + $0x9a0] sm:$0xff] }
  0x48   : >> { %543 = vst [vmem:[%s6486_s10 + $0x2a0] sm:$0xff] %v542_v42  ;;  %545 = vst [vmem:[%s6486_s10 + $0x2b0] sm:$0xff] %v544_v43  ;;  %v548_v45 = vld [vmem:[%s6490_s11 + $0x9d8] sm:$0xff]  ;;  %v550_v46 = vld [vmem:[%s6490_s11 + $0xa10] sm:$0xff] }
  0x49   : >> { %547 = vst [vmem:[%s6486_s10 + $0x2c0] sm:$0xff] %v546_v44  ;;  %v552_v47 = vld [vmem:[%s6490_s11 + $0xa48] sm:$0xff]  ;;  %549 = vst [vmem:[%s6486_s10 + $0x2d0] sm:$0xff] %v548_v45  ;;  %v554_v48 = vld [vmem:[%s6490_s11 + $0xa80] sm:$0xff] }
  0x4a   : >> { %551 = vst [vmem:[%s6486_s10 + $0x2e0] sm:$0xff] %v550_v46  ;;  %553 = vst [vmem:[%s6486_s10 + $0x2f0] sm:$0xff] %v552_v47  ;;  %v556_v49 = vld [vmem:[%s6490_s11 + $0xab8] sm:$0xff]  ;;  %v558_v50 = vld [vmem:[%s6490_s11 + $0xaf0] sm:$0xff] }
  0x4b   : >> { %555 = vst [vmem:[%s6486_s10 + $0x300] sm:$0xff] %v554_v48  ;;  %557 = vst [vmem:[%s6486_s10 + $0x310] sm:$0xff] %v556_v49  ;;  %v560_v51 = vld [vmem:[%s6490_s11 + $0xb28] sm:$0xff]  ;;  %v562_v52 = vld [vmem:[%s6490_s11 + $0xb60] sm:$0xff] }
  0x4c   : >> { %559 = vst [vmem:[%s6486_s10 + $0x320] sm:$0xff] %v558_v50  ;;  %v564_v53 = vld [vmem:[%s6490_s11 + $0xb98] sm:$0xff]  ;;  %561 = vst [vmem:[%s6486_s10 + $0x330] sm:$0xff] %v560_v51  ;;  %v566_v54 = vld [vmem:[%s6490_s11 + $0xbd0] sm:$0xff] }
  0x4d   : >> { %563 = vst [vmem:[%s6486_s10 + $0x340] sm:$0xff] %v562_v52  ;;  %565 = vst [vmem:[%s6486_s10 + $0x350] sm:$0xff] %v564_v53  ;;  %v568_v55 = vld [vmem:[%s6490_s11 + $0xc08] sm:$0xff]  ;;  %v570_v56 = vld [vmem:[%s6490_s11 + $0xc40] sm:$0xff] }
  0x4e   : >> { %567 = vst [vmem:[%s6486_s10 + $0x360] sm:$0xff] %v566_v54  ;;  %569 = vst [vmem:[%s6486_s10 + $0x370] sm:$0xff] %v568_v55  ;;  %v572_v57 = vld [vmem:[%s6490_s11 + $0xc78] sm:$0xff]  ;;  %v574_v58 = vld [vmem:[%s6490_s11 + $0xcb0] sm:$0xff] }
  0x4f   : >> { %571 = vst [vmem:[%s6486_s10 + $0x380] sm:$0xff] %v570_v56  ;;  %v576_v59 = vld [vmem:[%s6490_s11 + $0xce8] sm:$0xff]  ;;  %573 = vst [vmem:[%s6486_s10 + $0x390] sm:$0xff] %v572_v57  ;;  %v578_v60 = vld [vmem:[%s6490_s11 + $0xd20] sm:$0xff] }
  0x50   : >> { %575 = vst [vmem:[%s6486_s10 + $0x3a0] sm:$0xff] %v574_v58  ;;  %577 = vst [vmem:[%s6486_s10 + $0x3b0] sm:$0xff] %v576_v59  ;;  %v580_v61 = vld [vmem:[%s6490_s11 + $0xd58] sm:$0xff]  ;;  %v582_v62 = vld [vmem:[%s6490_s11 + $0xd90] sm:$0xff] }
  0x51   : >> { %579 = vst [vmem:[%s6486_s10 + $0x3c0] sm:$0xff] %v578_v60  ;;  %581 = vst [vmem:[%s6486_s10 + $0x3d0] sm:$0xff] %v580_v61  ;;  %v584_v63 = vld [vmem:[%s6490_s11 + $0xdc8] sm:$0xff]  ;;  %v586_v0 = vld [vmem:[%s6490_s11 + $0xe00] sm:$0xff] }
  0x52   : >> { %583 = vst [vmem:[%s6486_s10 + $0x3e0] sm:$0xff] %v582_v62  ;;  %v588_v1 = vld [vmem:[%s6490_s11 + $0xe38] sm:$0xff]  ;;  %585 = vst [vmem:[%s6486_s10 + $0x3f0] sm:$0xff] %v584_v63  ;;  %v590_v2 = vld [vmem:[%s6490_s11 + $0xe70] sm:$0xff] }
  0x53   : >> { %587 = vst [vmem:[%s6486_s10 + $0x400] sm:$0xff] %v586_v0  ;;  %589 = vst [vmem:[%s6486_s10 + $0x410] sm:$0xff] %v588_v1  ;;  %v592_v3 = vld [vmem:[%s6490_s11 + $0xea8] sm:$0xff]  ;;  %v594_v4 = vld [vmem:[%s6490_s11 + $0xee0] sm:$0xff] }
  0x54   : >> { %591 = vst [vmem:[%s6486_s10 + $0x420] sm:$0xff] %v590_v2  ;;  %593 = vst [vmem:[%s6486_s10 + $0x430] sm:$0xff] %v592_v3  ;;  %v596_v5 = vld [vmem:[%s6490_s11 + $0xf18] sm:$0xff]  ;;  %v598_v6 = vld [vmem:[%s6490_s11 + $0xf50] sm:$0xff] }
  0x55   : >> { %595 = vst [vmem:[%s6486_s10 + $0x440] sm:$0xff] %v594_v4  ;;  %v600_v7 = vld [vmem:[%s6490_s11 + $0xf88] sm:$0xff]  ;;  %597 = vst [vmem:[%s6486_s10 + $0x450] sm:$0xff] %v596_v5  ;;  %v602_v8 = vld [vmem:[%s6490_s11 + $0xfc0] sm:$0xff] }
  0x56   : >> { %599 = vst [vmem:[%s6486_s10 + $0x460] sm:$0xff] %v598_v6  ;;  %601 = vst [vmem:[%s6486_s10 + $0x470] sm:$0xff] %v600_v7  ;;  %v604_v9 = vld [vmem:[%s6490_s11 + $0xff8] sm:$0xff]  ;;  %v606_v10 = vld [vmem:[%s6490_s11 + $0x1030] sm:$0xff] }
  0x57   : >> { %603 = vst [vmem:[%s6486_s10 + $0x480] sm:$0xff] %v602_v8  ;;  %605 = vst [vmem:[%s6486_s10 + $0x490] sm:$0xff] %v604_v9  ;;  %v608_v11 = vld [vmem:[%s6490_s11 + $0x1068] sm:$0xff]  ;;  %v610_v12 = vld [vmem:[%s6490_s11 + $0x10a0] sm:$0xff] }
  0x58   : >> { %607 = vst [vmem:[%s6486_s10 + $0x4a0] sm:$0xff] %v606_v10  ;;  %v612_v13 = vld [vmem:[%s6490_s11 + $0x10d8] sm:$0xff]  ;;  %609 = vst [vmem:[%s6486_s10 + $0x4b0] sm:$0xff] %v608_v11  ;;  %v614_v14 = vld [vmem:[%s6490_s11 + $0x1110] sm:$0xff] }
  0x59   : >> { %611 = vst [vmem:[%s6486_s10 + $0x4c0] sm:$0xff] %v610_v12  ;;  %613 = vst [vmem:[%s6486_s10 + $0x4d0] sm:$0xff] %v612_v13  ;;  %v616_v15 = vld [vmem:[%s6490_s11 + $0x1148] sm:$0xff]  ;;  %v618_v16 = vld [vmem:[%s6490_s11 + $0x1180] sm:$0xff] }
  0x5a   : >> { %615 = vst [vmem:[%s6486_s10 + $0x4e0] sm:$0xff] %v614_v14  ;;  %617 = vst [vmem:[%s6486_s10 + $0x4f0] sm:$0xff] %v616_v15  ;;  %v620_v17 = vld [vmem:[%s6490_s11 + $0x11b8] sm:$0xff]  ;;  %v622_v18 = vld [vmem:[%s6490_s11 + $0x11f0] sm:$0xff] }
  0x5b   : >> { %619 = vst [vmem:[%s6486_s10 + $0x500] sm:$0xff] %v618_v16  ;;  %v624_v19 = vld [vmem:[%s6490_s11 + $0x1228] sm:$0xff]  ;;  %621 = vst [vmem:[%s6486_s10 + $0x510] sm:$0xff] %v620_v17  ;;  %v626_v20 = vld [vmem:[%s6490_s11 + $0x1260] sm:$0xff] }
  0x5c   : >> { %623 = vst [vmem:[%s6486_s10 + $0x520] sm:$0xff] %v622_v18  ;;  %625 = vst [vmem:[%s6486_s10 + $0x530] sm:$0xff] %v624_v19  ;;  %v628_v21 = vld [vmem:[%s6490_s11 + $0x1298] sm:$0xff]  ;;  %v630_v22 = vld [vmem:[%s6490_s11 + $0x12d0] sm:$0xff] }
  0x5d   : >> { %627 = vst [vmem:[%s6486_s10 + $0x540] sm:$0xff] %v626_v20  ;;  %629 = vst [vmem:[%s6486_s10 + $0x550] sm:$0xff] %v628_v21  ;;  %v632_v23 = vld [vmem:[%s6490_s11 + $0x1308] sm:$0xff]  ;;  %v634_v24 = vld [vmem:[%s6490_s11 + $0x1340] sm:$0xff] }
  0x5e   : >> { %631 = vst [vmem:[%s6486_s10 + $0x560] sm:$0xff] %v630_v22  ;;  %v636_v25 = vld [vmem:[%s6490_s11 + $0x1378] sm:$0xff]  ;;  %633 = vst [vmem:[%s6486_s10 + $0x570] sm:$0xff] %v632_v23  ;;  %v638_v26 = vld [vmem:[%s6490_s11 + $0x13b0] sm:$0xff] }
  0x5f   : >> { %635 = vst [vmem:[%s6486_s10 + $0x580] sm:$0xff] %v634_v24  ;;  %637 = vst [vmem:[%s6486_s10 + $0x590] sm:$0xff] %v636_v25  ;;  %v640_v27 = vld [vmem:[%s6490_s11 + $0x13e8] sm:$0xff]  ;;  %v642_v28 = vld [vmem:[%s6490_s11 + $0x1420] sm:$0xff] }
  0x60   : >> { %639 = vst [vmem:[%s6486_s10 + $0x5a0] sm:$0xff] %v638_v26  ;;  %641 = vst [vmem:[%s6486_s10 + $0x5b0] sm:$0xff] %v640_v27  ;;  %v644_v29 = vld [vmem:[%s6490_s11 + $0x1458] sm:$0xff]  ;;  %v646_v30 = vld [vmem:[%s6490_s11 + $0x1490] sm:$0xff] }
  0x61   : >> { %643 = vst [vmem:[%s6486_s10 + $0x5c0] sm:$0xff] %v642_v28  ;;  %v648_v31 = vld [vmem:[%s6490_s11 + $0x14c8] sm:$0xff]  ;;  %645 = vst [vmem:[%s6486_s10 + $0x5d0] sm:$0xff] %v644_v29  ;;  %v650_v32 = vld [vmem:[%s6490_s11 + $0x1500] sm:$0xff] }
  0x62   : >> { %647 = vst [vmem:[%s6486_s10 + $0x5e0] sm:$0xff] %v646_v30  ;;  %649 = vst [vmem:[%s6486_s10 + $0x5f0] sm:$0xff] %v648_v31  ;;  %v652_v33 = vld [vmem:[%s6490_s11 + $0x1538] sm:$0xff]  ;;  %v654_v34 = vld [vmem:[%s6490_s11 + $0x1570] sm:$0xff] }
  0x63   : >> { %651 = vst [vmem:[%s6486_s10 + $0x600] sm:$0xff] %v650_v32  ;;  %653 = vst [vmem:[%s6486_s10 + $0x610] sm:$0xff] %v652_v33  ;;  %v656_v35 = vld [vmem:[%s6490_s11 + $0x15a8] sm:$0xff]  ;;  %v658_v36 = vld [vmem:[%s6490_s11 + $0x15e0] sm:$0xff] }
  0x64   : >> { %655 = vst [vmem:[%s6486_s10 + $0x620] sm:$0xff] %v654_v34  ;;  %v660_v37 = vld [vmem:[%s6490_s11 + $0x1618] sm:$0xff]  ;;  %657 = vst [vmem:[%s6486_s10 + $0x630] sm:$0xff] %v656_v35  ;;  %v662_v38 = vld [vmem:[%s6490_s11 + $0x1650] sm:$0xff] }
  0x65   : >> { %659 = vst [vmem:[%s6486_s10 + $0x640] sm:$0xff] %v658_v36  ;;  %661 = vst [vmem:[%s6486_s10 + $0x650] sm:$0xff] %v660_v37  ;;  %v664_v39 = vld [vmem:[%s6490_s11 + $0x1688] sm:$0xff]  ;;  %v666_v40 = vld [vmem:[%s6490_s11 + $0x16c0] sm:$0xff] }
  0x66   : >> { %663 = vst [vmem:[%s6486_s10 + $0x660] sm:$0xff] %v662_v38  ;;  %665 = vst [vmem:[%s6486_s10 + $0x670] sm:$0xff] %v664_v39  ;;  %v668_v41 = vld [vmem:[%s6490_s11 + $0x16f8] sm:$0xff]  ;;  %v670_v42 = vld [vmem:[%s6490_s11 + $0x1730] sm:$0xff] }
  0x67   : >> { %667 = vst [vmem:[%s6486_s10 + $0x680] sm:$0xff] %v666_v40  ;;  %v672_v43 = vld [vmem:[%s6490_s11 + $0x1768] sm:$0xff]  ;;  %669 = vst [vmem:[%s6486_s10 + $0x690] sm:$0xff] %v668_v41  ;;  %v674_v44 = vld [vmem:[%s6490_s11 + $0x17a0] sm:$0xff] }
  0x68   : >> { %671 = vst [vmem:[%s6486_s10 + $0x6a0] sm:$0xff] %v670_v42  ;;  %673 = vst [vmem:[%s6486_s10 + $0x6b0] sm:$0xff] %v672_v43  ;;  %v676_v45 = vld [vmem:[%s6490_s11 + $0x17d8] sm:$0xff]  ;;  %v678_v46 = vld [vmem:[%s6490_s11 + $0x1810] sm:$0xff] }
  0x69   : >> { %675 = vst [vmem:[%s6486_s10 + $0x6c0] sm:$0xff] %v674_v44  ;;  %677 = vst [vmem:[%s6486_s10 + $0x6d0] sm:$0xff] %v676_v45  ;;  %v680_v47 = vld [vmem:[%s6490_s11 + $0x1848] sm:$0xff]  ;;  %v682_v48 = vld [vmem:[%s6490_s11 + $0x1880] sm:$0xff] }
  0x6a   : >> { %679 = vst [vmem:[%s6486_s10 + $0x6e0] sm:$0xff] %v678_v46  ;;  %v684_v49 = vld [vmem:[%s6490_s11 + $0x18b8] sm:$0xff]  ;;  %681 = vst [vmem:[%s6486_s10 + $0x6f0] sm:$0xff] %v680_v47  ;;  %v686_v50 = vld [vmem:[%s6490_s11 + $0x18f0] sm:$0xff] }
  0x6b   : >> { %683 = vst [vmem:[%s6486_s10 + $0x700] sm:$0xff] %v682_v48  ;;  %685 = vst [vmem:[%s6486_s10 + $0x710] sm:$0xff] %v684_v49  ;;  %v688_v51 = vld [vmem:[%s6490_s11 + $0x1928] sm:$0xff]  ;;  %v690_v52 = vld [vmem:[%s6490_s11 + $0x1960] sm:$0xff] }
  0x6c   : >> { %687 = vst [vmem:[%s6486_s10 + $0x720] sm:$0xff] %v686_v50  ;;  %689 = vst [vmem:[%s6486_s10 + $0x730] sm:$0xff] %v688_v51  ;;  %v692_v53 = vld [vmem:[%s6490_s11 + $0x1998] sm:$0xff]  ;;  %v694_v54 = vld [vmem:[%s6490_s11 + $0x19d0] sm:$0xff]  ;;  %454 = sbr.rel (!%p451_p0) target bundleno = 50 (0x32), region = 283 }
  0x6d   : >> { %691 = vst [vmem:[%s6486_s10 + $0x740] sm:$0xff] %v690_v52  ;;  %v696_v55 = vld [vmem:[%s6490_s11 + $0x1a08] sm:$0xff]  ;;  %693 = vst [vmem:[%s6486_s10 + $0x750] sm:$0xff] %v692_v53  ;;  %v698_v56 = vld [vmem:[%s6490_s11 + $0x1a40] sm:$0xff] }
  0x6e   : >> { %695 = vst [vmem:[%s6486_s10 + $0x760] sm:$0xff] %v694_v54  ;;  %697 = vst [vmem:[%s6486_s10 + $0x770] sm:$0xff] %v696_v55  ;;  %v700_v57 = vld [vmem:[%s6490_s11 + $0x1a78] sm:$0xff]  ;;  %v702_v58 = vld [vmem:[%s6490_s11 + $0x1ab0] sm:$0xff] }
  0x6f   : >> { %699 = vst [vmem:[%s6486_s10 + $0x780] sm:$0xff] %v698_v56  ;;  %701 = vst [vmem:[%s6486_s10 + $0x790] sm:$0xff] %v700_v57  ;;  %v704_v59 = vld [vmem:[%s6490_s11 + $0x1ae8] sm:$0xff]  ;;  %v706_v60 = vld [vmem:[%s6490_s11 + $0x1b20] sm:$0xff] }
  0x70   : >> { %703 = vst [vmem:[%s6486_s10 + $0x7a0] sm:$0xff] %v702_v58  ;;  %v708_v61 = vld [vmem:[%s6490_s11 + $0x1b58] sm:$0xff]  ;;  %705 = vst [vmem:[%s6486_s10 + $0x7b0] sm:$0xff] %v704_v59  ;;  %v710_v62 = vld [vmem:[%s6490_s11 + $0x1b90] sm:$0xff] }
  0x71   : >> { %707 = vst [vmem:[%s6486_s10 + $0x7c0] sm:$0xff] %v706_v60  ;;  %709 = vst [vmem:[%s6486_s10 + $0x7d0] sm:$0xff] %v708_v61  ;;  %v712_v63 = vld [vmem:[%s6490_s11 + $0x1bc8] sm:$0xff]  ;;  %s12326_s11 = smov %s6771_s25 }
  0x72   : >> { %711 = vst [vmem:[%s6486_s10 + $0x7e0] sm:$0xff] %v710_v62  ;;  %713 = vst [vmem:[%s6486_s10 + $0x7f0] sm:$0xff] %v712_v63  ;;  %s12325_s10 = smov %s6774_s26 }
  0x73 PF: > { %723 = sbr.rel (%p442_p11) target bundleno = 315 (0x13b), region = 58  ;;  %s725_s27 = ssub.s32 (!%p442_p11), %s6695_s6, %s6701_s8 }
  0x74   : > { %s729_s28 = sshrl.u32 (!%p442_p11), %s6695_s6, 3  ;;  %s7013_s29 = scalar_lea.vmem (!%p442_p11), %s6693_s4, %s725_s27 }
  0x75   : > { %s7016_s30 = scalar_lea.vmem (!%p442_p11), %s6697_s7, %s725_s27 [#allocation2]  ;;  %s12328_s5 = smov (!%p442_p11), %s6697_s7 }
  0x76   : > { %s12329_s9 = smov (!%p442_p11), %s6693_s4  ;;  %s7024_s10 = smov (!%p442_p11), 0  }
  0x77   : > { %s7026_s11 = smov (!%p442_p11), 0  }
  0x7a LB: >> { %v741_v0 = vld [vmem:[%s6506_s9] sm:$0xff]  ;;  %v743_v1 = vld [vmem:[%s6506_s9 + $0x38] sm:$0xff]  ;;  %v745_v2 = vld [vmem:[%s6506_s9 + $0x70] sm:$0xff]  ;;  %s997_s18 = sadd.s32 1, %s6510_s10  ;;  %s735_s11 = sadd.s32 1, %s6514_s11   ;;  %s6514_s11 = sphi %s7026_s11, %s735_s11   ;;  %s6510_s10 = sphi %s7024_s10, %s12332_s10   ;;  %s6506_s9 = sphi %s12329_s9, %s12331_s9   ;;  %s6502_s5 = sphi %s12328_s5, %s12330_s5  }
  0x7b   : >> { %742 = vst [vmem:[%s6502_s5] sm:$0xff] %v741_v0  ;;  %744 = vst [vmem:[%s6502_s5 + $0x10] sm:$0xff] %v743_v1  ;;  %v747_v3 = vld [vmem:[%s6506_s9 + $0xa8] sm:$0xff]  ;;  %v749_v4 = vld [vmem:[%s6506_s9 + $0xe0] sm:$0xff]  ;;  %p998_p1 = scmp.ge.s32.totalorder %s997_s18, %s729_s28  ;;  %p734_p2 = scmp.ge.s32.totalorder %s735_s11, %s729_s28 }
  0x7c   : >> { %746 = vst [vmem:[%s6502_s5 + $0x20] sm:$0xff] %v745_v2  ;;  %v751_v5 = vld [vmem:[%s6506_s9 + $0x118] sm:$0xff]  ;;  %748 = vst [vmem:[%s6502_s5 + $0x30] sm:$0xff] %v747_v3  ;;  %v753_v6 = vld [vmem:[%s6506_s9 + $0x150] sm:$0xff]  ;;  %s6612_s25 = smov (%p734_p2), 0  }
  0x7d   : >> { %750 = vst [vmem:[%s6502_s5 + $0x40] sm:$0xff] %v749_v4  ;;  %752 = vst [vmem:[%s6502_s5 + $0x50] sm:$0xff] %v751_v5  ;;  %v755_v7 = vld [vmem:[%s6506_s9 + $0x188] sm:$0xff]  ;;  %v757_v8 = vld [vmem:[%s6506_s9 + $0x1c0] sm:$0xff]  ;;  %s12374_s18 = smov (%p998_p1, %s997_s18), 0  ;;  %s7320_s26 = sshllo.u32 (%p734_p2), %s6612_s25, %s6701_s8 }
  0x7e   : >> { %754 = vst [vmem:[%s6502_s5 + $0x60] sm:$0xff] %v753_v6  ;;  %756 = vst [vmem:[%s6502_s5 + $0x70] sm:$0xff] %v755_v7  ;;  %v759_v9 = vld [vmem:[%s6506_s9 + $0x1f8] sm:$0xff]  ;;  %v761_v10 = vld [vmem:[%s6506_s9 + $0x230] sm:$0xff]  ;;  %s5760_s20 = sshll.u32 %s12374_s18, 3  ;;  %s12332_s10 = smov %s12374_s18 }
  0x7f   : >> { %758 = vst [vmem:[%s6502_s5 + $0x80] sm:$0xff] %v757_v8  ;;  %v763_v11 = vld [vmem:[%s6506_s9 + $0x268] sm:$0xff]  ;;  %760 = vst [vmem:[%s6502_s5 + $0x90] sm:$0xff] %v759_v9  ;;  %v765_v12 = vld [vmem:[%s6506_s9 + $0x2a0] sm:$0xff]  ;;  %s7083_s21 = scalar_lea.vmem %s6693_s4, %s5760_s20   ;;  %s7086_s24 = scalar_lea.vmem %s6697_s7, %s5760_s20 [#allocation2]  }
  0x80   : >> { %762 = vst [vmem:[%s6502_s5 + $0xa0] sm:$0xff] %v761_v10  ;;  %764 = vst [vmem:[%s6502_s5 + $0xb0] sm:$0xff] %v763_v11  ;;  %v767_v13 = vld [vmem:[%s6506_s9 + $0x2d8] sm:$0xff]  ;;  %v769_v14 = vld [vmem:[%s6506_s9 + $0x310] sm:$0xff] }
  0x81   : >> { %766 = vst [vmem:[%s6502_s5 + $0xc0] sm:$0xff] %v765_v12  ;;  %768 = vst [vmem:[%s6502_s5 + $0xd0] sm:$0xff] %v767_v13  ;;  %v771_v15 = vld [vmem:[%s6506_s9 + $0x348] sm:$0xff]  ;;  %v773_v16 = vld [vmem:[%s6506_s9 + $0x380] sm:$0xff] }
  0x82   : >> { %770 = vst [vmem:[%s6502_s5 + $0xe0] sm:$0xff] %v769_v14  ;;  %v775_v17 = vld [vmem:[%s6506_s9 + $0x3b8] sm:$0xff]  ;;  %772 = vst [vmem:[%s6502_s5 + $0xf0] sm:$0xff] %v771_v15  ;;  %v777_v18 = vld [vmem:[%s6506_s9 + $0x3f0] sm:$0xff] }
  0x83   : >> { %774 = vst [vmem:[%s6502_s5 + $0x100] sm:$0xff] %v773_v16  ;;  %776 = vst [vmem:[%s6502_s5 + $0x110] sm:$0xff] %v775_v17  ;;  %v779_v19 = vld [vmem:[%s6506_s9 + $0x428] sm:$0xff]  ;;  %v781_v20 = vld [vmem:[%s6506_s9 + $0x460] sm:$0xff] }
  0x84   : >> { %778 = vst [vmem:[%s6502_s5 + $0x120] sm:$0xff] %v777_v18  ;;  %780 = vst [vmem:[%s6502_s5 + $0x130] sm:$0xff] %v779_v19  ;;  %v783_v21 = vld [vmem:[%s6506_s9 + $0x498] sm:$0xff]  ;;  %v785_v22 = vld [vmem:[%s6506_s9 + $0x4d0] sm:$0xff] }
  0x85   : >> { %782 = vst [vmem:[%s6502_s5 + $0x140] sm:$0xff] %v781_v20  ;;  %v787_v23 = vld [vmem:[%s6506_s9 + $0x508] sm:$0xff]  ;;  %784 = vst [vmem:[%s6502_s5 + $0x150] sm:$0xff] %v783_v21  ;;  %v789_v24 = vld [vmem:[%s6506_s9 + $0x540] sm:$0xff] }
  0x86   : >> { %786 = vst [vmem:[%s6502_s5 + $0x160] sm:$0xff] %v785_v22  ;;  %788 = vst [vmem:[%s6502_s5 + $0x170] sm:$0xff] %v787_v23  ;;  %v791_v25 = vld [vmem:[%s6506_s9 + $0x578] sm:$0xff]  ;;  %v793_v26 = vld [vmem:[%s6506_s9 + $0x5b0] sm:$0xff] }
  0x87   : >> { %790 = vst [vmem:[%s6502_s5 + $0x180] sm:$0xff] %v789_v24  ;;  %792 = vst [vmem:[%s6502_s5 + $0x190] sm:$0xff] %v791_v25  ;;  %v795_v27 = vld [vmem:[%s6506_s9 + $0x5e8] sm:$0xff]  ;;  %v797_v28 = vld [vmem:[%s6506_s9 + $0x620] sm:$0xff] }
  0x88   : >> { %794 = vst [vmem:[%s6502_s5 + $0x1a0] sm:$0xff] %v793_v26  ;;  %v799_v29 = vld [vmem:[%s6506_s9 + $0x658] sm:$0xff]  ;;  %796 = vst [vmem:[%s6502_s5 + $0x1b0] sm:$0xff] %v795_v27  ;;  %v801_v30 = vld [vmem:[%s6506_s9 + $0x690] sm:$0xff] }
  0x89   : >> { %798 = vst [vmem:[%s6502_s5 + $0x1c0] sm:$0xff] %v797_v28  ;;  %800 = vst [vmem:[%s6502_s5 + $0x1d0] sm:$0xff] %v799_v29  ;;  %v803_v31 = vld [vmem:[%s6506_s9 + $0x6c8] sm:$0xff]  ;;  %v805_v32 = vld [vmem:[%s6506_s9 + $0x700] sm:$0xff] }
  0x8a   : >> { %802 = vst [vmem:[%s6502_s5 + $0x1e0] sm:$0xff] %v801_v30  ;;  %804 = vst [vmem:[%s6502_s5 + $0x1f0] sm:$0xff] %v803_v31  ;;  %v807_v33 = vld [vmem:[%s6506_s9 + $0x738] sm:$0xff]  ;;  %v809_v34 = vld [vmem:[%s6506_s9 + $0x770] sm:$0xff] }
  0x8b   : >> { %806 = vst [vmem:[%s6502_s5 + $0x200] sm:$0xff] %v805_v32  ;;  %v811_v35 = vld [vmem:[%s6506_s9 + $0x7a8] sm:$0xff]  ;;  %808 = vst [vmem:[%s6502_s5 + $0x210] sm:$0xff] %v807_v33  ;;  %v813_v36 = vld [vmem:[%s6506_s9 + $0x7e0] sm:$0xff] }
  0x8c   : >> { %810 = vst [vmem:[%s6502_s5 + $0x220] sm:$0xff] %v809_v34  ;;  %812 = vst [vmem:[%s6502_s5 + $0x230] sm:$0xff] %v811_v35  ;;  %v815_v37 = vld [vmem:[%s6506_s9 + $0x818] sm:$0xff]  ;;  %v817_v38 = vld [vmem:[%s6506_s9 + $0x850] sm:$0xff] }
  0x8d   : >> { %814 = vst [vmem:[%s6502_s5 + $0x240] sm:$0xff] %v813_v36  ;;  %816 = vst [vmem:[%s6502_s5 + $0x250] sm:$0xff] %v815_v37  ;;  %v819_v39 = vld [vmem:[%s6506_s9 + $0x888] sm:$0xff]  ;;  %v821_v40 = vld [vmem:[%s6506_s9 + $0x8c0] sm:$0xff] }
  0x8e   : >> { %818 = vst [vmem:[%s6502_s5 + $0x260] sm:$0xff] %v817_v38  ;;  %v823_v41 = vld [vmem:[%s6506_s9 + $0x8f8] sm:$0xff]  ;;  %820 = vst [vmem:[%s6502_s5 + $0x270] sm:$0xff] %v819_v39  ;;  %v825_v42 = vld [vmem:[%s6506_s9 + $0x930] sm:$0xff] }
  0x8f   : >> { %822 = vst [vmem:[%s6502_s5 + $0x280] sm:$0xff] %v821_v40  ;;  %824 = vst [vmem:[%s6502_s5 + $0x290] sm:$0xff] %v823_v41  ;;  %v827_v43 = vld [vmem:[%s6506_s9 + $0x968] sm:$0xff]  ;;  %v829_v44 = vld [vmem:[%s6506_s9 + $0x9a0] sm:$0xff] }
  0x90   : >> { %826 = vst [vmem:[%s6502_s5 + $0x2a0] sm:$0xff] %v825_v42  ;;  %828 = vst [vmem:[%s6502_s5 + $0x2b0] sm:$0xff] %v827_v43  ;;  %v831_v45 = vld [vmem:[%s6506_s9 + $0x9d8] sm:$0xff]  ;;  %v833_v46 = vld [vmem:[%s6506_s9 + $0xa10] sm:$0xff] }
  0x91   : >> { %830 = vst [vmem:[%s6502_s5 + $0x2c0] sm:$0xff] %v829_v44  ;;  %v835_v47 = vld [vmem:[%s6506_s9 + $0xa48] sm:$0xff]  ;;  %832 = vst [vmem:[%s6502_s5 + $0x2d0] sm:$0xff] %v831_v45  ;;  %v837_v48 = vld [vmem:[%s6506_s9 + $0xa80] sm:$0xff] }
  0x92   : >> { %834 = vst [vmem:[%s6502_s5 + $0x2e0] sm:$0xff] %v833_v46  ;;  %836 = vst [vmem:[%s6502_s5 + $0x2f0] sm:$0xff] %v835_v47  ;;  %v839_v49 = vld [vmem:[%s6506_s9 + $0xab8] sm:$0xff]  ;;  %v841_v50 = vld [vmem:[%s6506_s9 + $0xaf0] sm:$0xff] }
  0x93   : >> { %838 = vst [vmem:[%s6502_s5 + $0x300] sm:$0xff] %v837_v48  ;;  %840 = vst [vmem:[%s6502_s5 + $0x310] sm:$0xff] %v839_v49  ;;  %v843_v51 = vld [vmem:[%s6506_s9 + $0xb28] sm:$0xff]  ;;  %v845_v52 = vld [vmem:[%s6506_s9 + $0xb60] sm:$0xff] }
  0x94   : >> { %842 = vst [vmem:[%s6502_s5 + $0x320] sm:$0xff] %v841_v50  ;;  %v847_v53 = vld [vmem:[%s6506_s9 + $0xb98] sm:$0xff]  ;;  %844 = vst [vmem:[%s6502_s5 + $0x330] sm:$0xff] %v843_v51  ;;  %v849_v54 = vld [vmem:[%s6506_s9 + $0xbd0] sm:$0xff] }
  0x95   : >> { %846 = vst [vmem:[%s6502_s5 + $0x340] sm:$0xff] %v845_v52  ;;  %848 = vst [vmem:[%s6502_s5 + $0x350] sm:$0xff] %v847_v53  ;;  %v851_v55 = vld [vmem:[%s6506_s9 + $0xc08] sm:$0xff]  ;;  %v853_v56 = vld [vmem:[%s6506_s9 + $0xc40] sm:$0xff] }
  0x96   : >> { %850 = vst [vmem:[%s6502_s5 + $0x360] sm:$0xff] %v849_v54  ;;  %852 = vst [vmem:[%s6502_s5 + $0x370] sm:$0xff] %v851_v55  ;;  %v855_v57 = vld [vmem:[%s6506_s9 + $0xc78] sm:$0xff]  ;;  %v857_v58 = vld [vmem:[%s6506_s9 + $0xcb0] sm:$0xff] }
  0x97   : >> { %854 = vst [vmem:[%s6502_s5 + $0x380] sm:$0xff] %v853_v56  ;;  %v859_v59 = vld [vmem:[%s6506_s9 + $0xce8] sm:$0xff]  ;;  %856 = vst [vmem:[%s6502_s5 + $0x390] sm:$0xff] %v855_v57  ;;  %v861_v60 = vld [vmem:[%s6506_s9 + $0xd20] sm:$0xff] }
  0x98   : >> { %858 = vst [vmem:[%s6502_s5 + $0x3a0] sm:$0xff] %v857_v58  ;;  %860 = vst [vmem:[%s6502_s5 + $0x3b0] sm:$0xff] %v859_v59  ;;  %v863_v61 = vld [vmem:[%s6506_s9 + $0xd58] sm:$0xff]  ;;  %v865_v62 = vld [vmem:[%s6506_s9 + $0xd90] sm:$0xff] }
  0x99   : >> { %862 = vst [vmem:[%s6502_s5 + $0x3c0] sm:$0xff] %v861_v60  ;;  %864 = vst [vmem:[%s6502_s5 + $0x3d0] sm:$0xff] %v863_v61  ;;  %v867_v63 = vld [vmem:[%s6506_s9 + $0xdc8] sm:$0xff]  ;;  %v869_v0 = vld [vmem:[%s6506_s9 + $0xe00] sm:$0xff] }
  0x9a   : >> { %866 = vst [vmem:[%s6502_s5 + $0x3e0] sm:$0xff] %v865_v62  ;;  %v871_v1 = vld [vmem:[%s6506_s9 + $0xe38] sm:$0xff]  ;;  %868 = vst [vmem:[%s6502_s5 + $0x3f0] sm:$0xff] %v867_v63  ;;  %v873_v2 = vld [vmem:[%s6506_s9 + $0xe70] sm:$0xff] }
  0x9b   : >> { %870 = vst [vmem:[%s6502_s5 + $0x400] sm:$0xff] %v869_v0  ;;  %872 = vst [vmem:[%s6502_s5 + $0x410] sm:$0xff] %v871_v1  ;;  %v875_v3 = vld [vmem:[%s6506_s9 + $0xea8] sm:$0xff]  ;;  %v877_v4 = vld [vmem:[%s6506_s9 + $0xee0] sm:$0xff] }
  0x9c   : >> { %874 = vst [vmem:[%s6502_s5 + $0x420] sm:$0xff] %v873_v2  ;;  %876 = vst [vmem:[%s6502_s5 + $0x430] sm:$0xff] %v875_v3  ;;  %v879_v5 = vld [vmem:[%s6506_s9 + $0xf18] sm:$0xff]  ;;  %v881_v6 = vld [vmem:[%s6506_s9 + $0xf50] sm:$0xff] }
  0x9d   : >> { %878 = vst [vmem:[%s6502_s5 + $0x440] sm:$0xff] %v877_v4  ;;  %v883_v7 = vld [vmem:[%s6506_s9 + $0xf88] sm:$0xff]  ;;  %880 = vst [vmem:[%s6502_s5 + $0x450] sm:$0xff] %v879_v5  ;;  %v885_v8 = vld [vmem:[%s6506_s9 + $0xfc0] sm:$0xff] }
  0x9e   : >> { %882 = vst [vmem:[%s6502_s5 + $0x460] sm:$0xff] %v881_v6  ;;  %884 = vst [vmem:[%s6502_s5 + $0x470] sm:$0xff] %v883_v7  ;;  %v887_v9 = vld [vmem:[%s6506_s9 + $0xff8] sm:$0xff]  ;;  %v889_v10 = vld [vmem:[%s6506_s9 + $0x1030] sm:$0xff] }
  0x9f   : >> { %886 = vst [vmem:[%s6502_s5 + $0x480] sm:$0xff] %v885_v8  ;;  %888 = vst [vmem:[%s6502_s5 + $0x490] sm:$0xff] %v887_v9  ;;  %v891_v11 = vld [vmem:[%s6506_s9 + $0x1068] sm:$0xff]  ;;  %v893_v12 = vld [vmem:[%s6506_s9 + $0x10a0] sm:$0xff] }
  0xa0   : >> { %890 = vst [vmem:[%s6502_s5 + $0x4a0] sm:$0xff] %v889_v10  ;;  %v895_v13 = vld [vmem:[%s6506_s9 + $0x10d8] sm:$0xff]  ;;  %892 = vst [vmem:[%s6502_s5 + $0x4b0] sm:$0xff] %v891_v11  ;;  %v897_v14 = vld [vmem:[%s6506_s9 + $0x1110] sm:$0xff] }
  0xa1   : >> { %894 = vst [vmem:[%s6502_s5 + $0x4c0] sm:$0xff] %v893_v12  ;;  %896 = vst [vmem:[%s6502_s5 + $0x4d0] sm:$0xff] %v895_v13  ;;  %v899_v15 = vld [vmem:[%s6506_s9 + $0x1148] sm:$0xff]  ;;  %v901_v16 = vld [vmem:[%s6506_s9 + $0x1180] sm:$0xff] }
  0xa2   : >> { %898 = vst [vmem:[%s6502_s5 + $0x4e0] sm:$0xff] %v897_v14  ;;  %900 = vst [vmem:[%s6502_s5 + $0x4f0] sm:$0xff] %v899_v15  ;;  %v903_v17 = vld [vmem:[%s6506_s9 + $0x11b8] sm:$0xff]  ;;  %v905_v18 = vld [vmem:[%s6506_s9 + $0x11f0] sm:$0xff] }
  0xa3   : >> { %902 = vst [vmem:[%s6502_s5 + $0x500] sm:$0xff] %v901_v16  ;;  %v907_v19 = vld [vmem:[%s6506_s9 + $0x1228] sm:$0xff]  ;;  %904 = vst [vmem:[%s6502_s5 + $0x510] sm:$0xff] %v903_v17  ;;  %v909_v20 = vld [vmem:[%s6506_s9 + $0x1260] sm:$0xff] }
  0xa4   : >> { %906 = vst [vmem:[%s6502_s5 + $0x520] sm:$0xff] %v905_v18  ;;  %908 = vst [vmem:[%s6502_s5 + $0x530] sm:$0xff] %v907_v19  ;;  %v911_v21 = vld [vmem:[%s6506_s9 + $0x1298] sm:$0xff]  ;;  %v913_v22 = vld [vmem:[%s6506_s9 + $0x12d0] sm:$0xff] }
  0xa5   : >> { %910 = vst [vmem:[%s6502_s5 + $0x540] sm:$0xff] %v909_v20  ;;  %912 = vst [vmem:[%s6502_s5 + $0x550] sm:$0xff] %v911_v21  ;;  %v915_v23 = vld [vmem:[%s6506_s9 + $0x1308] sm:$0xff]  ;;  %v917_v24 = vld [vmem:[%s6506_s9 + $0x1340] sm:$0xff] }
  0xa6   : >> { %914 = vst [vmem:[%s6502_s5 + $0x560] sm:$0xff] %v913_v22  ;;  %v919_v25 = vld [vmem:[%s6506_s9 + $0x1378] sm:$0xff]  ;;  %916 = vst [vmem:[%s6502_s5 + $0x570] sm:$0xff] %v915_v23  ;;  %v921_v26 = vld [vmem:[%s6506_s9 + $0x13b0] sm:$0xff] }
  0xa7   : >> { %918 = vst [vmem:[%s6502_s5 + $0x580] sm:$0xff] %v917_v24  ;;  %920 = vst [vmem:[%s6502_s5 + $0x590] sm:$0xff] %v919_v25  ;;  %v923_v27 = vld [vmem:[%s6506_s9 + $0x13e8] sm:$0xff]  ;;  %v925_v28 = vld [vmem:[%s6506_s9 + $0x1420] sm:$0xff] }
  0xa8   : >> { %922 = vst [vmem:[%s6502_s5 + $0x5a0] sm:$0xff] %v921_v26  ;;  %924 = vst [vmem:[%s6502_s5 + $0x5b0] sm:$0xff] %v923_v27  ;;  %v927_v29 = vld [vmem:[%s6506_s9 + $0x1458] sm:$0xff]  ;;  %v929_v30 = vld [vmem:[%s6506_s9 + $0x1490] sm:$0xff] }
  0xa9   : >> { %926 = vst [vmem:[%s6502_s5 + $0x5c0] sm:$0xff] %v925_v28  ;;  %v931_v31 = vld [vmem:[%s6506_s9 + $0x14c8] sm:$0xff]  ;;  %928 = vst [vmem:[%s6502_s5 + $0x5d0] sm:$0xff] %v927_v29  ;;  %v933_v32 = vld [vmem:[%s6506_s9 + $0x1500] sm:$0xff] }
  0xaa   : >> { %930 = vst [vmem:[%s6502_s5 + $0x5e0] sm:$0xff] %v929_v30  ;;  %932 = vst [vmem:[%s6502_s5 + $0x5f0] sm:$0xff] %v931_v31  ;;  %v935_v33 = vld [vmem:[%s6506_s9 + $0x1538] sm:$0xff]  ;;  %v937_v34 = vld [vmem:[%s6506_s9 + $0x1570] sm:$0xff] }
  0xab   : >> { %934 = vst [vmem:[%s6502_s5 + $0x600] sm:$0xff] %v933_v32  ;;  %936 = vst [vmem:[%s6502_s5 + $0x610] sm:$0xff] %v935_v33  ;;  %v939_v35 = vld [vmem:[%s6506_s9 + $0x15a8] sm:$0xff]  ;;  %v941_v36 = vld [vmem:[%s6506_s9 + $0x15e0] sm:$0xff] }
  0xac   : >> { %938 = vst [vmem:[%s6502_s5 + $0x620] sm:$0xff] %v937_v34  ;;  %v943_v37 = vld [vmem:[%s6506_s9 + $0x1618] sm:$0xff]  ;;  %940 = vst [vmem:[%s6502_s5 + $0x630] sm:$0xff] %v939_v35  ;;  %v945_v38 = vld [vmem:[%s6506_s9 + $0x1650] sm:$0xff] }
  0xad   : >> { %942 = vst [vmem:[%s6502_s5 + $0x640] sm:$0xff] %v941_v36  ;;  %944 = vst [vmem:[%s6502_s5 + $0x650] sm:$0xff] %v943_v37  ;;  %v947_v39 = vld [vmem:[%s6506_s9 + $0x1688] sm:$0xff]  ;;  %v949_v40 = vld [vmem:[%s6506_s9 + $0x16c0] sm:$0xff] }
  0xae   : >> { %946 = vst [vmem:[%s6502_s5 + $0x660] sm:$0xff] %v945_v38  ;;  %948 = vst [vmem:[%s6502_s5 + $0x670] sm:$0xff] %v947_v39  ;;  %v951_v41 = vld [vmem:[%s6506_s9 + $0x16f8] sm:$0xff]  ;;  %v953_v42 = vld [vmem:[%s6506_s9 + $0x1730] sm:$0xff] }
  0xaf   : >> { %950 = vst [vmem:[%s6502_s5 + $0x680] sm:$0xff] %v949_v40  ;;  %v955_v43 = vld [vmem:[%s6506_s9 + $0x1768] sm:$0xff]  ;;  %952 = vst [vmem:[%s6502_s5 + $0x690] sm:$0xff] %v951_v41  ;;  %v957_v44 = vld [vmem:[%s6506_s9 + $0x17a0] sm:$0xff] }
  0xb0   : >> { %954 = vst [vmem:[%s6502_s5 + $0x6a0] sm:$0xff] %v953_v42  ;;  %956 = vst [vmem:[%s6502_s5 + $0x6b0] sm:$0xff] %v955_v43  ;;  %v959_v45 = vld [vmem:[%s6506_s9 + $0x17d8] sm:$0xff]  ;;  %v961_v46 = vld [vmem:[%s6506_s9 + $0x1810] sm:$0xff] }
  0xb1   : >> { %958 = vst [vmem:[%s6502_s5 + $0x6c0] sm:$0xff] %v957_v44  ;;  %960 = vst [vmem:[%s6502_s5 + $0x6d0] sm:$0xff] %v959_v45  ;;  %v963_v47 = vld [vmem:[%s6506_s9 + $0x1848] sm:$0xff]  ;;  %v965_v48 = vld [vmem:[%s6506_s9 + $0x1880] sm:$0xff] }
  0xb2   : >> { %962 = vst [vmem:[%s6502_s5 + $0x6e0] sm:$0xff] %v961_v46  ;;  %v967_v49 = vld [vmem:[%s6506_s9 + $0x18b8] sm:$0xff]  ;;  %964 = vst [vmem:[%s6502_s5 + $0x6f0] sm:$0xff] %v963_v47  ;;  %v969_v50 = vld [vmem:[%s6506_s9 + $0x18f0] sm:$0xff] }
  0xb3   : >> { %966 = vst [vmem:[%s6502_s5 + $0x700] sm:$0xff] %v965_v48  ;;  %968 = vst [vmem:[%s6502_s5 + $0x710] sm:$0xff] %v967_v49  ;;  %v971_v51 = vld [vmem:[%s6506_s9 + $0x1928] sm:$0xff]  ;;  %v973_v52 = vld [vmem:[%s6506_s9 + $0x1960] sm:$0xff] }
  0xb4   : >> { %970 = vst [vmem:[%s6502_s5 + $0x720] sm:$0xff] %v969_v50  ;;  %972 = vst [vmem:[%s6502_s5 + $0x730] sm:$0xff] %v971_v51  ;;  %v975_v53 = vld [vmem:[%s6506_s9 + $0x1998] sm:$0xff]  ;;  %v977_v54 = vld [vmem:[%s6506_s9 + $0x19d0] sm:$0xff]  ;;  %737 = sbr.rel (!%p734_p2) target bundleno = 122 (0x7a), region = 294 }
  0xb5   : >> { %974 = vst [vmem:[%s6502_s5 + $0x740] sm:$0xff] %v973_v52  ;;  %v979_v55 = vld [vmem:[%s6506_s9 + $0x1a08] sm:$0xff]  ;;  %976 = vst [vmem:[%s6502_s5 + $0x750] sm:$0xff] %v975_v53  ;;  %v981_v56 = vld [vmem:[%s6506_s9 + $0x1a40] sm:$0xff] }
  0xb6   : >> { %978 = vst [vmem:[%s6502_s5 + $0x760] sm:$0xff] %v977_v54  ;;  %980 = vst [vmem:[%s6502_s5 + $0x770] sm:$0xff] %v979_v55  ;;  %v983_v57 = vld [vmem:[%s6506_s9 + $0x1a78] sm:$0xff]  ;;  %v985_v58 = vld [vmem:[%s6506_s9 + $0x1ab0] sm:$0xff] }
  0xb7   : >> { %982 = vst [vmem:[%s6502_s5 + $0x780] sm:$0xff] %v981_v56  ;;  %984 = vst [vmem:[%s6502_s5 + $0x790] sm:$0xff] %v983_v57  ;;  %v987_v59 = vld [vmem:[%s6506_s9 + $0x1ae8] sm:$0xff]  ;;  %v989_v60 = vld [vmem:[%s6506_s9 + $0x1b20] sm:$0xff] }
  0xb8   : >> { %986 = vst [vmem:[%s6502_s5 + $0x7a0] sm:$0xff] %v985_v58  ;;  %v991_v61 = vld [vmem:[%s6506_s9 + $0x1b58] sm:$0xff]  ;;  %988 = vst [vmem:[%s6502_s5 + $0x7b0] sm:$0xff] %v987_v59  ;;  %v993_v62 = vld [vmem:[%s6506_s9 + $0x1b90] sm:$0xff] }
  0xb9   : >> { %990 = vst [vmem:[%s6502_s5 + $0x7c0] sm:$0xff] %v989_v60  ;;  %992 = vst [vmem:[%s6502_s5 + $0x7d0] sm:$0xff] %v991_v61  ;;  %v995_v63 = vld [vmem:[%s6506_s9 + $0x1bc8] sm:$0xff]  ;;  %s12331_s9 = smov %s7083_s21 }
  0xba   : >> { %994 = vst [vmem:[%s6502_s5 + $0x7e0] sm:$0xff] %v993_v62  ;;  %996 = vst [vmem:[%s6502_s5 + $0x7f0] sm:$0xff] %v995_v63  ;;  %s12330_s5 = smov %s7086_s24  ;;  %v1013_v0 = vld [vmem:[%s7013_s29] sm:%s7320_s26] (%p734_p2) }
  0xbb   : > { %v1015_v1 = vld [vmem:[%s7013_s29 + $0x38] sm:%s7320_s26]  ;;  %1014 = vst [vmem:[%s7016_s30] sm:%s7320_s26] %v1013_v0 }
  0xbc   : > { %1016 = vst [vmem:[%s7016_s30 + $0x10] sm:%s7320_s26] %v1015_v1  ;;  %v1017_v2 = vld [vmem:[%s7013_s29 + $0x70] sm:%s7320_s26] }
  0xbd   : > { %v1019_v3 = vld [vmem:[%s7013_s29 + $0xa8] sm:%s7320_s26]  ;;  %1018 = vst [vmem:[%s7016_s30 + $0x20] sm:%s7320_s26] %v1017_v2 }
  0xbe   : > { %1020 = vst [vmem:[%s7016_s30 + $0x30] sm:%s7320_s26] %v1019_v3  ;;  %v1021_v4 = vld [vmem:[%s7013_s29 + $0xe0] sm:%s7320_s26] }
  0xbf   : > { %v1023_v5 = vld [vmem:[%s7013_s29 + $0x118] sm:%s7320_s26]  ;;  %1022 = vst [vmem:[%s7016_s30 + $0x40] sm:%s7320_s26] %v1021_v4 }
  0xc0   : > { %1024 = vst [vmem:[%s7016_s30 + $0x50] sm:%s7320_s26] %v1023_v5  ;;  %v1025_v6 = vld [vmem:[%s7013_s29 + $0x150] sm:%s7320_s26] }
  0xc1   : > { %v1027_v7 = vld [vmem:[%s7013_s29 + $0x188] sm:%s7320_s26]  ;;  %1026 = vst [vmem:[%s7016_s30 + $0x60] sm:%s7320_s26] %v1025_v6 }
  0xc2   : > { %1028 = vst [vmem:[%s7016_s30 + $0x70] sm:%s7320_s26] %v1027_v7  ;;  %v1029_v8 = vld [vmem:[%s7013_s29 + $0x1c0] sm:%s7320_s26] }
  0xc3   : > { %v1031_v9 = vld [vmem:[%s7013_s29 + $0x1f8] sm:%s7320_s26]  ;;  %1030 = vst [vmem:[%s7016_s30 + $0x80] sm:%s7320_s26] %v1029_v8 }
  0xc4   : > { %1032 = vst [vmem:[%s7016_s30 + $0x90] sm:%s7320_s26] %v1031_v9  ;;  %v1033_v10 = vld [vmem:[%s7013_s29 + $0x230] sm:%s7320_s26] }
  0xc5   : > { %v1035_v11 = vld [vmem:[%s7013_s29 + $0x268] sm:%s7320_s26]  ;;  %1034 = vst [vmem:[%s7016_s30 + $0xa0] sm:%s7320_s26] %v1033_v10 }
  0xc6   : > { %1036 = vst [vmem:[%s7016_s30 + $0xb0] sm:%s7320_s26] %v1035_v11  ;;  %v1037_v12 = vld [vmem:[%s7013_s29 + $0x2a0] sm:%s7320_s26] }
  0xc7   : > { %v1039_v13 = vld [vmem:[%s7013_s29 + $0x2d8] sm:%s7320_s26]  ;;  %1038 = vst [vmem:[%s7016_s30 + $0xc0] sm:%s7320_s26] %v1037_v12 }
  0xc8   : > { %1040 = vst [vmem:[%s7016_s30 + $0xd0] sm:%s7320_s26] %v1039_v13  ;;  %v1041_v14 = vld [vmem:[%s7013_s29 + $0x310] sm:%s7320_s26] }
  0xc9   : > { %v1043_v15 = vld [vmem:[%s7013_s29 + $0x348] sm:%s7320_s26]  ;;  %1042 = vst [vmem:[%s7016_s30 + $0xe0] sm:%s7320_s26] %v1041_v14 }
  0xca   : > { %1044 = vst [vmem:[%s7016_s30 + $0xf0] sm:%s7320_s26] %v1043_v15  ;;  %v1045_v16 = vld [vmem:[%s7013_s29 + $0x380] sm:%s7320_s26] }
  0xcb   : > { %v1047_v17 = vld [vmem:[%s7013_s29 + $0x3b8] sm:%s7320_s26]  ;;  %1046 = vst [vmem:[%s7016_s30 + $0x100] sm:%s7320_s26] %v1045_v16 }
  0xcc   : > { %1048 = vst [vmem:[%s7016_s30 + $0x110] sm:%s7320_s26] %v1047_v17  ;;  %v1049_v18 = vld [vmem:[%s7013_s29 + $0x3f0] sm:%s7320_s26] }
  0xcd   : > { %v1051_v19 = vld [vmem:[%s7013_s29 + $0x428] sm:%s7320_s26]  ;;  %1050 = vst [vmem:[%s7016_s30 + $0x120] sm:%s7320_s26] %v1049_v18 }
  0xce   : > { %1052 = vst [vmem:[%s7016_s30 + $0x130] sm:%s7320_s26] %v1051_v19  ;;  %v1053_v20 = vld [vmem:[%s7013_s29 + $0x460] sm:%s7320_s26] }
  0xcf   : > { %v1055_v21 = vld [vmem:[%s7013_s29 + $0x498] sm:%s7320_s26]  ;;  %1054 = vst [vmem:[%s7016_s30 + $0x140] sm:%s7320_s26] %v1053_v20 }
  0xd0   : > { %1056 = vst [vmem:[%s7016_s30 + $0x150] sm:%s7320_s26] %v1055_v21  ;;  %v1057_v22 = vld [vmem:[%s7013_s29 + $0x4d0] sm:%s7320_s26] }
  0xd1   : > { %v1059_v23 = vld [vmem:[%s7013_s29 + $0x508] sm:%s7320_s26]  ;;  %1058 = vst [vmem:[%s7016_s30 + $0x160] sm:%s7320_s26] %v1057_v22 }
  0xd2   : > { %1060 = vst [vmem:[%s7016_s30 + $0x170] sm:%s7320_s26] %v1059_v23  ;;  %v1061_v24 = vld [vmem:[%s7013_s29 + $0x540] sm:%s7320_s26] }
  0xd3   : > { %v1063_v25 = vld [vmem:[%s7013_s29 + $0x578] sm:%s7320_s26]  ;;  %1062 = vst [vmem:[%s7016_s30 + $0x180] sm:%s7320_s26] %v1061_v24 }
  0xd4   : > { %1064 = vst [vmem:[%s7016_s30 + $0x190] sm:%s7320_s26] %v1063_v25  ;;  %v1065_v26 = vld [vmem:[%s7013_s29 + $0x5b0] sm:%s7320_s26] }
  0xd5   : > { %v1067_v27 = vld [vmem:[%s7013_s29 + $0x5e8] sm:%s7320_s26]  ;;  %1066 = vst [vmem:[%s7016_s30 + $0x1a0] sm:%s7320_s26] %v1065_v26 }
  0xd6   : > { %1068 = vst [vmem:[%s7016_s30 + $0x1b0] sm:%s7320_s26] %v1067_v27  ;;  %v1069_v28 = vld [vmem:[%s7013_s29 + $0x620] sm:%s7320_s26] }
  0xd7   : > { %v1071_v29 = vld [vmem:[%s7013_s29 + $0x658] sm:%s7320_s26]  ;;  %1070 = vst [vmem:[%s7016_s30 + $0x1c0] sm:%s7320_s26] %v1069_v28 }
  0xd8   : > { %1072 = vst [vmem:[%s7016_s30 + $0x1d0] sm:%s7320_s26] %v1071_v29  ;;  %v1073_v30 = vld [vmem:[%s7013_s29 + $0x690] sm:%s7320_s26] }
  0xd9   : > { %v1075_v31 = vld [vmem:[%s7013_s29 + $0x6c8] sm:%s7320_s26]  ;;  %1074 = vst [vmem:[%s7016_s30 + $0x1e0] sm:%s7320_s26] %v1073_v30 }
  0xda   : > { %1076 = vst [vmem:[%s7016_s30 + $0x1f0] sm:%s7320_s26] %v1075_v31  ;;  %v1077_v32 = vld [vmem:[%s7013_s29 + $0x700] sm:%s7320_s26] }
  0xdb   : > { %v1079_v33 = vld [vmem:[%s7013_s29 + $0x738] sm:%s7320_s26]  ;;  %1078 = vst [vmem:[%s7016_s30 + $0x200] sm:%s7320_s26] %v1077_v32 }
  0xdc   : > { %1080 = vst [vmem:[%s7016_s30 + $0x210] sm:%s7320_s26] %v1079_v33  ;;  %v1081_v34 = vld [vmem:[%s7013_s29 + $0x770] sm:%s7320_s26] }
  0xdd   : > { %v1083_v35 = vld [vmem:[%s7013_s29 + $0x7a8] sm:%s7320_s26]  ;;  %1082 = vst [vmem:[%s7016_s30 + $0x220] sm:%s7320_s26] %v1081_v34 }
  0xde   : > { %1084 = vst [vmem:[%s7016_s30 + $0x230] sm:%s7320_s26] %v1083_v35  ;;  %v1085_v36 = vld [vmem:[%s7013_s29 + $0x7e0] sm:%s7320_s26] }
  0xdf   : > { %v1087_v37 = vld [vmem:[%s7013_s29 + $0x818] sm:%s7320_s26]  ;;  %1086 = vst [vmem:[%s7016_s30 + $0x240] sm:%s7320_s26] %v1085_v36 }
  0xe0   : > { %1088 = vst [vmem:[%s7016_s30 + $0x250] sm:%s7320_s26] %v1087_v37  ;;  %v1089_v38 = vld [vmem:[%s7013_s29 + $0x850] sm:%s7320_s26] }
  0xe1   : > { %v1091_v39 = vld [vmem:[%s7013_s29 + $0x888] sm:%s7320_s26]  ;;  %1090 = vst [vmem:[%s7016_s30 + $0x260] sm:%s7320_s26] %v1089_v38 }
  0xe2   : > { %1092 = vst [vmem:[%s7016_s30 + $0x270] sm:%s7320_s26] %v1091_v39  ;;  %v1093_v40 = vld [vmem:[%s7013_s29 + $0x8c0] sm:%s7320_s26] }
  0xe3   : > { %v1095_v41 = vld [vmem:[%s7013_s29 + $0x8f8] sm:%s7320_s26]  ;;  %1094 = vst [vmem:[%s7016_s30 + $0x280] sm:%s7320_s26] %v1093_v40 }
  0xe4   : > { %1096 = vst [vmem:[%s7016_s30 + $0x290] sm:%s7320_s26] %v1095_v41  ;;  %v1097_v42 = vld [vmem:[%s7013_s29 + $0x930] sm:%s7320_s26] }
  0xe5   : > { %v1099_v43 = vld [vmem:[%s7013_s29 + $0x968] sm:%s7320_s26]  ;;  %1098 = vst [vmem:[%s7016_s30 + $0x2a0] sm:%s7320_s26] %v1097_v42 }
  0xe6   : > { %1100 = vst [vmem:[%s7016_s30 + $0x2b0] sm:%s7320_s26] %v1099_v43  ;;  %v1101_v44 = vld [vmem:[%s7013_s29 + $0x9a0] sm:%s7320_s26] }
  0xe7   : > { %v1103_v45 = vld [vmem:[%s7013_s29 + $0x9d8] sm:%s7320_s26]  ;;  %1102 = vst [vmem:[%s7016_s30 + $0x2c0] sm:%s7320_s26] %v1101_v44 }
  0xe8   : > { %1104 = vst [vmem:[%s7016_s30 + $0x2d0] sm:%s7320_s26] %v1103_v45  ;;  %v1105_v46 = vld [vmem:[%s7013_s29 + $0xa10] sm:%s7320_s26] }
  0xe9   : > { %v1107_v47 = vld [vmem:[%s7013_s29 + $0xa48] sm:%s7320_s26]  ;;  %1106 = vst [vmem:[%s7016_s30 + $0x2e0] sm:%s7320_s26] %v1105_v46 }
  0xea   : > { %1108 = vst [vmem:[%s7016_s30 + $0x2f0] sm:%s7320_s26] %v1107_v47  ;;  %v1109_v48 = vld [vmem:[%s7013_s29 + $0xa80] sm:%s7320_s26] }
  0xeb   : > { %v1111_v49 = vld [vmem:[%s7013_s29 + $0xab8] sm:%s7320_s26]  ;;  %1110 = vst [vmem:[%s7016_s30 + $0x300] sm:%s7320_s26] %v1109_v48 }
  0xec   : > { %1112 = vst [vmem:[%s7016_s30 + $0x310] sm:%s7320_s26] %v1111_v49  ;;  %v1113_v50 = vld [vmem:[%s7013_s29 + $0xaf0] sm:%s7320_s26] }
  0xed   : > { %v1115_v51 = vld [vmem:[%s7013_s29 + $0xb28] sm:%s7320_s26]  ;;  %1114 = vst [vmem:[%s7016_s30 + $0x320] sm:%s7320_s26] %v1113_v50 }
  0xee   : > { %1116 = vst [vmem:[%s7016_s30 + $0x330] sm:%s7320_s26] %v1115_v51  ;;  %v1117_v52 = vld [vmem:[%s7013_s29 + $0xb60] sm:%s7320_s26] }
  0xef   : > { %v1119_v53 = vld [vmem:[%s7013_s29 + $0xb98] sm:%s7320_s26]  ;;  %1118 = vst [vmem:[%s7016_s30 + $0x340] sm:%s7320_s26] %v1117_v52 }
  0xf0   : > { %1120 = vst [vmem:[%s7016_s30 + $0x350] sm:%s7320_s26] %v1119_v53  ;;  %v1121_v54 = vld [vmem:[%s7013_s29 + $0xbd0] sm:%s7320_s26] }
  0xf1   : > { %v1123_v55 = vld [vmem:[%s7013_s29 + $0xc08] sm:%s7320_s26]  ;;  %1122 = vst [vmem:[%s7016_s30 + $0x360] sm:%s7320_s26] %v1121_v54 }
  0xf2   : > { %1124 = vst [vmem:[%s7016_s30 + $0x370] sm:%s7320_s26] %v1123_v55  ;;  %v1125_v56 = vld [vmem:[%s7013_s29 + $0xc40] sm:%s7320_s26] }
  0xf3   : > { %v1127_v57 = vld [vmem:[%s7013_s29 + $0xc78] sm:%s7320_s26]  ;;  %1126 = vst [vmem:[%s7016_s30 + $0x380] sm:%s7320_s26] %v1125_v56 }
  0xf4   : > { %1128 = vst [vmem:[%s7016_s30 + $0x390] sm:%s7320_s26] %v1127_v57  ;;  %v1129_v58 = vld [vmem:[%s7013_s29 + $0xcb0] sm:%s7320_s26] }
  0xf5   : > { %v1131_v59 = vld [vmem:[%s7013_s29 + $0xce8] sm:%s7320_s26]  ;;  %1130 = vst [vmem:[%s7016_s30 + $0x3a0] sm:%s7320_s26] %v1129_v58 }
  0xf6   : > { %1132 = vst [vmem:[%s7016_s30 + $0x3b0] sm:%s7320_s26] %v1131_v59  ;;  %v1133_v60 = vld [vmem:[%s7013_s29 + $0xd20] sm:%s7320_s26] }
  0xf7   : > { %v1135_v61 = vld [vmem:[%s7013_s29 + $0xd58] sm:%s7320_s26]  ;;  %1134 = vst [vmem:[%s7016_s30 + $0x3c0] sm:%s7320_s26] %v1133_v60 }
  0xf8   : > { %1136 = vst [vmem:[%s7016_s30 + $0x3d0] sm:%s7320_s26] %v1135_v61  ;;  %v1137_v62 = vld [vmem:[%s7013_s29 + $0xd90] sm:%s7320_s26] }
  0xf9   : > { %v1139_v63 = vld [vmem:[%s7013_s29 + $0xdc8] sm:%s7320_s26]  ;;  %1138 = vst [vmem:[%s7016_s30 + $0x3e0] sm:%s7320_s26] %v1137_v62 }
  0xfa   : > { %1140 = vst [vmem:[%s7016_s30 + $0x3f0] sm:%s7320_s26] %v1139_v63  ;;  %v1141_v0 = vld [vmem:[%s7013_s29 + $0xe00] sm:%s7320_s26] }
  0xfb   : > { %v1143_v1 = vld [vmem:[%s7013_s29 + $0xe38] sm:%s7320_s26]  ;;  %1142 = vst [vmem:[%s7016_s30 + $0x400] sm:%s7320_s26] %v1141_v0 }
  0xfc   : > { %1144 = vst [vmem:[%s7016_s30 + $0x410] sm:%s7320_s26] %v1143_v1  ;;  %v1145_v2 = vld [vmem:[%s7013_s29 + $0xe70] sm:%s7320_s26] }
  0xfd   : > { %v1147_v3 = vld [vmem:[%s7013_s29 + $0xea8] sm:%s7320_s26]  ;;  %1146 = vst [vmem:[%s7016_s30 + $0x420] sm:%s7320_s26] %v1145_v2 }
  0xfe   : > { %1148 = vst [vmem:[%s7016_s30 + $0x430] sm:%s7320_s26] %v1147_v3  ;;  %v1149_v4 = vld [vmem:[%s7013_s29 + $0xee0] sm:%s7320_s26] }
  0xff   : > { %v1151_v5 = vld [vmem:[%s7013_s29 + $0xf18] sm:%s7320_s26]  ;;  %1150 = vst [vmem:[%s7016_s30 + $0x440] sm:%s7320_s26] %v1149_v4 }
 0x100   : > { %1152 = vst [vmem:[%s7016_s30 + $0x450] sm:%s7320_s26] %v1151_v5  ;;  %v1153_v6 = vld [vmem:[%s7013_s29 + $0xf50] sm:%s7320_s26] }
 0x101   : > { %v1155_v7 = vld [vmem:[%s7013_s29 + $0xf88] sm:%s7320_s26]  ;;  %1154 = vst [vmem:[%s7016_s30 + $0x460] sm:%s7320_s26] %v1153_v6 }
 0x102   : > { %1156 = vst [vmem:[%s7016_s30 + $0x470] sm:%s7320_s26] %v1155_v7  ;;  %v1157_v8 = vld [vmem:[%s7013_s29 + $0xfc0] sm:%s7320_s26] }
 0x103   : > { %v1159_v9 = vld [vmem:[%s7013_s29 + $0xff8] sm:%s7320_s26]  ;;  %1158 = vst [vmem:[%s7016_s30 + $0x480] sm:%s7320_s26] %v1157_v8 }
 0x104   : > { %1160 = vst [vmem:[%s7016_s30 + $0x490] sm:%s7320_s26] %v1159_v9  ;;  %v1161_v10 = vld [vmem:[%s7013_s29 + $0x1030] sm:%s7320_s26] }
 0x105   : > { %v1163_v11 = vld [vmem:[%s7013_s29 + $0x1068] sm:%s7320_s26]  ;;  %1162 = vst [vmem:[%s7016_s30 + $0x4a0] sm:%s7320_s26] %v1161_v10 }
 0x106   : > { %1164 = vst [vmem:[%s7016_s30 + $0x4b0] sm:%s7320_s26] %v1163_v11  ;;  %v1165_v12 = vld [vmem:[%s7013_s29 + $0x10a0] sm:%s7320_s26] }
 0x107   : > { %v1167_v13 = vld [vmem:[%s7013_s29 + $0x10d8] sm:%s7320_s26]  ;;  %1166 = vst [vmem:[%s7016_s30 + $0x4c0] sm:%s7320_s26] %v1165_v12 }
 0x108   : > { %1168 = vst [vmem:[%s7016_s30 + $0x4d0] sm:%s7320_s26] %v1167_v13  ;;  %v1169_v14 = vld [vmem:[%s7013_s29 + $0x1110] sm:%s7320_s26] }
 0x109   : > { %v1171_v15 = vld [vmem:[%s7013_s29 + $0x1148] sm:%s7320_s26]  ;;  %1170 = vst [vmem:[%s7016_s30 + $0x4e0] sm:%s7320_s26] %v1169_v14 }
 0x10a   : > { %1172 = vst [vmem:[%s7016_s30 + $0x4f0] sm:%s7320_s26] %v1171_v15  ;;  %v1173_v16 = vld [vmem:[%s7013_s29 + $0x1180] sm:%s7320_s26] }
 0x10b   : > { %v1175_v17 = vld [vmem:[%s7013_s29 + $0x11b8] sm:%s7320_s26]  ;;  %1174 = vst [vmem:[%s7016_s30 + $0x500] sm:%s7320_s26] %v1173_v16 }
 0x10c   : > { %1176 = vst [vmem:[%s7016_s30 + $0x510] sm:%s7320_s26] %v1175_v17  ;;  %v1177_v18 = vld [vmem:[%s7013_s29 + $0x11f0] sm:%s7320_s26] }
 0x10d   : > { %v1179_v19 = vld [vmem:[%s7013_s29 + $0x1228] sm:%s7320_s26]  ;;  %1178 = vst [vmem:[%s7016_s30 + $0x520] sm:%s7320_s26] %v1177_v18 }
 0x10e   : > { %1180 = vst [vmem:[%s7016_s30 + $0x530] sm:%s7320_s26] %v1179_v19  ;;  %v1181_v20 = vld [vmem:[%s7013_s29 + $0x1260] sm:%s7320_s26] }
 0x10f   : > { %v1183_v21 = vld [vmem:[%s7013_s29 + $0x1298] sm:%s7320_s26]  ;;  %1182 = vst [vmem:[%s7016_s30 + $0x540] sm:%s7320_s26] %v1181_v20 }
 0x110   : > { %1184 = vst [vmem:[%s7016_s30 + $0x550] sm:%s7320_s26] %v1183_v21  ;;  %v1185_v22 = vld [vmem:[%s7013_s29 + $0x12d0] sm:%s7320_s26] }
 0x111   : > { %v1187_v23 = vld [vmem:[%s7013_s29 + $0x1308] sm:%s7320_s26]  ;;  %1186 = vst [vmem:[%s7016_s30 + $0x560] sm:%s7320_s26] %v1185_v22 }
 0x112   : > { %1188 = vst [vmem:[%s7016_s30 + $0x570] sm:%s7320_s26] %v1187_v23  ;;  %v1189_v24 = vld [vmem:[%s7013_s29 + $0x1340] sm:%s7320_s26] }
 0x113   : > { %v1191_v25 = vld [vmem:[%s7013_s29 + $0x1378] sm:%s7320_s26]  ;;  %1190 = vst [vmem:[%s7016_s30 + $0x580] sm:%s7320_s26] %v1189_v24 }
 0x114   : > { %1192 = vst [vmem:[%s7016_s30 + $0x590] sm:%s7320_s26] %v1191_v25  ;;  %v1193_v26 = vld [vmem:[%s7013_s29 + $0x13b0] sm:%s7320_s26] }
 0x115   : > { %v1195_v27 = vld [vmem:[%s7013_s29 + $0x13e8] sm:%s7320_s26]  ;;  %1194 = vst [vmem:[%s7016_s30 + $0x5a0] sm:%s7320_s26] %v1193_v26 }
 0x116   : > { %1196 = vst [vmem:[%s7016_s30 + $0x5b0] sm:%s7320_s26] %v1195_v27  ;;  %v1197_v28 = vld [vmem:[%s7013_s29 + $0x1420] sm:%s7320_s26] }
 0x117   : > { %v1199_v29 = vld [vmem:[%s7013_s29 + $0x1458] sm:%s7320_s26]  ;;  %1198 = vst [vmem:[%s7016_s30 + $0x5c0] sm:%s7320_s26] %v1197_v28 }
 0x118   : > { %1200 = vst [vmem:[%s7016_s30 + $0x5d0] sm:%s7320_s26] %v1199_v29  ;;  %v1201_v30 = vld [vmem:[%s7013_s29 + $0x1490] sm:%s7320_s26] }
 0x119   : > { %v1203_v31 = vld [vmem:[%s7013_s29 + $0x14c8] sm:%s7320_s26]  ;;  %1202 = vst [vmem:[%s7016_s30 + $0x5e0] sm:%s7320_s26] %v1201_v30 }
 0x11a   : > { %1204 = vst [vmem:[%s7016_s30 + $0x5f0] sm:%s7320_s26] %v1203_v31  ;;  %v1205_v32 = vld [vmem:[%s7013_s29 + $0x1500] sm:%s7320_s26] }
 0x11b   : > { %v1207_v33 = vld [vmem:[%s7013_s29 + $0x1538] sm:%s7320_s26]  ;;  %1206 = vst [vmem:[%s7016_s30 + $0x600] sm:%s7320_s26] %v1205_v32 }
 0x11c   : > { %1208 = vst [vmem:[%s7016_s30 + $0x610] sm:%s7320_s26] %v1207_v33  ;;  %v1209_v34 = vld [vmem:[%s7013_s29 + $0x1570] sm:%s7320_s26] }
 0x11d   : > { %v1211_v35 = vld [vmem:[%s7013_s29 + $0x15a8] sm:%s7320_s26]  ;;  %1210 = vst [vmem:[%s7016_s30 + $0x620] sm:%s7320_s26] %v1209_v34 }
 0x11e   : > { %1212 = vst [vmem:[%s7016_s30 + $0x630] sm:%s7320_s26] %v1211_v35  ;;  %v1213_v36 = vld [vmem:[%s7013_s29 + $0x15e0] sm:%s7320_s26] }
 0x11f   : > { %v1215_v37 = vld [vmem:[%s7013_s29 + $0x1618] sm:%s7320_s26]  ;;  %1214 = vst [vmem:[%s7016_s30 + $0x640] sm:%s7320_s26] %v1213_v36 }
 0x120   : > { %1216 = vst [vmem:[%s7016_s30 + $0x650] sm:%s7320_s26] %v1215_v37  ;;  %v1217_v38 = vld [vmem:[%s7013_s29 + $0x1650] sm:%s7320_s26] }
 0x121   : > { %v1219_v39 = vld [vmem:[%s7013_s29 + $0x1688] sm:%s7320_s26]  ;;  %1218 = vst [vmem:[%s7016_s30 + $0x660] sm:%s7320_s26] %v1217_v38 }
 0x122   : > { %1220 = vst [vmem:[%s7016_s30 + $0x670] sm:%s7320_s26] %v1219_v39  ;;  %v1221_v40 = vld [vmem:[%s7013_s29 + $0x16c0] sm:%s7320_s26] }
 0x123   : > { %v1223_v41 = vld [vmem:[%s7013_s29 + $0x16f8] sm:%s7320_s26]  ;;  %1222 = vst [vmem:[%s7016_s30 + $0x680] sm:%s7320_s26] %v1221_v40 }
 0x124   : > { %1224 = vst [vmem:[%s7016_s30 + $0x690] sm:%s7320_s26] %v1223_v41  ;;  %v1225_v42 = vld [vmem:[%s7013_s29 + $0x1730] sm:%s7320_s26] }
 0x125   : > { %v1227_v43 = vld [vmem:[%s7013_s29 + $0x1768] sm:%s7320_s26]  ;;  %1226 = vst [vmem:[%s7016_s30 + $0x6a0] sm:%s7320_s26] %v1225_v42 }
 0x126   : > { %1228 = vst [vmem:[%s7016_s30 + $0x6b0] sm:%s7320_s26] %v1227_v43  ;;  %v1229_v44 = vld [vmem:[%s7013_s29 + $0x17a0] sm:%s7320_s26] }
 0x127   : > { %v1231_v45 = vld [vmem:[%s7013_s29 + $0x17d8] sm:%s7320_s26]  ;;  %1230 = vst [vmem:[%s7016_s30 + $0x6c0] sm:%s7320_s26] %v1229_v44 }
 0x128   : > { %1232 = vst [vmem:[%s7016_s30 + $0x6d0] sm:%s7320_s26] %v1231_v45  ;;  %v1233_v46 = vld [vmem:[%s7013_s29 + $0x1810] sm:%s7320_s26] }
 0x129   : > { %v1235_v47 = vld [vmem:[%s7013_s29 + $0x1848] sm:%s7320_s26]  ;;  %1234 = vst [vmem:[%s7016_s30 + $0x6e0] sm:%s7320_s26] %v1233_v46 }
 0x12a   : > { %1236 = vst [vmem:[%s7016_s30 + $0x6f0] sm:%s7320_s26] %v1235_v47  ;;  %v1237_v48 = vld [vmem:[%s7013_s29 + $0x1880] sm:%s7320_s26] }
 0x12b   : > { %v1239_v49 = vld [vmem:[%s7013_s29 + $0x18b8] sm:%s7320_s26]  ;;  %1238 = vst [vmem:[%s7016_s30 + $0x700] sm:%s7320_s26] %v1237_v48 }
 0x12c   : > { %1240 = vst [vmem:[%s7016_s30 + $0x710] sm:%s7320_s26] %v1239_v49  ;;  %v1241_v50 = vld [vmem:[%s7013_s29 + $0x18f0] sm:%s7320_s26] }
 0x12d   : > { %v1243_v51 = vld [vmem:[%s7013_s29 + $0x1928] sm:%s7320_s26]  ;;  %1242 = vst [vmem:[%s7016_s30 + $0x720] sm:%s7320_s26] %v1241_v50 }
 0x12e   : > { %1244 = vst [vmem:[%s7016_s30 + $0x730] sm:%s7320_s26] %v1243_v51  ;;  %v1245_v52 = vld [vmem:[%s7013_s29 + $0x1960] sm:%s7320_s26] }
 0x12f   : > { %v1247_v53 = vld [vmem:[%s7013_s29 + $0x1998] sm:%s7320_s26]  ;;  %1246 = vst [vmem:[%s7016_s30 + $0x740] sm:%s7320_s26] %v1245_v52 }
 0x130   : > { %1248 = vst [vmem:[%s7016_s30 + $0x750] sm:%s7320_s26] %v1247_v53  ;;  %v1249_v54 = vld [vmem:[%s7013_s29 + $0x19d0] sm:%s7320_s26] }
 0x131   : > { %v1251_v55 = vld [vmem:[%s7013_s29 + $0x1a08] sm:%s7320_s26]  ;;  %1250 = vst [vmem:[%s7016_s30 + $0x760] sm:%s7320_s26] %v1249_v54 }
 0x132   : > { %1252 = vst [vmem:[%s7016_s30 + $0x770] sm:%s7320_s26] %v1251_v55  ;;  %v1253_v56 = vld [vmem:[%s7013_s29 + $0x1a40] sm:%s7320_s26] }
 0x133   : > { %v1255_v57 = vld [vmem:[%s7013_s29 + $0x1a78] sm:%s7320_s26]  ;;  %1254 = vst [vmem:[%s7016_s30 + $0x780] sm:%s7320_s26] %v1253_v56 }
 0x134   : > { %1256 = vst [vmem:[%s7016_s30 + $0x790] sm:%s7320_s26] %v1255_v57  ;;  %v1257_v58 = vld [vmem:[%s7013_s29 + $0x1ab0] sm:%s7320_s26] }
 0x135   : > { %v1259_v59 = vld [vmem:[%s7013_s29 + $0x1ae8] sm:%s7320_s26]  ;;  %1258 = vst [vmem:[%s7016_s30 + $0x7a0] sm:%s7320_s26] %v1257_v58 }
 0x136   : > { %1260 = vst [vmem:[%s7016_s30 + $0x7b0] sm:%s7320_s26] %v1259_v59  ;;  %v1261_v60 = vld [vmem:[%s7013_s29 + $0x1b20] sm:%s7320_s26] }
 0x137   : > { %v1263_v61 = vld [vmem:[%s7013_s29 + $0x1b58] sm:%s7320_s26]  ;;  %1262 = vst [vmem:[%s7016_s30 + $0x7c0] sm:%s7320_s26] %v1261_v60 }
 0x138   : > { %1264 = vst [vmem:[%s7016_s30 + $0x7d0] sm:%s7320_s26] %v1263_v61  ;;  %v1265_v62 = vld [vmem:[%s7013_s29 + $0x1b90] sm:%s7320_s26] }
 0x139   : > { %v1267_v63 = vld [vmem:[%s7013_s29 + $0x1bc8] sm:%s7320_s26]  ;;  %1266 = vst [vmem:[%s7016_s30 + $0x7e0] sm:%s7320_s26] %v1265_v62 }
 0x13a   : > { %1268 = vst [vmem:[%s7016_s30 + $0x7f0] sm:%s7320_s26] %v1267_v63 }
 0x13b PF: > { %p5762_p4 = scmp.ge.u32.totalorder %s6695_s6, 8 }
 0x13c   : > { %s6613_s8 = smov (!%p5762_p4), 0  }
 0x13d   : > { %175 = sbr.rel (%p5762_p4) target bundleno = 446 (0x1be), region = 36  ;;  %s7836_s27 = sshllo.u32 (!%p5762_p4), %s6613_s8, %s6695_s6 }
 0x13e   : > { %v185_v0 = vld [vmem:[%s6693_s4] sm:%s7836_s27] (!%p5762_p4)  ;;  %v187_v1 = vld [vmem:[%s6693_s4 + $0x38] sm:%s7836_s27] (!%p5762_p4) }
 0x13f   : > { %186 = vst [vmem:[%s6697_s7] sm:%s7836_s27] (!%p5762_p4), %v185_v0  ;;  %188 = vst [vmem:[%s6697_s7 + $0x10] sm:%s7836_s27] (!%p5762_p4), %v187_v1 }
 0x140   : > { %v189_v2 = vld [vmem:[%s6693_s4 + $0x70] sm:%s7836_s27] (!%p5762_p4)  ;;  %v191_v3 = vld [vmem:[%s6693_s4 + $0xa8] sm:%s7836_s27] (!%p5762_p4) }
 0x141   : > { %190 = vst [vmem:[%s6697_s7 + $0x20] sm:%s7836_s27] (!%p5762_p4), %v189_v2  ;;  %192 = vst [vmem:[%s6697_s7 + $0x30] sm:%s7836_s27] (!%p5762_p4), %v191_v3 }
 0x142   : > { %v193_v4 = vld [vmem:[%s6693_s4 + $0xe0] sm:%s7836_s27] (!%p5762_p4)  ;;  %v195_v5 = vld [vmem:[%s6693_s4 + $0x118] sm:%s7836_s27] (!%p5762_p4) }
 0x143   : > { %194 = vst [vmem:[%s6697_s7 + $0x40] sm:%s7836_s27] (!%p5762_p4), %v193_v4  ;;  %196 = vst [vmem:[%s6697_s7 + $0x50] sm:%s7836_s27] (!%p5762_p4), %v195_v5 }
 0x144   : > { %v197_v6 = vld [vmem:[%s6693_s4 + $0x150] sm:%s7836_s27]  ;;  %v199_v7 = vld [vmem:[%s6693_s4 + $0x188] sm:%s7836_s27] }
 0x145   : > { %198 = vst [vmem:[%s6697_s7 + $0x60] sm:%s7836_s27] %v197_v6  ;;  %200 = vst [vmem:[%s6697_s7 + $0x70] sm:%s7836_s27] %v199_v7 }
 0x146   : > { %v201_v8 = vld [vmem:[%s6693_s4 + $0x1c0] sm:%s7836_s27]  ;;  %v203_v9 = vld [vmem:[%s6693_s4 + $0x1f8] sm:%s7836_s27] }
 0x147   : > { %202 = vst [vmem:[%s6697_s7 + $0x80] sm:%s7836_s27] %v201_v8  ;;  %204 = vst [vmem:[%s6697_s7 + $0x90] sm:%s7836_s27] %v203_v9 }
 0x148   : > { %v205_v10 = vld [vmem:[%s6693_s4 + $0x230] sm:%s7836_s27]  ;;  %v207_v11 = vld [vmem:[%s6693_s4 + $0x268] sm:%s7836_s27] }
 0x149   : > { %206 = vst [vmem:[%s6697_s7 + $0xa0] sm:%s7836_s27] %v205_v10  ;;  %208 = vst [vmem:[%s6697_s7 + $0xb0] sm:%s7836_s27] %v207_v11 }
 0x14a   : > { %v209_v12 = vld [vmem:[%s6693_s4 + $0x2a0] sm:%s7836_s27]  ;;  %v211_v13 = vld [vmem:[%s6693_s4 + $0x2d8] sm:%s7836_s27] }
 0x14b   : > { %210 = vst [vmem:[%s6697_s7 + $0xc0] sm:%s7836_s27] %v209_v12  ;;  %212 = vst [vmem:[%s6697_s7 + $0xd0] sm:%s7836_s27] %v211_v13 }
 0x14c   : > { %v213_v14 = vld [vmem:[%s6693_s4 + $0x310] sm:%s7836_s27]  ;;  %v215_v15 = vld [vmem:[%s6693_s4 + $0x348] sm:%s7836_s27] }
 0x14d   : > { %214 = vst [vmem:[%s6697_s7 + $0xe0] sm:%s7836_s27] %v213_v14  ;;  %216 = vst [vmem:[%s6697_s7 + $0xf0] sm:%s7836_s27] %v215_v15 }
 0x14e   : > { %v217_v16 = vld [vmem:[%s6693_s4 + $0x380] sm:%s7836_s27]  ;;  %v219_v17 = vld [vmem:[%s6693_s4 + $0x3b8] sm:%s7836_s27] }
 0x14f   : > { %218 = vst [vmem:[%s6697_s7 + $0x100] sm:%s7836_s27] %v217_v16  ;;  %220 = vst [vmem:[%s6697_s7 + $0x110] sm:%s7836_s27] %v219_v17 }
 0x150   : > { %v221_v18 = vld [vmem:[%s6693_s4 + $0x3f0] sm:%s7836_s27]  ;;  %v223_v19 = vld [vmem:[%s6693_s4 + $0x428] sm:%s7836_s27] }
 0x151   : > { %222 = vst [vmem:[%s6697_s7 + $0x120] sm:%s7836_s27] %v221_v18  ;;  %224 = vst [vmem:[%s6697_s7 + $0x130] sm:%s7836_s27] %v223_v19 }
 0x152   : > { %v225_v20 = vld [vmem:[%s6693_s4 + $0x460] sm:%s7836_s27]  ;;  %v227_v21 = vld [vmem:[%s6693_s4 + $0x498] sm:%s7836_s27] }
 0x153   : > { %226 = vst [vmem:[%s6697_s7 + $0x140] sm:%s7836_s27] %v225_v20  ;;  %228 = vst [vmem:[%s6697_s7 + $0x150] sm:%s7836_s27] %v227_v21 }
 0x154   : > { %v229_v22 = vld [vmem:[%s6693_s4 + $0x4d0] sm:%s7836_s27]  ;;  %v231_v23 = vld [vmem:[%s6693_s4 + $0x508] sm:%s7836_s27] }
 0x155   : > { %230 = vst [vmem:[%s6697_s7 + $0x160] sm:%s7836_s27] %v229_v22  ;;  %232 = vst [vmem:[%s6697_s7 + $0x170] sm:%s7836_s27] %v231_v23 }
 0x156   : > { %v233_v24 = vld [vmem:[%s6693_s4 + $0x540] sm:%s7836_s27]  ;;  %v235_v25 = vld [vmem:[%s6693_s4 + $0x578] sm:%s7836_s27] }
 0x157   : > { %234 = vst [vmem:[%s6697_s7 + $0x180] sm:%s7836_s27] %v233_v24  ;;  %236 = vst [vmem:[%s6697_s7 + $0x190] sm:%s7836_s27] %v235_v25 }
 0x158   : > { %v237_v26 = vld [vmem:[%s6693_s4 + $0x5b0] sm:%s7836_s27]  ;;  %v239_v27 = vld [vmem:[%s6693_s4 + $0x5e8] sm:%s7836_s27] }
 0x159   : > { %238 = vst [vmem:[%s6697_s7 + $0x1a0] sm:%s7836_s27] %v237_v26  ;;  %240 = vst [vmem:[%s6697_s7 + $0x1b0] sm:%s7836_s27] %v239_v27 }
 0x15a   : > { %v241_v28 = vld [vmem:[%s6693_s4 + $0x620] sm:%s7836_s27]  ;;  %v243_v29 = vld [vmem:[%s6693_s4 + $0x658] sm:%s7836_s27] }
 0x15b   : > { %242 = vst [vmem:[%s6697_s7 + $0x1c0] sm:%s7836_s27] %v241_v28  ;;  %244 = vst [vmem:[%s6697_s7 + $0x1d0] sm:%s7836_s27] %v243_v29 }
 0x15c   : > { %v245_v30 = vld [vmem:[%s6693_s4 + $0x690] sm:%s7836_s27]  ;;  %v247_v31 = vld [vmem:[%s6693_s4 + $0x6c8] sm:%s7836_s27] }
 0x15d   : > { %246 = vst [vmem:[%s6697_s7 + $0x1e0] sm:%s7836_s27] %v245_v30  ;;  %248 = vst [vmem:[%s6697_s7 + $0x1f0] sm:%s7836_s27] %v247_v31 }
 0x15e   : > { %v249_v32 = vld [vmem:[%s6693_s4 + $0x700] sm:%s7836_s27]  ;;  %v251_v33 = vld [vmem:[%s6693_s4 + $0x738] sm:%s7836_s27] }
 0x15f   : > { %250 = vst [vmem:[%s6697_s7 + $0x200] sm:%s7836_s27] %v249_v32  ;;  %252 = vst [vmem:[%s6697_s7 + $0x210] sm:%s7836_s27] %v251_v33 }
 0x160   : > { %v253_v34 = vld [vmem:[%s6693_s4 + $0x770] sm:%s7836_s27]  ;;  %v255_v35 = vld [vmem:[%s6693_s4 + $0x7a8] sm:%s7836_s27] }
 0x161   : > { %254 = vst [vmem:[%s6697_s7 + $0x220] sm:%s7836_s27] %v253_v34  ;;  %256 = vst [vmem:[%s6697_s7 + $0x230] sm:%s7836_s27] %v255_v35 }
 0x162   : > { %v257_v36 = vld [vmem:[%s6693_s4 + $0x7e0] sm:%s7836_s27]  ;;  %v259_v37 = vld [vmem:[%s6693_s4 + $0x818] sm:%s7836_s27] }
 0x163   : > { %258 = vst [vmem:[%s6697_s7 + $0x240] sm:%s7836_s27] %v257_v36  ;;  %260 = vst [vmem:[%s6697_s7 + $0x250] sm:%s7836_s27] %v259_v37 }
 0x164   : > { %v261_v38 = vld [vmem:[%s6693_s4 + $0x850] sm:%s7836_s27]  ;;  %v263_v39 = vld [vmem:[%s6693_s4 + $0x888] sm:%s7836_s27] }
 0x165   : > { %262 = vst [vmem:[%s6697_s7 + $0x260] sm:%s7836_s27] %v261_v38  ;;  %264 = vst [vmem:[%s6697_s7 + $0x270] sm:%s7836_s27] %v263_v39 }
 0x166   : > { %v265_v40 = vld [vmem:[%s6693_s4 + $0x8c0] sm:%s7836_s27]  ;;  %v267_v41 = vld [vmem:[%s6693_s4 + $0x8f8] sm:%s7836_s27] }
 0x167   : > { %266 = vst [vmem:[%s6697_s7 + $0x280] sm:%s7836_s27] %v265_v40  ;;  %268 = vst [vmem:[%s6697_s7 + $0x290] sm:%s7836_s27] %v267_v41 }
 0x168   : > { %v269_v42 = vld [vmem:[%s6693_s4 + $0x930] sm:%s7836_s27]  ;;  %v271_v43 = vld [vmem:[%s6693_s4 + $0x968] sm:%s7836_s27] }
 0x169   : > { %270 = vst [vmem:[%s6697_s7 + $0x2a0] sm:%s7836_s27] %v269_v42  ;;  %272 = vst [vmem:[%s6697_s7 + $0x2b0] sm:%s7836_s27] %v271_v43 }
 0x16a   : > { %v273_v44 = vld [vmem:[%s6693_s4 + $0x9a0] sm:%s7836_s27]  ;;  %v275_v45 = vld [vmem:[%s6693_s4 + $0x9d8] sm:%s7836_s27] }
 0x16b   : > { %274 = vst [vmem:[%s6697_s7 + $0x2c0] sm:%s7836_s27] %v273_v44  ;;  %276 = vst [vmem:[%s6697_s7 + $0x2d0] sm:%s7836_s27] %v275_v45 }
 0x16c   : > { %v277_v46 = vld [vmem:[%s6693_s4 + $0xa10] sm:%s7836_s27]  ;;  %v279_v47 = vld [vmem:[%s6693_s4 + $0xa48] sm:%s7836_s27] }
 0x16d   : > { %278 = vst [vmem:[%s6697_s7 + $0x2e0] sm:%s7836_s27] %v277_v46  ;;  %280 = vst [vmem:[%s6697_s7 + $0x2f0] sm:%s7836_s27] %v279_v47 }
 0x16e   : > { %v281_v48 = vld [vmem:[%s6693_s4 + $0xa80] sm:%s7836_s27]  ;;  %v283_v49 = vld [vmem:[%s6693_s4 + $0xab8] sm:%s7836_s27] }
 0x16f   : > { %282 = vst [vmem:[%s6697_s7 + $0x300] sm:%s7836_s27] %v281_v48  ;;  %284 = vst [vmem:[%s6697_s7 + $0x310] sm:%s7836_s27] %v283_v49 }
 0x170   : > { %v285_v50 = vld [vmem:[%s6693_s4 + $0xaf0] sm:%s7836_s27]  ;;  %v287_v51 = vld [vmem:[%s6693_s4 + $0xb28] sm:%s7836_s27] }
 0x171   : > { %286 = vst [vmem:[%s6697_s7 + $0x320] sm:%s7836_s27] %v285_v50  ;;  %288 = vst [vmem:[%s6697_s7 + $0x330] sm:%s7836_s27] %v287_v51 }
 0x172   : > { %v289_v52 = vld [vmem:[%s6693_s4 + $0xb60] sm:%s7836_s27]  ;;  %v291_v53 = vld [vmem:[%s6693_s4 + $0xb98] sm:%s7836_s27] }
 0x173   : > { %290 = vst [vmem:[%s6697_s7 + $0x340] sm:%s7836_s27] %v289_v52  ;;  %292 = vst [vmem:[%s6697_s7 + $0x350] sm:%s7836_s27] %v291_v53 }
 0x174   : > { %v293_v54 = vld [vmem:[%s6693_s4 + $0xbd0] sm:%s7836_s27]  ;;  %v295_v55 = vld [vmem:[%s6693_s4 + $0xc08] sm:%s7836_s27] }
 0x175   : > { %294 = vst [vmem:[%s6697_s7 + $0x360] sm:%s7836_s27] %v293_v54  ;;  %296 = vst [vmem:[%s6697_s7 + $0x370] sm:%s7836_s27] %v295_v55 }
 0x176   : > { %v297_v56 = vld [vmem:[%s6693_s4 + $0xc40] sm:%s7836_s27]  ;;  %v299_v57 = vld [vmem:[%s6693_s4 + $0xc78] sm:%s7836_s27] }
 0x177   : > { %298 = vst [vmem:[%s6697_s7 + $0x380] sm:%s7836_s27] %v297_v56  ;;  %300 = vst [vmem:[%s6697_s7 + $0x390] sm:%s7836_s27] %v299_v57 }
 0x178   : > { %v301_v58 = vld [vmem:[%s6693_s4 + $0xcb0] sm:%s7836_s27]  ;;  %v303_v59 = vld [vmem:[%s6693_s4 + $0xce8] sm:%s7836_s27] }
 0x179   : > { %302 = vst [vmem:[%s6697_s7 + $0x3a0] sm:%s7836_s27] %v301_v58  ;;  %304 = vst [vmem:[%s6697_s7 + $0x3b0] sm:%s7836_s27] %v303_v59 }
 0x17a   : > { %v305_v60 = vld [vmem:[%s6693_s4 + $0xd20] sm:%s7836_s27]  ;;  %v307_v61 = vld [vmem:[%s6693_s4 + $0xd58] sm:%s7836_s27] }
 0x17b   : > { %306 = vst [vmem:[%s6697_s7 + $0x3c0] sm:%s7836_s27] %v305_v60  ;;  %308 = vst [vmem:[%s6697_s7 + $0x3d0] sm:%s7836_s27] %v307_v61 }
 0x17c   : > { %v309_v62 = vld [vmem:[%s6693_s4 + $0xd90] sm:%s7836_s27]  ;;  %v311_v63 = vld [vmem:[%s6693_s4 + $0xdc8] sm:%s7836_s27] }
 0x17d   : > { %310 = vst [vmem:[%s6697_s7 + $0x3e0] sm:%s7836_s27] %v309_v62  ;;  %312 = vst [vmem:[%s6697_s7 + $0x3f0] sm:%s7836_s27] %v311_v63 }
 0x17e   : > { %v313_v0 = vld [vmem:[%s6693_s4 + $0xe00] sm:%s7836_s27]  ;;  %v315_v1 = vld [vmem:[%s6693_s4 + $0xe38] sm:%s7836_s27] }
 0x17f   : > { %314 = vst [vmem:[%s6697_s7 + $0x400] sm:%s7836_s27] %v313_v0  ;;  %316 = vst [vmem:[%s6697_s7 + $0x410] sm:%s7836_s27] %v315_v1 }
 0x180   : > { %v317_v2 = vld [vmem:[%s6693_s4 + $0xe70] sm:%s7836_s27]  ;;  %v319_v3 = vld [vmem:[%s6693_s4 + $0xea8] sm:%s7836_s27] }
 0x181   : > { %318 = vst [vmem:[%s6697_s7 + $0x420] sm:%s7836_s27] %v317_v2  ;;  %320 = vst [vmem:[%s6697_s7 + $0x430] sm:%s7836_s27] %v319_v3 }
 0x182   : > { %v321_v4 = vld [vmem:[%s6693_s4 + $0xee0] sm:%s7836_s27]  ;;  %v323_v5 = vld [vmem:[%s6693_s4 + $0xf18] sm:%s7836_s27] }
 0x183   : > { %322 = vst [vmem:[%s6697_s7 + $0x440] sm:%s7836_s27] %v321_v4  ;;  %324 = vst [vmem:[%s6697_s7 + $0x450] sm:%s7836_s27] %v323_v5 }
 0x184   : > { %v325_v6 = vld [vmem:[%s6693_s4 + $0xf50] sm:%s7836_s27]  ;;  %v327_v7 = vld [vmem:[%s6693_s4 + $0xf88] sm:%s7836_s27] }
 0x185   : > { %326 = vst [vmem:[%s6697_s7 + $0x460] sm:%s7836_s27] %v325_v6  ;;  %328 = vst [vmem:[%s6697_s7 + $0x470] sm:%s7836_s27] %v327_v7 }
 0x186   : > { %v329_v8 = vld [vmem:[%s6693_s4 + $0xfc0] sm:%s7836_s27]  ;;  %v331_v9 = vld [vmem:[%s6693_s4 + $0xff8] sm:%s7836_s27] }
 0x187   : > { %330 = vst [vmem:[%s6697_s7 + $0x480] sm:%s7836_s27] %v329_v8  ;;  %332 = vst [vmem:[%s6697_s7 + $0x490] sm:%s7836_s27] %v331_v9 }
 0x188   : > { %v333_v10 = vld [vmem:[%s6693_s4 + $0x1030] sm:%s7836_s27]  ;;  %v335_v11 = vld [vmem:[%s6693_s4 + $0x1068] sm:%s7836_s27] }
 0x189   : > { %334 = vst [vmem:[%s6697_s7 + $0x4a0] sm:%s7836_s27] %v333_v10  ;;  %336 = vst [vmem:[%s6697_s7 + $0x4b0] sm:%s7836_s27] %v335_v11 }
 0x18a   : > { %v337_v12 = vld [vmem:[%s6693_s4 + $0x10a0] sm:%s7836_s27]  ;;  %v339_v13 = vld [vmem:[%s6693_s4 + $0x10d8] sm:%s7836_s27] }
 0x18b   : > { %338 = vst [vmem:[%s6697_s7 + $0x4c0] sm:%s7836_s27] %v337_v12  ;;  %340 = vst [vmem:[%s6697_s7 + $0x4d0] sm:%s7836_s27] %v339_v13 }
 0x18c   : > { %v341_v14 = vld [vmem:[%s6693_s4 + $0x1110] sm:%s7836_s27]  ;;  %v343_v15 = vld [vmem:[%s6693_s4 + $0x1148] sm:%s7836_s27] }
 0x18d   : > { %342 = vst [vmem:[%s6697_s7 + $0x4e0] sm:%s7836_s27] %v341_v14  ;;  %344 = vst [vmem:[%s6697_s7 + $0x4f0] sm:%s7836_s27] %v343_v15 }
 0x18e   : > { %v345_v16 = vld [vmem:[%s6693_s4 + $0x1180] sm:%s7836_s27]  ;;  %v347_v17 = vld [vmem:[%s6693_s4 + $0x11b8] sm:%s7836_s27] }
 0x18f   : > { %346 = vst [vmem:[%s6697_s7 + $0x500] sm:%s7836_s27] %v345_v16  ;;  %348 = vst [vmem:[%s6697_s7 + $0x510] sm:%s7836_s27] %v347_v17 }
 0x190   : > { %v349_v18 = vld [vmem:[%s6693_s4 + $0x11f0] sm:%s7836_s27]  ;;  %v351_v19 = vld [vmem:[%s6693_s4 + $0x1228] sm:%s7836_s27] }
 0x191   : > { %350 = vst [vmem:[%s6697_s7 + $0x520] sm:%s7836_s27] %v349_v18  ;;  %352 = vst [vmem:[%s6697_s7 + $0x530] sm:%s7836_s27] %v351_v19 }
 0x192   : > { %v353_v20 = vld [vmem:[%s6693_s4 + $0x1260] sm:%s7836_s27]  ;;  %v355_v21 = vld [vmem:[%s6693_s4 + $0x1298] sm:%s7836_s27] }
 0x193   : > { %354 = vst [vmem:[%s6697_s7 + $0x540] sm:%s7836_s27] %v353_v20  ;;  %356 = vst [vmem:[%s6697_s7 + $0x550] sm:%s7836_s27] %v355_v21 }
 0x194   : > { %v357_v22 = vld [vmem:[%s6693_s4 + $0x12d0] sm:%s7836_s27]  ;;  %v359_v23 = vld [vmem:[%s6693_s4 + $0x1308] sm:%s7836_s27] }
 0x195   : > { %358 = vst [vmem:[%s6697_s7 + $0x560] sm:%s7836_s27] %v357_v22  ;;  %360 = vst [vmem:[%s6697_s7 + $0x570] sm:%s7836_s27] %v359_v23 }
 0x196   : > { %v361_v24 = vld [vmem:[%s6693_s4 + $0x1340] sm:%s7836_s27]  ;;  %v363_v25 = vld [vmem:[%s6693_s4 + $0x1378] sm:%s7836_s27] }
 0x197   : > { %362 = vst [vmem:[%s6697_s7 + $0x580] sm:%s7836_s27] %v361_v24  ;;  %364 = vst [vmem:[%s6697_s7 + $0x590] sm:%s7836_s27] %v363_v25 }
 0x198   : > { %v365_v26 = vld [vmem:[%s6693_s4 + $0x13b0] sm:%s7836_s27]  ;;  %v367_v27 = vld [vmem:[%s6693_s4 + $0x13e8] sm:%s7836_s27] }
 0x199   : > { %366 = vst [vmem:[%s6697_s7 + $0x5a0] sm:%s7836_s27] %v365_v26  ;;  %368 = vst [vmem:[%s6697_s7 + $0x5b0] sm:%s7836_s27] %v367_v27 }
 0x19a   : > { %v369_v28 = vld [vmem:[%s6693_s4 + $0x1420] sm:%s7836_s27]  ;;  %v371_v29 = vld [vmem:[%s6693_s4 + $0x1458] sm:%s7836_s27] }
 0x19b   : > { %370 = vst [vmem:[%s6697_s7 + $0x5c0] sm:%s7836_s27] %v369_v28  ;;  %372 = vst [vmem:[%s6697_s7 + $0x5d0] sm:%s7836_s27] %v371_v29 }
 0x19c   : > { %v373_v30 = vld [vmem:[%s6693_s4 + $0x1490] sm:%s7836_s27]  ;;  %v375_v31 = vld [vmem:[%s6693_s4 + $0x14c8] sm:%s7836_s27] }
 0x19d   : > { %374 = vst [vmem:[%s6697_s7 + $0x5e0] sm:%s7836_s27] %v373_v30  ;;  %376 = vst [vmem:[%s6697_s7 + $0x5f0] sm:%s7836_s27] %v375_v31 }
 0x19e   : > { %v377_v32 = vld [vmem:[%s6693_s4 + $0x1500] sm:%s7836_s27]  ;;  %v379_v33 = vld [vmem:[%s6693_s4 + $0x1538] sm:%s7836_s27] }
 0x19f   : > { %378 = vst [vmem:[%s6697_s7 + $0x600] sm:%s7836_s27] %v377_v32  ;;  %380 = vst [vmem:[%s6697_s7 + $0x610] sm:%s7836_s27] %v379_v33 }
 0x1a0   : > { %v381_v34 = vld [vmem:[%s6693_s4 + $0x1570] sm:%s7836_s27]  ;;  %v383_v35 = vld [vmem:[%s6693_s4 + $0x15a8] sm:%s7836_s27] }
 0x1a1   : > { %382 = vst [vmem:[%s6697_s7 + $0x620] sm:%s7836_s27] %v381_v34  ;;  %384 = vst [vmem:[%s6697_s7 + $0x630] sm:%s7836_s27] %v383_v35 }
 0x1a2   : > { %v385_v36 = vld [vmem:[%s6693_s4 + $0x15e0] sm:%s7836_s27]  ;;  %v387_v37 = vld [vmem:[%s6693_s4 + $0x1618] sm:%s7836_s27] }
 0x1a3   : > { %386 = vst [vmem:[%s6697_s7 + $0x640] sm:%s7836_s27] %v385_v36  ;;  %388 = vst [vmem:[%s6697_s7 + $0x650] sm:%s7836_s27] %v387_v37 }
 0x1a4   : > { %v389_v38 = vld [vmem:[%s6693_s4 + $0x1650] sm:%s7836_s27]  ;;  %v391_v39 = vld [vmem:[%s6693_s4 + $0x1688] sm:%s7836_s27] }
 0x1a5   : > { %390 = vst [vmem:[%s6697_s7 + $0x660] sm:%s7836_s27] %v389_v38  ;;  %392 = vst [vmem:[%s6697_s7 + $0x670] sm:%s7836_s27] %v391_v39 }
 0x1a6   : > { %v393_v40 = vld [vmem:[%s6693_s4 + $0x16c0] sm:%s7836_s27]  ;;  %v395_v41 = vld [vmem:[%s6693_s4 + $0x16f8] sm:%s7836_s27] }
 0x1a7   : > { %394 = vst [vmem:[%s6697_s7 + $0x680] sm:%s7836_s27] %v393_v40  ;;  %396 = vst [vmem:[%s6697_s7 + $0x690] sm:%s7836_s27] %v395_v41 }
 0x1a8   : > { %v397_v42 = vld [vmem:[%s6693_s4 + $0x1730] sm:%s7836_s27]  ;;  %v399_v43 = vld [vmem:[%s6693_s4 + $0x1768] sm:%s7836_s27] }
 0x1a9   : > { %398 = vst [vmem:[%s6697_s7 + $0x6a0] sm:%s7836_s27] %v397_v42  ;;  %400 = vst [vmem:[%s6697_s7 + $0x6b0] sm:%s7836_s27] %v399_v43 }
 0x1aa   : > { %v401_v44 = vld [vmem:[%s6693_s4 + $0x17a0] sm:%s7836_s27]  ;;  %v403_v45 = vld [vmem:[%s6693_s4 + $0x17d8] sm:%s7836_s27] }
 0x1ab   : > { %402 = vst [vmem:[%s6697_s7 + $0x6c0] sm:%s7836_s27] %v401_v44  ;;  %404 = vst [vmem:[%s6697_s7 + $0x6d0] sm:%s7836_s27] %v403_v45 }
 0x1ac   : > { %v405_v46 = vld [vmem:[%s6693_s4 + $0x1810] sm:%s7836_s27]  ;;  %v407_v47 = vld [vmem:[%s6693_s4 + $0x1848] sm:%s7836_s27] }
 0x1ad   : > { %406 = vst [vmem:[%s6697_s7 + $0x6e0] sm:%s7836_s27] %v405_v46  ;;  %408 = vst [vmem:[%s6697_s7 + $0x6f0] sm:%s7836_s27] %v407_v47 }
 0x1ae   : > { %v409_v48 = vld [vmem:[%s6693_s4 + $0x1880] sm:%s7836_s27]  ;;  %v411_v49 = vld [vmem:[%s6693_s4 + $0x18b8] sm:%s7836_s27] }
 0x1af   : > { %410 = vst [vmem:[%s6697_s7 + $0x700] sm:%s7836_s27] %v409_v48  ;;  %412 = vst [vmem:[%s6697_s7 + $0x710] sm:%s7836_s27] %v411_v49 }
 0x1b0   : > { %v413_v50 = vld [vmem:[%s6693_s4 + $0x18f0] sm:%s7836_s27]  ;;  %v415_v51 = vld [vmem:[%s6693_s4 + $0x1928] sm:%s7836_s27] }
 0x1b1   : > { %414 = vst [vmem:[%s6697_s7 + $0x720] sm:%s7836_s27] %v413_v50  ;;  %416 = vst [vmem:[%s6697_s7 + $0x730] sm:%s7836_s27] %v415_v51 }
 0x1b2   : > { %v417_v52 = vld [vmem:[%s6693_s4 + $0x1960] sm:%s7836_s27]  ;;  %v419_v53 = vld [vmem:[%s6693_s4 + $0x1998] sm:%s7836_s27] }
 0x1b3   : > { %418 = vst [vmem:[%s6697_s7 + $0x740] sm:%s7836_s27] %v417_v52  ;;  %420 = vst [vmem:[%s6697_s7 + $0x750] sm:%s7836_s27] %v419_v53 }
 0x1b4   : > { %v421_v54 = vld [vmem:[%s6693_s4 + $0x19d0] sm:%s7836_s27]  ;;  %v423_v55 = vld [vmem:[%s6693_s4 + $0x1a08] sm:%s7836_s27] }
 0x1b5   : > { %422 = vst [vmem:[%s6697_s7 + $0x760] sm:%s7836_s27] %v421_v54  ;;  %424 = vst [vmem:[%s6697_s7 + $0x770] sm:%s7836_s27] %v423_v55 }
 0x1b6   : > { %v425_v56 = vld [vmem:[%s6693_s4 + $0x1a40] sm:%s7836_s27]  ;;  %v427_v57 = vld [vmem:[%s6693_s4 + $0x1a78] sm:%s7836_s27] }
 0x1b7   : > { %426 = vst [vmem:[%s6697_s7 + $0x780] sm:%s7836_s27] %v425_v56  ;;  %428 = vst [vmem:[%s6697_s7 + $0x790] sm:%s7836_s27] %v427_v57 }
 0x1b8   : > { %v429_v58 = vld [vmem:[%s6693_s4 + $0x1ab0] sm:%s7836_s27]  ;;  %v431_v59 = vld [vmem:[%s6693_s4 + $0x1ae8] sm:%s7836_s27] }
 0x1b9   : > { %430 = vst [vmem:[%s6697_s7 + $0x7a0] sm:%s7836_s27] %v429_v58  ;;  %432 = vst [vmem:[%s6697_s7 + $0x7b0] sm:%s7836_s27] %v431_v59 }
 0x1ba   : > { %v433_v60 = vld [vmem:[%s6693_s4 + $0x1b20] sm:%s7836_s27]  ;;  %v435_v61 = vld [vmem:[%s6693_s4 + $0x1b58] sm:%s7836_s27] }
 0x1bb   : > { %434 = vst [vmem:[%s6697_s7 + $0x7c0] sm:%s7836_s27] %v433_v60  ;;  %436 = vst [vmem:[%s6697_s7 + $0x7d0] sm:%s7836_s27] %v435_v61 }
 0x1bc   : > { %v437_v62 = vld [vmem:[%s6693_s4 + $0x1b90] sm:%s7836_s27]  ;;  %v439_v63 = vld [vmem:[%s6693_s4 + $0x1bc8] sm:%s7836_s27] }
 0x1bd   : > { %438 = vst [vmem:[%s6697_s7 + $0x7e0] sm:%s7836_s27] %v437_v62  ;;  %440 = vst [vmem:[%s6697_s7 + $0x7f0] sm:%s7836_s27] %v439_v63 }
 0x1be PF: > { %1272 = sbr.rel (!%p6670_p3) target bundleno = 874 (0x36a), region = 76  ;;  %s1274_s6 = sand.u32 (%p6670_p3), 1, %s6470_s13  }
 0x1bf   : > { %s5764_s28 = sshll.u32 (%p6670_p3), %s6478_s15, 1  ;;  %s5763_s29 = sshll.u32 (%p6670_p3), %s1274_s6, 11 }
 0x1c0   : > { %s1278_s30 = ssub.s32 (%p6670_p3), 7, %s5764_s28  ;;  %s5812_s5 = sshll.u32 (%p6670_p3), %s6478_s15, 4 }
 0x1c1   : > { %p1279_p5 = scmp.lt.s32.totalorder (%p6670_p3), %s1278_s30, 2  ;;  %s8358_s7 = scalar_lea.vmem (%p6670_p3), %s12318_s1, %s5812_s5  }
 0x1c2   : > { %s8362_s19 = scalar_lea.vmem (%p6670_p3), [#allocation3], %s5763_s29  }
 0x1c5   : > { %s12376_s30 = smov (!%p1279_p5, %s1278_s30), 2 }
 0x1c6   : > { %s5765_s10 = sshll.u32 %s12376_s30, 14  ;;  %s8360_s11 = sshll.u32 %s12376_s30, 3 }
 0x1c7   : > { %p5769_p3 = scmp.eq.s32.totalorder %s5765_s10, 0 }
 0x1c8   : > { %p1291_p7 = scmp.lt.u32.totalorder (!%p5769_p3), %s8360_s11, 8 }
 0x1c9   : > { %1290 = sbr.rel (%p5769_p3) target bundleno = 874 (0x36a), region = 80 }
 0x1d0   : > { %1294 = sbr.rel (%p1291_p7) target bundleno = 743 (0x2e7), region = 84  ;;  %s8366_s18 = sand.u32 (!%p1291_p7), 7, %s8360_s11  }
 0x1d1   : > { %p1564_p8 = scmp.eq.s32.totalorder (!%p1291_p7), %s8366_s18, 0  ;;  %p5770_p9 = scmp.ne.s32.totalorder (!%p1291_p7), %s8366_s18, 0 }
 0x1d7   : > { %1567 = sbr.rel (%p5770_p9) target bundleno = 543 (0x21f), region = 99  ;;  %s1568_s20 = sshrl.u32 (!%p5770_p9), %s8360_s11, 3 }
 0x1d8   : > { %s12333_s21 = smov (!%p5770_p9), %s8362_s19  ;;  %s12334_s24 = smov (!%p5770_p9), %s8358_s7 }
 0x1d9   : > { %s8377_s25 = smov (!%p5770_p9), 0   ;;  %s8379_s26 = smov (!%p5770_p9), 0  }
 0x1de LB: >> { %v1580_v0 = vld [vmem:[%s6522_s24] sm:$0xff]  ;;  %v1582_v1 = vld [vmem:[%s6522_s24 + $0x38] sm:$0xff]  ;;  %v1584_v2 = vld [vmem:[%s6522_s24 + $0x70] sm:$0xff]  ;;  %s1836_s8 = sadd.s32 1, %s6526_s25  ;;  %s1574_s26 = sadd.s32 1, %s6530_s26   ;;  %s6530_s26 = sphi %s8379_s26, %s1574_s26   ;;  %s6526_s25 = sphi %s8377_s25, %s12337_s25   ;;  %s6522_s24 = sphi %s12334_s24, %s12336_s24   ;;  %s6518_s21 = sphi %s12333_s21, %s12335_s21  }
 0x1df   : >> { %1581 = vst [vmem:[%s6518_s21] sm:$0xff] %v1580_v0  ;;  %1583 = vst [vmem:[%s6518_s21 + $0x10] sm:$0xff] %v1582_v1  ;;  %v1586_v3 = vld [vmem:[%s6522_s24 + $0xa8] sm:$0xff]  ;;  %v1588_v4 = vld [vmem:[%s6522_s24 + $0xe0] sm:$0xff]  ;;  %p1837_p10 = scmp.ge.s32.totalorder %s1836_s8, %s1568_s20  ;;  %p1573_p11 = scmp.ge.s32.totalorder %s1574_s26, %s1568_s20 }
 0x1e0   : >> { %1585 = vst [vmem:[%s6518_s21 + $0x20] sm:$0xff] %v1584_v2  ;;  %v1590_v5 = vld [vmem:[%s6522_s24 + $0x118] sm:$0xff]  ;;  %1587 = vst [vmem:[%s6518_s21 + $0x30] sm:$0xff] %v1586_v3  ;;  %v1592_v6 = vld [vmem:[%s6522_s24 + $0x150] sm:$0xff] }
 0x1e1   : >> { %1589 = vst [vmem:[%s6518_s21 + $0x40] sm:$0xff] %v1588_v4  ;;  %1591 = vst [vmem:[%s6518_s21 + $0x50] sm:$0xff] %v1590_v5  ;;  %v1594_v7 = vld [vmem:[%s6522_s24 + $0x188] sm:$0xff]  ;;  %v1596_v8 = vld [vmem:[%s6522_s24 + $0x1c0] sm:$0xff]  ;;  %s12378_s8 = smov (%p1837_p10, %s1836_s8), 0 }
 0x1e2   : >> { %1593 = vst [vmem:[%s6518_s21 + $0x60] sm:$0xff] %v1592_v6  ;;  %1595 = vst [vmem:[%s6518_s21 + $0x70] sm:$0xff] %v1594_v7  ;;  %v1598_v9 = vld [vmem:[%s6522_s24 + $0x1f8] sm:$0xff]  ;;  %v1600_v10 = vld [vmem:[%s6522_s24 + $0x230] sm:$0xff]  ;;  %s5772_s27 = sshll.u32 %s12378_s8, 3  ;;  %s12337_s25 = smov %s12378_s8 }
 0x1e3   : >> { %1597 = vst [vmem:[%s6518_s21 + $0x80] sm:$0xff] %v1596_v8  ;;  %v1602_v11 = vld [vmem:[%s6522_s24 + $0x268] sm:$0xff]  ;;  %1599 = vst [vmem:[%s6518_s21 + $0x90] sm:$0xff] %v1598_v9  ;;  %v1604_v12 = vld [vmem:[%s6522_s24 + $0x2a0] sm:$0xff]  ;;  %s8436_s6 = scalar_lea.vmem %s8358_s7, %s5772_s27   ;;  %s8439_s28 = scalar_lea.vmem %s8362_s19, %s5772_s27 [#allocation3]  }
 0x1e4   : >> { %1601 = vst [vmem:[%s6518_s21 + $0xa0] sm:$0xff] %v1600_v10  ;;  %1603 = vst [vmem:[%s6518_s21 + $0xb0] sm:$0xff] %v1602_v11  ;;  %v1606_v13 = vld [vmem:[%s6522_s24 + $0x2d8] sm:$0xff]  ;;  %v1608_v14 = vld [vmem:[%s6522_s24 + $0x310] sm:$0xff] }
 0x1e5   : >> { %1605 = vst [vmem:[%s6518_s21 + $0xc0] sm:$0xff] %v1604_v12  ;;  %1607 = vst [vmem:[%s6518_s21 + $0xd0] sm:$0xff] %v1606_v13  ;;  %v1610_v15 = vld [vmem:[%s6522_s24 + $0x348] sm:$0xff]  ;;  %v1612_v16 = vld [vmem:[%s6522_s24 + $0x380] sm:$0xff] }
 0x1e6   : >> { %1609 = vst [vmem:[%s6518_s21 + $0xe0] sm:$0xff] %v1608_v14  ;;  %v1614_v17 = vld [vmem:[%s6522_s24 + $0x3b8] sm:$0xff]  ;;  %1611 = vst [vmem:[%s6518_s21 + $0xf0] sm:$0xff] %v1610_v15  ;;  %v1616_v18 = vld [vmem:[%s6522_s24 + $0x3f0] sm:$0xff] }
 0x1e7   : >> { %1613 = vst [vmem:[%s6518_s21 + $0x100] sm:$0xff] %v1612_v16  ;;  %1615 = vst [vmem:[%s6518_s21 + $0x110] sm:$0xff] %v1614_v17  ;;  %v1618_v19 = vld [vmem:[%s6522_s24 + $0x428] sm:$0xff]  ;;  %v1620_v20 = vld [vmem:[%s6522_s24 + $0x460] sm:$0xff] }
 0x1e8   : >> { %1617 = vst [vmem:[%s6518_s21 + $0x120] sm:$0xff] %v1616_v18  ;;  %1619 = vst [vmem:[%s6518_s21 + $0x130] sm:$0xff] %v1618_v19  ;;  %v1622_v21 = vld [vmem:[%s6522_s24 + $0x498] sm:$0xff]  ;;  %v1624_v22 = vld [vmem:[%s6522_s24 + $0x4d0] sm:$0xff] }
 0x1e9   : >> { %1621 = vst [vmem:[%s6518_s21 + $0x140] sm:$0xff] %v1620_v20  ;;  %v1626_v23 = vld [vmem:[%s6522_s24 + $0x508] sm:$0xff]  ;;  %1623 = vst [vmem:[%s6518_s21 + $0x150] sm:$0xff] %v1622_v21  ;;  %v1628_v24 = vld [vmem:[%s6522_s24 + $0x540] sm:$0xff] }
 0x1ea   : >> { %1625 = vst [vmem:[%s6518_s21 + $0x160] sm:$0xff] %v1624_v22  ;;  %1627 = vst [vmem:[%s6518_s21 + $0x170] sm:$0xff] %v1626_v23  ;;  %v1630_v25 = vld [vmem:[%s6522_s24 + $0x578] sm:$0xff]  ;;  %v1632_v26 = vld [vmem:[%s6522_s24 + $0x5b0] sm:$0xff] }
 0x1eb   : >> { %1629 = vst [vmem:[%s6518_s21 + $0x180] sm:$0xff] %v1628_v24  ;;  %1631 = vst [vmem:[%s6518_s21 + $0x190] sm:$0xff] %v1630_v25  ;;  %v1634_v27 = vld [vmem:[%s6522_s24 + $0x5e8] sm:$0xff]  ;;  %v1636_v28 = vld [vmem:[%s6522_s24 + $0x620] sm:$0xff] }
 0x1ec   : >> { %1633 = vst [vmem:[%s6518_s21 + $0x1a0] sm:$0xff] %v1632_v26  ;;  %v1638_v29 = vld [vmem:[%s6522_s24 + $0x658] sm:$0xff]  ;;  %1635 = vst [vmem:[%s6518_s21 + $0x1b0] sm:$0xff] %v1634_v27  ;;  %v1640_v30 = vld [vmem:[%s6522_s24 + $0x690] sm:$0xff] }
 0x1ed   : >> { %1637 = vst [vmem:[%s6518_s21 + $0x1c0] sm:$0xff] %v1636_v28  ;;  %1639 = vst [vmem:[%s6518_s21 + $0x1d0] sm:$0xff] %v1638_v29  ;;  %v1642_v31 = vld [vmem:[%s6522_s24 + $0x6c8] sm:$0xff]  ;;  %v1644_v32 = vld [vmem:[%s6522_s24 + $0x700] sm:$0xff] }
 0x1ee   : >> { %1641 = vst [vmem:[%s6518_s21 + $0x1e0] sm:$0xff] %v1640_v30  ;;  %1643 = vst [vmem:[%s6518_s21 + $0x1f0] sm:$0xff] %v1642_v31  ;;  %v1646_v33 = vld [vmem:[%s6522_s24 + $0x738] sm:$0xff]  ;;  %v1648_v34 = vld [vmem:[%s6522_s24 + $0x770] sm:$0xff] }
 0x1ef   : >> { %1645 = vst [vmem:[%s6518_s21 + $0x200] sm:$0xff] %v1644_v32  ;;  %v1650_v35 = vld [vmem:[%s6522_s24 + $0x7a8] sm:$0xff]  ;;  %1647 = vst [vmem:[%s6518_s21 + $0x210] sm:$0xff] %v1646_v33  ;;  %v1652_v36 = vld [vmem:[%s6522_s24 + $0x7e0] sm:$0xff] }
 0x1f0   : >> { %1649 = vst [vmem:[%s6518_s21 + $0x220] sm:$0xff] %v1648_v34  ;;  %1651 = vst [vmem:[%s6518_s21 + $0x230] sm:$0xff] %v1650_v35  ;;  %v1654_v37 = vld [vmem:[%s6522_s24 + $0x818] sm:$0xff]  ;;  %v1656_v38 = vld [vmem:[%s6522_s24 + $0x850] sm:$0xff] }
 0x1f1   : >> { %1653 = vst [vmem:[%s6518_s21 + $0x240] sm:$0xff] %v1652_v36  ;;  %1655 = vst [vmem:[%s6518_s21 + $0x250] sm:$0xff] %v1654_v37  ;;  %v1658_v39 = vld [vmem:[%s6522_s24 + $0x888] sm:$0xff]  ;;  %v1660_v40 = vld [vmem:[%s6522_s24 + $0x8c0] sm:$0xff] }
 0x1f2   : >> { %1657 = vst [vmem:[%s6518_s21 + $0x260] sm:$0xff] %v1656_v38  ;;  %v1662_v41 = vld [vmem:[%s6522_s24 + $0x8f8] sm:$0xff]  ;;  %1659 = vst [vmem:[%s6518_s21 + $0x270] sm:$0xff] %v1658_v39  ;;  %v1664_v42 = vld [vmem:[%s6522_s24 + $0x930] sm:$0xff] }
 0x1f3   : >> { %1661 = vst [vmem:[%s6518_s21 + $0x280] sm:$0xff] %v1660_v40  ;;  %1663 = vst [vmem:[%s6518_s21 + $0x290] sm:$0xff] %v1662_v41  ;;  %v1666_v43 = vld [vmem:[%s6522_s24 + $0x968] sm:$0xff]  ;;  %v1668_v44 = vld [vmem:[%s6522_s24 + $0x9a0] sm:$0xff] }
 0x1f4   : >> { %1665 = vst [vmem:[%s6518_s21 + $0x2a0] sm:$0xff] %v1664_v42  ;;  %1667 = vst [vmem:[%s6518_s21 + $0x2b0] sm:$0xff] %v1666_v43  ;;  %v1670_v45 = vld [vmem:[%s6522_s24 + $0x9d8] sm:$0xff]  ;;  %v1672_v46 = vld [vmem:[%s6522_s24 + $0xa10] sm:$0xff] }
 0x1f5   : >> { %1669 = vst [vmem:[%s6518_s21 + $0x2c0] sm:$0xff] %v1668_v44  ;;  %v1674_v47 = vld [vmem:[%s6522_s24 + $0xa48] sm:$0xff]  ;;  %1671 = vst [vmem:[%s6518_s21 + $0x2d0] sm:$0xff] %v1670_v45  ;;  %v1676_v48 = vld [vmem:[%s6522_s24 + $0xa80] sm:$0xff] }
 0x1f6   : >> { %1673 = vst [vmem:[%s6518_s21 + $0x2e0] sm:$0xff] %v1672_v46  ;;  %1675 = vst [vmem:[%s6518_s21 + $0x2f0] sm:$0xff] %v1674_v47  ;;  %v1678_v49 = vld [vmem:[%s6522_s24 + $0xab8] sm:$0xff]  ;;  %v1680_v50 = vld [vmem:[%s6522_s24 + $0xaf0] sm:$0xff] }
 0x1f7   : >> { %1677 = vst [vmem:[%s6518_s21 + $0x300] sm:$0xff] %v1676_v48  ;;  %1679 = vst [vmem:[%s6518_s21 + $0x310] sm:$0xff] %v1678_v49  ;;  %v1682_v51 = vld [vmem:[%s6522_s24 + $0xb28] sm:$0xff]  ;;  %v1684_v52 = vld [vmem:[%s6522_s24 + $0xb60] sm:$0xff] }
 0x1f8   : >> { %1681 = vst [vmem:[%s6518_s21 + $0x320] sm:$0xff] %v1680_v50  ;;  %v1686_v53 = vld [vmem:[%s6522_s24 + $0xb98] sm:$0xff]  ;;  %1683 = vst [vmem:[%s6518_s21 + $0x330] sm:$0xff] %v1682_v51  ;;  %v1688_v54 = vld [vmem:[%s6522_s24 + $0xbd0] sm:$0xff] }
 0x1f9   : >> { %1685 = vst [vmem:[%s6518_s21 + $0x340] sm:$0xff] %v1684_v52  ;;  %1687 = vst [vmem:[%s6518_s21 + $0x350] sm:$0xff] %v1686_v53  ;;  %v1690_v55 = vld [vmem:[%s6522_s24 + $0xc08] sm:$0xff]  ;;  %v1692_v56 = vld [vmem:[%s6522_s24 + $0xc40] sm:$0xff] }
 0x1fa   : >> { %1689 = vst [vmem:[%s6518_s21 + $0x360] sm:$0xff] %v1688_v54  ;;  %1691 = vst [vmem:[%s6518_s21 + $0x370] sm:$0xff] %v1690_v55  ;;  %v1694_v57 = vld [vmem:[%s6522_s24 + $0xc78] sm:$0xff]  ;;  %v1696_v58 = vld [vmem:[%s6522_s24 + $0xcb0] sm:$0xff] }
 0x1fb   : >> { %1693 = vst [vmem:[%s6518_s21 + $0x380] sm:$0xff] %v1692_v56  ;;  %v1698_v59 = vld [vmem:[%s6522_s24 + $0xce8] sm:$0xff]  ;;  %1695 = vst [vmem:[%s6518_s21 + $0x390] sm:$0xff] %v1694_v57  ;;  %v1700_v60 = vld [vmem:[%s6522_s24 + $0xd20] sm:$0xff] }
 0x1fc   : >> { %1697 = vst [vmem:[%s6518_s21 + $0x3a0] sm:$0xff] %v1696_v58  ;;  %1699 = vst [vmem:[%s6518_s21 + $0x3b0] sm:$0xff] %v1698_v59  ;;  %v1702_v61 = vld [vmem:[%s6522_s24 + $0xd58] sm:$0xff]  ;;  %v1704_v62 = vld [vmem:[%s6522_s24 + $0xd90] sm:$0xff] }
 0x1fd   : >> { %1701 = vst [vmem:[%s6518_s21 + $0x3c0] sm:$0xff] %v1700_v60  ;;  %1703 = vst [vmem:[%s6518_s21 + $0x3d0] sm:$0xff] %v1702_v61  ;;  %v1706_v63 = vld [vmem:[%s6522_s24 + $0xdc8] sm:$0xff]  ;;  %v1708_v0 = vld [vmem:[%s6522_s24 + $0xe00] sm:$0xff] }
 0x1fe   : >> { %1705 = vst [vmem:[%s6518_s21 + $0x3e0] sm:$0xff] %v1704_v62  ;;  %v1710_v1 = vld [vmem:[%s6522_s24 + $0xe38] sm:$0xff]  ;;  %1707 = vst [vmem:[%s6518_s21 + $0x3f0] sm:$0xff] %v1706_v63  ;;  %v1712_v2 = vld [vmem:[%s6522_s24 + $0xe70] sm:$0xff] }
 0x1ff   : >> { %1709 = vst [vmem:[%s6518_s21 + $0x400] sm:$0xff] %v1708_v0  ;;  %1711 = vst [vmem:[%s6518_s21 + $0x410] sm:$0xff] %v1710_v1  ;;  %v1714_v3 = vld [vmem:[%s6522_s24 + $0xea8] sm:$0xff]  ;;  %v1716_v4 = vld [vmem:[%s6522_s24 + $0xee0] sm:$0xff] }
 0x200   : >> { %1713 = vst [vmem:[%s6518_s21 + $0x420] sm:$0xff] %v1712_v2  ;;  %1715 = vst [vmem:[%s6518_s21 + $0x430] sm:$0xff] %v1714_v3  ;;  %v1718_v5 = vld [vmem:[%s6522_s24 + $0xf18] sm:$0xff]  ;;  %v1720_v6 = vld [vmem:[%s6522_s24 + $0xf50] sm:$0xff] }
 0x201   : >> { %1717 = vst [vmem:[%s6518_s21 + $0x440] sm:$0xff] %v1716_v4  ;;  %v1722_v7 = vld [vmem:[%s6522_s24 + $0xf88] sm:$0xff]  ;;  %1719 = vst [vmem:[%s6518_s21 + $0x450] sm:$0xff] %v1718_v5  ;;  %v1724_v8 = vld [vmem:[%s6522_s24 + $0xfc0] sm:$0xff] }
 0x202   : >> { %1721 = vst [vmem:[%s6518_s21 + $0x460] sm:$0xff] %v1720_v6  ;;  %1723 = vst [vmem:[%s6518_s21 + $0x470] sm:$0xff] %v1722_v7  ;;  %v1726_v9 = vld [vmem:[%s6522_s24 + $0xff8] sm:$0xff]  ;;  %v1728_v10 = vld [vmem:[%s6522_s24 + $0x1030] sm:$0xff] }
 0x203   : >> { %1725 = vst [vmem:[%s6518_s21 + $0x480] sm:$0xff] %v1724_v8  ;;  %1727 = vst [vmem:[%s6518_s21 + $0x490] sm:$0xff] %v1726_v9  ;;  %v1730_v11 = vld [vmem:[%s6522_s24 + $0x1068] sm:$0xff]  ;;  %v1732_v12 = vld [vmem:[%s6522_s24 + $0x10a0] sm:$0xff] }
 0x204   : >> { %1729 = vst [vmem:[%s6518_s21 + $0x4a0] sm:$0xff] %v1728_v10  ;;  %v1734_v13 = vld [vmem:[%s6522_s24 + $0x10d8] sm:$0xff]  ;;  %1731 = vst [vmem:[%s6518_s21 + $0x4b0] sm:$0xff] %v1730_v11  ;;  %v1736_v14 = vld [vmem:[%s6522_s24 + $0x1110] sm:$0xff] }
 0x205   : >> { %1733 = vst [vmem:[%s6518_s21 + $0x4c0] sm:$0xff] %v1732_v12  ;;  %1735 = vst [vmem:[%s6518_s21 + $0x4d0] sm:$0xff] %v1734_v13  ;;  %v1738_v15 = vld [vmem:[%s6522_s24 + $0x1148] sm:$0xff]  ;;  %v1740_v16 = vld [vmem:[%s6522_s24 + $0x1180] sm:$0xff] }
 0x206   : >> { %1737 = vst [vmem:[%s6518_s21 + $0x4e0] sm:$0xff] %v1736_v14  ;;  %1739 = vst [vmem:[%s6518_s21 + $0x4f0] sm:$0xff] %v1738_v15  ;;  %v1742_v17 = vld [vmem:[%s6522_s24 + $0x11b8] sm:$0xff]  ;;  %v1744_v18 = vld [vmem:[%s6522_s24 + $0x11f0] sm:$0xff] }
 0x207   : >> { %1741 = vst [vmem:[%s6518_s21 + $0x500] sm:$0xff] %v1740_v16  ;;  %v1746_v19 = vld [vmem:[%s6522_s24 + $0x1228] sm:$0xff]  ;;  %1743 = vst [vmem:[%s6518_s21 + $0x510] sm:$0xff] %v1742_v17  ;;  %v1748_v20 = vld [vmem:[%s6522_s24 + $0x1260] sm:$0xff] }
 0x208   : >> { %1745 = vst [vmem:[%s6518_s21 + $0x520] sm:$0xff] %v1744_v18  ;;  %1747 = vst [vmem:[%s6518_s21 + $0x530] sm:$0xff] %v1746_v19  ;;  %v1750_v21 = vld [vmem:[%s6522_s24 + $0x1298] sm:$0xff]  ;;  %v1752_v22 = vld [vmem:[%s6522_s24 + $0x12d0] sm:$0xff] }
 0x209   : >> { %1749 = vst [vmem:[%s6518_s21 + $0x540] sm:$0xff] %v1748_v20  ;;  %1751 = vst [vmem:[%s6518_s21 + $0x550] sm:$0xff] %v1750_v21  ;;  %v1754_v23 = vld [vmem:[%s6522_s24 + $0x1308] sm:$0xff]  ;;  %v1756_v24 = vld [vmem:[%s6522_s24 + $0x1340] sm:$0xff] }
 0x20a   : >> { %1753 = vst [vmem:[%s6518_s21 + $0x560] sm:$0xff] %v1752_v22  ;;  %v1758_v25 = vld [vmem:[%s6522_s24 + $0x1378] sm:$0xff]  ;;  %1755 = vst [vmem:[%s6518_s21 + $0x570] sm:$0xff] %v1754_v23  ;;  %v1760_v26 = vld [vmem:[%s6522_s24 + $0x13b0] sm:$0xff] }
 0x20b   : >> { %1757 = vst [vmem:[%s6518_s21 + $0x580] sm:$0xff] %v1756_v24  ;;  %1759 = vst [vmem:[%s6518_s21 + $0x590] sm:$0xff] %v1758_v25  ;;  %v1762_v27 = vld [vmem:[%s6522_s24 + $0x13e8] sm:$0xff]  ;;  %v1764_v28 = vld [vmem:[%s6522_s24 + $0x1420] sm:$0xff] }
 0x20c   : >> { %1761 = vst [vmem:[%s6518_s21 + $0x5a0] sm:$0xff] %v1760_v26  ;;  %1763 = vst [vmem:[%s6518_s21 + $0x5b0] sm:$0xff] %v1762_v27  ;;  %v1766_v29 = vld [vmem:[%s6522_s24 + $0x1458] sm:$0xff]  ;;  %v1768_v30 = vld [vmem:[%s6522_s24 + $0x1490] sm:$0xff] }
 0x20d   : >> { %1765 = vst [vmem:[%s6518_s21 + $0x5c0] sm:$0xff] %v1764_v28  ;;  %v1770_v31 = vld [vmem:[%s6522_s24 + $0x14c8] sm:$0xff]  ;;  %1767 = vst [vmem:[%s6518_s21 + $0x5d0] sm:$0xff] %v1766_v29  ;;  %v1772_v32 = vld [vmem:[%s6522_s24 + $0x1500] sm:$0xff] }
 0x20e   : >> { %1769 = vst [vmem:[%s6518_s21 + $0x5e0] sm:$0xff] %v1768_v30  ;;  %1771 = vst [vmem:[%s6518_s21 + $0x5f0] sm:$0xff] %v1770_v31  ;;  %v1774_v33 = vld [vmem:[%s6522_s24 + $0x1538] sm:$0xff]  ;;  %v1776_v34 = vld [vmem:[%s6522_s24 + $0x1570] sm:$0xff] }
 0x20f   : >> { %1773 = vst [vmem:[%s6518_s21 + $0x600] sm:$0xff] %v1772_v32  ;;  %1775 = vst [vmem:[%s6518_s21 + $0x610] sm:$0xff] %v1774_v33  ;;  %v1778_v35 = vld [vmem:[%s6522_s24 + $0x15a8] sm:$0xff]  ;;  %v1780_v36 = vld [vmem:[%s6522_s24 + $0x15e0] sm:$0xff] }
 0x210   : >> { %1777 = vst [vmem:[%s6518_s21 + $0x620] sm:$0xff] %v1776_v34  ;;  %v1782_v37 = vld [vmem:[%s6522_s24 + $0x1618] sm:$0xff]  ;;  %1779 = vst [vmem:[%s6518_s21 + $0x630] sm:$0xff] %v1778_v35  ;;  %v1784_v38 = vld [vmem:[%s6522_s24 + $0x1650] sm:$0xff] }
 0x211   : >> { %1781 = vst [vmem:[%s6518_s21 + $0x640] sm:$0xff] %v1780_v36  ;;  %1783 = vst [vmem:[%s6518_s21 + $0x650] sm:$0xff] %v1782_v37  ;;  %v1786_v39 = vld [vmem:[%s6522_s24 + $0x1688] sm:$0xff]  ;;  %v1788_v40 = vld [vmem:[%s6522_s24 + $0x16c0] sm:$0xff] }
 0x212   : >> { %1785 = vst [vmem:[%s6518_s21 + $0x660] sm:$0xff] %v1784_v38  ;;  %1787 = vst [vmem:[%s6518_s21 + $0x670] sm:$0xff] %v1786_v39  ;;  %v1790_v41 = vld [vmem:[%s6522_s24 + $0x16f8] sm:$0xff]  ;;  %v1792_v42 = vld [vmem:[%s6522_s24 + $0x1730] sm:$0xff] }
 0x213   : >> { %1789 = vst [vmem:[%s6518_s21 + $0x680] sm:$0xff] %v1788_v40  ;;  %v1794_v43 = vld [vmem:[%s6522_s24 + $0x1768] sm:$0xff]  ;;  %1791 = vst [vmem:[%s6518_s21 + $0x690] sm:$0xff] %v1790_v41  ;;  %v1796_v44 = vld [vmem:[%s6522_s24 + $0x17a0] sm:$0xff] }
 0x214   : >> { %1793 = vst [vmem:[%s6518_s21 + $0x6a0] sm:$0xff] %v1792_v42  ;;  %1795 = vst [vmem:[%s6518_s21 + $0x6b0] sm:$0xff] %v1794_v43  ;;  %v1798_v45 = vld [vmem:[%s6522_s24 + $0x17d8] sm:$0xff]  ;;  %v1800_v46 = vld [vmem:[%s6522_s24 + $0x1810] sm:$0xff] }
 0x215   : >> { %1797 = vst [vmem:[%s6518_s21 + $0x6c0] sm:$0xff] %v1796_v44  ;;  %1799 = vst [vmem:[%s6518_s21 + $0x6d0] sm:$0xff] %v1798_v45  ;;  %v1802_v47 = vld [vmem:[%s6522_s24 + $0x1848] sm:$0xff]  ;;  %v1804_v48 = vld [vmem:[%s6522_s24 + $0x1880] sm:$0xff] }
 0x216   : >> { %1801 = vst [vmem:[%s6518_s21 + $0x6e0] sm:$0xff] %v1800_v46  ;;  %v1806_v49 = vld [vmem:[%s6522_s24 + $0x18b8] sm:$0xff]  ;;  %1803 = vst [vmem:[%s6518_s21 + $0x6f0] sm:$0xff] %v1802_v47  ;;  %v1808_v50 = vld [vmem:[%s6522_s24 + $0x18f0] sm:$0xff] }
 0x217   : >> { %1805 = vst [vmem:[%s6518_s21 + $0x700] sm:$0xff] %v1804_v48  ;;  %1807 = vst [vmem:[%s6518_s21 + $0x710] sm:$0xff] %v1806_v49  ;;  %v1810_v51 = vld [vmem:[%s6522_s24 + $0x1928] sm:$0xff]  ;;  %v1812_v52 = vld [vmem:[%s6522_s24 + $0x1960] sm:$0xff] }
 0x218   : >> { %1809 = vst [vmem:[%s6518_s21 + $0x720] sm:$0xff] %v1808_v50  ;;  %1811 = vst [vmem:[%s6518_s21 + $0x730] sm:$0xff] %v1810_v51  ;;  %v1814_v53 = vld [vmem:[%s6522_s24 + $0x1998] sm:$0xff]  ;;  %v1816_v54 = vld [vmem:[%s6522_s24 + $0x19d0] sm:$0xff]  ;;  %1576 = sbr.rel (!%p1573_p11) target bundleno = 478 (0x1de), region = 305 }
 0x219   : >> { %1813 = vst [vmem:[%s6518_s21 + $0x740] sm:$0xff] %v1812_v52  ;;  %v1818_v55 = vld [vmem:[%s6522_s24 + $0x1a08] sm:$0xff]  ;;  %1815 = vst [vmem:[%s6518_s21 + $0x750] sm:$0xff] %v1814_v53  ;;  %v1820_v56 = vld [vmem:[%s6522_s24 + $0x1a40] sm:$0xff] }
 0x21a   : >> { %1817 = vst [vmem:[%s6518_s21 + $0x760] sm:$0xff] %v1816_v54  ;;  %1819 = vst [vmem:[%s6518_s21 + $0x770] sm:$0xff] %v1818_v55  ;;  %v1822_v57 = vld [vmem:[%s6522_s24 + $0x1a78] sm:$0xff]  ;;  %v1824_v58 = vld [vmem:[%s6522_s24 + $0x1ab0] sm:$0xff] }
 0x21b   : >> { %1821 = vst [vmem:[%s6518_s21 + $0x780] sm:$0xff] %v1820_v56  ;;  %1823 = vst [vmem:[%s6518_s21 + $0x790] sm:$0xff] %v1822_v57  ;;  %v1826_v59 = vld [vmem:[%s6522_s24 + $0x1ae8] sm:$0xff]  ;;  %v1828_v60 = vld [vmem:[%s6522_s24 + $0x1b20] sm:$0xff] }
 0x21c   : >> { %1825 = vst [vmem:[%s6518_s21 + $0x7a0] sm:$0xff] %v1824_v58  ;;  %v1830_v61 = vld [vmem:[%s6522_s24 + $0x1b58] sm:$0xff]  ;;  %1827 = vst [vmem:[%s6518_s21 + $0x7b0] sm:$0xff] %v1826_v59  ;;  %v1832_v62 = vld [vmem:[%s6522_s24 + $0x1b90] sm:$0xff] }
 0x21d   : >> { %1829 = vst [vmem:[%s6518_s21 + $0x7c0] sm:$0xff] %v1828_v60  ;;  %1831 = vst [vmem:[%s6518_s21 + $0x7d0] sm:$0xff] %v1830_v61  ;;  %v1834_v63 = vld [vmem:[%s6522_s24 + $0x1bc8] sm:$0xff]  ;;  %s12336_s24 = smov %s8436_s6 }
 0x21e   : >> { %1833 = vst [vmem:[%s6518_s21 + $0x7e0] sm:$0xff] %v1832_v62  ;;  %1835 = vst [vmem:[%s6518_s21 + $0x7f0] sm:$0xff] %v1834_v63  ;;  %s12335_s21 = smov %s8439_s28 }
 0x21f PF: > { %1845 = sbr.rel (%p1564_p8) target bundleno = 743 (0x2e7), region = 110  ;;  %s1847_s29 = ssub.s32 (!%p1564_p8), %s8360_s11, %s8366_s18 }
 0x220   : > { %s1851_s30 = sshrl.u32 (!%p1564_p8), %s8360_s11, 3  ;;  %s8678_s5 = scalar_lea.vmem (!%p1564_p8), %s8358_s7, %s1847_s29 }
 0x221   : > { %s8681_s9 = scalar_lea.vmem (!%p1564_p8), %s8362_s19, %s1847_s29 [#allocation3]  ;;  %s12338_s4 = smov (!%p1564_p8), %s8362_s19 }
 0x222   : > { %s12339_s10 = smov (!%p1564_p8), %s8358_s7  ;;  %s8689_s20 = smov (!%p1564_p8), 0  }
 0x223   : > { %s8691_s21 = smov (!%p1564_p8), 0  }
 0x226 LB: >> { %v1863_v0 = vld [vmem:[%s6538_s10] sm:$0xff]  ;;  %v1865_v1 = vld [vmem:[%s6538_s10 + $0x38] sm:$0xff]  ;;  %v1867_v2 = vld [vmem:[%s6538_s10 + $0x70] sm:$0xff]  ;;  %s2119_s24 = sadd.s32 1, %s6542_s20  ;;  %s1857_s21 = sadd.s32 1, %s6546_s21   ;;  %s6546_s21 = sphi %s8691_s21, %s1857_s21   ;;  %s6542_s20 = sphi %s8689_s20, %s12342_s20   ;;  %s6538_s10 = sphi %s12339_s10, %s12341_s10   ;;  %s6534_s4 = sphi %s12338_s4, %s12340_s4  }
 0x227   : >> { %1864 = vst [vmem:[%s6534_s4] sm:$0xff] %v1863_v0  ;;  %1866 = vst [vmem:[%s6534_s4 + $0x10] sm:$0xff] %v1865_v1  ;;  %v1869_v3 = vld [vmem:[%s6538_s10 + $0xa8] sm:$0xff]  ;;  %v1871_v4 = vld [vmem:[%s6538_s10 + $0xe0] sm:$0xff]  ;;  %p2120_p12 = scmp.ge.s32.totalorder %s2119_s24, %s1851_s30  ;;  %p1856_p13 = scmp.ge.s32.totalorder %s1857_s21, %s1851_s30 }
 0x228   : >> { %1868 = vst [vmem:[%s6534_s4 + $0x20] sm:$0xff] %v1867_v2  ;;  %v1873_v5 = vld [vmem:[%s6538_s10 + $0x118] sm:$0xff]  ;;  %1870 = vst [vmem:[%s6534_s4 + $0x30] sm:$0xff] %v1869_v3  ;;  %v1875_v6 = vld [vmem:[%s6538_s10 + $0x150] sm:$0xff]  ;;  %s6614_s27 = smov (%p1856_p13), 0  }
 0x229   : >> { %1872 = vst [vmem:[%s6534_s4 + $0x40] sm:$0xff] %v1871_v4  ;;  %1874 = vst [vmem:[%s6534_s4 + $0x50] sm:$0xff] %v1873_v5  ;;  %v1877_v7 = vld [vmem:[%s6538_s10 + $0x188] sm:$0xff]  ;;  %v1879_v8 = vld [vmem:[%s6538_s10 + $0x1c0] sm:$0xff]  ;;  %s12380_s24 = smov (%p2120_p12, %s2119_s24), 0  ;;  %s8985_s6 = sshllo.u32 (%p1856_p13), %s6614_s27, %s8366_s18 }
 0x22a   : >> { %1876 = vst [vmem:[%s6534_s4 + $0x60] sm:$0xff] %v1875_v6  ;;  %1878 = vst [vmem:[%s6534_s4 + $0x70] sm:$0xff] %v1877_v7  ;;  %v1881_v9 = vld [vmem:[%s6538_s10 + $0x1f8] sm:$0xff]  ;;  %v1883_v10 = vld [vmem:[%s6538_s10 + $0x230] sm:$0xff]  ;;  %s5775_s25 = sshll.u32 %s12380_s24, 3  ;;  %s12342_s20 = smov %s12380_s24 }
 0x22b   : >> { %1880 = vst [vmem:[%s6534_s4 + $0x80] sm:$0xff] %v1879_v8  ;;  %v1885_v11 = vld [vmem:[%s6538_s10 + $0x268] sm:$0xff]  ;;  %1882 = vst [vmem:[%s6534_s4 + $0x90] sm:$0xff] %v1881_v9  ;;  %v1887_v12 = vld [vmem:[%s6538_s10 + $0x2a0] sm:$0xff]  ;;  %s8748_s26 = scalar_lea.vmem %s8358_s7, %s5775_s25   ;;  %s8751_s8 = scalar_lea.vmem %s8362_s19, %s5775_s25 [#allocation3]  }
 0x22c   : >> { %1884 = vst [vmem:[%s6534_s4 + $0xa0] sm:$0xff] %v1883_v10  ;;  %1886 = vst [vmem:[%s6534_s4 + $0xb0] sm:$0xff] %v1885_v11  ;;  %v1889_v13 = vld [vmem:[%s6538_s10 + $0x2d8] sm:$0xff]  ;;  %v1891_v14 = vld [vmem:[%s6538_s10 + $0x310] sm:$0xff] }
 0x22d   : >> { %1888 = vst [vmem:[%s6534_s4 + $0xc0] sm:$0xff] %v1887_v12  ;;  %1890 = vst [vmem:[%s6534_s4 + $0xd0] sm:$0xff] %v1889_v13  ;;  %v1893_v15 = vld [vmem:[%s6538_s10 + $0x348] sm:$0xff]  ;;  %v1895_v16 = vld [vmem:[%s6538_s10 + $0x380] sm:$0xff] }
 0x22e   : >> { %1892 = vst [vmem:[%s6534_s4 + $0xe0] sm:$0xff] %v1891_v14  ;;  %v1897_v17 = vld [vmem:[%s6538_s10 + $0x3b8] sm:$0xff]  ;;  %1894 = vst [vmem:[%s6534_s4 + $0xf0] sm:$0xff] %v1893_v15  ;;  %v1899_v18 = vld [vmem:[%s6538_s10 + $0x3f0] sm:$0xff] }
 0x22f   : >> { %1896 = vst [vmem:[%s6534_s4 + $0x100] sm:$0xff] %v1895_v16  ;;  %1898 = vst [vmem:[%s6534_s4 + $0x110] sm:$0xff] %v1897_v17  ;;  %v1901_v19 = vld [vmem:[%s6538_s10 + $0x428] sm:$0xff]  ;;  %v1903_v20 = vld [vmem:[%s6538_s10 + $0x460] sm:$0xff] }
 0x230   : >> { %1900 = vst [vmem:[%s6534_s4 + $0x120] sm:$0xff] %v1899_v18  ;;  %1902 = vst [vmem:[%s6534_s4 + $0x130] sm:$0xff] %v1901_v19  ;;  %v1905_v21 = vld [vmem:[%s6538_s10 + $0x498] sm:$0xff]  ;;  %v1907_v22 = vld [vmem:[%s6538_s10 + $0x4d0] sm:$0xff] }
 0x231   : >> { %1904 = vst [vmem:[%s6534_s4 + $0x140] sm:$0xff] %v1903_v20  ;;  %v1909_v23 = vld [vmem:[%s6538_s10 + $0x508] sm:$0xff]  ;;  %1906 = vst [vmem:[%s6534_s4 + $0x150] sm:$0xff] %v1905_v21  ;;  %v1911_v24 = vld [vmem:[%s6538_s10 + $0x540] sm:$0xff] }
 0x232   : >> { %1908 = vst [vmem:[%s6534_s4 + $0x160] sm:$0xff] %v1907_v22  ;;  %1910 = vst [vmem:[%s6534_s4 + $0x170] sm:$0xff] %v1909_v23  ;;  %v1913_v25 = vld [vmem:[%s6538_s10 + $0x578] sm:$0xff]  ;;  %v1915_v26 = vld [vmem:[%s6538_s10 + $0x5b0] sm:$0xff] }
 0x233   : >> { %1912 = vst [vmem:[%s6534_s4 + $0x180] sm:$0xff] %v1911_v24  ;;  %1914 = vst [vmem:[%s6534_s4 + $0x190] sm:$0xff] %v1913_v25  ;;  %v1917_v27 = vld [vmem:[%s6538_s10 + $0x5e8] sm:$0xff]  ;;  %v1919_v28 = vld [vmem:[%s6538_s10 + $0x620] sm:$0xff] }
 0x234   : >> { %1916 = vst [vmem:[%s6534_s4 + $0x1a0] sm:$0xff] %v1915_v26  ;;  %v1921_v29 = vld [vmem:[%s6538_s10 + $0x658] sm:$0xff]  ;;  %1918 = vst [vmem:[%s6534_s4 + $0x1b0] sm:$0xff] %v1917_v27  ;;  %v1923_v30 = vld [vmem:[%s6538_s10 + $0x690] sm:$0xff] }
 0x235   : >> { %1920 = vst [vmem:[%s6534_s4 + $0x1c0] sm:$0xff] %v1919_v28  ;;  %1922 = vst [vmem:[%s6534_s4 + $0x1d0] sm:$0xff] %v1921_v29  ;;  %v1925_v31 = vld [vmem:[%s6538_s10 + $0x6c8] sm:$0xff]  ;;  %v1927_v32 = vld [vmem:[%s6538_s10 + $0x700] sm:$0xff] }
 0x236   : >> { %1924 = vst [vmem:[%s6534_s4 + $0x1e0] sm:$0xff] %v1923_v30  ;;  %1926 = vst [vmem:[%s6534_s4 + $0x1f0] sm:$0xff] %v1925_v31  ;;  %v1929_v33 = vld [vmem:[%s6538_s10 + $0x738] sm:$0xff]  ;;  %v1931_v34 = vld [vmem:[%s6538_s10 + $0x770] sm:$0xff] }
 0x237   : >> { %1928 = vst [vmem:[%s6534_s4 + $0x200] sm:$0xff] %v1927_v32  ;;  %v1933_v35 = vld [vmem:[%s6538_s10 + $0x7a8] sm:$0xff]  ;;  %1930 = vst [vmem:[%s6534_s4 + $0x210] sm:$0xff] %v1929_v33  ;;  %v1935_v36 = vld [vmem:[%s6538_s10 + $0x7e0] sm:$0xff] }
 0x238   : >> { %1932 = vst [vmem:[%s6534_s4 + $0x220] sm:$0xff] %v1931_v34  ;;  %1934 = vst [vmem:[%s6534_s4 + $0x230] sm:$0xff] %v1933_v35  ;;  %v1937_v37 = vld [vmem:[%s6538_s10 + $0x818] sm:$0xff]  ;;  %v1939_v38 = vld [vmem:[%s6538_s10 + $0x850] sm:$0xff] }
 0x239   : >> { %1936 = vst [vmem:[%s6534_s4 + $0x240] sm:$0xff] %v1935_v36  ;;  %1938 = vst [vmem:[%s6534_s4 + $0x250] sm:$0xff] %v1937_v37  ;;  %v1941_v39 = vld [vmem:[%s6538_s10 + $0x888] sm:$0xff]  ;;  %v1943_v40 = vld [vmem:[%s6538_s10 + $0x8c0] sm:$0xff] }
 0x23a   : >> { %1940 = vst [vmem:[%s6534_s4 + $0x260] sm:$0xff] %v1939_v38  ;;  %v1945_v41 = vld [vmem:[%s6538_s10 + $0x8f8] sm:$0xff]  ;;  %1942 = vst [vmem:[%s6534_s4 + $0x270] sm:$0xff] %v1941_v39  ;;  %v1947_v42 = vld [vmem:[%s6538_s10 + $0x930] sm:$0xff] }
 0x23b   : >> { %1944 = vst [vmem:[%s6534_s4 + $0x280] sm:$0xff] %v1943_v40  ;;  %1946 = vst [vmem:[%s6534_s4 + $0x290] sm:$0xff] %v1945_v41  ;;  %v1949_v43 = vld [vmem:[%s6538_s10 + $0x968] sm:$0xff]  ;;  %v1951_v44 = vld [vmem:[%s6538_s10 + $0x9a0] sm:$0xff] }
 0x23c   : >> { %1948 = vst [vmem:[%s6534_s4 + $0x2a0] sm:$0xff] %v1947_v42  ;;  %1950 = vst [vmem:[%s6534_s4 + $0x2b0] sm:$0xff] %v1949_v43  ;;  %v1953_v45 = vld [vmem:[%s6538_s10 + $0x9d8] sm:$0xff]  ;;  %v1955_v46 = vld [vmem:[%s6538_s10 + $0xa10] sm:$0xff] }
 0x23d   : >> { %1952 = vst [vmem:[%s6534_s4 + $0x2c0] sm:$0xff] %v1951_v44  ;;  %v1957_v47 = vld [vmem:[%s6538_s10 + $0xa48] sm:$0xff]  ;;  %1954 = vst [vmem:[%s6534_s4 + $0x2d0] sm:$0xff] %v1953_v45  ;;  %v1959_v48 = vld [vmem:[%s6538_s10 + $0xa80] sm:$0xff] }
 0x23e   : >> { %1956 = vst [vmem:[%s6534_s4 + $0x2e0] sm:$0xff] %v1955_v46  ;;  %1958 = vst [vmem:[%s6534_s4 + $0x2f0] sm:$0xff] %v1957_v47  ;;  %v1961_v49 = vld [vmem:[%s6538_s10 + $0xab8] sm:$0xff]  ;;  %v1963_v50 = vld [vmem:[%s6538_s10 + $0xaf0] sm:$0xff] }
 0x23f   : >> { %1960 = vst [vmem:[%s6534_s4 + $0x300] sm:$0xff] %v1959_v48  ;;  %1962 = vst [vmem:[%s6534_s4 + $0x310] sm:$0xff] %v1961_v49  ;;  %v1965_v51 = vld [vmem:[%s6538_s10 + $0xb28] sm:$0xff]  ;;  %v1967_v52 = vld [vmem:[%s6538_s10 + $0xb60] sm:$0xff] }
 0x240   : >> { %1964 = vst [vmem:[%s6534_s4 + $0x320] sm:$0xff] %v1963_v50  ;;  %v1969_v53 = vld [vmem:[%s6538_s10 + $0xb98] sm:$0xff]  ;;  %1966 = vst [vmem:[%s6534_s4 + $0x330] sm:$0xff] %v1965_v51  ;;  %v1971_v54 = vld [vmem:[%s6538_s10 + $0xbd0] sm:$0xff] }
 0x241   : >> { %1968 = vst [vmem:[%s6534_s4 + $0x340] sm:$0xff] %v1967_v52  ;;  %1970 = vst [vmem:[%s6534_s4 + $0x350] sm:$0xff] %v1969_v53  ;;  %v1973_v55 = vld [vmem:[%s6538_s10 + $0xc08] sm:$0xff]  ;;  %v1975_v56 = vld [vmem:[%s6538_s10 + $0xc40] sm:$0xff] }
 0x242   : >> { %1972 = vst [vmem:[%s6534_s4 + $0x360] sm:$0xff] %v1971_v54  ;;  %1974 = vst [vmem:[%s6534_s4 + $0x370] sm:$0xff] %v1973_v55  ;;  %v1977_v57 = vld [vmem:[%s6538_s10 + $0xc78] sm:$0xff]  ;;  %v1979_v58 = vld [vmem:[%s6538_s10 + $0xcb0] sm:$0xff] }
 0x243   : >> { %1976 = vst [vmem:[%s6534_s4 + $0x380] sm:$0xff] %v1975_v56  ;;  %v1981_v59 = vld [vmem:[%s6538_s10 + $0xce8] sm:$0xff]  ;;  %1978 = vst [vmem:[%s6534_s4 + $0x390] sm:$0xff] %v1977_v57  ;;  %v1983_v60 = vld [vmem:[%s6538_s10 + $0xd20] sm:$0xff] }
 0x244   : >> { %1980 = vst [vmem:[%s6534_s4 + $0x3a0] sm:$0xff] %v1979_v58  ;;  %1982 = vst [vmem:[%s6534_s4 + $0x3b0] sm:$0xff] %v1981_v59  ;;  %v1985_v61 = vld [vmem:[%s6538_s10 + $0xd58] sm:$0xff]  ;;  %v1987_v62 = vld [vmem:[%s6538_s10 + $0xd90] sm:$0xff] }
 0x245   : >> { %1984 = vst [vmem:[%s6534_s4 + $0x3c0] sm:$0xff] %v1983_v60  ;;  %1986 = vst [vmem:[%s6534_s4 + $0x3d0] sm:$0xff] %v1985_v61  ;;  %v1989_v63 = vld [vmem:[%s6538_s10 + $0xdc8] sm:$0xff]  ;;  %v1991_v0 = vld [vmem:[%s6538_s10 + $0xe00] sm:$0xff] }
 0x246   : >> { %1988 = vst [vmem:[%s6534_s4 + $0x3e0] sm:$0xff] %v1987_v62  ;;  %v1993_v1 = vld [vmem:[%s6538_s10 + $0xe38] sm:$0xff]  ;;  %1990 = vst [vmem:[%s6534_s4 + $0x3f0] sm:$0xff] %v1989_v63  ;;  %v1995_v2 = vld [vmem:[%s6538_s10 + $0xe70] sm:$0xff] }
 0x247   : >> { %1992 = vst [vmem:[%s6534_s4 + $0x400] sm:$0xff] %v1991_v0  ;;  %1994 = vst [vmem:[%s6534_s4 + $0x410] sm:$0xff] %v1993_v1  ;;  %v1997_v3 = vld [vmem:[%s6538_s10 + $0xea8] sm:$0xff]  ;;  %v1999_v4 = vld [vmem:[%s6538_s10 + $0xee0] sm:$0xff] }
 0x248   : >> { %1996 = vst [vmem:[%s6534_s4 + $0x420] sm:$0xff] %v1995_v2  ;;  %1998 = vst [vmem:[%s6534_s4 + $0x430] sm:$0xff] %v1997_v3  ;;  %v2001_v5 = vld [vmem:[%s6538_s10 + $0xf18] sm:$0xff]  ;;  %v2003_v6 = vld [vmem:[%s6538_s10 + $0xf50] sm:$0xff] }
 0x249   : >> { %2000 = vst [vmem:[%s6534_s4 + $0x440] sm:$0xff] %v1999_v4  ;;  %v2005_v7 = vld [vmem:[%s6538_s10 + $0xf88] sm:$0xff]  ;;  %2002 = vst [vmem:[%s6534_s4 + $0x450] sm:$0xff] %v2001_v5  ;;  %v2007_v8 = vld [vmem:[%s6538_s10 + $0xfc0] sm:$0xff] }
 0x24a   : >> { %2004 = vst [vmem:[%s6534_s4 + $0x460] sm:$0xff] %v2003_v6  ;;  %2006 = vst [vmem:[%s6534_s4 + $0x470] sm:$0xff] %v2005_v7  ;;  %v2009_v9 = vld [vmem:[%s6538_s10 + $0xff8] sm:$0xff]  ;;  %v2011_v10 = vld [vmem:[%s6538_s10 + $0x1030] sm:$0xff] }
 0x24b   : >> { %2008 = vst [vmem:[%s6534_s4 + $0x480] sm:$0xff] %v2007_v8  ;;  %2010 = vst [vmem:[%s6534_s4 + $0x490] sm:$0xff] %v2009_v9  ;;  %v2013_v11 = vld [vmem:[%s6538_s10 + $0x1068] sm:$0xff]  ;;  %v2015_v12 = vld [vmem:[%s6538_s10 + $0x10a0] sm:$0xff] }
 0x24c   : >> { %2012 = vst [vmem:[%s6534_s4 + $0x4a0] sm:$0xff] %v2011_v10  ;;  %v2017_v13 = vld [vmem:[%s6538_s10 + $0x10d8] sm:$0xff]  ;;  %2014 = vst [vmem:[%s6534_s4 + $0x4b0] sm:$0xff] %v2013_v11  ;;  %v2019_v14 = vld [vmem:[%s6538_s10 + $0x1110] sm:$0xff] }
 0x24d   : >> { %2016 = vst [vmem:[%s6534_s4 + $0x4c0] sm:$0xff] %v2015_v12  ;;  %2018 = vst [vmem:[%s6534_s4 + $0x4d0] sm:$0xff] %v2017_v13  ;;  %v2021_v15 = vld [vmem:[%s6538_s10 + $0x1148] sm:$0xff]  ;;  %v2023_v16 = vld [vmem:[%s6538_s10 + $0x1180] sm:$0xff] }
 0x24e   : >> { %2020 = vst [vmem:[%s6534_s4 + $0x4e0] sm:$0xff] %v2019_v14  ;;  %2022 = vst [vmem:[%s6534_s4 + $0x4f0] sm:$0xff] %v2021_v15  ;;  %v2025_v17 = vld [vmem:[%s6538_s10 + $0x11b8] sm:$0xff]  ;;  %v2027_v18 = vld [vmem:[%s6538_s10 + $0x11f0] sm:$0xff] }
 0x24f   : >> { %2024 = vst [vmem:[%s6534_s4 + $0x500] sm:$0xff] %v2023_v16  ;;  %v2029_v19 = vld [vmem:[%s6538_s10 + $0x1228] sm:$0xff]  ;;  %2026 = vst [vmem:[%s6534_s4 + $0x510] sm:$0xff] %v2025_v17  ;;  %v2031_v20 = vld [vmem:[%s6538_s10 + $0x1260] sm:$0xff] }
 0x250   : >> { %2028 = vst [vmem:[%s6534_s4 + $0x520] sm:$0xff] %v2027_v18  ;;  %2030 = vst [vmem:[%s6534_s4 + $0x530] sm:$0xff] %v2029_v19  ;;  %v2033_v21 = vld [vmem:[%s6538_s10 + $0x1298] sm:$0xff]  ;;  %v2035_v22 = vld [vmem:[%s6538_s10 + $0x12d0] sm:$0xff] }
 0x251   : >> { %2032 = vst [vmem:[%s6534_s4 + $0x540] sm:$0xff] %v2031_v20  ;;  %2034 = vst [vmem:[%s6534_s4 + $0x550] sm:$0xff] %v2033_v21  ;;  %v2037_v23 = vld [vmem:[%s6538_s10 + $0x1308] sm:$0xff]  ;;  %v2039_v24 = vld [vmem:[%s6538_s10 + $0x1340] sm:$0xff] }
 0x252   : >> { %2036 = vst [vmem:[%s6534_s4 + $0x560] sm:$0xff] %v2035_v22  ;;  %v2041_v25 = vld [vmem:[%s6538_s10 + $0x1378] sm:$0xff]  ;;  %2038 = vst [vmem:[%s6534_s4 + $0x570] sm:$0xff] %v2037_v23  ;;  %v2043_v26 = vld [vmem:[%s6538_s10 + $0x13b0] sm:$0xff] }
 0x253   : >> { %2040 = vst [vmem:[%s6534_s4 + $0x580] sm:$0xff] %v2039_v24  ;;  %2042 = vst [vmem:[%s6534_s4 + $0x590] sm:$0xff] %v2041_v25  ;;  %v2045_v27 = vld [vmem:[%s6538_s10 + $0x13e8] sm:$0xff]  ;;  %v2047_v28 = vld [vmem:[%s6538_s10 + $0x1420] sm:$0xff] }
 0x254   : >> { %2044 = vst [vmem:[%s6534_s4 + $0x5a0] sm:$0xff] %v2043_v26  ;;  %2046 = vst [vmem:[%s6534_s4 + $0x5b0] sm:$0xff] %v2045_v27  ;;  %v2049_v29 = vld [vmem:[%s6538_s10 + $0x1458] sm:$0xff]  ;;  %v2051_v30 = vld [vmem:[%s6538_s10 + $0x1490] sm:$0xff] }
 0x255   : >> { %2048 = vst [vmem:[%s6534_s4 + $0x5c0] sm:$0xff] %v2047_v28  ;;  %v2053_v31 = vld [vmem:[%s6538_s10 + $0x14c8] sm:$0xff]  ;;  %2050 = vst [vmem:[%s6534_s4 + $0x5d0] sm:$0xff] %v2049_v29  ;;  %v2055_v32 = vld [vmem:[%s6538_s10 + $0x1500] sm:$0xff] }
 0x256   : >> { %2052 = vst [vmem:[%s6534_s4 + $0x5e0] sm:$0xff] %v2051_v30  ;;  %2054 = vst [vmem:[%s6534_s4 + $0x5f0] sm:$0xff] %v2053_v31  ;;  %v2057_v33 = vld [vmem:[%s6538_s10 + $0x1538] sm:$0xff]  ;;  %v2059_v34 = vld [vmem:[%s6538_s10 + $0x1570] sm:$0xff] }
 0x257   : >> { %2056 = vst [vmem:[%s6534_s4 + $0x600] sm:$0xff] %v2055_v32  ;;  %2058 = vst [vmem:[%s6534_s4 + $0x610] sm:$0xff] %v2057_v33  ;;  %v2061_v35 = vld [vmem:[%s6538_s10 + $0x15a8] sm:$0xff]  ;;  %v2063_v36 = vld [vmem:[%s6538_s10 + $0x15e0] sm:$0xff] }
 0x258   : >> { %2060 = vst [vmem:[%s6534_s4 + $0x620] sm:$0xff] %v2059_v34  ;;  %v2065_v37 = vld [vmem:[%s6538_s10 + $0x1618] sm:$0xff]  ;;  %2062 = vst [vmem:[%s6534_s4 + $0x630] sm:$0xff] %v2061_v35  ;;  %v2067_v38 = vld [vmem:[%s6538_s10 + $0x1650] sm:$0xff] }
 0x259   : >> { %2064 = vst [vmem:[%s6534_s4 + $0x640] sm:$0xff] %v2063_v36  ;;  %2066 = vst [vmem:[%s6534_s4 + $0x650] sm:$0xff] %v2065_v37  ;;  %v2069_v39 = vld [vmem:[%s6538_s10 + $0x1688] sm:$0xff]  ;;  %v2071_v40 = vld [vmem:[%s6538_s10 + $0x16c0] sm:$0xff] }
 0x25a   : >> { %2068 = vst [vmem:[%s6534_s4 + $0x660] sm:$0xff] %v2067_v38  ;;  %2070 = vst [vmem:[%s6534_s4 + $0x670] sm:$0xff] %v2069_v39  ;;  %v2073_v41 = vld [vmem:[%s6538_s10 + $0x16f8] sm:$0xff]  ;;  %v2075_v42 = vld [vmem:[%s6538_s10 + $0x1730] sm:$0xff] }
 0x25b   : >> { %2072 = vst [vmem:[%s6534_s4 + $0x680] sm:$0xff] %v2071_v40  ;;  %v2077_v43 = vld [vmem:[%s6538_s10 + $0x1768] sm:$0xff]  ;;  %2074 = vst [vmem:[%s6534_s4 + $0x690] sm:$0xff] %v2073_v41  ;;  %v2079_v44 = vld [vmem:[%s6538_s10 + $0x17a0] sm:$0xff] }
 0x25c   : >> { %2076 = vst [vmem:[%s6534_s4 + $0x6a0] sm:$0xff] %v2075_v42  ;;  %2078 = vst [vmem:[%s6534_s4 + $0x6b0] sm:$0xff] %v2077_v43  ;;  %v2081_v45 = vld [vmem:[%s6538_s10 + $0x17d8] sm:$0xff]  ;;  %v2083_v46 = vld [vmem:[%s6538_s10 + $0x1810] sm:$0xff] }
 0x25d   : >> { %2080 = vst [vmem:[%s6534_s4 + $0x6c0] sm:$0xff] %v2079_v44  ;;  %2082 = vst [vmem:[%s6534_s4 + $0x6d0] sm:$0xff] %v2081_v45  ;;  %v2085_v47 = vld [vmem:[%s6538_s10 + $0x1848] sm:$0xff]  ;;  %v2087_v48 = vld [vmem:[%s6538_s10 + $0x1880] sm:$0xff] }
 0x25e   : >> { %2084 = vst [vmem:[%s6534_s4 + $0x6e0] sm:$0xff] %v2083_v46  ;;  %v2089_v49 = vld [vmem:[%s6538_s10 + $0x18b8] sm:$0xff]  ;;  %2086 = vst [vmem:[%s6534_s4 + $0x6f0] sm:$0xff] %v2085_v47  ;;  %v2091_v50 = vld [vmem:[%s6538_s10 + $0x18f0] sm:$0xff] }
 0x25f   : >> { %2088 = vst [vmem:[%s6534_s4 + $0x700] sm:$0xff] %v2087_v48  ;;  %2090 = vst [vmem:[%s6534_s4 + $0x710] sm:$0xff] %v2089_v49  ;;  %v2093_v51 = vld [vmem:[%s6538_s10 + $0x1928] sm:$0xff]  ;;  %v2095_v52 = vld [vmem:[%s6538_s10 + $0x1960] sm:$0xff] }
 0x260   : >> { %2092 = vst [vmem:[%s6534_s4 + $0x720] sm:$0xff] %v2091_v50  ;;  %2094 = vst [vmem:[%s6534_s4 + $0x730] sm:$0xff] %v2093_v51  ;;  %v2097_v53 = vld [vmem:[%s6538_s10 + $0x1998] sm:$0xff]  ;;  %v2099_v54 = vld [vmem:[%s6538_s10 + $0x19d0] sm:$0xff]  ;;  %1859 = sbr.rel (!%p1856_p13) target bundleno = 550 (0x226), region = 316 }
 0x261   : >> { %2096 = vst [vmem:[%s6534_s4 + $0x740] sm:$0xff] %v2095_v52  ;;  %v2101_v55 = vld [vmem:[%s6538_s10 + $0x1a08] sm:$0xff]  ;;  %2098 = vst [vmem:[%s6534_s4 + $0x750] sm:$0xff] %v2097_v53  ;;  %v2103_v56 = vld [vmem:[%s6538_s10 + $0x1a40] sm:$0xff] }
 0x262   : >> { %2100 = vst [vmem:[%s6534_s4 + $0x760] sm:$0xff] %v2099_v54  ;;  %2102 = vst [vmem:[%s6534_s4 + $0x770] sm:$0xff] %v2101_v55  ;;  %v2105_v57 = vld [vmem:[%s6538_s10 + $0x1a78] sm:$0xff]  ;;  %v2107_v58 = vld [vmem:[%s6538_s10 + $0x1ab0] sm:$0xff] }
 0x263   : >> { %2104 = vst [vmem:[%s6534_s4 + $0x780] sm:$0xff] %v2103_v56  ;;  %2106 = vst [vmem:[%s6534_s4 + $0x790] sm:$0xff] %v2105_v57  ;;  %v2109_v59 = vld [vmem:[%s6538_s10 + $0x1ae8] sm:$0xff]  ;;  %v2111_v60 = vld [vmem:[%s6538_s10 + $0x1b20] sm:$0xff] }
 0x264   : >> { %2108 = vst [vmem:[%s6534_s4 + $0x7a0] sm:$0xff] %v2107_v58  ;;  %v2113_v61 = vld [vmem:[%s6538_s10 + $0x1b58] sm:$0xff]  ;;  %2110 = vst [vmem:[%s6534_s4 + $0x7b0] sm:$0xff] %v2109_v59  ;;  %v2115_v62 = vld [vmem:[%s6538_s10 + $0x1b90] sm:$0xff] }
 0x265   : >> { %2112 = vst [vmem:[%s6534_s4 + $0x7c0] sm:$0xff] %v2111_v60  ;;  %2114 = vst [vmem:[%s6534_s4 + $0x7d0] sm:$0xff] %v2113_v61  ;;  %v2117_v63 = vld [vmem:[%s6538_s10 + $0x1bc8] sm:$0xff]  ;;  %s12341_s10 = smov %s8748_s26 }
 0x266   : >> { %2116 = vst [vmem:[%s6534_s4 + $0x7e0] sm:$0xff] %v2115_v62  ;;  %2118 = vst [vmem:[%s6534_s4 + $0x7f0] sm:$0xff] %v2117_v63  ;;  %s12340_s4 = smov %s8751_s8  ;;  %v2135_v0 = vld [vmem:[%s8678_s5] sm:%s8985_s6] (%p1856_p13) }
 0x267   : > { %v2137_v1 = vld [vmem:[%s8678_s5 + $0x38] sm:%s8985_s6]  ;;  %2136 = vst [vmem:[%s8681_s9] sm:%s8985_s6] %v2135_v0 }
 0x268   : > { %2138 = vst [vmem:[%s8681_s9 + $0x10] sm:%s8985_s6] %v2137_v1  ;;  %v2139_v2 = vld [vmem:[%s8678_s5 + $0x70] sm:%s8985_s6] }
 0x269   : > { %v2141_v3 = vld [vmem:[%s8678_s5 + $0xa8] sm:%s8985_s6]  ;;  %2140 = vst [vmem:[%s8681_s9 + $0x20] sm:%s8985_s6] %v2139_v2 }
 0x26a   : > { %2142 = vst [vmem:[%s8681_s9 + $0x30] sm:%s8985_s6] %v2141_v3  ;;  %v2143_v4 = vld [vmem:[%s8678_s5 + $0xe0] sm:%s8985_s6] }
 0x26b   : > { %v2145_v5 = vld [vmem:[%s8678_s5 + $0x118] sm:%s8985_s6]  ;;  %2144 = vst [vmem:[%s8681_s9 + $0x40] sm:%s8985_s6] %v2143_v4 }
 0x26c   : > { %2146 = vst [vmem:[%s8681_s9 + $0x50] sm:%s8985_s6] %v2145_v5  ;;  %v2147_v6 = vld [vmem:[%s8678_s5 + $0x150] sm:%s8985_s6] }
 0x26d   : > { %v2149_v7 = vld [vmem:[%s8678_s5 + $0x188] sm:%s8985_s6]  ;;  %2148 = vst [vmem:[%s8681_s9 + $0x60] sm:%s8985_s6] %v2147_v6 }
 0x26e   : > { %2150 = vst [vmem:[%s8681_s9 + $0x70] sm:%s8985_s6] %v2149_v7  ;;  %v2151_v8 = vld [vmem:[%s8678_s5 + $0x1c0] sm:%s8985_s6] }
 0x26f   : > { %v2153_v9 = vld [vmem:[%s8678_s5 + $0x1f8] sm:%s8985_s6]  ;;  %2152 = vst [vmem:[%s8681_s9 + $0x80] sm:%s8985_s6] %v2151_v8 }
 0x270   : > { %2154 = vst [vmem:[%s8681_s9 + $0x90] sm:%s8985_s6] %v2153_v9  ;;  %v2155_v10 = vld [vmem:[%s8678_s5 + $0x230] sm:%s8985_s6] }
 0x271   : > { %v2157_v11 = vld [vmem:[%s8678_s5 + $0x268] sm:%s8985_s6]  ;;  %2156 = vst [vmem:[%s8681_s9 + $0xa0] sm:%s8985_s6] %v2155_v10 }
 0x272   : > { %2158 = vst [vmem:[%s8681_s9 + $0xb0] sm:%s8985_s6] %v2157_v11  ;;  %v2159_v12 = vld [vmem:[%s8678_s5 + $0x2a0] sm:%s8985_s6] }
 0x273   : > { %v2161_v13 = vld [vmem:[%s8678_s5 + $0x2d8] sm:%s8985_s6]  ;;  %2160 = vst [vmem:[%s8681_s9 + $0xc0] sm:%s8985_s6] %v2159_v12 }
 0x274   : > { %2162 = vst [vmem:[%s8681_s9 + $0xd0] sm:%s8985_s6] %v2161_v13  ;;  %v2163_v14 = vld [vmem:[%s8678_s5 + $0x310] sm:%s8985_s6] }
 0x275   : > { %v2165_v15 = vld [vmem:[%s8678_s5 + $0x348] sm:%s8985_s6]  ;;  %2164 = vst [vmem:[%s8681_s9 + $0xe0] sm:%s8985_s6] %v2163_v14 }
 0x276   : > { %2166 = vst [vmem:[%s8681_s9 + $0xf0] sm:%s8985_s6] %v2165_v15  ;;  %v2167_v16 = vld [vmem:[%s8678_s5 + $0x380] sm:%s8985_s6] }
 0x277   : > { %v2169_v17 = vld [vmem:[%s8678_s5 + $0x3b8] sm:%s8985_s6]  ;;  %2168 = vst [vmem:[%s8681_s9 + $0x100] sm:%s8985_s6] %v2167_v16 }
 0x278   : > { %2170 = vst [vmem:[%s8681_s9 + $0x110] sm:%s8985_s6] %v2169_v17  ;;  %v2171_v18 = vld [vmem:[%s8678_s5 + $0x3f0] sm:%s8985_s6] }
 0x279   : > { %v2173_v19 = vld [vmem:[%s8678_s5 + $0x428] sm:%s8985_s6]  ;;  %2172 = vst [vmem:[%s8681_s9 + $0x120] sm:%s8985_s6] %v2171_v18 }
 0x27a   : > { %2174 = vst [vmem:[%s8681_s9 + $0x130] sm:%s8985_s6] %v2173_v19  ;;  %v2175_v20 = vld [vmem:[%s8678_s5 + $0x460] sm:%s8985_s6] }
 0x27b   : > { %v2177_v21 = vld [vmem:[%s8678_s5 + $0x498] sm:%s8985_s6]  ;;  %2176 = vst [vmem:[%s8681_s9 + $0x140] sm:%s8985_s6] %v2175_v20 }
 0x27c   : > { %2178 = vst [vmem:[%s8681_s9 + $0x150] sm:%s8985_s6] %v2177_v21  ;;  %v2179_v22 = vld [vmem:[%s8678_s5 + $0x4d0] sm:%s8985_s6] }
 0x27d   : > { %v2181_v23 = vld [vmem:[%s8678_s5 + $0x508] sm:%s8985_s6]  ;;  %2180 = vst [vmem:[%s8681_s9 + $0x160] sm:%s8985_s6] %v2179_v22 }
 0x27e   : > { %2182 = vst [vmem:[%s8681_s9 + $0x170] sm:%s8985_s6] %v2181_v23  ;;  %v2183_v24 = vld [vmem:[%s8678_s5 + $0x540] sm:%s8985_s6] }
 0x27f   : > { %v2185_v25 = vld [vmem:[%s8678_s5 + $0x578] sm:%s8985_s6]  ;;  %2184 = vst [vmem:[%s8681_s9 + $0x180] sm:%s8985_s6] %v2183_v24 }
 0x280   : > { %2186 = vst [vmem:[%s8681_s9 + $0x190] sm:%s8985_s6] %v2185_v25  ;;  %v2187_v26 = vld [vmem:[%s8678_s5 + $0x5b0] sm:%s8985_s6] }
 0x281   : > { %v2189_v27 = vld [vmem:[%s8678_s5 + $0x5e8] sm:%s8985_s6]  ;;  %2188 = vst [vmem:[%s8681_s9 + $0x1a0] sm:%s8985_s6] %v2187_v26 }
 0x282   : > { %2190 = vst [vmem:[%s8681_s9 + $0x1b0] sm:%s8985_s6] %v2189_v27  ;;  %v2191_v28 = vld [vmem:[%s8678_s5 + $0x620] sm:%s8985_s6] }
 0x283   : > { %v2193_v29 = vld [vmem:[%s8678_s5 + $0x658] sm:%s8985_s6]  ;;  %2192 = vst [vmem:[%s8681_s9 + $0x1c0] sm:%s8985_s6] %v2191_v28 }
 0x284   : > { %2194 = vst [vmem:[%s8681_s9 + $0x1d0] sm:%s8985_s6] %v2193_v29  ;;  %v2195_v30 = vld [vmem:[%s8678_s5 + $0x690] sm:%s8985_s6] }
 0x285   : > { %v2197_v31 = vld [vmem:[%s8678_s5 + $0x6c8] sm:%s8985_s6]  ;;  %2196 = vst [vmem:[%s8681_s9 + $0x1e0] sm:%s8985_s6] %v2195_v30 }
 0x286   : > { %2198 = vst [vmem:[%s8681_s9 + $0x1f0] sm:%s8985_s6] %v2197_v31  ;;  %v2199_v32 = vld [vmem:[%s8678_s5 + $0x700] sm:%s8985_s6] }
 0x287   : > { %v2201_v33 = vld [vmem:[%s8678_s5 + $0x738] sm:%s8985_s6]  ;;  %2200 = vst [vmem:[%s8681_s9 + $0x200] sm:%s8985_s6] %v2199_v32 }
 0x288   : > { %2202 = vst [vmem:[%s8681_s9 + $0x210] sm:%s8985_s6] %v2201_v33  ;;  %v2203_v34 = vld [vmem:[%s8678_s5 + $0x770] sm:%s8985_s6] }
 0x289   : > { %v2205_v35 = vld [vmem:[%s8678_s5 + $0x7a8] sm:%s8985_s6]  ;;  %2204 = vst [vmem:[%s8681_s9 + $0x220] sm:%s8985_s6] %v2203_v34 }
 0x28a   : > { %2206 = vst [vmem:[%s8681_s9 + $0x230] sm:%s8985_s6] %v2205_v35  ;;  %v2207_v36 = vld [vmem:[%s8678_s5 + $0x7e0] sm:%s8985_s6] }
 0x28b   : > { %v2209_v37 = vld [vmem:[%s8678_s5 + $0x818] sm:%s8985_s6]  ;;  %2208 = vst [vmem:[%s8681_s9 + $0x240] sm:%s8985_s6] %v2207_v36 }
 0x28c   : > { %2210 = vst [vmem:[%s8681_s9 + $0x250] sm:%s8985_s6] %v2209_v37  ;;  %v2211_v38 = vld [vmem:[%s8678_s5 + $0x850] sm:%s8985_s6] }
 0x28d   : > { %v2213_v39 = vld [vmem:[%s8678_s5 + $0x888] sm:%s8985_s6]  ;;  %2212 = vst [vmem:[%s8681_s9 + $0x260] sm:%s8985_s6] %v2211_v38 }
 0x28e   : > { %2214 = vst [vmem:[%s8681_s9 + $0x270] sm:%s8985_s6] %v2213_v39  ;;  %v2215_v40 = vld [vmem:[%s8678_s5 + $0x8c0] sm:%s8985_s6] }
 0x28f   : > { %v2217_v41 = vld [vmem:[%s8678_s5 + $0x8f8] sm:%s8985_s6]  ;;  %2216 = vst [vmem:[%s8681_s9 + $0x280] sm:%s8985_s6] %v2215_v40 }
 0x290   : > { %2218 = vst [vmem:[%s8681_s9 + $0x290] sm:%s8985_s6] %v2217_v41  ;;  %v2219_v42 = vld [vmem:[%s8678_s5 + $0x930] sm:%s8985_s6] }
 0x291   : > { %v2221_v43 = vld [vmem:[%s8678_s5 + $0x968] sm:%s8985_s6]  ;;  %2220 = vst [vmem:[%s8681_s9 + $0x2a0] sm:%s8985_s6] %v2219_v42 }
 0x292   : > { %2222 = vst [vmem:[%s8681_s9 + $0x2b0] sm:%s8985_s6] %v2221_v43  ;;  %v2223_v44 = vld [vmem:[%s8678_s5 + $0x9a0] sm:%s8985_s6] }
 0x293   : > { %v2225_v45 = vld [vmem:[%s8678_s5 + $0x9d8] sm:%s8985_s6]  ;;  %2224 = vst [vmem:[%s8681_s9 + $0x2c0] sm:%s8985_s6] %v2223_v44 }
 0x294   : > { %2226 = vst [vmem:[%s8681_s9 + $0x2d0] sm:%s8985_s6] %v2225_v45  ;;  %v2227_v46 = vld [vmem:[%s8678_s5 + $0xa10] sm:%s8985_s6] }
 0x295   : > { %v2229_v47 = vld [vmem:[%s8678_s5 + $0xa48] sm:%s8985_s6]  ;;  %2228 = vst [vmem:[%s8681_s9 + $0x2e0] sm:%s8985_s6] %v2227_v46 }
 0x296   : > { %2230 = vst [vmem:[%s8681_s9 + $0x2f0] sm:%s8985_s6] %v2229_v47  ;;  %v2231_v48 = vld [vmem:[%s8678_s5 + $0xa80] sm:%s8985_s6] }
 0x297   : > { %v2233_v49 = vld [vmem:[%s8678_s5 + $0xab8] sm:%s8985_s6]  ;;  %2232 = vst [vmem:[%s8681_s9 + $0x300] sm:%s8985_s6] %v2231_v48 }
 0x298   : > { %2234 = vst [vmem:[%s8681_s9 + $0x310] sm:%s8985_s6] %v2233_v49  ;;  %v2235_v50 = vld [vmem:[%s8678_s5 + $0xaf0] sm:%s8985_s6] }
 0x299   : > { %v2237_v51 = vld [vmem:[%s8678_s5 + $0xb28] sm:%s8985_s6]  ;;  %2236 = vst [vmem:[%s8681_s9 + $0x320] sm:%s8985_s6] %v2235_v50 }
 0x29a   : > { %2238 = vst [vmem:[%s8681_s9 + $0x330] sm:%s8985_s6] %v2237_v51  ;;  %v2239_v52 = vld [vmem:[%s8678_s5 + $0xb60] sm:%s8985_s6] }
 0x29b   : > { %v2241_v53 = vld [vmem:[%s8678_s5 + $0xb98] sm:%s8985_s6]  ;;  %2240 = vst [vmem:[%s8681_s9 + $0x340] sm:%s8985_s6] %v2239_v52 }
 0x29c   : > { %2242 = vst [vmem:[%s8681_s9 + $0x350] sm:%s8985_s6] %v2241_v53  ;;  %v2243_v54 = vld [vmem:[%s8678_s5 + $0xbd0] sm:%s8985_s6] }
 0x29d   : > { %v2245_v55 = vld [vmem:[%s8678_s5 + $0xc08] sm:%s8985_s6]  ;;  %2244 = vst [vmem:[%s8681_s9 + $0x360] sm:%s8985_s6] %v2243_v54 }
 0x29e   : > { %2246 = vst [vmem:[%s8681_s9 + $0x370] sm:%s8985_s6] %v2245_v55  ;;  %v2247_v56 = vld [vmem:[%s8678_s5 + $0xc40] sm:%s8985_s6] }
 0x29f   : > { %v2249_v57 = vld [vmem:[%s8678_s5 + $0xc78] sm:%s8985_s6]  ;;  %2248 = vst [vmem:[%s8681_s9 + $0x380] sm:%s8985_s6] %v2247_v56 }
 0x2a0   : > { %2250 = vst [vmem:[%s8681_s9 + $0x390] sm:%s8985_s6] %v2249_v57  ;;  %v2251_v58 = vld [vmem:[%s8678_s5 + $0xcb0] sm:%s8985_s6] }
 0x2a1   : > { %v2253_v59 = vld [vmem:[%s8678_s5 + $0xce8] sm:%s8985_s6]  ;;  %2252 = vst [vmem:[%s8681_s9 + $0x3a0] sm:%s8985_s6] %v2251_v58 }
 0x2a2   : > { %2254 = vst [vmem:[%s8681_s9 + $0x3b0] sm:%s8985_s6] %v2253_v59  ;;  %v2255_v60 = vld [vmem:[%s8678_s5 + $0xd20] sm:%s8985_s6] }
 0x2a3   : > { %v2257_v61 = vld [vmem:[%s8678_s5 + $0xd58] sm:%s8985_s6]  ;;  %2256 = vst [vmem:[%s8681_s9 + $0x3c0] sm:%s8985_s6] %v2255_v60 }
 0x2a4   : > { %2258 = vst [vmem:[%s8681_s9 + $0x3d0] sm:%s8985_s6] %v2257_v61  ;;  %v2259_v62 = vld [vmem:[%s8678_s5 + $0xd90] sm:%s8985_s6] }
 0x2a5   : > { %v2261_v63 = vld [vmem:[%s8678_s5 + $0xdc8] sm:%s8985_s6]  ;;  %2260 = vst [vmem:[%s8681_s9 + $0x3e0] sm:%s8985_s6] %v2259_v62 }
 0x2a6   : > { %2262 = vst [vmem:[%s8681_s9 + $0x3f0] sm:%s8985_s6] %v2261_v63  ;;  %v2263_v0 = vld [vmem:[%s8678_s5 + $0xe00] sm:%s8985_s6] }
 0x2a7   : > { %v2265_v1 = vld [vmem:[%s8678_s5 + $0xe38] sm:%s8985_s6]  ;;  %2264 = vst [vmem:[%s8681_s9 + $0x400] sm:%s8985_s6] %v2263_v0 }
 0x2a8   : > { %2266 = vst [vmem:[%s8681_s9 + $0x410] sm:%s8985_s6] %v2265_v1  ;;  %v2267_v2 = vld [vmem:[%s8678_s5 + $0xe70] sm:%s8985_s6] }
 0x2a9   : > { %v2269_v3 = vld [vmem:[%s8678_s5 + $0xea8] sm:%s8985_s6]  ;;  %2268 = vst [vmem:[%s8681_s9 + $0x420] sm:%s8985_s6] %v2267_v2 }
 0x2aa   : > { %2270 = vst [vmem:[%s8681_s9 + $0x430] sm:%s8985_s6] %v2269_v3  ;;  %v2271_v4 = vld [vmem:[%s8678_s5 + $0xee0] sm:%s8985_s6] }
 0x2ab   : > { %v2273_v5 = vld [vmem:[%s8678_s5 + $0xf18] sm:%s8985_s6]  ;;  %2272 = vst [vmem:[%s8681_s9 + $0x440] sm:%s8985_s6] %v2271_v4 }
 0x2ac   : > { %2274 = vst [vmem:[%s8681_s9 + $0x450] sm:%s8985_s6] %v2273_v5  ;;  %v2275_v6 = vld [vmem:[%s8678_s5 + $0xf50] sm:%s8985_s6] }
 0x2ad   : > { %v2277_v7 = vld [vmem:[%s8678_s5 + $0xf88] sm:%s8985_s6]  ;;  %2276 = vst [vmem:[%s8681_s9 + $0x460] sm:%s8985_s6] %v2275_v6 }
 0x2ae   : > { %2278 = vst [vmem:[%s8681_s9 + $0x470] sm:%s8985_s6] %v2277_v7  ;;  %v2279_v8 = vld [vmem:[%s8678_s5 + $0xfc0] sm:%s8985_s6] }
 0x2af   : > { %v2281_v9 = vld [vmem:[%s8678_s5 + $0xff8] sm:%s8985_s6]  ;;  %2280 = vst [vmem:[%s8681_s9 + $0x480] sm:%s8985_s6] %v2279_v8 }
 0x2b0   : > { %2282 = vst [vmem:[%s8681_s9 + $0x490] sm:%s8985_s6] %v2281_v9  ;;  %v2283_v10 = vld [vmem:[%s8678_s5 + $0x1030] sm:%s8985_s6] }
 0x2b1   : > { %v2285_v11 = vld [vmem:[%s8678_s5 + $0x1068] sm:%s8985_s6]  ;;  %2284 = vst [vmem:[%s8681_s9 + $0x4a0] sm:%s8985_s6] %v2283_v10 }
 0x2b2   : > { %2286 = vst [vmem:[%s8681_s9 + $0x4b0] sm:%s8985_s6] %v2285_v11  ;;  %v2287_v12 = vld [vmem:[%s8678_s5 + $0x10a0] sm:%s8985_s6] }
 0x2b3   : > { %v2289_v13 = vld [vmem:[%s8678_s5 + $0x10d8] sm:%s8985_s6]  ;;  %2288 = vst [vmem:[%s8681_s9 + $0x4c0] sm:%s8985_s6] %v2287_v12 }
 0x2b4   : > { %2290 = vst [vmem:[%s8681_s9 + $0x4d0] sm:%s8985_s6] %v2289_v13  ;;  %v2291_v14 = vld [vmem:[%s8678_s5 + $0x1110] sm:%s8985_s6] }
 0x2b5   : > { %v2293_v15 = vld [vmem:[%s8678_s5 + $0x1148] sm:%s8985_s6]  ;;  %2292 = vst [vmem:[%s8681_s9 + $0x4e0] sm:%s8985_s6] %v2291_v14 }
 0x2b6   : > { %2294 = vst [vmem:[%s8681_s9 + $0x4f0] sm:%s8985_s6] %v2293_v15  ;;  %v2295_v16 = vld [vmem:[%s8678_s5 + $0x1180] sm:%s8985_s6] }
 0x2b7   : > { %v2297_v17 = vld [vmem:[%s8678_s5 + $0x11b8] sm:%s8985_s6]  ;;  %2296 = vst [vmem:[%s8681_s9 + $0x500] sm:%s8985_s6] %v2295_v16 }
 0x2b8   : > { %2298 = vst [vmem:[%s8681_s9 + $0x510] sm:%s8985_s6] %v2297_v17  ;;  %v2299_v18 = vld [vmem:[%s8678_s5 + $0x11f0] sm:%s8985_s6] }
 0x2b9   : > { %v2301_v19 = vld [vmem:[%s8678_s5 + $0x1228] sm:%s8985_s6]  ;;  %2300 = vst [vmem:[%s8681_s9 + $0x520] sm:%s8985_s6] %v2299_v18 }
 0x2ba   : > { %2302 = vst [vmem:[%s8681_s9 + $0x530] sm:%s8985_s6] %v2301_v19  ;;  %v2303_v20 = vld [vmem:[%s8678_s5 + $0x1260] sm:%s8985_s6] }
 0x2bb   : > { %v2305_v21 = vld [vmem:[%s8678_s5 + $0x1298] sm:%s8985_s6]  ;;  %2304 = vst [vmem:[%s8681_s9 + $0x540] sm:%s8985_s6] %v2303_v20 }
 0x2bc   : > { %2306 = vst [vmem:[%s8681_s9 + $0x550] sm:%s8985_s6] %v2305_v21  ;;  %v2307_v22 = vld [vmem:[%s8678_s5 + $0x12d0] sm:%s8985_s6] }
 0x2bd   : > { %v2309_v23 = vld [vmem:[%s8678_s5 + $0x1308] sm:%s8985_s6]  ;;  %2308 = vst [vmem:[%s8681_s9 + $0x560] sm:%s8985_s6] %v2307_v22 }
 0x2be   : > { %2310 = vst [vmem:[%s8681_s9 + $0x570] sm:%s8985_s6] %v2309_v23  ;;  %v2311_v24 = vld [vmem:[%s8678_s5 + $0x1340] sm:%s8985_s6] }
 0x2bf   : > { %v2313_v25 = vld [vmem:[%s8678_s5 + $0x1378] sm:%s8985_s6]  ;;  %2312 = vst [vmem:[%s8681_s9 + $0x580] sm:%s8985_s6] %v2311_v24 }
 0x2c0   : > { %2314 = vst [vmem:[%s8681_s9 + $0x590] sm:%s8985_s6] %v2313_v25  ;;  %v2315_v26 = vld [vmem:[%s8678_s5 + $0x13b0] sm:%s8985_s6] }
 0x2c1   : > { %v2317_v27 = vld [vmem:[%s8678_s5 + $0x13e8] sm:%s8985_s6]  ;;  %2316 = vst [vmem:[%s8681_s9 + $0x5a0] sm:%s8985_s6] %v2315_v26 }
 0x2c2   : > { %2318 = vst [vmem:[%s8681_s9 + $0x5b0] sm:%s8985_s6] %v2317_v27  ;;  %v2319_v28 = vld [vmem:[%s8678_s5 + $0x1420] sm:%s8985_s6] }
 0x2c3   : > { %v2321_v29 = vld [vmem:[%s8678_s5 + $0x1458] sm:%s8985_s6]  ;;  %2320 = vst [vmem:[%s8681_s9 + $0x5c0] sm:%s8985_s6] %v2319_v28 }
 0x2c4   : > { %2322 = vst [vmem:[%s8681_s9 + $0x5d0] sm:%s8985_s6] %v2321_v29  ;;  %v2323_v30 = vld [vmem:[%s8678_s5 + $0x1490] sm:%s8985_s6] }
 0x2c5   : > { %v2325_v31 = vld [vmem:[%s8678_s5 + $0x14c8] sm:%s8985_s6]  ;;  %2324 = vst [vmem:[%s8681_s9 + $0x5e0] sm:%s8985_s6] %v2323_v30 }
 0x2c6   : > { %2326 = vst [vmem:[%s8681_s9 + $0x5f0] sm:%s8985_s6] %v2325_v31  ;;  %v2327_v32 = vld [vmem:[%s8678_s5 + $0x1500] sm:%s8985_s6] }
 0x2c7   : > { %v2329_v33 = vld [vmem:[%s8678_s5 + $0x1538] sm:%s8985_s6]  ;;  %2328 = vst [vmem:[%s8681_s9 + $0x600] sm:%s8985_s6] %v2327_v32 }
 0x2c8   : > { %2330 = vst [vmem:[%s8681_s9 + $0x610] sm:%s8985_s6] %v2329_v33  ;;  %v2331_v34 = vld [vmem:[%s8678_s5 + $0x1570] sm:%s8985_s6] }
 0x2c9   : > { %v2333_v35 = vld [vmem:[%s8678_s5 + $0x15a8] sm:%s8985_s6]  ;;  %2332 = vst [vmem:[%s8681_s9 + $0x620] sm:%s8985_s6] %v2331_v34 }
 0x2ca   : > { %2334 = vst [vmem:[%s8681_s9 + $0x630] sm:%s8985_s6] %v2333_v35  ;;  %v2335_v36 = vld [vmem:[%s8678_s5 + $0x15e0] sm:%s8985_s6] }
 0x2cb   : > { %v2337_v37 = vld [vmem:[%s8678_s5 + $0x1618] sm:%s8985_s6]  ;;  %2336 = vst [vmem:[%s8681_s9 + $0x640] sm:%s8985_s6] %v2335_v36 }
 0x2cc   : > { %2338 = vst [vmem:[%s8681_s9 + $0x650] sm:%s8985_s6] %v2337_v37  ;;  %v2339_v38 = vld [vmem:[%s8678_s5 + $0x1650] sm:%s8985_s6] }
 0x2cd   : > { %v2341_v39 = vld [vmem:[%s8678_s5 + $0x1688] sm:%s8985_s6]  ;;  %2340 = vst [vmem:[%s8681_s9 + $0x660] sm:%s8985_s6] %v2339_v38 }
 0x2ce   : > { %2342 = vst [vmem:[%s8681_s9 + $0x670] sm:%s8985_s6] %v2341_v39  ;;  %v2343_v40 = vld [vmem:[%s8678_s5 + $0x16c0] sm:%s8985_s6] }
 0x2cf   : > { %v2345_v41 = vld [vmem:[%s8678_s5 + $0x16f8] sm:%s8985_s6]  ;;  %2344 = vst [vmem:[%s8681_s9 + $0x680] sm:%s8985_s6] %v2343_v40 }
 0x2d0   : > { %2346 = vst [vmem:[%s8681_s9 + $0x690] sm:%s8985_s6] %v2345_v41  ;;  %v2347_v42 = vld [vmem:[%s8678_s5 + $0x1730] sm:%s8985_s6] }
 0x2d1   : > { %v2349_v43 = vld [vmem:[%s8678_s5 + $0x1768] sm:%s8985_s6]  ;;  %2348 = vst [vmem:[%s8681_s9 + $0x6a0] sm:%s8985_s6] %v2347_v42 }
 0x2d2   : > { %2350 = vst [vmem:[%s8681_s9 + $0x6b0] sm:%s8985_s6] %v2349_v43  ;;  %v2351_v44 = vld [vmem:[%s8678_s5 + $0x17a0] sm:%s8985_s6] }
 0x2d3   : > { %v2353_v45 = vld [vmem:[%s8678_s5 + $0x17d8] sm:%s8985_s6]  ;;  %2352 = vst [vmem:[%s8681_s9 + $0x6c0] sm:%s8985_s6] %v2351_v44 }
 0x2d4   : > { %2354 = vst [vmem:[%s8681_s9 + $0x6d0] sm:%s8985_s6] %v2353_v45  ;;  %v2355_v46 = vld [vmem:[%s8678_s5 + $0x1810] sm:%s8985_s6] }
 0x2d5   : > { %v2357_v47 = vld [vmem:[%s8678_s5 + $0x1848] sm:%s8985_s6]  ;;  %2356 = vst [vmem:[%s8681_s9 + $0x6e0] sm:%s8985_s6] %v2355_v46 }
 0x2d6   : > { %2358 = vst [vmem:[%s8681_s9 + $0x6f0] sm:%s8985_s6] %v2357_v47  ;;  %v2359_v48 = vld [vmem:[%s8678_s5 + $0x1880] sm:%s8985_s6] }
 0x2d7   : > { %v2361_v49 = vld [vmem:[%s8678_s5 + $0x18b8] sm:%s8985_s6]  ;;  %2360 = vst [vmem:[%s8681_s9 + $0x700] sm:%s8985_s6] %v2359_v48 }
 0x2d8   : > { %2362 = vst [vmem:[%s8681_s9 + $0x710] sm:%s8985_s6] %v2361_v49  ;;  %v2363_v50 = vld [vmem:[%s8678_s5 + $0x18f0] sm:%s8985_s6] }
 0x2d9   : > { %v2365_v51 = vld [vmem:[%s8678_s5 + $0x1928] sm:%s8985_s6]  ;;  %2364 = vst [vmem:[%s8681_s9 + $0x720] sm:%s8985_s6] %v2363_v50 }
 0x2da   : > { %2366 = vst [vmem:[%s8681_s9 + $0x730] sm:%s8985_s6] %v2365_v51  ;;  %v2367_v52 = vld [vmem:[%s8678_s5 + $0x1960] sm:%s8985_s6] }
 0x2db   : > { %v2369_v53 = vld [vmem:[%s8678_s5 + $0x1998] sm:%s8985_s6]  ;;  %2368 = vst [vmem:[%s8681_s9 + $0x740] sm:%s8985_s6] %v2367_v52 }
 0x2dc   : > { %2370 = vst [vmem:[%s8681_s9 + $0x750] sm:%s8985_s6] %v2369_v53  ;;  %v2371_v54 = vld [vmem:[%s8678_s5 + $0x19d0] sm:%s8985_s6] }
 0x2dd   : > { %v2373_v55 = vld [vmem:[%s8678_s5 + $0x1a08] sm:%s8985_s6]  ;;  %2372 = vst [vmem:[%s8681_s9 + $0x760] sm:%s8985_s6] %v2371_v54 }
 0x2de   : > { %2374 = vst [vmem:[%s8681_s9 + $0x770] sm:%s8985_s6] %v2373_v55  ;;  %v2375_v56 = vld [vmem:[%s8678_s5 + $0x1a40] sm:%s8985_s6] }
 0x2df   : > { %v2377_v57 = vld [vmem:[%s8678_s5 + $0x1a78] sm:%s8985_s6]  ;;  %2376 = vst [vmem:[%s8681_s9 + $0x780] sm:%s8985_s6] %v2375_v56 }
 0x2e0   : > { %2378 = vst [vmem:[%s8681_s9 + $0x790] sm:%s8985_s6] %v2377_v57  ;;  %v2379_v58 = vld [vmem:[%s8678_s5 + $0x1ab0] sm:%s8985_s6] }
 0x2e1   : > { %v2381_v59 = vld [vmem:[%s8678_s5 + $0x1ae8] sm:%s8985_s6]  ;;  %2380 = vst [vmem:[%s8681_s9 + $0x7a0] sm:%s8985_s6] %v2379_v58 }
 0x2e2   : > { %2382 = vst [vmem:[%s8681_s9 + $0x7b0] sm:%s8985_s6] %v2381_v59  ;;  %v2383_v60 = vld [vmem:[%s8678_s5 + $0x1b20] sm:%s8985_s6] }
 0x2e3   : > { %v2385_v61 = vld [vmem:[%s8678_s5 + $0x1b58] sm:%s8985_s6]  ;;  %2384 = vst [vmem:[%s8681_s9 + $0x7c0] sm:%s8985_s6] %v2383_v60 }
 0x2e4   : > { %2386 = vst [vmem:[%s8681_s9 + $0x7d0] sm:%s8985_s6] %v2385_v61  ;;  %v2387_v62 = vld [vmem:[%s8678_s5 + $0x1b90] sm:%s8985_s6] }
 0x2e5   : > { %v2389_v63 = vld [vmem:[%s8678_s5 + $0x1bc8] sm:%s8985_s6]  ;;  %2388 = vst [vmem:[%s8681_s9 + $0x7e0] sm:%s8985_s6] %v2387_v62 }
 0x2e6   : > { %2390 = vst [vmem:[%s8681_s9 + $0x7f0] sm:%s8985_s6] %v2389_v63 }
 0x2e7 PF: > { %p5777_p0 = scmp.ge.u32.totalorder %s8360_s11, 8 }
 0x2e8   : > { %s6615_s18 = smov (!%p5777_p0), 0  }
 0x2e9   : > { %1297 = sbr.rel (%p5777_p0) target bundleno = 874 (0x36a), region = 88  ;;  %s9501_s28 = sshllo.u32 (!%p5777_p0), %s6615_s18, %s8360_s11 }
 0x2ea   : > { %v1307_v0 = vld [vmem:[%s8358_s7] sm:%s9501_s28] (!%p5777_p0)  ;;  %v1309_v1 = vld [vmem:[%s8358_s7 + $0x38] sm:%s9501_s28] (!%p5777_p0) }
 0x2eb   : > { %1308 = vst [vmem:[%s8362_s19] sm:%s9501_s28] (!%p5777_p0), %v1307_v0  ;;  %1310 = vst [vmem:[%s8362_s19 + $0x10] sm:%s9501_s28] (!%p5777_p0), %v1309_v1 }
 0x2ec   : > { %v1311_v2 = vld [vmem:[%s8358_s7 + $0x70] sm:%s9501_s28] (!%p5777_p0)  ;;  %v1313_v3 = vld [vmem:[%s8358_s7 + $0xa8] sm:%s9501_s28] (!%p5777_p0) }
 0x2ed   : > { %1312 = vst [vmem:[%s8362_s19 + $0x20] sm:%s9501_s28] (!%p5777_p0), %v1311_v2  ;;  %1314 = vst [vmem:[%s8362_s19 + $0x30] sm:%s9501_s28] (!%p5777_p0), %v1313_v3 }
 0x2ee   : > { %v1315_v4 = vld [vmem:[%s8358_s7 + $0xe0] sm:%s9501_s28] (!%p5777_p0)  ;;  %v1317_v5 = vld [vmem:[%s8358_s7 + $0x118] sm:%s9501_s28] (!%p5777_p0) }
 0x2ef   : > { %1316 = vst [vmem:[%s8362_s19 + $0x40] sm:%s9501_s28] (!%p5777_p0), %v1315_v4  ;;  %1318 = vst [vmem:[%s8362_s19 + $0x50] sm:%s9501_s28] (!%p5777_p0), %v1317_v5 }
 0x2f0   : > { %v1319_v6 = vld [vmem:[%s8358_s7 + $0x150] sm:%s9501_s28]  ;;  %v1321_v7 = vld [vmem:[%s8358_s7 + $0x188] sm:%s9501_s28] }
 0x2f1   : > { %1320 = vst [vmem:[%s8362_s19 + $0x60] sm:%s9501_s28] %v1319_v6  ;;  %1322 = vst [vmem:[%s8362_s19 + $0x70] sm:%s9501_s28] %v1321_v7 }
 0x2f2   : > { %v1323_v8 = vld [vmem:[%s8358_s7 + $0x1c0] sm:%s9501_s28]  ;;  %v1325_v9 = vld [vmem:[%s8358_s7 + $0x1f8] sm:%s9501_s28] }
 0x2f3   : > { %1324 = vst [vmem:[%s8362_s19 + $0x80] sm:%s9501_s28] %v1323_v8  ;;  %1326 = vst [vmem:[%s8362_s19 + $0x90] sm:%s9501_s28] %v1325_v9 }
 0x2f4   : > { %v1327_v10 = vld [vmem:[%s8358_s7 + $0x230] sm:%s9501_s28]  ;;  %v1329_v11 = vld [vmem:[%s8358_s7 + $0x268] sm:%s9501_s28] }
 0x2f5   : > { %1328 = vst [vmem:[%s8362_s19 + $0xa0] sm:%s9501_s28] %v1327_v10  ;;  %1330 = vst [vmem:[%s8362_s19 + $0xb0] sm:%s9501_s28] %v1329_v11 }
 0x2f6   : > { %v1331_v12 = vld [vmem:[%s8358_s7 + $0x2a0] sm:%s9501_s28]  ;;  %v1333_v13 = vld [vmem:[%s8358_s7 + $0x2d8] sm:%s9501_s28] }
 0x2f7   : > { %1332 = vst [vmem:[%s8362_s19 + $0xc0] sm:%s9501_s28] %v1331_v12  ;;  %1334 = vst [vmem:[%s8362_s19 + $0xd0] sm:%s9501_s28] %v1333_v13 }
 0x2f8   : > { %v1335_v14 = vld [vmem:[%s8358_s7 + $0x310] sm:%s9501_s28]  ;;  %v1337_v15 = vld [vmem:[%s8358_s7 + $0x348] sm:%s9501_s28] }
 0x2f9   : > { %1336 = vst [vmem:[%s8362_s19 + $0xe0] sm:%s9501_s28] %v1335_v14  ;;  %1338 = vst [vmem:[%s8362_s19 + $0xf0] sm:%s9501_s28] %v1337_v15 }
 0x2fa   : > { %v1339_v16 = vld [vmem:[%s8358_s7 + $0x380] sm:%s9501_s28]  ;;  %v1341_v17 = vld [vmem:[%s8358_s7 + $0x3b8] sm:%s9501_s28] }
 0x2fb   : > { %1340 = vst [vmem:[%s8362_s19 + $0x100] sm:%s9501_s28] %v1339_v16  ;;  %1342 = vst [vmem:[%s8362_s19 + $0x110] sm:%s9501_s28] %v1341_v17 }
 0x2fc   : > { %v1343_v18 = vld [vmem:[%s8358_s7 + $0x3f0] sm:%s9501_s28]  ;;  %v1345_v19 = vld [vmem:[%s8358_s7 + $0x428] sm:%s9501_s28] }
 0x2fd   : > { %1344 = vst [vmem:[%s8362_s19 + $0x120] sm:%s9501_s28] %v1343_v18  ;;  %1346 = vst [vmem:[%s8362_s19 + $0x130] sm:%s9501_s28] %v1345_v19 }
 0x2fe   : > { %v1347_v20 = vld [vmem:[%s8358_s7 + $0x460] sm:%s9501_s28]  ;;  %v1349_v21 = vld [vmem:[%s8358_s7 + $0x498] sm:%s9501_s28] }
 0x2ff   : > { %1348 = vst [vmem:[%s8362_s19 + $0x140] sm:%s9501_s28] %v1347_v20  ;;  %1350 = vst [vmem:[%s8362_s19 + $0x150] sm:%s9501_s28] %v1349_v21 }
 0x300   : > { %v1351_v22 = vld [vmem:[%s8358_s7 + $0x4d0] sm:%s9501_s28]  ;;  %v1353_v23 = vld [vmem:[%s8358_s7 + $0x508] sm:%s9501_s28] }
 0x301   : > { %1352 = vst [vmem:[%s8362_s19 + $0x160] sm:%s9501_s28] %v1351_v22  ;;  %1354 = vst [vmem:[%s8362_s19 + $0x170] sm:%s9501_s28] %v1353_v23 }
 0x302   : > { %v1355_v24 = vld [vmem:[%s8358_s7 + $0x540] sm:%s9501_s28]  ;;  %v1357_v25 = vld [vmem:[%s8358_s7 + $0x578] sm:%s9501_s28] }
 0x303   : > { %1356 = vst [vmem:[%s8362_s19 + $0x180] sm:%s9501_s28] %v1355_v24  ;;  %1358 = vst [vmem:[%s8362_s19 + $0x190] sm:%s9501_s28] %v1357_v25 }
 0x304   : > { %v1359_v26 = vld [vmem:[%s8358_s7 + $0x5b0] sm:%s9501_s28]  ;;  %v1361_v27 = vld [vmem:[%s8358_s7 + $0x5e8] sm:%s9501_s28] }
 0x305   : > { %1360 = vst [vmem:[%s8362_s19 + $0x1a0] sm:%s9501_s28] %v1359_v26  ;;  %1362 = vst [vmem:[%s8362_s19 + $0x1b0] sm:%s9501_s28] %v1361_v27 }
 0x306   : > { %v1363_v28 = vld [vmem:[%s8358_s7 + $0x620] sm:%s9501_s28]  ;;  %v1365_v29 = vld [vmem:[%s8358_s7 + $0x658] sm:%s9501_s28] }
 0x307   : > { %1364 = vst [vmem:[%s8362_s19 + $0x1c0] sm:%s9501_s28] %v1363_v28  ;;  %1366 = vst [vmem:[%s8362_s19 + $0x1d0] sm:%s9501_s28] %v1365_v29 }
 0x308   : > { %v1367_v30 = vld [vmem:[%s8358_s7 + $0x690] sm:%s9501_s28]  ;;  %v1369_v31 = vld [vmem:[%s8358_s7 + $0x6c8] sm:%s9501_s28] }
 0x309   : > { %1368 = vst [vmem:[%s8362_s19 + $0x1e0] sm:%s9501_s28] %v1367_v30  ;;  %1370 = vst [vmem:[%s8362_s19 + $0x1f0] sm:%s9501_s28] %v1369_v31 }
 0x30a   : > { %v1371_v32 = vld [vmem:[%s8358_s7 + $0x700] sm:%s9501_s28]  ;;  %v1373_v33 = vld [vmem:[%s8358_s7 + $0x738] sm:%s9501_s28] }
 0x30b   : > { %1372 = vst [vmem:[%s8362_s19 + $0x200] sm:%s9501_s28] %v1371_v32  ;;  %1374 = vst [vmem:[%s8362_s19 + $0x210] sm:%s9501_s28] %v1373_v33 }
 0x30c   : > { %v1375_v34 = vld [vmem:[%s8358_s7 + $0x770] sm:%s9501_s28]  ;;  %v1377_v35 = vld [vmem:[%s8358_s7 + $0x7a8] sm:%s9501_s28] }
 0x30d   : > { %1376 = vst [vmem:[%s8362_s19 + $0x220] sm:%s9501_s28] %v1375_v34  ;;  %1378 = vst [vmem:[%s8362_s19 + $0x230] sm:%s9501_s28] %v1377_v35 }
 0x30e   : > { %v1379_v36 = vld [vmem:[%s8358_s7 + $0x7e0] sm:%s9501_s28]  ;;  %v1381_v37 = vld [vmem:[%s8358_s7 + $0x818] sm:%s9501_s28] }
 0x30f   : > { %1380 = vst [vmem:[%s8362_s19 + $0x240] sm:%s9501_s28] %v1379_v36  ;;  %1382 = vst [vmem:[%s8362_s19 + $0x250] sm:%s9501_s28] %v1381_v37 }
 0x310   : > { %v1383_v38 = vld [vmem:[%s8358_s7 + $0x850] sm:%s9501_s28]  ;;  %v1385_v39 = vld [vmem:[%s8358_s7 + $0x888] sm:%s9501_s28] }
 0x311   : > { %1384 = vst [vmem:[%s8362_s19 + $0x260] sm:%s9501_s28] %v1383_v38  ;;  %1386 = vst [vmem:[%s8362_s19 + $0x270] sm:%s9501_s28] %v1385_v39 }
 0x312   : > { %v1387_v40 = vld [vmem:[%s8358_s7 + $0x8c0] sm:%s9501_s28]  ;;  %v1389_v41 = vld [vmem:[%s8358_s7 + $0x8f8] sm:%s9501_s28] }
 0x313   : > { %1388 = vst [vmem:[%s8362_s19 + $0x280] sm:%s9501_s28] %v1387_v40  ;;  %1390 = vst [vmem:[%s8362_s19 + $0x290] sm:%s9501_s28] %v1389_v41 }
 0x314   : > { %v1391_v42 = vld [vmem:[%s8358_s7 + $0x930] sm:%s9501_s28]  ;;  %v1393_v43 = vld [vmem:[%s8358_s7 + $0x968] sm:%s9501_s28] }
 0x315   : > { %1392 = vst [vmem:[%s8362_s19 + $0x2a0] sm:%s9501_s28] %v1391_v42  ;;  %1394 = vst [vmem:[%s8362_s19 + $0x2b0] sm:%s9501_s28] %v1393_v43 }
 0x316   : > { %v1395_v44 = vld [vmem:[%s8358_s7 + $0x9a0] sm:%s9501_s28]  ;;  %v1397_v45 = vld [vmem:[%s8358_s7 + $0x9d8] sm:%s9501_s28] }
 0x317   : > { %1396 = vst [vmem:[%s8362_s19 + $0x2c0] sm:%s9501_s28] %v1395_v44  ;;  %1398 = vst [vmem:[%s8362_s19 + $0x2d0] sm:%s9501_s28] %v1397_v45 }
 0x318   : > { %v1399_v46 = vld [vmem:[%s8358_s7 + $0xa10] sm:%s9501_s28]  ;;  %v1401_v47 = vld [vmem:[%s8358_s7 + $0xa48] sm:%s9501_s28] }
 0x319   : > { %1400 = vst [vmem:[%s8362_s19 + $0x2e0] sm:%s9501_s28] %v1399_v46  ;;  %1402 = vst [vmem:[%s8362_s19 + $0x2f0] sm:%s9501_s28] %v1401_v47 }
 0x31a   : > { %v1403_v48 = vld [vmem:[%s8358_s7 + $0xa80] sm:%s9501_s28]  ;;  %v1405_v49 = vld [vmem:[%s8358_s7 + $0xab8] sm:%s9501_s28] }
 0x31b   : > { %1404 = vst [vmem:[%s8362_s19 + $0x300] sm:%s9501_s28] %v1403_v48  ;;  %1406 = vst [vmem:[%s8362_s19 + $0x310] sm:%s9501_s28] %v1405_v49 }
 0x31c   : > { %v1407_v50 = vld [vmem:[%s8358_s7 + $0xaf0] sm:%s9501_s28]  ;;  %v1409_v51 = vld [vmem:[%s8358_s7 + $0xb28] sm:%s9501_s28] }
 0x31d   : > { %1408 = vst [vmem:[%s8362_s19 + $0x320] sm:%s9501_s28] %v1407_v50  ;;  %1410 = vst [vmem:[%s8362_s19 + $0x330] sm:%s9501_s28] %v1409_v51 }
 0x31e   : > { %v1411_v52 = vld [vmem:[%s8358_s7 + $0xb60] sm:%s9501_s28]  ;;  %v1413_v53 = vld [vmem:[%s8358_s7 + $0xb98] sm:%s9501_s28] }
 0x31f   : > { %1412 = vst [vmem:[%s8362_s19 + $0x340] sm:%s9501_s28] %v1411_v52  ;;  %1414 = vst [vmem:[%s8362_s19 + $0x350] sm:%s9501_s28] %v1413_v53 }
 0x320   : > { %v1415_v54 = vld [vmem:[%s8358_s7 + $0xbd0] sm:%s9501_s28]  ;;  %v1417_v55 = vld [vmem:[%s8358_s7 + $0xc08] sm:%s9501_s28] }
 0x321   : > { %1416 = vst [vmem:[%s8362_s19 + $0x360] sm:%s9501_s28] %v1415_v54  ;;  %1418 = vst [vmem:[%s8362_s19 + $0x370] sm:%s9501_s28] %v1417_v55 }
 0x322   : > { %v1419_v56 = vld [vmem:[%s8358_s7 + $0xc40] sm:%s9501_s28]  ;;  %v1421_v57 = vld [vmem:[%s8358_s7 + $0xc78] sm:%s9501_s28] }
 0x323   : > { %1420 = vst [vmem:[%s8362_s19 + $0x380] sm:%s9501_s28] %v1419_v56  ;;  %1422 = vst [vmem:[%s8362_s19 + $0x390] sm:%s9501_s28] %v1421_v57 }
 0x324   : > { %v1423_v58 = vld [vmem:[%s8358_s7 + $0xcb0] sm:%s9501_s28]  ;;  %v1425_v59 = vld [vmem:[%s8358_s7 + $0xce8] sm:%s9501_s28] }
 0x325   : > { %1424 = vst [vmem:[%s8362_s19 + $0x3a0] sm:%s9501_s28] %v1423_v58  ;;  %1426 = vst [vmem:[%s8362_s19 + $0x3b0] sm:%s9501_s28] %v1425_v59 }
 0x326   : > { %v1427_v60 = vld [vmem:[%s8358_s7 + $0xd20] sm:%s9501_s28]  ;;  %v1429_v61 = vld [vmem:[%s8358_s7 + $0xd58] sm:%s9501_s28] }
 0x327   : > { %1428 = vst [vmem:[%s8362_s19 + $0x3c0] sm:%s9501_s28] %v1427_v60  ;;  %1430 = vst [vmem:[%s8362_s19 + $0x3d0] sm:%s9501_s28] %v1429_v61 }
 0x328   : > { %v1431_v62 = vld [vmem:[%s8358_s7 + $0xd90] sm:%s9501_s28]  ;;  %v1433_v63 = vld [vmem:[%s8358_s7 + $0xdc8] sm:%s9501_s28] }
 0x329   : > { %1432 = vst [vmem:[%s8362_s19 + $0x3e0] sm:%s9501_s28] %v1431_v62  ;;  %1434 = vst [vmem:[%s8362_s19 + $0x3f0] sm:%s9501_s28] %v1433_v63 }
 0x32a   : > { %v1435_v0 = vld [vmem:[%s8358_s7 + $0xe00] sm:%s9501_s28]  ;;  %v1437_v1 = vld [vmem:[%s8358_s7 + $0xe38] sm:%s9501_s28] }
 0x32b   : > { %1436 = vst [vmem:[%s8362_s19 + $0x400] sm:%s9501_s28] %v1435_v0  ;;  %1438 = vst [vmem:[%s8362_s19 + $0x410] sm:%s9501_s28] %v1437_v1 }
 0x32c   : > { %v1439_v2 = vld [vmem:[%s8358_s7 + $0xe70] sm:%s9501_s28]  ;;  %v1441_v3 = vld [vmem:[%s8358_s7 + $0xea8] sm:%s9501_s28] }
 0x32d   : > { %1440 = vst [vmem:[%s8362_s19 + $0x420] sm:%s9501_s28] %v1439_v2  ;;  %1442 = vst [vmem:[%s8362_s19 + $0x430] sm:%s9501_s28] %v1441_v3 }
 0x32e   : > { %v1443_v4 = vld [vmem:[%s8358_s7 + $0xee0] sm:%s9501_s28]  ;;  %v1445_v5 = vld [vmem:[%s8358_s7 + $0xf18] sm:%s9501_s28] }
 0x32f   : > { %1444 = vst [vmem:[%s8362_s19 + $0x440] sm:%s9501_s28] %v1443_v4  ;;  %1446 = vst [vmem:[%s8362_s19 + $0x450] sm:%s9501_s28] %v1445_v5 }
 0x330   : > { %v1447_v6 = vld [vmem:[%s8358_s7 + $0xf50] sm:%s9501_s28]  ;;  %v1449_v7 = vld [vmem:[%s8358_s7 + $0xf88] sm:%s9501_s28] }
 0x331   : > { %1448 = vst [vmem:[%s8362_s19 + $0x460] sm:%s9501_s28] %v1447_v6  ;;  %1450 = vst [vmem:[%s8362_s19 + $0x470] sm:%s9501_s28] %v1449_v7 }
 0x332   : > { %v1451_v8 = vld [vmem:[%s8358_s7 + $0xfc0] sm:%s9501_s28]  ;;  %v1453_v9 = vld [vmem:[%s8358_s7 + $0xff8] sm:%s9501_s28] }
 0x333   : > { %1452 = vst [vmem:[%s8362_s19 + $0x480] sm:%s9501_s28] %v1451_v8  ;;  %1454 = vst [vmem:[%s8362_s19 + $0x490] sm:%s9501_s28] %v1453_v9 }
 0x334   : > { %v1455_v10 = vld [vmem:[%s8358_s7 + $0x1030] sm:%s9501_s28]  ;;  %v1457_v11 = vld [vmem:[%s8358_s7 + $0x1068] sm:%s9501_s28] }
 0x335   : > { %1456 = vst [vmem:[%s8362_s19 + $0x4a0] sm:%s9501_s28] %v1455_v10  ;;  %1458 = vst [vmem:[%s8362_s19 + $0x4b0] sm:%s9501_s28] %v1457_v11 }
 0x336   : > { %v1459_v12 = vld [vmem:[%s8358_s7 + $0x10a0] sm:%s9501_s28]  ;;  %v1461_v13 = vld [vmem:[%s8358_s7 + $0x10d8] sm:%s9501_s28] }
 0x337   : > { %1460 = vst [vmem:[%s8362_s19 + $0x4c0] sm:%s9501_s28] %v1459_v12  ;;  %1462 = vst [vmem:[%s8362_s19 + $0x4d0] sm:%s9501_s28] %v1461_v13 }
 0x338   : > { %v1463_v14 = vld [vmem:[%s8358_s7 + $0x1110] sm:%s9501_s28]  ;;  %v1465_v15 = vld [vmem:[%s8358_s7 + $0x1148] sm:%s9501_s28] }
 0x339   : > { %1464 = vst [vmem:[%s8362_s19 + $0x4e0] sm:%s9501_s28] %v1463_v14  ;;  %1466 = vst [vmem:[%s8362_s19 + $0x4f0] sm:%s9501_s28] %v1465_v15 }
 0x33a   : > { %v1467_v16 = vld [vmem:[%s8358_s7 + $0x1180] sm:%s9501_s28]  ;;  %v1469_v17 = vld [vmem:[%s8358_s7 + $0x11b8] sm:%s9501_s28] }
 0x33b   : > { %1468 = vst [vmem:[%s8362_s19 + $0x500] sm:%s9501_s28] %v1467_v16  ;;  %1470 = vst [vmem:[%s8362_s19 + $0x510] sm:%s9501_s28] %v1469_v17 }
 0x33c   : > { %v1471_v18 = vld [vmem:[%s8358_s7 + $0x11f0] sm:%s9501_s28]  ;;  %v1473_v19 = vld [vmem:[%s8358_s7 + $0x1228] sm:%s9501_s28] }
 0x33d   : > { %1472 = vst [vmem:[%s8362_s19 + $0x520] sm:%s9501_s28] %v1471_v18  ;;  %1474 = vst [vmem:[%s8362_s19 + $0x530] sm:%s9501_s28] %v1473_v19 }
 0x33e   : > { %v1475_v20 = vld [vmem:[%s8358_s7 + $0x1260] sm:%s9501_s28]  ;;  %v1477_v21 = vld [vmem:[%s8358_s7 + $0x1298] sm:%s9501_s28] }
 0x33f   : > { %1476 = vst [vmem:[%s8362_s19 + $0x540] sm:%s9501_s28] %v1475_v20  ;;  %1478 = vst [vmem:[%s8362_s19 + $0x550] sm:%s9501_s28] %v1477_v21 }
 0x340   : > { %v1479_v22 = vld [vmem:[%s8358_s7 + $0x12d0] sm:%s9501_s28]  ;;  %v1481_v23 = vld [vmem:[%s8358_s7 + $0x1308] sm:%s9501_s28] }
 0x341   : > { %1480 = vst [vmem:[%s8362_s19 + $0x560] sm:%s9501_s28] %v1479_v22  ;;  %1482 = vst [vmem:[%s8362_s19 + $0x570] sm:%s9501_s28] %v1481_v23 }
 0x342   : > { %v1483_v24 = vld [vmem:[%s8358_s7 + $0x1340] sm:%s9501_s28]  ;;  %v1485_v25 = vld [vmem:[%s8358_s7 + $0x1378] sm:%s9501_s28] }
 0x343   : > { %1484 = vst [vmem:[%s8362_s19 + $0x580] sm:%s9501_s28] %v1483_v24  ;;  %1486 = vst [vmem:[%s8362_s19 + $0x590] sm:%s9501_s28] %v1485_v25 }
 0x344   : > { %v1487_v26 = vld [vmem:[%s8358_s7 + $0x13b0] sm:%s9501_s28]  ;;  %v1489_v27 = vld [vmem:[%s8358_s7 + $0x13e8] sm:%s9501_s28] }
 0x345   : > { %1488 = vst [vmem:[%s8362_s19 + $0x5a0] sm:%s9501_s28] %v1487_v26  ;;  %1490 = vst [vmem:[%s8362_s19 + $0x5b0] sm:%s9501_s28] %v1489_v27 }
 0x346   : > { %v1491_v28 = vld [vmem:[%s8358_s7 + $0x1420] sm:%s9501_s28]  ;;  %v1493_v29 = vld [vmem:[%s8358_s7 + $0x1458] sm:%s9501_s28] }
 0x347   : > { %1492 = vst [vmem:[%s8362_s19 + $0x5c0] sm:%s9501_s28] %v1491_v28  ;;  %1494 = vst [vmem:[%s8362_s19 + $0x5d0] sm:%s9501_s28] %v1493_v29 }
 0x348   : > { %v1495_v30 = vld [vmem:[%s8358_s7 + $0x1490] sm:%s9501_s28]  ;;  %v1497_v31 = vld [vmem:[%s8358_s7 + $0x14c8] sm:%s9501_s28] }
 0x349   : > { %1496 = vst [vmem:[%s8362_s19 + $0x5e0] sm:%s9501_s28] %v1495_v30  ;;  %1498 = vst [vmem:[%s8362_s19 + $0x5f0] sm:%s9501_s28] %v1497_v31 }
 0x34a   : > { %v1499_v32 = vld [vmem:[%s8358_s7 + $0x1500] sm:%s9501_s28]  ;;  %v1501_v33 = vld [vmem:[%s8358_s7 + $0x1538] sm:%s9501_s28] }
 0x34b   : > { %1500 = vst [vmem:[%s8362_s19 + $0x600] sm:%s9501_s28] %v1499_v32  ;;  %1502 = vst [vmem:[%s8362_s19 + $0x610] sm:%s9501_s28] %v1501_v33 }
 0x34c   : > { %v1503_v34 = vld [vmem:[%s8358_s7 + $0x1570] sm:%s9501_s28]  ;;  %v1505_v35 = vld [vmem:[%s8358_s7 + $0x15a8] sm:%s9501_s28] }
 0x34d   : > { %1504 = vst [vmem:[%s8362_s19 + $0x620] sm:%s9501_s28] %v1503_v34  ;;  %1506 = vst [vmem:[%s8362_s19 + $0x630] sm:%s9501_s28] %v1505_v35 }
 0x34e   : > { %v1507_v36 = vld [vmem:[%s8358_s7 + $0x15e0] sm:%s9501_s28]  ;;  %v1509_v37 = vld [vmem:[%s8358_s7 + $0x1618] sm:%s9501_s28] }
 0x34f   : > { %1508 = vst [vmem:[%s8362_s19 + $0x640] sm:%s9501_s28] %v1507_v36  ;;  %1510 = vst [vmem:[%s8362_s19 + $0x650] sm:%s9501_s28] %v1509_v37 }
 0x350   : > { %v1511_v38 = vld [vmem:[%s8358_s7 + $0x1650] sm:%s9501_s28]  ;;  %v1513_v39 = vld [vmem:[%s8358_s7 + $0x1688] sm:%s9501_s28] }
 0x351   : > { %1512 = vst [vmem:[%s8362_s19 + $0x660] sm:%s9501_s28] %v1511_v38  ;;  %1514 = vst [vmem:[%s8362_s19 + $0x670] sm:%s9501_s28] %v1513_v39 }
 0x352   : > { %v1515_v40 = vld [vmem:[%s8358_s7 + $0x16c0] sm:%s9501_s28]  ;;  %v1517_v41 = vld [vmem:[%s8358_s7 + $0x16f8] sm:%s9501_s28] }
 0x353   : > { %1516 = vst [vmem:[%s8362_s19 + $0x680] sm:%s9501_s28] %v1515_v40  ;;  %1518 = vst [vmem:[%s8362_s19 + $0x690] sm:%s9501_s28] %v1517_v41 }
 0x354   : > { %v1519_v42 = vld [vmem:[%s8358_s7 + $0x1730] sm:%s9501_s28]  ;;  %v1521_v43 = vld [vmem:[%s8358_s7 + $0x1768] sm:%s9501_s28] }
 0x355   : > { %1520 = vst [vmem:[%s8362_s19 + $0x6a0] sm:%s9501_s28] %v1519_v42  ;;  %1522 = vst [vmem:[%s8362_s19 + $0x6b0] sm:%s9501_s28] %v1521_v43 }
 0x356   : > { %v1523_v44 = vld [vmem:[%s8358_s7 + $0x17a0] sm:%s9501_s28]  ;;  %v1525_v45 = vld [vmem:[%s8358_s7 + $0x17d8] sm:%s9501_s28] }
 0x357   : > { %1524 = vst [vmem:[%s8362_s19 + $0x6c0] sm:%s9501_s28] %v1523_v44  ;;  %1526 = vst [vmem:[%s8362_s19 + $0x6d0] sm:%s9501_s28] %v1525_v45 }
 0x358   : > { %v1527_v46 = vld [vmem:[%s8358_s7 + $0x1810] sm:%s9501_s28]  ;;  %v1529_v47 = vld [vmem:[%s8358_s7 + $0x1848] sm:%s9501_s28] }
 0x359   : > { %1528 = vst [vmem:[%s8362_s19 + $0x6e0] sm:%s9501_s28] %v1527_v46  ;;  %1530 = vst [vmem:[%s8362_s19 + $0x6f0] sm:%s9501_s28] %v1529_v47 }
 0x35a   : > { %v1531_v48 = vld [vmem:[%s8358_s7 + $0x1880] sm:%s9501_s28]  ;;  %v1533_v49 = vld [vmem:[%s8358_s7 + $0x18b8] sm:%s9501_s28] }
 0x35b   : > { %1532 = vst [vmem:[%s8362_s19 + $0x700] sm:%s9501_s28] %v1531_v48  ;;  %1534 = vst [vmem:[%s8362_s19 + $0x710] sm:%s9501_s28] %v1533_v49 }
 0x35c   : > { %v1535_v50 = vld [vmem:[%s8358_s7 + $0x18f0] sm:%s9501_s28]  ;;  %v1537_v51 = vld [vmem:[%s8358_s7 + $0x1928] sm:%s9501_s28] }
 0x35d   : > { %1536 = vst [vmem:[%s8362_s19 + $0x720] sm:%s9501_s28] %v1535_v50  ;;  %1538 = vst [vmem:[%s8362_s19 + $0x730] sm:%s9501_s28] %v1537_v51 }
 0x35e   : > { %v1539_v52 = vld [vmem:[%s8358_s7 + $0x1960] sm:%s9501_s28]  ;;  %v1541_v53 = vld [vmem:[%s8358_s7 + $0x1998] sm:%s9501_s28] }
 0x35f   : > { %1540 = vst [vmem:[%s8362_s19 + $0x740] sm:%s9501_s28] %v1539_v52  ;;  %1542 = vst [vmem:[%s8362_s19 + $0x750] sm:%s9501_s28] %v1541_v53 }
 0x360   : > { %v1543_v54 = vld [vmem:[%s8358_s7 + $0x19d0] sm:%s9501_s28]  ;;  %v1545_v55 = vld [vmem:[%s8358_s7 + $0x1a08] sm:%s9501_s28] }
 0x361   : > { %1544 = vst [vmem:[%s8362_s19 + $0x760] sm:%s9501_s28] %v1543_v54  ;;  %1546 = vst [vmem:[%s8362_s19 + $0x770] sm:%s9501_s28] %v1545_v55 }
 0x362   : > { %v1547_v56 = vld [vmem:[%s8358_s7 + $0x1a40] sm:%s9501_s28]  ;;  %v1549_v57 = vld [vmem:[%s8358_s7 + $0x1a78] sm:%s9501_s28] }
 0x363   : > { %1548 = vst [vmem:[%s8362_s19 + $0x780] sm:%s9501_s28] %v1547_v56  ;;  %1550 = vst [vmem:[%s8362_s19 + $0x790] sm:%s9501_s28] %v1549_v57 }
 0x364   : > { %v1551_v58 = vld [vmem:[%s8358_s7 + $0x1ab0] sm:%s9501_s28]  ;;  %v1553_v59 = vld [vmem:[%s8358_s7 + $0x1ae8] sm:%s9501_s28] }
 0x365   : > { %1552 = vst [vmem:[%s8362_s19 + $0x7a0] sm:%s9501_s28] %v1551_v58  ;;  %1554 = vst [vmem:[%s8362_s19 + $0x7b0] sm:%s9501_s28] %v1553_v59 }
 0x366   : > { %v1555_v60 = vld [vmem:[%s8358_s7 + $0x1b20] sm:%s9501_s28]  ;;  %v1557_v61 = vld [vmem:[%s8358_s7 + $0x1b58] sm:%s9501_s28] }
 0x367   : > { %1556 = vst [vmem:[%s8362_s19 + $0x7c0] sm:%s9501_s28] %v1555_v60  ;;  %1558 = vst [vmem:[%s8362_s19 + $0x7d0] sm:%s9501_s28] %v1557_v61 }
 0x368   : > { %v1559_v62 = vld [vmem:[%s8358_s7 + $0x1b90] sm:%s9501_s28]  ;;  %v1561_v63 = vld [vmem:[%s8358_s7 + $0x1bc8] sm:%s9501_s28] }
 0x369   : > { %1560 = vst [vmem:[%s8362_s19 + $0x7e0] sm:%s9501_s28] %v1559_v62  ;;  %1562 = vst [vmem:[%s8362_s19 + $0x7f0] sm:%s9501_s28] %v1561_v63 }
 0x36a PF: > { %p5778_p1 = scmp.ge.s32.totalorder %s6482_s16, 1  ;;  %p2393_p2 = scmp.lt.s32.totalorder %s6482_s16, 5 }
 0x36c   : > { %p2394_p4 = pnand %p5778_p1, %p2393_p2 }
 0x36d   : > { %s2400_s11 = sand.u32 (!%p2394_p4), 1, %s6466_s12   ;;  %v3473_v0 = vld [vmem:[%s12319_s2 + $0x8] sm:$0xff] (!%p2394_p4) }
 0x36e   : > { %2397 = sbr.rel (%p2394_p4) target bundleno = 1678 (0x68e), region = 128  ;;  %v3481_v1 = vld [vmem:[%s12319_s2 + $0x48] sm:$0xff] (!%p2394_p4)  ;;  %s5779_s4 = sshll.u32 (!%p2394_p4), %s2400_s11, 11 }
 0x36f   : > { %v3477_v2 = vld [vmem:[%s12319_s2 + $0x28] sm:$0xff] (!%p2394_p4)  ;;  %v3729_v3 = vpack.c.bf16 (!%p2394_p4), %v3481_v1, %v3473_v0  ;;  %s10032_s21 = scalar_lea.vmem (!%p2394_p4), [#allocation2], %s5779_s4  ;;  %s10036_s24 = scalar_lea.vmem (!%p2394_p4), [#allocation3], %s5779_s4 }
 0x370   : > { %v3485_v4 = vld [vmem:[%s12319_s2 + $0x68] sm:$0xff] (!%p2394_p4)  ;;  %v2451_v7 = vld [vmem:[%s10032_s21 + $0x18] sm:$0xff] (!%p2394_p4)  ;;  %v2448_v16 = vld [vmem:[%s10032_s21] sm:$0xff] (!%p2394_p4)  ;;  %s5781_s9 = sshll.u32 (!%p2394_p4), %s2400_s11, 9 }
 0x371   : > { %v3733_v5 = vpack.c.bf16 (!%p2394_p4), %v3485_v4, %v3477_v2  ;;  %v2449_v6 = vld [vmem:[%s10032_s21 + $0x8] sm:$0xff] (!%p2394_p4)  ;;  %4016 = vmatprep.mubr.bf16.mxu1 (!%p2394_p4), %v3729_v3  ;;  %v2707_v9 = vld [vmem:[%s10036_s24 + $0x18] sm:$0xff] (!%p2394_p4)  ;;  %v2450_v20 = vld [vmem:[%s10032_s21 + $0x10] sm:$0xff] (!%p2394_p4) }
 0x372   : > { %v2705_v8 = vld [vmem:[%s10036_s24 + $0x8] sm:$0xff] (!%p2394_p4)  ;;  %v2579_v12 = vld [vmem:[%s10032_s21 + $0x418] sm:$0xff] (!%p2394_p4)  ;;  %v2963_v13 = vadd.f32 (!%p2394_p4), %v2707_v9, %v2451_v7  ;;  %v2704_v21 = vld [vmem:[%s10036_s24] sm:$0xff] (!%p2394_p4) }
 0x373   : > { %v2961_v10 = vadd.f32 (!%p2394_p4), %v2705_v8, %v2449_v6  ;;  %v2577_v11 = vld [vmem:[%s10032_s21 + $0x408] sm:$0xff] (!%p2394_p4)  ;;  %4402 = vmatprep.mubr.bf16.mxu0 (!%p2394_p4), %v3733_v5  ;;  %v2835_v15 = vld [vmem:[%s10036_s24 + $0x418] sm:$0xff] (!%p2394_p4)  ;;  %v2706_v22 = vld [vmem:[%s10036_s24 + $0x10] sm:$0xff] (!%p2394_p4)  ;;  %v2960_v24 = vadd.f32 (!%p2394_p4), %v2704_v21, %v2448_v16 }
 0x374   : > { %v2833_v14 = vld [vmem:[%s10036_s24 + $0x408] sm:$0xff] (!%p2394_p4)  ;;  %v3091_v19 = vadd.f32 (!%p2394_p4), %v2835_v15, %v2579_v12  ;;  %v3219_v23 = vmax.f32 (!%p2394_p4), %v2963_v13, 0.0  ;;  %v2962_v25 = vadd.f32 (!%p2394_p4), %v2706_v22, %v2450_v20  ;;  %v2576_v26 = vld [vmem:[%s10032_s21 + $0x400] sm:$0xff] (!%p2394_p4)  ;;  %v2578_v27 = vld [vmem:[%s10032_s21 + $0x410] sm:$0xff] (!%p2394_p4) }
 0x375   : > { %v3217_v17 = vmax.f32 %v2961_v10, 0.0  ;;  %v3089_v18 = vadd.f32 %v2833_v14, %v2577_v11  ;;  %v2832_v28 = vld [vmem:[%s10036_s24 + $0x400] sm:$0xff]  ;;  %v2834_v31 = vld [vmem:[%s10036_s24 + $0x410] sm:$0xff]  ;;  %v2453_v33 = vld [vmem:[%s10032_s21 + $0x28] sm:$0xff]  ;;  %v3216_v36 = vmax.f32 %v2960_v24, 0.0  ;;  %s5783_s12 = sshll.u32 (%p6677_p6), %s6474_s14, 1 }
 0x376   : > { %v3347_v30 = vmax.f32 %v3091_v19, 0.0  ;;  %v3088_v32 = vadd.f32 %v2832_v28, %v2576_v26  ;;  %v2455_v34 = vld [vmem:[%s10032_s21 + $0x38] sm:$0xff]  ;;  %v3218_v37 = vmax.f32 %v2962_v25, 0.0  ;;  %v3090_v38 = vadd.f32 %v2834_v31, %v2578_v27  ;;  %v2709_v39 = vld [vmem:[%s10036_s24 + $0x28] sm:$0xff]  ;;  %v2452_v53 = vld [vmem:[%s10032_s21 + $0x20] sm:$0xff]  ;;  %s5813_s11 = sshll.u32 (%p6677_p6), %s6474_s14, 4 }
 0x377   : > { %v3345_v29 = vmax.f32 %v3089_v18, 0.0  ;;  %v3857_v35 = vpack.c.bf16 %v3219_v23, %v3217_v17  ;;  %v2711_v40 = vld [vmem:[%s10036_s24 + $0x38] sm:$0xff]  ;;  %v2581_v41 = vld [vmem:[%s10032_s21 + $0x428] sm:$0xff]  ;;  %v2965_v44 = vadd.f32 %v2709_v39, %v2453_v33  ;;  %v2454_v54 = vld [vmem:[%s10032_s21 + $0x30] sm:$0xff]  ;;  %s4828_s4 = ssub.s32 (%p6677_p6), 7, %s5783_s12  ;;  %s11433_s20 = scalar_lea.vmem (%p6677_p6), %s12320_s3, %s5813_s11  }
 0x378   : > { %v3344_v43 = vmax.f32 %v3088_v32, 0.0  ;;  %v2967_v45 = vadd.f32 %v2711_v40, %v2455_v34  ;;  %v2583_v46 = vld [vmem:[%s10032_s21 + $0x438] sm:$0xff]  ;;  %v2837_v47 = vld [vmem:[%s10036_s24 + $0x428] sm:$0xff]  ;;  %v3856_v49 = vpack.c.bf16 %v3218_v37, %v3216_v36  ;;  %v3346_v50 = vmax.f32 %v3090_v38, 0.0  ;;  %v2708_v55 = vld [vmem:[%s10036_s24 + $0x20] sm:$0xff]  ;;  %p4829_p5 = scmp.lt.s32.totalorder (%p6677_p6), %s4828_s4, 2 }
 0x379   : > { %v3921_v42 = vpack.c.bf16 %v3347_v30, %v3345_v29  ;;  %v2839_v48 = vld [vmem:[%s10036_s24 + $0x438] sm:$0xff]  ;;  %3984 = vmatprep.subr.bf16.mxu1 %v3857_v35  ;;  %v3093_v51 = vadd.f32 %v2837_v47, %v2581_v41  ;;  %v3221_v56 = vmax.f32 %v2965_v44, 0.0  ;;  %v2710_v58 = vld [vmem:[%s10036_s24 + $0x30] sm:$0xff]  ;;  %v2964_v59 = vadd.f32 %v2708_v55, %v2452_v53  ;;  %v2580_v60 = vld [vmem:[%s10032_s21 + $0x420] sm:$0xff] }
 0x37a   : > { %v3095_v52 = vadd.f32 %v2839_v48, %v2583_v46  ;;  %v3223_v57 = vmax.f32 %v2967_v45, 0.0  ;;  %v2582_v61 = vld [vmem:[%s10032_s21 + $0x430] sm:$0xff]  ;;  %3985 = vmatpush1.bf16.msra.mxu1 %v3856_v49  ;;  %v3920_v62 = vpack.c.bf16 %v3346_v50, %v3344_v43  ;;  %v2966_v1 = vadd.f32 %v2710_v58, %v2454_v54  ;;  %v2836_v2 = vld [vmem:[%s10036_s24 + $0x420] sm:$0xff]  ;;  %v2457_v4 = vld [vmem:[%s10032_s21 + $0x48] sm:$0xff] }
 0x37b   : > { %4370 = vmatprep.subr.bf16.mxu0 %v3921_v42  ;;  %v3349_v63 = vmax.f32 %v3093_v51, 0.0  ;;  %v2838_v3 = vld [vmem:[%s10036_s24 + $0x430] sm:$0xff]  ;;  %v3220_v6 = vmax.f32 %v2964_v59, 0.0  ;;  %v3092_v7 = vadd.f32 %v2836_v2, %v2580_v60  ;;  %v2459_v9 = vld [vmem:[%s10032_s21 + $0x58] sm:$0xff]  ;;  %v2713_v10 = vld [vmem:[%s10036_s24 + $0x48] sm:$0xff] }
 0x37c   : > { %v3351_v0 = vmax.f32 %v3095_v52, 0.0  ;;  %v3859_v5 = vpack.c.bf16 %v3223_v57, %v3221_v56  ;;  %v3094_v8 = vadd.f32 %v2838_v3, %v2582_v61  ;;  %v2715_v11 = vld [vmem:[%s10036_s24 + $0x58] sm:$0xff]  ;;  %4371 = vmatpush1.bf16.msra.mxu0 %v3920_v62  ;;  %v3222_v13 = vmax.f32 %v2966_v1, 0.0  ;;  %v2585_v16 = vld [vmem:[%s10032_s21 + $0x448] sm:$0xff]  ;;  %v2456_v23 = vld [vmem:[%s10032_s21 + $0x40] sm:$0xff] }
 0x37d   : > { %v2969_v14 = vadd.f32 %v2713_v10, %v2457_v4  ;;  %v2971_v15 = vadd.f32 %v2715_v11, %v2459_v9  ;;  %v2587_v17 = vld [vmem:[%s10032_s21 + $0x458] sm:$0xff]  ;;  %v2841_v18 = vld [vmem:[%s10036_s24 + $0x448] sm:$0xff]  ;;  %v3348_v19 = vmax.f32 %v3092_v7, 0.0  ;;  %v2458_v24 = vld [vmem:[%s10032_s21 + $0x50] sm:$0xff] }
 0x37e   : > { %v3923_v12 = vpack.c.bf16 %v3351_v0, %v3349_v63  ;;  %3986 = vmatprep.subr.bf16.mxu1 %v3859_v5  ;;  %v3350_v20 = vmax.f32 %v3094_v8, 0.0  ;;  %v2843_v21 = vld [vmem:[%s10036_s24 + $0x458] sm:$0xff]  ;;  %v3097_v22 = vadd.f32 %v2841_v18, %v2585_v16  ;;  %v3858_v25 = vpack.c.bf16 %v3222_v13, %v3220_v6  ;;  %v2712_v29 = vld [vmem:[%s10036_s24 + $0x40] sm:$0xff]  ;;  %v2714_v30 = vld [vmem:[%s10036_s24 + $0x50] sm:$0xff] }
 0x37f   : > { %v3225_v26 = vmax.f32 %v2969_v14, 0.0  ;;  %v3227_v27 = vmax.f32 %v2971_v15, 0.0  ;;  %v3099_v28 = vadd.f32 %v2843_v21, %v2587_v17  ;;  %v2584_v31 = vld [vmem:[%s10032_s21 + $0x440] sm:$0xff]  ;;  %v2968_v34 = vadd.f32 %v2712_v29, %v2456_v23  ;;  %v2586_v36 = vld [vmem:[%s10032_s21 + $0x450] sm:$0xff]  ;;  %v2461_v43 = vld [vmem:[%s10032_s21 + $0x68] sm:$0xff] }
 0x380   : > { %4372 = vmatprep.subr.bf16.mxu0 %v3923_v12  ;;  %v3922_v32 = vpack.c.bf16 %v3350_v20, %v3348_v19  ;;  %v3353_v33 = vmax.f32 %v3097_v22, 0.0  ;;  %v2970_v35 = vadd.f32 %v2714_v30, %v2458_v24  ;;  %v2840_v37 = vld [vmem:[%s10036_s24 + $0x440] sm:$0xff]  ;;  %v2842_v38 = vld [vmem:[%s10036_s24 + $0x450] sm:$0xff]  ;;  %3987 = vmatpush1.bf16.msra.mxu1 %v3858_v25  ;;  %v2463_v44 = vld [vmem:[%s10032_s21 + $0x78] sm:$0xff] }
 0x381   : > { %v3861_v39 = vpack.c.bf16 %v3227_v27, %v3225_v26  ;;  %v3355_v40 = vmax.f32 %v3099_v28, 0.0  ;;  %v3096_v41 = vadd.f32 %v2840_v37, %v2584_v31  ;;  %v3098_v42 = vadd.f32 %v2842_v38, %v2586_v36  ;;  %v2717_v45 = vld [vmem:[%s10036_s24 + $0x68] sm:$0xff]  ;;  %v2719_v48 = vld [vmem:[%s10036_s24 + $0x78] sm:$0xff]  ;;  %v2460_v58 = vld [vmem:[%s10032_s21 + $0x60] sm:$0xff] }
 0x382   : > { %4373 = vmatpush1.bf16.msra.mxu0 %v3922_v32  ;;  %v3224_v46 = vmax.f32 %v2968_v34, 0.0  ;;  %v3226_v47 = vmax.f32 %v2970_v35, 0.0  ;;  %v2973_v49 = vadd.f32 %v2717_v45, %v2461_v43  ;;  %v2589_v50 = vld [vmem:[%s10032_s21 + $0x468] sm:$0xff]  ;;  %v2591_v51 = vld [vmem:[%s10032_s21 + $0x478] sm:$0xff]  ;;  %v2975_v55 = vadd.f32 %v2719_v48, %v2463_v44  ;;  %v2462_v63 = vld [vmem:[%s10032_s21 + $0x70] sm:$0xff] }
 0x383   : > { %3988 = vmatprep.subr.bf16.mxu1 %v3861_v39  ;;  %v3925_v52 = vpack.c.bf16 %v3355_v40, %v3353_v33  ;;  %v3352_v53 = vmax.f32 %v3096_v41, 0.0  ;;  %v3354_v54 = vmax.f32 %v3098_v42, 0.0  ;;  %v2845_v56 = vld [vmem:[%s10036_s24 + $0x468] sm:$0xff]  ;;  %v2847_v57 = vld [vmem:[%s10036_s24 + $0x478] sm:$0xff]  ;;  %v2716_v0 = vld [vmem:[%s10036_s24 + $0x60] sm:$0xff] }
 0x384   : > { %v3860_v59 = vpack.c.bf16 %v3226_v47, %v3224_v46  ;;  %v3229_v60 = vmax.f32 %v2973_v49, 0.0  ;;  %v3101_v61 = vadd.f32 %v2845_v56, %v2589_v50  ;;  %v3103_v62 = vadd.f32 %v2847_v57, %v2591_v51  ;;  %v2718_v1 = vld [vmem:[%s10036_s24 + $0x70] sm:$0xff]  ;;  %v2588_v6 = vld [vmem:[%s10032_s21 + $0x460] sm:$0xff]  ;;  %v2465_v13 = vld [vmem:[%s10032_s21 + $0x88] sm:$0xff] }
 0x385   : > { %4374 = vmatprep.subr.bf16.mxu0 %v3925_v52  ;;  %v3924_v2 = vpack.c.bf16 %v3354_v54, %v3352_v53  ;;  %v3231_v3 = vmax.f32 %v2975_v55, 0.0  ;;  %v2972_v4 = vadd.f32 %v2716_v0, %v2460_v58  ;;  %v2974_v5 = vadd.f32 %v2718_v1, %v2462_v63  ;;  %v2590_v7 = vld [vmem:[%s10032_s21 + $0x470] sm:$0xff]  ;;  %v2844_v8 = vld [vmem:[%s10036_s24 + $0x460] sm:$0xff]  ;;  %v2467_v14 = vld [vmem:[%s10032_s21 + $0x98] sm:$0xff] }
 0x386   : > { %3989 = vmatpush1.bf16.msra.mxu1 %v3860_v59  ;;  %v3357_v9 = vmax.f32 %v3101_v61, 0.0  ;;  %v3359_v10 = vmax.f32 %v3103_v62, 0.0  ;;  %v2846_v11 = vld [vmem:[%s10036_s24 + $0x470] sm:$0xff]  ;;  %v3100_v12 = vadd.f32 %v2844_v8, %v2588_v6  ;;  %v2721_v19 = vld [vmem:[%s10036_s24 + $0x88] sm:$0xff]  ;;  %v2723_v20 = vld [vmem:[%s10036_s24 + $0x98] sm:$0xff] }
 0x387   : > { %4375 = vmatpush1.bf16.msra.mxu0 %v3924_v2  ;;  %v3863_v15 = vpack.c.bf16 %v3231_v3, %v3229_v60  ;;  %v3228_v16 = vmax.f32 %v2972_v4, 0.0  ;;  %v3230_v17 = vmax.f32 %v2974_v5, 0.0  ;;  %v3102_v18 = vadd.f32 %v2846_v11, %v2590_v7  ;;  %v2593_v21 = vld [vmem:[%s10032_s21 + $0x488] sm:$0xff]  ;;  %v2595_v26 = vld [vmem:[%s10032_s21 + $0x498] sm:$0xff]  ;;  %v2464_v33 = vld [vmem:[%s10032_s21 + $0x80] sm:$0xff] }
 0x388   : > { %v3927_v22 = vpack.c.bf16 %v3359_v10, %v3357_v9  ;;  %v3356_v23 = vmax.f32 %v3100_v12, 0.0  ;;  %v2977_v24 = vadd.f32 %v2721_v19, %v2465_v13  ;;  %v2979_v25 = vadd.f32 %v2723_v20, %v2467_v14  ;;  %v2849_v27 = vld [vmem:[%s10036_s24 + $0x488] sm:$0xff]  ;;  %v2851_v28 = vld [vmem:[%s10036_s24 + $0x498] sm:$0xff]  ;;  %v2466_v34 = vld [vmem:[%s10032_s21 + $0x90] sm:$0xff] }
 0x389   : > { %3990 = vmatprep.subr.bf16.mxu1 %v3863_v15  ;;  %v3862_v29 = vpack.c.bf16 %v3230_v17, %v3228_v16  ;;  %v3358_v30 = vmax.f32 %v3102_v18, 0.0  ;;  %v3105_v31 = vadd.f32 %v2849_v27, %v2593_v21  ;;  %v3107_v32 = vadd.f32 %v2851_v28, %v2595_v26  ;;  %v2720_v35 = vld [vmem:[%s10036_s24 + $0x80] sm:$0xff]  ;;  %v2722_v38 = vld [vmem:[%s10036_s24 + $0x90] sm:$0xff]  ;;  %v2469_v48 = vld [vmem:[%s10032_s21 + $0xa8] sm:$0xff] }
 0x38a   : > { %4376 = vmatprep.subr.bf16.mxu0 %v3927_v22  ;;  %v3233_v36 = vmax.f32 %v2977_v24, 0.0  ;;  %v3235_v37 = vmax.f32 %v2979_v25, 0.0  ;;  %v2976_v39 = vadd.f32 %v2720_v35, %v2464_v33  ;;  %v2592_v40 = vld [vmem:[%s10032_s21 + $0x480] sm:$0xff]  ;;  %v2594_v41 = vld [vmem:[%s10032_s21 + $0x490] sm:$0xff]  ;;  %v2978_v45 = vadd.f32 %v2722_v38, %v2466_v34  ;;  %v2471_v53 = vld [vmem:[%s10032_s21 + $0xb8] sm:$0xff] }
 0x38b   : > { %3991 = vmatpush1.bf16.msra.mxu1 %v3862_v29  ;;  %v3926_v42 = vpack.c.bf16 %v3358_v30, %v3356_v23  ;;  %v3361_v43 = vmax.f32 %v3105_v31, 0.0  ;;  %v3363_v44 = vmax.f32 %v3107_v32, 0.0  ;;  %v2848_v46 = vld [vmem:[%s10036_s24 + $0x480] sm:$0xff]  ;;  %v2850_v47 = vld [vmem:[%s10036_s24 + $0x490] sm:$0xff]  ;;  %v2725_v54 = vld [vmem:[%s10036_s24 + $0xa8] sm:$0xff] }
 0x38c   : > { %v3865_v49 = vpack.c.bf16 %v3235_v37, %v3233_v36  ;;  %v3232_v50 = vmax.f32 %v2976_v39, 0.0  ;;  %v3104_v51 = vadd.f32 %v2848_v46, %v2592_v40  ;;  %v3106_v52 = vadd.f32 %v2850_v47, %v2594_v41  ;;  %v2727_v55 = vld [vmem:[%s10036_s24 + $0xb8] sm:$0xff]  ;;  %v2597_v60 = vld [vmem:[%s10032_s21 + $0x4a8] sm:$0xff]  ;;  %v2468_v3 = vld [vmem:[%s10032_s21 + $0xa0] sm:$0xff] }
 0x38d   : > { %4377 = vmatpush1.bf16.msra.mxu0 %v3926_v42  ;;  %v3929_v56 = vpack.c.bf16 %v3363_v44, %v3361_v43  ;;  %v3234_v57 = vmax.f32 %v2978_v45, 0.0  ;;  %v2981_v58 = vadd.f32 %v2725_v54, %v2469_v48  ;;  %v2983_v59 = vadd.f32 %v2727_v55, %v2471_v53  ;;  %v2599_v61 = vld [vmem:[%s10032_s21 + $0x4b8] sm:$0xff]  ;;  %v2853_v62 = vld [vmem:[%s10036_s24 + $0x4a8] sm:$0xff]  ;;  %v2470_v4 = vld [vmem:[%s10032_s21 + $0xb0] sm:$0xff] }
 0x38e   : > { %3992 = vmatprep.subr.bf16.mxu1 %v3865_v49  ;;  %v3360_v63 = vmax.f32 %v3104_v51, 0.0  ;;  %v3362_v0 = vmax.f32 %v3106_v52, 0.0  ;;  %v2855_v1 = vld [vmem:[%s10036_s24 + $0x4b8] sm:$0xff]  ;;  %v3109_v2 = vadd.f32 %v2853_v62, %v2597_v60  ;;  %v2724_v9 = vld [vmem:[%s10036_s24 + $0xa0] sm:$0xff]  ;;  %v2726_v10 = vld [vmem:[%s10036_s24 + $0xb0] sm:$0xff] }
 0x38f   : > { %4378 = vmatprep.subr.bf16.mxu0 %v3929_v56  ;;  %v3864_v5 = vpack.c.bf16 %v3234_v57, %v3232_v50  ;;  %v3237_v6 = vmax.f32 %v2981_v58, 0.0  ;;  %v3239_v7 = vmax.f32 %v2983_v59, 0.0  ;;  %v3111_v8 = vadd.f32 %v2855_v1, %v2599_v61  ;;  %v2596_v11 = vld [vmem:[%s10032_s21 + $0x4a0] sm:$0xff]  ;;  %v2598_v16 = vld [vmem:[%s10032_s21 + $0x4b0] sm:$0xff]  ;;  %v2473_v23 = vld [vmem:[%s10032_s21 + $0xc8] sm:$0xff] }
 0x390   : > { %v3928_v12 = vpack.c.bf16 %v3362_v0, %v3360_v63  ;;  %v3365_v13 = vmax.f32 %v3109_v2, 0.0  ;;  %v2980_v14 = vadd.f32 %v2724_v9, %v2468_v3  ;;  %v2982_v15 = vadd.f32 %v2726_v10, %v2470_v4  ;;  %v2852_v17 = vld [vmem:[%s10036_s24 + $0x4a0] sm:$0xff]  ;;  %v2854_v18 = vld [vmem:[%s10036_s24 + $0x4b0] sm:$0xff]  ;;  %v2475_v24 = vld [vmem:[%s10032_s21 + $0xd8] sm:$0xff] }
 0x391   : > { %3993 = vmatpush1.bf16.msra.mxu1 %v3864_v5  ;;  %v3867_v19 = vpack.c.bf16 %v3239_v7, %v3237_v6  ;;  %v3367_v20 = vmax.f32 %v3111_v8, 0.0  ;;  %v3108_v21 = vadd.f32 %v2852_v17, %v2596_v11  ;;  %v3110_v22 = vadd.f32 %v2854_v18, %v2598_v16  ;;  %v2729_v25 = vld [vmem:[%s10036_s24 + $0xc8] sm:$0xff]  ;;  %v2731_v28 = vld [vmem:[%s10036_s24 + $0xd8] sm:$0xff]  ;;  %v2472_v38 = vld [vmem:[%s10032_s21 + $0xc0] sm:$0xff] }
 0x392   : > { %4379 = vmatpush1.bf16.msra.mxu0 %v3928_v12  ;;  %v3236_v26 = vmax.f32 %v2980_v14, 0.0  ;;  %v3238_v27 = vmax.f32 %v2982_v15, 0.0  ;;  %v2985_v29 = vadd.f32 %v2729_v25, %v2473_v23  ;;  %v2601_v30 = vld [vmem:[%s10032_s21 + $0x4c8] sm:$0xff]  ;;  %v2603_v31 = vld [vmem:[%s10032_s21 + $0x4d8] sm:$0xff]  ;;  %v2987_v35 = vadd.f32 %v2731_v28, %v2475_v24  ;;  %v2474_v43 = vld [vmem:[%s10032_s21 + $0xd0] sm:$0xff] }
 0x393   : > { %3994 = vmatprep.subr.bf16.mxu1 %v3867_v19  ;;  %v3931_v32 = vpack.c.bf16 %v3367_v20, %v3365_v13  ;;  %v3364_v33 = vmax.f32 %v3108_v21, 0.0  ;;  %v3366_v34 = vmax.f32 %v3110_v22, 0.0  ;;  %v2857_v36 = vld [vmem:[%s10036_s24 + $0x4c8] sm:$0xff]  ;;  %v2859_v37 = vld [vmem:[%s10036_s24 + $0x4d8] sm:$0xff]  ;;  %v2728_v44 = vld [vmem:[%s10036_s24 + $0xc0] sm:$0xff] }
 0x394   : > { %v3866_v39 = vpack.c.bf16 %v3238_v27, %v3236_v26  ;;  %v3241_v40 = vmax.f32 %v2985_v29, 0.0  ;;  %v3113_v41 = vadd.f32 %v2857_v36, %v2601_v30  ;;  %v3115_v42 = vadd.f32 %v2859_v37, %v2603_v31  ;;  %v2730_v45 = vld [vmem:[%s10036_s24 + $0xd0] sm:$0xff]  ;;  %v2600_v50 = vld [vmem:[%s10032_s21 + $0x4c0] sm:$0xff]  ;;  %v2477_v57 = vld [vmem:[%s10032_s21 + $0xe8] sm:$0xff] }
 0x395   : > { %4380 = vmatprep.subr.bf16.mxu0 %v3931_v32  ;;  %v3930_v46 = vpack.c.bf16 %v3366_v34, %v3364_v33  ;;  %v3243_v47 = vmax.f32 %v2987_v35, 0.0  ;;  %v2984_v48 = vadd.f32 %v2728_v44, %v2472_v38  ;;  %v2986_v49 = vadd.f32 %v2730_v45, %v2474_v43  ;;  %v2602_v51 = vld [vmem:[%s10032_s21 + $0x4d0] sm:$0xff]  ;;  %v2856_v52 = vld [vmem:[%s10036_s24 + $0x4c0] sm:$0xff]  ;;  %v2479_v58 = vld [vmem:[%s10032_s21 + $0xf8] sm:$0xff] }
 0x396   : > { %3995 = vmatpush1.bf16.msra.mxu1 %v3866_v39  ;;  %v3369_v53 = vmax.f32 %v3113_v41, 0.0  ;;  %v3371_v54 = vmax.f32 %v3115_v42, 0.0  ;;  %v2858_v55 = vld [vmem:[%s10036_s24 + $0x4d0] sm:$0xff]  ;;  %v3112_v56 = vadd.f32 %v2856_v52, %v2600_v50  ;;  %v2733_v63 = vld [vmem:[%s10036_s24 + $0xe8] sm:$0xff]  ;;  %v2735_v0 = vld [vmem:[%s10036_s24 + $0xf8] sm:$0xff] }
 0x397   : > { %4381 = vmatpush1.bf16.msra.mxu0 %v3930_v46  ;;  %v3869_v59 = vpack.c.bf16 %v3243_v47, %v3241_v40  ;;  %v3240_v60 = vmax.f32 %v2984_v48, 0.0  ;;  %v3242_v61 = vmax.f32 %v2986_v49, 0.0  ;;  %v3114_v62 = vadd.f32 %v2858_v55, %v2602_v51  ;;  %v2605_v1 = vld [vmem:[%s10032_s21 + $0x4e8] sm:$0xff]  ;;  %v2607_v6 = vld [vmem:[%s10032_s21 + $0x4f8] sm:$0xff]  ;;  %v2476_v13 = vld [vmem:[%s10032_s21 + $0xe0] sm:$0xff] }
 0x398   : > { %v3933_v2 = vpack.c.bf16 %v3371_v54, %v3369_v53  ;;  %v3368_v3 = vmax.f32 %v3112_v56, 0.0  ;;  %v2989_v4 = vadd.f32 %v2733_v63, %v2477_v57  ;;  %v2991_v5 = vadd.f32 %v2735_v0, %v2479_v58  ;;  %v2861_v7 = vld [vmem:[%s10036_s24 + $0x4e8] sm:$0xff]  ;;  %v2863_v8 = vld [vmem:[%s10036_s24 + $0x4f8] sm:$0xff]  ;;  %v2478_v14 = vld [vmem:[%s10032_s21 + $0xf0] sm:$0xff] }
 0x399   : > { %3996 = vmatprep.subr.bf16.mxu1 %v3869_v59  ;;  %v3868_v9 = vpack.c.bf16 %v3242_v61, %v3240_v60  ;;  %v3370_v10 = vmax.f32 %v3114_v62, 0.0  ;;  %v3117_v11 = vadd.f32 %v2861_v7, %v2605_v1  ;;  %v3119_v12 = vadd.f32 %v2863_v8, %v2607_v6  ;;  %v2732_v15 = vld [vmem:[%s10036_s24 + $0xe0] sm:$0xff]  ;;  %v2734_v18 = vld [vmem:[%s10036_s24 + $0xf0] sm:$0xff]  ;;  %v2481_v28 = vld [vmem:[%s10032_s21 + $0x108] sm:$0xff] }
 0x39a   : > { %4382 = vmatprep.subr.bf16.mxu0 %v3933_v2  ;;  %v3245_v16 = vmax.f32 %v2989_v4, 0.0  ;;  %v3247_v17 = vmax.f32 %v2991_v5, 0.0  ;;  %v2988_v19 = vadd.f32 %v2732_v15, %v2476_v13  ;;  %v2604_v20 = vld [vmem:[%s10032_s21 + $0x4e0] sm:$0xff]  ;;  %v2606_v21 = vld [vmem:[%s10032_s21 + $0x4f0] sm:$0xff]  ;;  %v2990_v25 = vadd.f32 %v2734_v18, %v2478_v14  ;;  %v2483_v33 = vld [vmem:[%s10032_s21 + $0x118] sm:$0xff] }
 0x39b   : > { %3997 = vmatpush1.bf16.msra.mxu1 %v3868_v9  ;;  %v3932_v22 = vpack.c.bf16 %v3370_v10, %v3368_v3  ;;  %v3373_v23 = vmax.f32 %v3117_v11, 0.0  ;;  %v3375_v24 = vmax.f32 %v3119_v12, 0.0  ;;  %v2860_v26 = vld [vmem:[%s10036_s24 + $0x4e0] sm:$0xff]  ;;  %v2862_v27 = vld [vmem:[%s10036_s24 + $0x4f0] sm:$0xff]  ;;  %v2737_v34 = vld [vmem:[%s10036_s24 + $0x108] sm:$0xff] }
 0x39c   : > { %v3871_v29 = vpack.c.bf16 %v3247_v17, %v3245_v16  ;;  %v3244_v30 = vmax.f32 %v2988_v19, 0.0  ;;  %v3116_v31 = vadd.f32 %v2860_v26, %v2604_v20  ;;  %v3118_v32 = vadd.f32 %v2862_v27, %v2606_v21  ;;  %v2739_v35 = vld [vmem:[%s10036_s24 + $0x118] sm:$0xff]  ;;  %v2609_v40 = vld [vmem:[%s10032_s21 + $0x508] sm:$0xff]  ;;  %v2480_v47 = vld [vmem:[%s10032_s21 + $0x100] sm:$0xff] }
 0x39d   : > { %4383 = vmatpush1.bf16.msra.mxu0 %v3932_v22  ;;  %v3935_v36 = vpack.c.bf16 %v3375_v24, %v3373_v23  ;;  %v3246_v37 = vmax.f32 %v2990_v25, 0.0  ;;  %v2993_v38 = vadd.f32 %v2737_v34, %v2481_v28  ;;  %v2995_v39 = vadd.f32 %v2739_v35, %v2483_v33  ;;  %v2611_v41 = vld [vmem:[%s10032_s21 + $0x518] sm:$0xff]  ;;  %v2865_v42 = vld [vmem:[%s10036_s24 + $0x508] sm:$0xff]  ;;  %v2482_v48 = vld [vmem:[%s10032_s21 + $0x110] sm:$0xff] }
 0x39e   : > { %3998 = vmatprep.subr.bf16.mxu1 %v3871_v29  ;;  %v3372_v43 = vmax.f32 %v3116_v31, 0.0  ;;  %v3374_v44 = vmax.f32 %v3118_v32, 0.0  ;;  %v2867_v45 = vld [vmem:[%s10036_s24 + $0x518] sm:$0xff]  ;;  %v3121_v46 = vadd.f32 %v2865_v42, %v2609_v40  ;;  %v2736_v53 = vld [vmem:[%s10036_s24 + $0x100] sm:$0xff]  ;;  %v2738_v54 = vld [vmem:[%s10036_s24 + $0x110] sm:$0xff] }
 0x39f   : > { %4384 = vmatprep.subr.bf16.mxu0 %v3935_v36  ;;  %v3870_v49 = vpack.c.bf16 %v3246_v37, %v3244_v30  ;;  %v3249_v50 = vmax.f32 %v2993_v38, 0.0  ;;  %v3251_v51 = vmax.f32 %v2995_v39, 0.0  ;;  %v3123_v52 = vadd.f32 %v2867_v45, %v2611_v41  ;;  %v2608_v55 = vld [vmem:[%s10032_s21 + $0x500] sm:$0xff]  ;;  %v2610_v60 = vld [vmem:[%s10032_s21 + $0x510] sm:$0xff]  ;;  %v2485_v3 = vld [vmem:[%s10032_s21 + $0x128] sm:$0xff] }
 0x3a0   : > { %v3934_v56 = vpack.c.bf16 %v3374_v44, %v3372_v43  ;;  %v3377_v57 = vmax.f32 %v3121_v46, 0.0  ;;  %v2992_v58 = vadd.f32 %v2736_v53, %v2480_v47  ;;  %v2994_v59 = vadd.f32 %v2738_v54, %v2482_v48  ;;  %v2864_v61 = vld [vmem:[%s10036_s24 + $0x500] sm:$0xff]  ;;  %v2866_v62 = vld [vmem:[%s10036_s24 + $0x510] sm:$0xff]  ;;  %v2487_v4 = vld [vmem:[%s10032_s21 + $0x138] sm:$0xff] }
 0x3a1   : > { %3999 = vmatpush1.bf16.msra.mxu1 %v3870_v49  ;;  %v3873_v63 = vpack.c.bf16 %v3251_v51, %v3249_v50  ;;  %v3379_v0 = vmax.f32 %v3123_v52, 0.0  ;;  %v3120_v1 = vadd.f32 %v2864_v61, %v2608_v55  ;;  %v3122_v2 = vadd.f32 %v2866_v62, %v2610_v60  ;;  %v2741_v5 = vld [vmem:[%s10036_s24 + $0x128] sm:$0xff]  ;;  %v2743_v8 = vld [vmem:[%s10036_s24 + $0x138] sm:$0xff]  ;;  %v2484_v18 = vld [vmem:[%s10032_s21 + $0x120] sm:$0xff] }
 0x3a2   : > { %4385 = vmatpush1.bf16.msra.mxu0 %v3934_v56  ;;  %v3248_v6 = vmax.f32 %v2992_v58, 0.0  ;;  %v3250_v7 = vmax.f32 %v2994_v59, 0.0  ;;  %v2997_v9 = vadd.f32 %v2741_v5, %v2485_v3  ;;  %v2613_v10 = vld [vmem:[%s10032_s21 + $0x528] sm:$0xff]  ;;  %v2615_v11 = vld [vmem:[%s10032_s21 + $0x538] sm:$0xff]  ;;  %v2999_v15 = vadd.f32 %v2743_v8, %v2487_v4  ;;  %v2486_v23 = vld [vmem:[%s10032_s21 + $0x130] sm:$0xff] }
 0x3a3   : > { %4000 = vmatprep.subr.bf16.mxu1 %v3873_v63  ;;  %v3937_v12 = vpack.c.bf16 %v3379_v0, %v3377_v57  ;;  %v3376_v13 = vmax.f32 %v3120_v1, 0.0  ;;  %v3378_v14 = vmax.f32 %v3122_v2, 0.0  ;;  %v2869_v16 = vld [vmem:[%s10036_s24 + $0x528] sm:$0xff]  ;;  %v2871_v17 = vld [vmem:[%s10036_s24 + $0x538] sm:$0xff]  ;;  %v2740_v24 = vld [vmem:[%s10036_s24 + $0x120] sm:$0xff] }
 0x3a4   : > { %v3872_v19 = vpack.c.bf16 %v3250_v7, %v3248_v6  ;;  %v3253_v20 = vmax.f32 %v2997_v9, 0.0  ;;  %v3125_v21 = vadd.f32 %v2869_v16, %v2613_v10  ;;  %v3127_v22 = vadd.f32 %v2871_v17, %v2615_v11  ;;  %v2742_v25 = vld [vmem:[%s10036_s24 + $0x130] sm:$0xff]  ;;  %v2612_v30 = vld [vmem:[%s10032_s21 + $0x520] sm:$0xff]  ;;  %v2489_v37 = vld [vmem:[%s10032_s21 + $0x148] sm:$0xff] }
 0x3a5   : > { %4386 = vmatprep.subr.bf16.mxu0 %v3937_v12  ;;  %v3936_v26 = vpack.c.bf16 %v3378_v14, %v3376_v13  ;;  %v3255_v27 = vmax.f32 %v2999_v15, 0.0  ;;  %v2996_v28 = vadd.f32 %v2740_v24, %v2484_v18  ;;  %v2998_v29 = vadd.f32 %v2742_v25, %v2486_v23  ;;  %v2614_v31 = vld [vmem:[%s10032_s21 + $0x530] sm:$0xff]  ;;  %v2868_v32 = vld [vmem:[%s10036_s24 + $0x520] sm:$0xff]  ;;  %v2491_v38 = vld [vmem:[%s10032_s21 + $0x158] sm:$0xff] }
 0x3a6   : > { %4001 = vmatpush1.bf16.msra.mxu1 %v3872_v19  ;;  %v3381_v33 = vmax.f32 %v3125_v21, 0.0  ;;  %v3383_v34 = vmax.f32 %v3127_v22, 0.0  ;;  %v2870_v35 = vld [vmem:[%s10036_s24 + $0x530] sm:$0xff]  ;;  %v3124_v36 = vadd.f32 %v2868_v32, %v2612_v30  ;;  %v2745_v43 = vld [vmem:[%s10036_s24 + $0x148] sm:$0xff]  ;;  %v2747_v44 = vld [vmem:[%s10036_s24 + $0x158] sm:$0xff] }
 0x3a7   : > { %4387 = vmatpush1.bf16.msra.mxu0 %v3936_v26  ;;  %v3875_v39 = vpack.c.bf16 %v3255_v27, %v3253_v20  ;;  %v3252_v40 = vmax.f32 %v2996_v28, 0.0  ;;  %v3254_v41 = vmax.f32 %v2998_v29, 0.0  ;;  %v3126_v42 = vadd.f32 %v2870_v35, %v2614_v31  ;;  %v2617_v45 = vld [vmem:[%s10032_s21 + $0x548] sm:$0xff]  ;;  %v2619_v50 = vld [vmem:[%s10032_s21 + $0x558] sm:$0xff]  ;;  %v2488_v57 = vld [vmem:[%s10032_s21 + $0x140] sm:$0xff] }
 0x3a8   : > { %v3939_v46 = vpack.c.bf16 %v3383_v34, %v3381_v33  ;;  %v3380_v47 = vmax.f32 %v3124_v36, 0.0  ;;  %v3001_v48 = vadd.f32 %v2745_v43, %v2489_v37  ;;  %v3003_v49 = vadd.f32 %v2747_v44, %v2491_v38  ;;  %v2873_v51 = vld [vmem:[%s10036_s24 + $0x548] sm:$0xff]  ;;  %v2875_v52 = vld [vmem:[%s10036_s24 + $0x558] sm:$0xff]  ;;  %v2490_v58 = vld [vmem:[%s10032_s21 + $0x150] sm:$0xff] }
 0x3a9   : > { %4002 = vmatprep.subr.bf16.mxu1 %v3875_v39  ;;  %v3874_v53 = vpack.c.bf16 %v3254_v41, %v3252_v40  ;;  %v3382_v54 = vmax.f32 %v3126_v42, 0.0  ;;  %v3129_v55 = vadd.f32 %v2873_v51, %v2617_v45  ;;  %v3131_v56 = vadd.f32 %v2875_v52, %v2619_v50  ;;  %v2744_v59 = vld [vmem:[%s10036_s24 + $0x140] sm:$0xff]  ;;  %v2746_v62 = vld [vmem:[%s10036_s24 + $0x150] sm:$0xff]  ;;  %v2493_v8 = vld [vmem:[%s10032_s21 + $0x168] sm:$0xff] }
 0x3aa   : > { %4388 = vmatprep.subr.bf16.mxu0 %v3939_v46  ;;  %v3257_v60 = vmax.f32 %v3001_v48, 0.0  ;;  %v3259_v61 = vmax.f32 %v3003_v49, 0.0  ;;  %v3000_v63 = vadd.f32 %v2744_v59, %v2488_v57  ;;  %v2616_v0 = vld [vmem:[%s10032_s21 + $0x540] sm:$0xff]  ;;  %v2618_v1 = vld [vmem:[%s10032_s21 + $0x550] sm:$0xff]  ;;  %v3002_v5 = vadd.f32 %v2746_v62, %v2490_v58  ;;  %v2495_v13 = vld [vmem:[%s10032_s21 + $0x178] sm:$0xff] }
 0x3ab   : > { %4003 = vmatpush1.bf16.msra.mxu1 %v3874_v53  ;;  %v3938_v2 = vpack.c.bf16 %v3382_v54, %v3380_v47  ;;  %v3385_v3 = vmax.f32 %v3129_v55, 0.0  ;;  %v3387_v4 = vmax.f32 %v3131_v56, 0.0  ;;  %v2872_v6 = vld [vmem:[%s10036_s24 + $0x540] sm:$0xff]  ;;  %v2874_v7 = vld [vmem:[%s10036_s24 + $0x550] sm:$0xff]  ;;  %v2749_v14 = vld [vmem:[%s10036_s24 + $0x168] sm:$0xff] }
 0x3ac   : > { %v3877_v9 = vpack.c.bf16 %v3259_v61, %v3257_v60  ;;  %v3256_v10 = vmax.f32 %v3000_v63, 0.0  ;;  %v3128_v11 = vadd.f32 %v2872_v6, %v2616_v0  ;;  %v3130_v12 = vadd.f32 %v2874_v7, %v2618_v1  ;;  %v2751_v15 = vld [vmem:[%s10036_s24 + $0x178] sm:$0xff]  ;;  %v2621_v20 = vld [vmem:[%s10032_s21 + $0x568] sm:$0xff]  ;;  %v2492_v27 = vld [vmem:[%s10032_s21 + $0x160] sm:$0xff] }
 0x3ad   : > { %4389 = vmatpush1.bf16.msra.mxu0 %v3938_v2  ;;  %v3941_v16 = vpack.c.bf16 %v3387_v4, %v3385_v3  ;;  %v3258_v17 = vmax.f32 %v3002_v5, 0.0  ;;  %v3005_v18 = vadd.f32 %v2749_v14, %v2493_v8  ;;  %v3007_v19 = vadd.f32 %v2751_v15, %v2495_v13  ;;  %v2623_v21 = vld [vmem:[%s10032_s21 + $0x578] sm:$0xff]  ;;  %v2877_v22 = vld [vmem:[%s10036_s24 + $0x568] sm:$0xff]  ;;  %v2494_v28 = vld [vmem:[%s10032_s21 + $0x170] sm:$0xff] }
 0x3ae   : > { %4004 = vmatprep.subr.bf16.mxu1 %v3877_v9  ;;  %v3384_v23 = vmax.f32 %v3128_v11, 0.0  ;;  %v3386_v24 = vmax.f32 %v3130_v12, 0.0  ;;  %v2879_v25 = vld [vmem:[%s10036_s24 + $0x578] sm:$0xff]  ;;  %v3133_v26 = vadd.f32 %v2877_v22, %v2621_v20  ;;  %v2748_v33 = vld [vmem:[%s10036_s24 + $0x160] sm:$0xff]  ;;  %v2750_v34 = vld [vmem:[%s10036_s24 + $0x170] sm:$0xff] }
 0x3af   : > { %4390 = vmatprep.subr.bf16.mxu0 %v3941_v16  ;;  %v3876_v29 = vpack.c.bf16 %v3258_v17, %v3256_v10  ;;  %v3261_v30 = vmax.f32 %v3005_v18, 0.0  ;;  %v3263_v31 = vmax.f32 %v3007_v19, 0.0  ;;  %v3135_v32 = vadd.f32 %v2879_v25, %v2623_v21  ;;  %v2620_v35 = vld [vmem:[%s10032_s21 + $0x560] sm:$0xff]  ;;  %v2622_v40 = vld [vmem:[%s10032_s21 + $0x570] sm:$0xff]  ;;  %v2497_v47 = vld [vmem:[%s10032_s21 + $0x188] sm:$0xff] }
 0x3b0   : > { %v3940_v36 = vpack.c.bf16 %v3386_v24, %v3384_v23  ;;  %v3389_v37 = vmax.f32 %v3133_v26, 0.0  ;;  %v3004_v38 = vadd.f32 %v2748_v33, %v2492_v27  ;;  %v3006_v39 = vadd.f32 %v2750_v34, %v2494_v28  ;;  %v2876_v41 = vld [vmem:[%s10036_s24 + $0x560] sm:$0xff]  ;;  %v2878_v42 = vld [vmem:[%s10036_s24 + $0x570] sm:$0xff]  ;;  %v2499_v48 = vld [vmem:[%s10032_s21 + $0x198] sm:$0xff] }
 0x3b1   : > { %4005 = vmatpush1.bf16.msra.mxu1 %v3876_v29  ;;  %v3879_v43 = vpack.c.bf16 %v3263_v31, %v3261_v30  ;;  %v3391_v44 = vmax.f32 %v3135_v32, 0.0  ;;  %v3132_v45 = vadd.f32 %v2876_v41, %v2620_v35  ;;  %v3134_v46 = vadd.f32 %v2878_v42, %v2622_v40  ;;  %v2753_v49 = vld [vmem:[%s10036_s24 + $0x188] sm:$0xff]  ;;  %v2755_v52 = vld [vmem:[%s10036_s24 + $0x198] sm:$0xff]  ;;  %v2496_v62 = vld [vmem:[%s10032_s21 + $0x180] sm:$0xff] }
 0x3b2   : > { %4391 = vmatpush1.bf16.msra.mxu0 %v3940_v36  ;;  %v3260_v50 = vmax.f32 %v3004_v38, 0.0  ;;  %v3262_v51 = vmax.f32 %v3006_v39, 0.0  ;;  %v3009_v53 = vadd.f32 %v2753_v49, %v2497_v47  ;;  %v2625_v54 = vld [vmem:[%s10032_s21 + $0x588] sm:$0xff]  ;;  %v2627_v55 = vld [vmem:[%s10032_s21 + $0x598] sm:$0xff]  ;;  %v3011_v59 = vadd.f32 %v2755_v52, %v2499_v48  ;;  %v2498_v3 = vld [vmem:[%s10032_s21 + $0x190] sm:$0xff] }
 0x3b3   : > { %4006 = vmatprep.subr.bf16.mxu1 %v3879_v43  ;;  %v3943_v56 = vpack.c.bf16 %v3391_v44, %v3389_v37  ;;  %v3388_v57 = vmax.f32 %v3132_v45, 0.0  ;;  %v3390_v58 = vmax.f32 %v3134_v46, 0.0  ;;  %v2881_v60 = vld [vmem:[%s10036_s24 + $0x588] sm:$0xff]  ;;  %v2883_v61 = vld [vmem:[%s10036_s24 + $0x598] sm:$0xff]  ;;  %v2752_v4 = vld [vmem:[%s10036_s24 + $0x180] sm:$0xff] }
 0x3b4   : > { %v3878_v63 = vpack.c.bf16 %v3262_v51, %v3260_v50  ;;  %v3265_v0 = vmax.f32 %v3009_v53, 0.0  ;;  %v3137_v1 = vadd.f32 %v2881_v60, %v2625_v54  ;;  %v3139_v2 = vadd.f32 %v2883_v61, %v2627_v55  ;;  %v2754_v5 = vld [vmem:[%s10036_s24 + $0x190] sm:$0xff]  ;;  %v2624_v10 = vld [vmem:[%s10032_s21 + $0x580] sm:$0xff]  ;;  %v2501_v17 = vld [vmem:[%s10032_s21 + $0x1a8] sm:$0xff] }
 0x3b5   : > { %4392 = vmatprep.subr.bf16.mxu0 %v3943_v56  ;;  %v3942_v6 = vpack.c.bf16 %v3390_v58, %v3388_v57  ;;  %v3267_v7 = vmax.f32 %v3011_v59, 0.0  ;;  %v3008_v8 = vadd.f32 %v2752_v4, %v2496_v62  ;;  %v3010_v9 = vadd.f32 %v2754_v5, %v2498_v3  ;;  %v2626_v11 = vld [vmem:[%s10032_s21 + $0x590] sm:$0xff]  ;;  %v2880_v12 = vld [vmem:[%s10036_s24 + $0x580] sm:$0xff]  ;;  %v2503_v18 = vld [vmem:[%s10032_s21 + $0x1b8] sm:$0xff] }
 0x3b6   : > { %4007 = vmatpush1.bf16.msra.mxu1 %v3878_v63  ;;  %v3393_v13 = vmax.f32 %v3137_v1, 0.0  ;;  %v3395_v14 = vmax.f32 %v3139_v2, 0.0  ;;  %v2882_v15 = vld [vmem:[%s10036_s24 + $0x590] sm:$0xff]  ;;  %v3136_v16 = vadd.f32 %v2880_v12, %v2624_v10  ;;  %v2757_v23 = vld [vmem:[%s10036_s24 + $0x1a8] sm:$0xff]  ;;  %v2759_v24 = vld [vmem:[%s10036_s24 + $0x1b8] sm:$0xff] }
 0x3b7   : > { %4393 = vmatpush1.bf16.msra.mxu0 %v3942_v6  ;;  %v3881_v19 = vpack.c.bf16 %v3267_v7, %v3265_v0  ;;  %v3264_v20 = vmax.f32 %v3008_v8, 0.0  ;;  %v3266_v21 = vmax.f32 %v3010_v9, 0.0  ;;  %v3138_v22 = vadd.f32 %v2882_v15, %v2626_v11  ;;  %v2629_v25 = vld [vmem:[%s10032_s21 + $0x5a8] sm:$0xff]  ;;  %v2631_v30 = vld [vmem:[%s10032_s21 + $0x5b8] sm:$0xff]  ;;  %v2500_v37 = vld [vmem:[%s10032_s21 + $0x1a0] sm:$0xff] }
 0x3b8   : > { %v3945_v26 = vpack.c.bf16 %v3395_v14, %v3393_v13  ;;  %v3392_v27 = vmax.f32 %v3136_v16, 0.0  ;;  %v3013_v28 = vadd.f32 %v2757_v23, %v2501_v17  ;;  %v3015_v29 = vadd.f32 %v2759_v24, %v2503_v18  ;;  %v2885_v31 = vld [vmem:[%s10036_s24 + $0x5a8] sm:$0xff]  ;;  %v2887_v32 = vld [vmem:[%s10036_s24 + $0x5b8] sm:$0xff]  ;;  %v2502_v38 = vld [vmem:[%s10032_s21 + $0x1b0] sm:$0xff] }
 0x3b9   : > { %4008 = vmatprep.subr.bf16.mxu1 %v3881_v19  ;;  %v3880_v33 = vpack.c.bf16 %v3266_v21, %v3264_v20  ;;  %v3394_v34 = vmax.f32 %v3138_v22, 0.0  ;;  %v3141_v35 = vadd.f32 %v2885_v31, %v2629_v25  ;;  %v3143_v36 = vadd.f32 %v2887_v32, %v2631_v30  ;;  %v2756_v39 = vld [vmem:[%s10036_s24 + $0x1a0] sm:$0xff]  ;;  %v2758_v42 = vld [vmem:[%s10036_s24 + $0x1b0] sm:$0xff]  ;;  %v2505_v52 = vld [vmem:[%s10032_s21 + $0x1c8] sm:$0xff] }
 0x3ba   : > { %4394 = vmatprep.subr.bf16.mxu0 %v3945_v26  ;;  %v3269_v40 = vmax.f32 %v3013_v28, 0.0  ;;  %v3271_v41 = vmax.f32 %v3015_v29, 0.0  ;;  %v3012_v43 = vadd.f32 %v2756_v39, %v2500_v37  ;;  %v2628_v44 = vld [vmem:[%s10032_s21 + $0x5a0] sm:$0xff]  ;;  %v2630_v45 = vld [vmem:[%s10032_s21 + $0x5b0] sm:$0xff]  ;;  %v3014_v49 = vadd.f32 %v2758_v42, %v2502_v38  ;;  %v2507_v57 = vld [vmem:[%s10032_s21 + $0x1d8] sm:$0xff] }
 0x3bb   : > { %4009 = vmatpush1.bf16.msra.mxu1 %v3880_v33  ;;  %v3944_v46 = vpack.c.bf16 %v3394_v34, %v3392_v27  ;;  %v3397_v47 = vmax.f32 %v3141_v35, 0.0  ;;  %v3399_v48 = vmax.f32 %v3143_v36, 0.0  ;;  %v2884_v50 = vld [vmem:[%s10036_s24 + $0x5a0] sm:$0xff]  ;;  %v2886_v51 = vld [vmem:[%s10036_s24 + $0x5b0] sm:$0xff]  ;;  %v2761_v58 = vld [vmem:[%s10036_s24 + $0x1c8] sm:$0xff] }
 0x3bc   : > { %v3883_v53 = vpack.c.bf16 %v3271_v41, %v3269_v40  ;;  %v3268_v54 = vmax.f32 %v3012_v43, 0.0  ;;  %v3140_v55 = vadd.f32 %v2884_v50, %v2628_v44  ;;  %v3142_v56 = vadd.f32 %v2886_v51, %v2630_v45  ;;  %v2763_v59 = vld [vmem:[%s10036_s24 + $0x1d8] sm:$0xff]  ;;  %v2633_v0 = vld [vmem:[%s10032_s21 + $0x5c8] sm:$0xff]  ;;  %v2504_v7 = vld [vmem:[%s10032_s21 + $0x1c0] sm:$0xff] }
 0x3bd   : > { %4395 = vmatpush1.bf16.msra.mxu0 %v3944_v46  ;;  %v3947_v60 = vpack.c.bf16 %v3399_v48, %v3397_v47  ;;  %v3270_v61 = vmax.f32 %v3014_v49, 0.0  ;;  %v3017_v62 = vadd.f32 %v2761_v58, %v2505_v52  ;;  %v3019_v63 = vadd.f32 %v2763_v59, %v2507_v57  ;;  %v2635_v1 = vld [vmem:[%s10032_s21 + $0x5d8] sm:$0xff]  ;;  %v2889_v2 = vld [vmem:[%s10036_s24 + $0x5c8] sm:$0xff]  ;;  %v2506_v8 = vld [vmem:[%s10032_s21 + $0x1d0] sm:$0xff] }
 0x3be   : > { %4010 = vmatprep.subr.bf16.mxu1 %v3883_v53  ;;  %v3396_v3 = vmax.f32 %v3140_v55, 0.0  ;;  %v3398_v4 = vmax.f32 %v3142_v56, 0.0  ;;  %v2891_v5 = vld [vmem:[%s10036_s24 + $0x5d8] sm:$0xff]  ;;  %v3145_v6 = vadd.f32 %v2889_v2, %v2633_v0  ;;  %v2760_v13 = vld [vmem:[%s10036_s24 + $0x1c0] sm:$0xff]  ;;  %v2762_v14 = vld [vmem:[%s10036_s24 + $0x1d0] sm:$0xff] }
 0x3bf   : > { %4396 = vmatprep.subr.bf16.mxu0 %v3947_v60  ;;  %v3882_v9 = vpack.c.bf16 %v3270_v61, %v3268_v54  ;;  %v3273_v10 = vmax.f32 %v3017_v62, 0.0  ;;  %v3275_v11 = vmax.f32 %v3019_v63, 0.0  ;;  %v3147_v12 = vadd.f32 %v2891_v5, %v2635_v1  ;;  %v2632_v15 = vld [vmem:[%s10032_s21 + $0x5c0] sm:$0xff]  ;;  %v2634_v20 = vld [vmem:[%s10032_s21 + $0x5d0] sm:$0xff]  ;;  %v2509_v27 = vld [vmem:[%s10032_s21 + $0x1e8] sm:$0xff] }
 0x3c0   : > { %v3946_v16 = vpack.c.bf16 %v3398_v4, %v3396_v3  ;;  %v3401_v17 = vmax.f32 %v3145_v6, 0.0  ;;  %v3016_v18 = vadd.f32 %v2760_v13, %v2504_v7  ;;  %v3018_v19 = vadd.f32 %v2762_v14, %v2506_v8  ;;  %v2888_v21 = vld [vmem:[%s10036_s24 + $0x5c0] sm:$0xff]  ;;  %v2890_v22 = vld [vmem:[%s10036_s24 + $0x5d0] sm:$0xff]  ;;  %v2511_v28 = vld [vmem:[%s10032_s21 + $0x1f8] sm:$0xff] }
 0x3c1   : > { %4011 = vmatpush1.bf16.msra.mxu1 %v3882_v9  ;;  %v3885_v23 = vpack.c.bf16 %v3275_v11, %v3273_v10  ;;  %v3403_v24 = vmax.f32 %v3147_v12, 0.0  ;;  %v3144_v25 = vadd.f32 %v2888_v21, %v2632_v15  ;;  %v3146_v26 = vadd.f32 %v2890_v22, %v2634_v20  ;;  %v2765_v29 = vld [vmem:[%s10036_s24 + $0x1e8] sm:$0xff]  ;;  %v10282_v30 = vld [vmem:[%s12319_s2] sm:$0xff]  ;;  %v2767_v34 = vld [vmem:[%s10036_s24 + $0x1f8] sm:$0xff] }
 0x3c2   : > { %v10287_v31 = vld [vmem:[%s12319_s2 + $0x40] sm:$0xff]  ;;  %4397 = vmatpush1.bf16.msra.mxu0 %v3946_v16  ;;  %v3272_v32 = vmax.f32 %v3016_v18, 0.0  ;;  %v3274_v33 = vmax.f32 %v3018_v19, 0.0  ;;  %v3021_v35 = vadd.f32 %v2765_v29, %v2509_v27  ;;  %v2637_v36 = vld [vmem:[%s10032_s21 + $0x5e8] sm:$0xff]  ;;  %v2639_v37 = vld [vmem:[%s10032_s21 + $0x5f8] sm:$0xff]  ;;  %v3023_v41 = vadd.f32 %v2767_v34, %v2511_v28 }
 0x3c3   : > { %4012 = vmatprep.subr.bf16.mxu1 %v3885_v23  ;;  %v3949_v38 = vpack.c.bf16 %v3403_v24, %v3401_v17  ;;  %v3400_v39 = vmax.f32 %v3144_v25, 0.0  ;;  %v3402_v40 = vmax.f32 %v3146_v26, 0.0  ;;  %v2893_v42 = vld [vmem:[%s10036_s24 + $0x5e8] sm:$0xff]  ;;  %v2895_v43 = vld [vmem:[%s10036_s24 + $0x5f8] sm:$0xff]  ;;  %v2508_v44 = vld [vmem:[%s10032_s21 + $0x1e0] sm:$0xff]  ;;  %v3728_v1 = vpack.c.bf16 %v10287_v31, %v10282_v30 }
 0x3c4   : > { %v3884_v45 = vpack.c.bf16 %v3274_v33, %v3272_v32  ;;  %v3277_v46 = vmax.f32 %v3021_v35, 0.0  ;;  %v3149_v47 = vadd.f32 %v2893_v42, %v2637_v36  ;;  %v3151_v48 = vadd.f32 %v2895_v43, %v2639_v37  ;;  %v2510_v49 = vld [vmem:[%s10032_s21 + $0x1f0] sm:$0xff]  ;;  %v2764_v50 = vld [vmem:[%s10036_s24 + $0x1e0] sm:$0xff]  ;;  %v2513_v2 = vld [vmem:[%s10032_s21 + $0x208] sm:$0xff] }
 0x3c5   : > { %v2766_v51 = vld [vmem:[%s10036_s24 + $0x1f0] sm:$0xff]  ;;  %4398 = vmatprep.subr.bf16.mxu0 %v3949_v38  ;;  %v3948_v52 = vpack.c.bf16 %v3402_v40, %v3400_v39  ;;  %v3279_v53 = vmax.f32 %v3023_v41, 0.0  ;;  %v3020_v54 = vadd.f32 %v2764_v50, %v2508_v44  ;;  %v2636_v56 = vld [vmem:[%s10032_s21 + $0x5e0] sm:$0xff]  ;;  %v2515_v3 = vld [vmem:[%s10032_s21 + $0x218] sm:$0xff] }
 0x3c6   : > { %v3022_v55 = vadd.f32 %v2766_v51, %v2510_v49  ;;  %v2638_v57 = vld [vmem:[%s10032_s21 + $0x5f0] sm:$0xff]  ;;  %v2892_v58 = vld [vmem:[%s10036_s24 + $0x5e0] sm:$0xff]  ;;  %4013 = vmatpush1.bf16.msra.mxu1 %v3884_v45  ;;  %v3405_v61 = vmax.f32 %v3149_v47, 0.0  ;;  %v3407_v62 = vmax.f32 %v3151_v48, 0.0  ;;  %v2769_v8 = vld [vmem:[%s10036_s24 + $0x208] sm:$0xff] }
 0x3c7   : > { %v10304_v59 = vld [vmem:[%s12319_s2 + $0x20] sm:$0xff]  ;;  %v2894_v63 = vld [vmem:[%s10036_s24 + $0x5f0] sm:$0xff]  ;;  %v3148_v0 = vadd.f32 %v2892_v58, %v2636_v56  ;;  %4399 = vmatpush1.bf16.msra.mxu0 %v3948_v52  ;;  %v3887_v4 = vpack.c.bf16 %v3279_v53, %v3277_v46  ;;  %v3276_v5 = vmax.f32 %v3020_v54, 0.0  ;;  %v2771_v9 = vld [vmem:[%s10036_s24 + $0x218] sm:$0xff]  ;;  %v3025_v13 = vadd.f32 %v2769_v8, %v2513_v2 }
 0x3c8   : > { %v10309_v60 = vld [vmem:[%s12319_s2 + $0x60] sm:$0xff]  ;;  %v3278_v6 = vmax.f32 %v3022_v55, 0.0  ;;  %v3150_v7 = vadd.f32 %v2894_v63, %v2638_v57  ;;  %v2641_v10 = vld [vmem:[%s10032_s21 + $0x608] sm:$0xff]  ;;  %v3951_v11 = vpack.c.bf16 %v3407_v62, %v3405_v61  ;;  %v3027_v14 = vadd.f32 %v2771_v9, %v2515_v3  ;;  %v2643_v15 = vld [vmem:[%s10032_s21 + $0x618] sm:$0xff] }
 0x3c9   : > { %v3404_v12 = vmax.f32 %v3148_v0, 0.0  ;;  %v2897_v16 = vld [vmem:[%s10036_s24 + $0x608] sm:$0xff]  ;;  %v2899_v17 = vld [vmem:[%s10036_s24 + $0x618] sm:$0xff]  ;;  %4014 = vmatprep.subr.bf16.mxu1 %v3887_v4  ;;  %v2512_v23 = vld [vmem:[%s10032_s21 + $0x200] sm:$0xff]  ;;  %v3281_v26 = vmax.f32 %v3025_v13, 0.0  ;;  %v3732_v28 = vpack.c.bf16 %v10309_v60, %v10304_v59 }
 0x3ca   : > { %v3489_v18 = vld [vmem:[%s12319_s2 + $0x88] sm:$0xff]  ;;  %v3886_v19 = vpack.c.bf16 %v3278_v6, %v3276_v5  ;;  %v3406_v20 = vmax.f32 %v3150_v7, 0.0  ;;  %v3153_v21 = vadd.f32 %v2897_v16, %v2641_v10  ;;  %v3155_v22 = vadd.f32 %v2899_v17, %v2643_v15  ;;  %v2514_v24 = vld [vmem:[%s10032_s21 + $0x210] sm:$0xff]  ;;  %v2768_v25 = vld [vmem:[%s10036_s24 + $0x200] sm:$0xff]  ;;  %4400 = vmatprep.subr.bf16.mxu0 %v3951_v11 }
 0x3cb   : > { %v3283_v27 = vmax.f32 %v3027_v14, 0.0  ;;  %v2770_v29 = vld [vmem:[%s10036_s24 + $0x210] sm:$0xff]  ;;  %v3024_v30 = vadd.f32 %v2768_v25, %v2512_v23  ;;  %v2640_v31 = vld [vmem:[%s10032_s21 + $0x600] sm:$0xff]  ;;  %v3497_v39 = vld [vmem:[%s12319_s2 + $0xc8] sm:$0xff] }
 0x3cc   : > { %v2642_v32 = vld [vmem:[%s10032_s21 + $0x610] sm:$0xff]  ;;  %4015 = vmatpush1.bf16.msra.mxu1 %v3886_v19  ;;  %v3950_v33 = vpack.c.bf16 %v3406_v20, %v3404_v12  ;;  %v3409_v34 = vmax.f32 %v3153_v21, 0.0  ;;  %v3411_v35 = vmax.f32 %v3155_v22, 0.0  ;;  %v3026_v36 = vadd.f32 %v2770_v29, %v2514_v24  ;;  %v2896_v37 = vld [vmem:[%s10036_s24 + $0x600] sm:$0xff]  ;;  %v3493_v44 = vld [vmem:[%s12319_s2 + $0xa8] sm:$0xff] }
 0x3cd   : > { %v2898_v38 = vld [vmem:[%s10036_s24 + $0x610] sm:$0xff]  ;;  %v3889_v40 = vpack.c.bf16 %v3283_v27, %v3281_v26  ;;  %v3280_v41 = vmax.f32 %v3024_v30, 0.0  ;;  %v3152_v42 = vadd.f32 %v2896_v37, %v2640_v31  ;;  %v3501_v45 = vld [vmem:[%s12319_s2 + $0xe8] sm:$0xff]  ;;  %v3737_v48 = vpack.c.bf16 %v3497_v39, %v3489_v18  ;;  %v3488_v50 = vld [vmem:[%s12319_s2 + $0x80] sm:$0xff] }
 0x3ce   : > { %v3154_v43 = vadd.f32 %v2898_v38, %v2642_v32  ;;  %4401 = vmatpush1.bf16.msra.mxu0 %v3950_v33  ;;  %v3953_v46 = vpack.c.bf16 %v3411_v35, %v3409_v34  ;;  %v3282_v47 = vmax.f32 %v3026_v36, 0.0  ;;  %v3741_v49 = vpack.c.bf16 %v3501_v45, %v3493_v44  ;;  %v3496_v51 = vld [vmem:[%s12319_s2 + $0xc0] sm:$0xff]  ;;  %v2517_v52 = vld [vmem:[%s10032_s21 + $0x228] sm:$0xff]  ;;  %v2519_v53 = vld [vmem:[%s10032_s21 + $0x238] sm:$0xff] }
 0x3cf   : > { %4017 = vmatmul.mubr.bf16.vlgmr.msra.gmra.mrb[0].mxu1 %v3728_v1  ;;  %4177 = vmatprep.subr.bf16.mxu1 %v3889_v40  ;;  %v3408_v54 = vmax.f32 %v3152_v42, 0.0  ;;  %v2773_v56 = vld [vmem:[%s10036_s24 + $0x228] sm:$0xff]  ;;  %v2775_v57 = vld [vmem:[%s10036_s24 + $0x238] sm:$0xff]  ;;  %v10357_v58 = vld [vmem:[%s12319_s2 + $0xa0] sm:$0xff]  ;;  %v3736_v12 = vpack.c.bf16 %v3496_v51, %v3488_v50 }
 0x3d0   : > { %v3410_v55 = vmax.f32 %v3154_v43, 0.0  ;;  %4563 = vmatprep.subr.bf16.mxu0 %v3953_v46  ;;  %v3888_v59 = vpack.c.bf16 %v3282_v47, %v3280_v41  ;;  %4026 = vmatprep.mubr.bf16.mxu1 %v3737_v48  ;;  %v3029_v60 = vadd.f32 %v2773_v56, %v2517_v52  ;;  %v3031_v61 = vadd.f32 %v2775_v57, %v2519_v53  ;;  %v3500_v62 = vld [vmem:[%s12319_s2 + $0xe0] sm:$0xff]  ;;  %v2645_v63 = vld [vmem:[%s10032_s21 + $0x628] sm:$0xff]  ;;  %v2647_v0 = vld [vmem:[%s10032_s21 + $0x638] sm:$0xff] }
 0x3d1   : > { %4403 = vmatmul.mubr.bf16.vlgmr.msra.gmra.mrb[0].mxu0 %v3732_v28  ;;  %v2901_v2 = vld [vmem:[%s10036_s24 + $0x628] sm:$0xff]  ;;  %v2903_v3 = vld [vmem:[%s10036_s24 + $0x638] sm:$0xff]  ;;  %v2516_v4 = vld [vmem:[%s10032_s21 + $0x220] sm:$0xff]  ;;  %v3740_v13 = vpack.c.bf16 %v3500_v62, %v10357_v58 }
 0x3d2   : > { %v3952_v1 = vpack.c.bf16 %v3410_v55, %v3408_v54  ;;  %4178 = vmatpush1.bf16.msra.mxu1 %v3888_v59  ;;  %4412 = vmatprep.mubr.bf16.mxu0 %v3741_v49  ;;  %v3285_v5 = vmax.f32 %v3029_v60, 0.0  ;;  %v3287_v6 = vmax.f32 %v3031_v61, 0.0  ;;  %v3157_v7 = vadd.f32 %v2901_v2, %v2645_v63  ;;  %v2518_v9 = vld [vmem:[%s10032_s21 + $0x230] sm:$0xff]  ;;  %v2772_v10 = vld [vmem:[%s10036_s24 + $0x220] sm:$0xff]  ;;  %v3505_v24 = vld [vmem:[%s12319_s2 + $0x108] sm:$0xff] }
 0x3d3   : > { %v3159_v8 = vadd.f32 %v2903_v3, %v2647_v0  ;;  %v2774_v11 = vld [vmem:[%s10036_s24 + $0x230] sm:$0xff]  ;;  %v3028_v14 = vadd.f32 %v2772_v10, %v2516_v4  ;;  %v2644_v16 = vld [vmem:[%s10032_s21 + $0x620] sm:$0xff]  ;;  %v3513_v25 = vld [vmem:[%s12319_s2 + $0x148] sm:$0xff] }
 0x3d4   : > { %4564 = vmatpush1.bf16.msra.mxu0 %v3952_v1  ;;  %v3030_v15 = vadd.f32 %v2774_v11, %v2518_v9  ;;  %v2646_v17 = vld [vmem:[%s10032_s21 + $0x630] sm:$0xff]  ;;  %v2900_v18 = vld [vmem:[%s10036_s24 + $0x620] sm:$0xff]  ;;  %v3891_v19 = vpack.c.bf16 %v3287_v6, %v3285_v5  ;;  %v3413_v20 = vmax.f32 %v3157_v7, 0.0  ;;  %v3745_v29 = vpack.c.bf16 %v3513_v25, %v3505_v24  ;;  %v3509_v30 = vld [vmem:[%s12319_s2 + $0x128] sm:$0xff] }
 0x3d5   : > { %v3415_v21 = vmax.f32 %v3159_v8, 0.0  ;;  %v2902_v22 = vld [vmem:[%s10036_s24 + $0x630] sm:$0xff]  ;;  %v3156_v23 = vadd.f32 %v2900_v18, %v2644_v16  ;;  %v3284_v26 = vmax.f32 %v3028_v14, 0.0  ;;  %v3517_v31 = vld [vmem:[%s12319_s2 + $0x168] sm:$0xff]  ;;  %v3504_v35 = vld [vmem:[%s12319_s2 + $0x100] sm:$0xff] }
 0x3d6   : > { %v3286_v27 = vmax.f32 %v3030_v15, 0.0  ;;  %v3158_v28 = vadd.f32 %v2902_v22, %v2646_v17  ;;  %4179 = vmatprep.subr.bf16.mxu1 %v3891_v19  ;;  %v3749_v34 = vpack.c.bf16 %v3517_v31, %v3509_v30  ;;  %v3512_v36 = vld [vmem:[%s12319_s2 + $0x140] sm:$0xff]  ;;  %v2521_v37 = vld [vmem:[%s10032_s21 + $0x248] sm:$0xff]  ;;  %v2523_v38 = vld [vmem:[%s10032_s21 + $0x258] sm:$0xff] }
 0x3d7   : > { %v3955_v32 = vpack.c.bf16 %v3415_v21, %v3413_v20  ;;  %v3412_v33 = vmax.f32 %v3156_v23, 0.0  ;;  %4027 = vmatmul.mubr.bf16.gmra.mrb[4].mxu1 %v3736_v12  ;;  %v2777_v41 = vld [vmem:[%s10036_s24 + $0x248] sm:$0xff]  ;;  %v2779_v42 = vld [vmem:[%s10036_s24 + $0x258] sm:$0xff]  ;;  %v10400_v43 = vld [vmem:[%s12319_s2 + $0x120] sm:$0xff]  ;;  %v3744_v60 = vpack.c.bf16 %v3512_v36, %v3504_v35 }
 0x3d8   : > { %v3890_v39 = vpack.c.bf16 %v3286_v27, %v3284_v26  ;;  %v3414_v40 = vmax.f32 %v3158_v28, 0.0  ;;  %4036 = vmatprep.mubr.bf16.mxu1 %v3745_v29  ;;  %v3033_v44 = vadd.f32 %v2777_v41, %v2521_v37  ;;  %v3035_v45 = vadd.f32 %v2779_v42, %v2523_v38  ;;  %v3516_v46 = vld [vmem:[%s12319_s2 + $0x160] sm:$0xff]  ;;  %v2649_v47 = vld [vmem:[%s10032_s21 + $0x648] sm:$0xff]  ;;  %v2651_v48 = vld [vmem:[%s10032_s21 + $0x658] sm:$0xff] }
 0x3d9   : > { %4565 = vmatprep.subr.bf16.mxu0 %v3955_v32  ;;  %4413 = vmatmul.mubr.bf16.gmra.mrb[4].mxu0 %v3740_v13  ;;  %v2905_v50 = vld [vmem:[%s10036_s24 + $0x648] sm:$0xff]  ;;  %v2907_v51 = vld [vmem:[%s10036_s24 + $0x658] sm:$0xff]  ;;  %v2520_v52 = vld [vmem:[%s10032_s21 + $0x240] sm:$0xff]  ;;  %v3748_v61 = vpack.c.bf16 %v3516_v46, %v10400_v43 }
 0x3da   : > { %4180 = vmatpush1.bf16.msra.mxu1 %v3890_v39  ;;  %v3954_v49 = vpack.c.bf16 %v3414_v40, %v3412_v33  ;;  %4422 = vmatprep.mubr.bf16.mxu0 %v3749_v34  ;;  %v3289_v53 = vmax.f32 %v3033_v44, 0.0  ;;  %v3291_v54 = vmax.f32 %v3035_v45, 0.0  ;;  %v3161_v55 = vadd.f32 %v2905_v50, %v2649_v47  ;;  %v2522_v57 = vld [vmem:[%s10032_s21 + $0x250] sm:$0xff]  ;;  %v2776_v58 = vld [vmem:[%s10036_s24 + $0x240] sm:$0xff]  ;;  %v3521_v8 = vld [vmem:[%s12319_s2 + $0x188] sm:$0xff] }
 0x3db   : > { %v3163_v56 = vadd.f32 %v2907_v51, %v2651_v48  ;;  %v2778_v59 = vld [vmem:[%s10036_s24 + $0x250] sm:$0xff]  ;;  %v3032_v62 = vadd.f32 %v2776_v58, %v2520_v52  ;;  %v2648_v0 = vld [vmem:[%s10032_s21 + $0x640] sm:$0xff]  ;;  %v3529_v9 = vld [vmem:[%s12319_s2 + $0x1c8] sm:$0xff] }
 0x3dc   : > { %4566 = vmatpush1.bf16.msra.mxu0 %v3954_v49  ;;  %v3034_v63 = vadd.f32 %v2778_v59, %v2522_v57  ;;  %v2650_v1 = vld [vmem:[%s10032_s21 + $0x650] sm:$0xff]  ;;  %v2904_v2 = vld [vmem:[%s10036_s24 + $0x640] sm:$0xff]  ;;  %v3893_v3 = vpack.c.bf16 %v3291_v54, %v3289_v53  ;;  %v3417_v4 = vmax.f32 %v3161_v55, 0.0  ;;  %v3753_v13 = vpack.c.bf16 %v3529_v9, %v3521_v8  ;;  %v3525_v14 = vld [vmem:[%s12319_s2 + $0x1a8] sm:$0xff] }
 0x3dd   : > { %v3419_v5 = vmax.f32 %v3163_v56, 0.0  ;;  %v2906_v6 = vld [vmem:[%s10036_s24 + $0x650] sm:$0xff]  ;;  %v3160_v7 = vadd.f32 %v2904_v2, %v2648_v0  ;;  %v3288_v10 = vmax.f32 %v3032_v62, 0.0  ;;  %v3533_v15 = vld [vmem:[%s12319_s2 + $0x1e8] sm:$0xff]  ;;  %v3520_v19 = vld [vmem:[%s12319_s2 + $0x180] sm:$0xff] }
 0x3de   : > { %v3290_v11 = vmax.f32 %v3034_v63, 0.0  ;;  %v3162_v12 = vadd.f32 %v2906_v6, %v2650_v1  ;;  %4181 = vmatprep.subr.bf16.mxu1 %v3893_v3  ;;  %v3757_v18 = vpack.c.bf16 %v3533_v15, %v3525_v14  ;;  %v3528_v20 = vld [vmem:[%s12319_s2 + $0x1c0] sm:$0xff]  ;;  %v2525_v21 = vld [vmem:[%s10032_s21 + $0x268] sm:$0xff]  ;;  %v2527_v22 = vld [vmem:[%s10032_s21 + $0x278] sm:$0xff] }
 0x3df   : > { %v3957_v16 = vpack.c.bf16 %v3419_v5, %v3417_v4  ;;  %v3416_v17 = vmax.f32 %v3160_v7, 0.0  ;;  %4037 = vmatmul.mubr.bf16.gmra.mrb[8].mxu1 %v3744_v60  ;;  %v2781_v25 = vld [vmem:[%s10036_s24 + $0x268] sm:$0xff]  ;;  %v2783_v26 = vld [vmem:[%s10036_s24 + $0x278] sm:$0xff]  ;;  %v10443_v27 = vld [vmem:[%s12319_s2 + $0x1a0] sm:$0xff]  ;;  %v3752_v44 = vpack.c.bf16 %v3528_v20, %v3520_v19 }
 0x3e0   : > { %v3892_v23 = vpack.c.bf16 %v3290_v11, %v3288_v10  ;;  %v3418_v24 = vmax.f32 %v3162_v12, 0.0  ;;  %4046 = vmatprep.mubr.bf16.mxu1 %v3753_v13  ;;  %v3037_v28 = vadd.f32 %v2781_v25, %v2525_v21  ;;  %v3039_v29 = vadd.f32 %v2783_v26, %v2527_v22  ;;  %v3532_v30 = vld [vmem:[%s12319_s2 + $0x1e0] sm:$0xff]  ;;  %v2653_v31 = vld [vmem:[%s10032_s21 + $0x668] sm:$0xff]  ;;  %v2655_v32 = vld [vmem:[%s10032_s21 + $0x678] sm:$0xff] }
 0x3e1   : > { %4567 = vmatprep.subr.bf16.mxu0 %v3957_v16  ;;  %4423 = vmatmul.mubr.bf16.gmra.mrb[8].mxu0 %v3748_v61  ;;  %v2909_v34 = vld [vmem:[%s10036_s24 + $0x668] sm:$0xff]  ;;  %v2911_v35 = vld [vmem:[%s10036_s24 + $0x678] sm:$0xff]  ;;  %v2524_v36 = vld [vmem:[%s10032_s21 + $0x260] sm:$0xff]  ;;  %v3756_v45 = vpack.c.bf16 %v3532_v30, %v10443_v27 }
 0x3e2   : > { %4182 = vmatpush1.bf16.msra.mxu1 %v3892_v23  ;;  %v3956_v33 = vpack.c.bf16 %v3418_v24, %v3416_v17  ;;  %4432 = vmatprep.mubr.bf16.mxu0 %v3757_v18  ;;  %v3293_v37 = vmax.f32 %v3037_v28, 0.0  ;;  %v3295_v38 = vmax.f32 %v3039_v29, 0.0  ;;  %v3165_v39 = vadd.f32 %v2909_v34, %v2653_v31  ;;  %v2526_v41 = vld [vmem:[%s10032_s21 + $0x270] sm:$0xff]  ;;  %v2780_v42 = vld [vmem:[%s10036_s24 + $0x260] sm:$0xff]  ;;  %v3537_v56 = vld [vmem:[%s12319_s2 + $0x208] sm:$0xff] }
 0x3e3   : > { %v3167_v40 = vadd.f32 %v2911_v35, %v2655_v32  ;;  %v2782_v43 = vld [vmem:[%s10036_s24 + $0x270] sm:$0xff]  ;;  %v3036_v46 = vadd.f32 %v2780_v42, %v2524_v36  ;;  %v2652_v48 = vld [vmem:[%s10032_s21 + $0x660] sm:$0xff]  ;;  %v3545_v57 = vld [vmem:[%s12319_s2 + $0x248] sm:$0xff] }
 0x3e4   : > { %4568 = vmatpush1.bf16.msra.mxu0 %v3956_v33  ;;  %v3038_v47 = vadd.f32 %v2782_v43, %v2526_v41  ;;  %v2654_v49 = vld [vmem:[%s10032_s21 + $0x670] sm:$0xff]  ;;  %v2908_v50 = vld [vmem:[%s10036_s24 + $0x660] sm:$0xff]  ;;  %v3895_v51 = vpack.c.bf16 %v3295_v38, %v3293_v37  ;;  %v3421_v52 = vmax.f32 %v3165_v39, 0.0  ;;  %v3761_v61 = vpack.c.bf16 %v3545_v57, %v3537_v56  ;;  %v3541_v62 = vld [vmem:[%s12319_s2 + $0x228] sm:$0xff] }
 0x3e5   : > { %v3423_v53 = vmax.f32 %v3167_v40, 0.0  ;;  %v2910_v54 = vld [vmem:[%s10036_s24 + $0x670] sm:$0xff]  ;;  %v3164_v55 = vadd.f32 %v2908_v50, %v2652_v48  ;;  %v3292_v58 = vmax.f32 %v3036_v46, 0.0  ;;  %v3549_v63 = vld [vmem:[%s12319_s2 + $0x268] sm:$0xff]  ;;  %v3536_v3 = vld [vmem:[%s12319_s2 + $0x200] sm:$0xff] }
 0x3e6   : > { %v3294_v59 = vmax.f32 %v3038_v47, 0.0  ;;  %v3166_v60 = vadd.f32 %v2910_v54, %v2654_v49  ;;  %4183 = vmatprep.subr.bf16.mxu1 %v3895_v51  ;;  %v3765_v2 = vpack.c.bf16 %v3549_v63, %v3541_v62  ;;  %v3544_v4 = vld [vmem:[%s12319_s2 + $0x240] sm:$0xff]  ;;  %v2529_v5 = vld [vmem:[%s10032_s21 + $0x288] sm:$0xff]  ;;  %v2531_v6 = vld [vmem:[%s10032_s21 + $0x298] sm:$0xff] }
 0x3e7   : > { %v3959_v0 = vpack.c.bf16 %v3423_v53, %v3421_v52  ;;  %v3420_v1 = vmax.f32 %v3164_v55, 0.0  ;;  %4047 = vmatmul.mubr.bf16.gmra.mrb[12].mxu1 %v3752_v44  ;;  %v2785_v9 = vld [vmem:[%s10036_s24 + $0x288] sm:$0xff]  ;;  %v2787_v10 = vld [vmem:[%s10036_s24 + $0x298] sm:$0xff]  ;;  %v10486_v11 = vld [vmem:[%s12319_s2 + $0x220] sm:$0xff]  ;;  %v3760_v28 = vpack.c.bf16 %v3544_v4, %v3536_v3 }
 0x3e8   : > { %v3894_v7 = vpack.c.bf16 %v3294_v59, %v3292_v58  ;;  %v3422_v8 = vmax.f32 %v3166_v60, 0.0  ;;  %4056 = vmatprep.mubr.bf16.mxu1 %v3761_v61  ;;  %v3041_v12 = vadd.f32 %v2785_v9, %v2529_v5  ;;  %v3043_v13 = vadd.f32 %v2787_v10, %v2531_v6  ;;  %v3548_v14 = vld [vmem:[%s12319_s2 + $0x260] sm:$0xff]  ;;  %v2657_v15 = vld [vmem:[%s10032_s21 + $0x688] sm:$0xff]  ;;  %v2659_v16 = vld [vmem:[%s10032_s21 + $0x698] sm:$0xff] }
 0x3e9   : > { %4569 = vmatprep.subr.bf16.mxu0 %v3959_v0  ;;  %4433 = vmatmul.mubr.bf16.gmra.mrb[12].mxu0 %v3756_v45  ;;  %v2913_v18 = vld [vmem:[%s10036_s24 + $0x688] sm:$0xff]  ;;  %v2915_v19 = vld [vmem:[%s10036_s24 + $0x698] sm:$0xff]  ;;  %v2528_v20 = vld [vmem:[%s10032_s21 + $0x280] sm:$0xff]  ;;  %v3764_v29 = vpack.c.bf16 %v3548_v14, %v10486_v11 }
 0x3ea   : > { %4184 = vmatpush1.bf16.msra.mxu1 %v3894_v7  ;;  %v3958_v17 = vpack.c.bf16 %v3422_v8, %v3420_v1  ;;  %4442 = vmatprep.mubr.bf16.mxu0 %v3765_v2  ;;  %v3297_v21 = vmax.f32 %v3041_v12, 0.0  ;;  %v3299_v22 = vmax.f32 %v3043_v13, 0.0  ;;  %v3169_v23 = vadd.f32 %v2913_v18, %v2657_v15  ;;  %v2530_v25 = vld [vmem:[%s10032_s21 + $0x290] sm:$0xff]  ;;  %v2784_v26 = vld [vmem:[%s10036_s24 + $0x280] sm:$0xff]  ;;  %v3553_v40 = vld [vmem:[%s12319_s2 + $0x288] sm:$0xff] }
 0x3eb   : > { %v3171_v24 = vadd.f32 %v2915_v19, %v2659_v16  ;;  %v2786_v27 = vld [vmem:[%s10036_s24 + $0x290] sm:$0xff]  ;;  %v3040_v30 = vadd.f32 %v2784_v26, %v2528_v20  ;;  %v2656_v32 = vld [vmem:[%s10032_s21 + $0x680] sm:$0xff]  ;;  %v3561_v41 = vld [vmem:[%s12319_s2 + $0x2c8] sm:$0xff] }
 0x3ec   : > { %4570 = vmatpush1.bf16.msra.mxu0 %v3958_v17  ;;  %v3042_v31 = vadd.f32 %v2786_v27, %v2530_v25  ;;  %v2658_v33 = vld [vmem:[%s10032_s21 + $0x690] sm:$0xff]  ;;  %v2912_v34 = vld [vmem:[%s10036_s24 + $0x680] sm:$0xff]  ;;  %v3897_v35 = vpack.c.bf16 %v3299_v22, %v3297_v21  ;;  %v3425_v36 = vmax.f32 %v3169_v23, 0.0  ;;  %v3769_v45 = vpack.c.bf16 %v3561_v41, %v3553_v40  ;;  %v3557_v46 = vld [vmem:[%s12319_s2 + $0x2a8] sm:$0xff] }
 0x3ed   : > { %v3427_v37 = vmax.f32 %v3171_v24, 0.0  ;;  %v2914_v38 = vld [vmem:[%s10036_s24 + $0x690] sm:$0xff]  ;;  %v3168_v39 = vadd.f32 %v2912_v34, %v2656_v32  ;;  %v3296_v42 = vmax.f32 %v3040_v30, 0.0  ;;  %v3565_v47 = vld [vmem:[%s12319_s2 + $0x2e8] sm:$0xff]  ;;  %v3552_v51 = vld [vmem:[%s12319_s2 + $0x280] sm:$0xff] }
 0x3ee   : > { %v3298_v43 = vmax.f32 %v3042_v31, 0.0  ;;  %v3170_v44 = vadd.f32 %v2914_v38, %v2658_v33  ;;  %4185 = vmatprep.subr.bf16.mxu1 %v3897_v35  ;;  %v3773_v50 = vpack.c.bf16 %v3565_v47, %v3557_v46  ;;  %v3560_v52 = vld [vmem:[%s12319_s2 + $0x2c0] sm:$0xff]  ;;  %v2533_v53 = vld [vmem:[%s10032_s21 + $0x2a8] sm:$0xff]  ;;  %v2535_v54 = vld [vmem:[%s10032_s21 + $0x2b8] sm:$0xff] }
 0x3ef   : > { %v3961_v48 = vpack.c.bf16 %v3427_v37, %v3425_v36  ;;  %v3424_v49 = vmax.f32 %v3168_v39, 0.0  ;;  %4057 = vmatmul.mubr.bf16.gmra.mrb[16].mxu1 %v3760_v28  ;;  %v2789_v57 = vld [vmem:[%s10036_s24 + $0x2a8] sm:$0xff]  ;;  %v2791_v58 = vld [vmem:[%s10036_s24 + $0x2b8] sm:$0xff]  ;;  %v10529_v59 = vld [vmem:[%s12319_s2 + $0x2a0] sm:$0xff]  ;;  %v3768_v12 = vpack.c.bf16 %v3560_v52, %v3552_v51 }
 0x3f0   : > { %v3896_v55 = vpack.c.bf16 %v3298_v43, %v3296_v42  ;;  %v3426_v56 = vmax.f32 %v3170_v44, 0.0  ;;  %4066 = vmatprep.mubr.bf16.mxu1 %v3769_v45  ;;  %v3045_v60 = vadd.f32 %v2789_v57, %v2533_v53  ;;  %v3047_v61 = vadd.f32 %v2791_v58, %v2535_v54  ;;  %v3564_v62 = vld [vmem:[%s12319_s2 + $0x2e0] sm:$0xff]  ;;  %v2661_v63 = vld [vmem:[%s10032_s21 + $0x6a8] sm:$0xff]  ;;  %v2663_v0 = vld [vmem:[%s10032_s21 + $0x6b8] sm:$0xff] }
 0x3f1   : > { %4571 = vmatprep.subr.bf16.mxu0 %v3961_v48  ;;  %4443 = vmatmul.mubr.bf16.gmra.mrb[16].mxu0 %v3764_v29  ;;  %v2917_v2 = vld [vmem:[%s10036_s24 + $0x6a8] sm:$0xff]  ;;  %v2919_v3 = vld [vmem:[%s10036_s24 + $0x6b8] sm:$0xff]  ;;  %v2532_v4 = vld [vmem:[%s10032_s21 + $0x2a0] sm:$0xff]  ;;  %v3772_v13 = vpack.c.bf16 %v3564_v62, %v10529_v59 }
 0x3f2   : > { %4186 = vmatpush1.bf16.msra.mxu1 %v3896_v55  ;;  %v3960_v1 = vpack.c.bf16 %v3426_v56, %v3424_v49  ;;  %4452 = vmatprep.mubr.bf16.mxu0 %v3773_v50  ;;  %v3301_v5 = vmax.f32 %v3045_v60, 0.0  ;;  %v3303_v6 = vmax.f32 %v3047_v61, 0.0  ;;  %v3173_v7 = vadd.f32 %v2917_v2, %v2661_v63  ;;  %v2534_v9 = vld [vmem:[%s10032_s21 + $0x2b0] sm:$0xff]  ;;  %v2788_v10 = vld [vmem:[%s10036_s24 + $0x2a0] sm:$0xff]  ;;  %v3569_v24 = vld [vmem:[%s12319_s2 + $0x308] sm:$0xff] }
 0x3f3   : > { %v3175_v8 = vadd.f32 %v2919_v3, %v2663_v0  ;;  %v2790_v11 = vld [vmem:[%s10036_s24 + $0x2b0] sm:$0xff]  ;;  %v3044_v14 = vadd.f32 %v2788_v10, %v2532_v4  ;;  %v2660_v16 = vld [vmem:[%s10032_s21 + $0x6a0] sm:$0xff]  ;;  %v3577_v25 = vld [vmem:[%s12319_s2 + $0x348] sm:$0xff] }
 0x3f4   : > { %4572 = vmatpush1.bf16.msra.mxu0 %v3960_v1  ;;  %v3046_v15 = vadd.f32 %v2790_v11, %v2534_v9  ;;  %v2662_v17 = vld [vmem:[%s10032_s21 + $0x6b0] sm:$0xff]  ;;  %v2916_v18 = vld [vmem:[%s10036_s24 + $0x6a0] sm:$0xff]  ;;  %v3899_v19 = vpack.c.bf16 %v3303_v6, %v3301_v5  ;;  %v3429_v20 = vmax.f32 %v3173_v7, 0.0  ;;  %v3777_v29 = vpack.c.bf16 %v3577_v25, %v3569_v24  ;;  %v3573_v30 = vld [vmem:[%s12319_s2 + $0x328] sm:$0xff] }
 0x3f5   : > { %v3431_v21 = vmax.f32 %v3175_v8, 0.0  ;;  %v2918_v22 = vld [vmem:[%s10036_s24 + $0x6b0] sm:$0xff]  ;;  %v3172_v23 = vadd.f32 %v2916_v18, %v2660_v16  ;;  %v3300_v26 = vmax.f32 %v3044_v14, 0.0  ;;  %v3581_v31 = vld [vmem:[%s12319_s2 + $0x368] sm:$0xff]  ;;  %v3568_v35 = vld [vmem:[%s12319_s2 + $0x300] sm:$0xff] }
 0x3f6   : > { %v3302_v27 = vmax.f32 %v3046_v15, 0.0  ;;  %v3174_v28 = vadd.f32 %v2918_v22, %v2662_v17  ;;  %4187 = vmatprep.subr.bf16.mxu1 %v3899_v19  ;;  %v3781_v34 = vpack.c.bf16 %v3581_v31, %v3573_v30  ;;  %v3576_v36 = vld [vmem:[%s12319_s2 + $0x340] sm:$0xff]  ;;  %v2537_v37 = vld [vmem:[%s10032_s21 + $0x2c8] sm:$0xff]  ;;  %v2539_v38 = vld [vmem:[%s10032_s21 + $0x2d8] sm:$0xff] }
 0x3f7   : > { %v3963_v32 = vpack.c.bf16 %v3431_v21, %v3429_v20  ;;  %v3428_v33 = vmax.f32 %v3172_v23, 0.0  ;;  %4067 = vmatmul.mubr.bf16.gmra.mrb[20].mxu1 %v3768_v12  ;;  %v2793_v41 = vld [vmem:[%s10036_s24 + $0x2c8] sm:$0xff]  ;;  %v2795_v42 = vld [vmem:[%s10036_s24 + $0x2d8] sm:$0xff]  ;;  %v10572_v43 = vld [vmem:[%s12319_s2 + $0x320] sm:$0xff]  ;;  %v3776_v60 = vpack.c.bf16 %v3576_v36, %v3568_v35 }
 0x3f8   : > { %v3898_v39 = vpack.c.bf16 %v3302_v27, %v3300_v26  ;;  %v3430_v40 = vmax.f32 %v3174_v28, 0.0  ;;  %4076 = vmatprep.mubr.bf16.mxu1 %v3777_v29  ;;  %v3049_v44 = vadd.f32 %v2793_v41, %v2537_v37  ;;  %v3051_v45 = vadd.f32 %v2795_v42, %v2539_v38  ;;  %v3580_v46 = vld [vmem:[%s12319_s2 + $0x360] sm:$0xff]  ;;  %v2665_v47 = vld [vmem:[%s10032_s21 + $0x6c8] sm:$0xff]  ;;  %v2667_v48 = vld [vmem:[%s10032_s21 + $0x6d8] sm:$0xff] }
 0x3f9   : > { %4573 = vmatprep.subr.bf16.mxu0 %v3963_v32  ;;  %4453 = vmatmul.mubr.bf16.gmra.mrb[20].mxu0 %v3772_v13  ;;  %v2921_v50 = vld [vmem:[%s10036_s24 + $0x6c8] sm:$0xff]  ;;  %v2923_v51 = vld [vmem:[%s10036_s24 + $0x6d8] sm:$0xff]  ;;  %v2536_v52 = vld [vmem:[%s10032_s21 + $0x2c0] sm:$0xff]  ;;  %v3780_v61 = vpack.c.bf16 %v3580_v46, %v10572_v43 }
 0x3fa   : > { %4188 = vmatpush1.bf16.msra.mxu1 %v3898_v39  ;;  %v3962_v49 = vpack.c.bf16 %v3430_v40, %v3428_v33  ;;  %4462 = vmatprep.mubr.bf16.mxu0 %v3781_v34  ;;  %v3305_v53 = vmax.f32 %v3049_v44, 0.0  ;;  %v3307_v54 = vmax.f32 %v3051_v45, 0.0  ;;  %v3177_v55 = vadd.f32 %v2921_v50, %v2665_v47  ;;  %v2538_v57 = vld [vmem:[%s10032_s21 + $0x2d0] sm:$0xff]  ;;  %v2792_v58 = vld [vmem:[%s10036_s24 + $0x2c0] sm:$0xff]  ;;  %v3585_v8 = vld [vmem:[%s12319_s2 + $0x388] sm:$0xff] }
 0x3fb   : > { %v3179_v56 = vadd.f32 %v2923_v51, %v2667_v48  ;;  %v2794_v59 = vld [vmem:[%s10036_s24 + $0x2d0] sm:$0xff]  ;;  %v3048_v62 = vadd.f32 %v2792_v58, %v2536_v52  ;;  %v2664_v0 = vld [vmem:[%s10032_s21 + $0x6c0] sm:$0xff]  ;;  %v3593_v9 = vld [vmem:[%s12319_s2 + $0x3c8] sm:$0xff] }
 0x3fc   : > { %4574 = vmatpush1.bf16.msra.mxu0 %v3962_v49  ;;  %v3050_v63 = vadd.f32 %v2794_v59, %v2538_v57  ;;  %v2666_v1 = vld [vmem:[%s10032_s21 + $0x6d0] sm:$0xff]  ;;  %v2920_v2 = vld [vmem:[%s10036_s24 + $0x6c0] sm:$0xff]  ;;  %v3901_v3 = vpack.c.bf16 %v3307_v54, %v3305_v53  ;;  %v3433_v4 = vmax.f32 %v3177_v55, 0.0  ;;  %v3785_v13 = vpack.c.bf16 %v3593_v9, %v3585_v8  ;;  %v3589_v14 = vld [vmem:[%s12319_s2 + $0x3a8] sm:$0xff] }
 0x3fd   : > { %v3435_v5 = vmax.f32 %v3179_v56, 0.0  ;;  %v2922_v6 = vld [vmem:[%s10036_s24 + $0x6d0] sm:$0xff]  ;;  %v3176_v7 = vadd.f32 %v2920_v2, %v2664_v0  ;;  %v3304_v10 = vmax.f32 %v3048_v62, 0.0  ;;  %v3597_v15 = vld [vmem:[%s12319_s2 + $0x3e8] sm:$0xff]  ;;  %v3584_v19 = vld [vmem:[%s12319_s2 + $0x380] sm:$0xff] }
 0x3fe   : > { %v3306_v11 = vmax.f32 %v3050_v63, 0.0  ;;  %v3178_v12 = vadd.f32 %v2922_v6, %v2666_v1  ;;  %4189 = vmatprep.subr.bf16.mxu1 %v3901_v3  ;;  %v3789_v18 = vpack.c.bf16 %v3597_v15, %v3589_v14  ;;  %v3592_v20 = vld [vmem:[%s12319_s2 + $0x3c0] sm:$0xff]  ;;  %v2541_v21 = vld [vmem:[%s10032_s21 + $0x2e8] sm:$0xff]  ;;  %v2543_v22 = vld [vmem:[%s10032_s21 + $0x2f8] sm:$0xff] }
 0x3ff   : > { %v3965_v16 = vpack.c.bf16 %v3435_v5, %v3433_v4  ;;  %v3432_v17 = vmax.f32 %v3176_v7, 0.0  ;;  %4077 = vmatmul.mubr.bf16.gmra.mrb[24].mxu1 %v3776_v60  ;;  %v2797_v25 = vld [vmem:[%s10036_s24 + $0x2e8] sm:$0xff]  ;;  %v2799_v26 = vld [vmem:[%s10036_s24 + $0x2f8] sm:$0xff]  ;;  %v10615_v27 = vld [vmem:[%s12319_s2 + $0x3a0] sm:$0xff]  ;;  %v3784_v44 = vpack.c.bf16 %v3592_v20, %v3584_v19 }
 0x400   : > { %v3900_v23 = vpack.c.bf16 %v3306_v11, %v3304_v10  ;;  %v3434_v24 = vmax.f32 %v3178_v12, 0.0  ;;  %4086 = vmatprep.mubr.bf16.mxu1 %v3785_v13  ;;  %v3053_v28 = vadd.f32 %v2797_v25, %v2541_v21  ;;  %v3055_v29 = vadd.f32 %v2799_v26, %v2543_v22  ;;  %v3596_v30 = vld [vmem:[%s12319_s2 + $0x3e0] sm:$0xff]  ;;  %v2669_v31 = vld [vmem:[%s10032_s21 + $0x6e8] sm:$0xff]  ;;  %v2671_v32 = vld [vmem:[%s10032_s21 + $0x6f8] sm:$0xff] }
 0x401   : > { %4575 = vmatprep.subr.bf16.mxu0 %v3965_v16  ;;  %4463 = vmatmul.mubr.bf16.gmra.mrb[24].mxu0 %v3780_v61  ;;  %v2925_v34 = vld [vmem:[%s10036_s24 + $0x6e8] sm:$0xff]  ;;  %v2927_v35 = vld [vmem:[%s10036_s24 + $0x6f8] sm:$0xff]  ;;  %v2540_v36 = vld [vmem:[%s10032_s21 + $0x2e0] sm:$0xff]  ;;  %v3788_v45 = vpack.c.bf16 %v3596_v30, %v10615_v27 }
 0x402   : > { %4190 = vmatpush1.bf16.msra.mxu1 %v3900_v23  ;;  %v3964_v33 = vpack.c.bf16 %v3434_v24, %v3432_v17  ;;  %4472 = vmatprep.mubr.bf16.mxu0 %v3789_v18  ;;  %v3309_v37 = vmax.f32 %v3053_v28, 0.0  ;;  %v3311_v38 = vmax.f32 %v3055_v29, 0.0  ;;  %v3181_v39 = vadd.f32 %v2925_v34, %v2669_v31  ;;  %v2542_v41 = vld [vmem:[%s10032_s21 + $0x2f0] sm:$0xff]  ;;  %v2796_v42 = vld [vmem:[%s10036_s24 + $0x2e0] sm:$0xff]  ;;  %v3601_v56 = vld [vmem:[%s12319_s2 + $0x408] sm:$0xff] }
 0x403   : > { %v3183_v40 = vadd.f32 %v2927_v35, %v2671_v32  ;;  %v2798_v43 = vld [vmem:[%s10036_s24 + $0x2f0] sm:$0xff]  ;;  %v3052_v46 = vadd.f32 %v2796_v42, %v2540_v36  ;;  %v2668_v48 = vld [vmem:[%s10032_s21 + $0x6e0] sm:$0xff]  ;;  %v3609_v57 = vld [vmem:[%s12319_s2 + $0x448] sm:$0xff] }
 0x404   : > { %4576 = vmatpush1.bf16.msra.mxu0 %v3964_v33  ;;  %v3054_v47 = vadd.f32 %v2798_v43, %v2542_v41  ;;  %v2670_v49 = vld [vmem:[%s10032_s21 + $0x6f0] sm:$0xff]  ;;  %v2924_v50 = vld [vmem:[%s10036_s24 + $0x6e0] sm:$0xff]  ;;  %v3903_v51 = vpack.c.bf16 %v3311_v38, %v3309_v37  ;;  %v3437_v52 = vmax.f32 %v3181_v39, 0.0  ;;  %v3793_v61 = vpack.c.bf16 %v3609_v57, %v3601_v56  ;;  %v3605_v62 = vld [vmem:[%s12319_s2 + $0x428] sm:$0xff] }
 0x405   : > { %v3439_v53 = vmax.f32 %v3183_v40, 0.0  ;;  %v2926_v54 = vld [vmem:[%s10036_s24 + $0x6f0] sm:$0xff]  ;;  %v3180_v55 = vadd.f32 %v2924_v50, %v2668_v48  ;;  %v3308_v58 = vmax.f32 %v3052_v46, 0.0  ;;  %v3613_v63 = vld [vmem:[%s12319_s2 + $0x468] sm:$0xff]  ;;  %v3600_v3 = vld [vmem:[%s12319_s2 + $0x400] sm:$0xff] }
 0x406   : > { %v3310_v59 = vmax.f32 %v3054_v47, 0.0  ;;  %v3182_v60 = vadd.f32 %v2926_v54, %v2670_v49  ;;  %4191 = vmatprep.subr.bf16.mxu1 %v3903_v51  ;;  %v3797_v2 = vpack.c.bf16 %v3613_v63, %v3605_v62  ;;  %v3608_v4 = vld [vmem:[%s12319_s2 + $0x440] sm:$0xff]  ;;  %v2545_v5 = vld [vmem:[%s10032_s21 + $0x308] sm:$0xff]  ;;  %v2547_v6 = vld [vmem:[%s10032_s21 + $0x318] sm:$0xff] }
 0x407   : > { %v3967_v0 = vpack.c.bf16 %v3439_v53, %v3437_v52  ;;  %v3436_v1 = vmax.f32 %v3180_v55, 0.0  ;;  %4087 = vmatmul.mubr.bf16.gmra.mrb[28].mxu1 %v3784_v44  ;;  %v2801_v9 = vld [vmem:[%s10036_s24 + $0x308] sm:$0xff]  ;;  %v2803_v10 = vld [vmem:[%s10036_s24 + $0x318] sm:$0xff]  ;;  %v10658_v11 = vld [vmem:[%s12319_s2 + $0x420] sm:$0xff]  ;;  %v3792_v28 = vpack.c.bf16 %v3608_v4, %v3600_v3 }
 0x408   : > { %v3902_v7 = vpack.c.bf16 %v3310_v59, %v3308_v58  ;;  %v3438_v8 = vmax.f32 %v3182_v60, 0.0  ;;  %4096 = vmatprep.mubr.bf16.mxu1 %v3793_v61  ;;  %v3057_v12 = vadd.f32 %v2801_v9, %v2545_v5  ;;  %v3059_v13 = vadd.f32 %v2803_v10, %v2547_v6  ;;  %v3612_v14 = vld [vmem:[%s12319_s2 + $0x460] sm:$0xff]  ;;  %v2673_v15 = vld [vmem:[%s10032_s21 + $0x708] sm:$0xff]  ;;  %v2675_v16 = vld [vmem:[%s10032_s21 + $0x718] sm:$0xff] }
 0x409   : > { %4577 = vmatprep.subr.bf16.mxu0 %v3967_v0  ;;  %4473 = vmatmul.mubr.bf16.gmra.mrb[28].mxu0 %v3788_v45  ;;  %v2929_v18 = vld [vmem:[%s10036_s24 + $0x708] sm:$0xff]  ;;  %v2931_v19 = vld [vmem:[%s10036_s24 + $0x718] sm:$0xff]  ;;  %v2544_v20 = vld [vmem:[%s10032_s21 + $0x300] sm:$0xff]  ;;  %v3796_v29 = vpack.c.bf16 %v3612_v14, %v10658_v11 }
 0x40a   : > { %4192 = vmatpush1.bf16.msra.mxu1 %v3902_v7  ;;  %v3966_v17 = vpack.c.bf16 %v3438_v8, %v3436_v1  ;;  %4482 = vmatprep.mubr.bf16.mxu0 %v3797_v2  ;;  %v3313_v21 = vmax.f32 %v3057_v12, 0.0  ;;  %v3315_v22 = vmax.f32 %v3059_v13, 0.0  ;;  %v3185_v23 = vadd.f32 %v2929_v18, %v2673_v15  ;;  %v2546_v25 = vld [vmem:[%s10032_s21 + $0x310] sm:$0xff]  ;;  %v2800_v26 = vld [vmem:[%s10036_s24 + $0x300] sm:$0xff]  ;;  %v3617_v40 = vld [vmem:[%s12319_s2 + $0x488] sm:$0xff] }
 0x40b   : > { %v3187_v24 = vadd.f32 %v2931_v19, %v2675_v16  ;;  %v2802_v27 = vld [vmem:[%s10036_s24 + $0x310] sm:$0xff]  ;;  %v3056_v30 = vadd.f32 %v2800_v26, %v2544_v20  ;;  %v2672_v32 = vld [vmem:[%s10032_s21 + $0x700] sm:$0xff]  ;;  %v3625_v41 = vld [vmem:[%s12319_s2 + $0x4c8] sm:$0xff] }
 0x40c   : > { %4578 = vmatpush1.bf16.msra.mxu0 %v3966_v17  ;;  %v3058_v31 = vadd.f32 %v2802_v27, %v2546_v25  ;;  %v2674_v33 = vld [vmem:[%s10032_s21 + $0x710] sm:$0xff]  ;;  %v2928_v34 = vld [vmem:[%s10036_s24 + $0x700] sm:$0xff]  ;;  %v3905_v35 = vpack.c.bf16 %v3315_v22, %v3313_v21  ;;  %v3441_v36 = vmax.f32 %v3185_v23, 0.0  ;;  %v3801_v45 = vpack.c.bf16 %v3625_v41, %v3617_v40  ;;  %v3621_v46 = vld [vmem:[%s12319_s2 + $0x4a8] sm:$0xff] }
 0x40d   : > { %v3443_v37 = vmax.f32 %v3187_v24, 0.0  ;;  %v2930_v38 = vld [vmem:[%s10036_s24 + $0x710] sm:$0xff]  ;;  %v3184_v39 = vadd.f32 %v2928_v34, %v2672_v32  ;;  %v3312_v42 = vmax.f32 %v3056_v30, 0.0  ;;  %v3629_v47 = vld [vmem:[%s12319_s2 + $0x4e8] sm:$0xff]  ;;  %v3616_v51 = vld [vmem:[%s12319_s2 + $0x480] sm:$0xff] }
 0x40e   : > { %v3314_v43 = vmax.f32 %v3058_v31, 0.0  ;;  %v3186_v44 = vadd.f32 %v2930_v38, %v2674_v33  ;;  %4193 = vmatprep.subr.bf16.mxu1 %v3905_v35  ;;  %v3805_v50 = vpack.c.bf16 %v3629_v47, %v3621_v46  ;;  %v3624_v52 = vld [vmem:[%s12319_s2 + $0x4c0] sm:$0xff]  ;;  %v2549_v53 = vld [vmem:[%s10032_s21 + $0x328] sm:$0xff]  ;;  %v2551_v54 = vld [vmem:[%s10032_s21 + $0x338] sm:$0xff] }
 0x40f   : > { %v3969_v48 = vpack.c.bf16 %v3443_v37, %v3441_v36  ;;  %v3440_v49 = vmax.f32 %v3184_v39, 0.0  ;;  %4097 = vmatmul.mubr.bf16.gmra.mrb[32].mxu1 %v3792_v28  ;;  %v2805_v57 = vld [vmem:[%s10036_s24 + $0x328] sm:$0xff]  ;;  %v2807_v58 = vld [vmem:[%s10036_s24 + $0x338] sm:$0xff]  ;;  %v10701_v59 = vld [vmem:[%s12319_s2 + $0x4a0] sm:$0xff]  ;;  %v3800_v12 = vpack.c.bf16 %v3624_v52, %v3616_v51 }
 0x410   : > { %v3904_v55 = vpack.c.bf16 %v3314_v43, %v3312_v42  ;;  %v3442_v56 = vmax.f32 %v3186_v44, 0.0  ;;  %4106 = vmatprep.mubr.bf16.mxu1 %v3801_v45  ;;  %v3061_v60 = vadd.f32 %v2805_v57, %v2549_v53  ;;  %v3063_v61 = vadd.f32 %v2807_v58, %v2551_v54  ;;  %v3628_v62 = vld [vmem:[%s12319_s2 + $0x4e0] sm:$0xff]  ;;  %v2677_v63 = vld [vmem:[%s10032_s21 + $0x728] sm:$0xff]  ;;  %v2679_v0 = vld [vmem:[%s10032_s21 + $0x738] sm:$0xff] }
 0x411   : > { %4579 = vmatprep.subr.bf16.mxu0 %v3969_v48  ;;  %4483 = vmatmul.mubr.bf16.gmra.mrb[32].mxu0 %v3796_v29  ;;  %v2933_v2 = vld [vmem:[%s10036_s24 + $0x728] sm:$0xff]  ;;  %v2935_v3 = vld [vmem:[%s10036_s24 + $0x738] sm:$0xff]  ;;  %v2548_v4 = vld [vmem:[%s10032_s21 + $0x320] sm:$0xff]  ;;  %v3804_v13 = vpack.c.bf16 %v3628_v62, %v10701_v59 }
 0x412   : > { %4194 = vmatpush1.bf16.msra.mxu1 %v3904_v55  ;;  %v3968_v1 = vpack.c.bf16 %v3442_v56, %v3440_v49  ;;  %4492 = vmatprep.mubr.bf16.mxu0 %v3805_v50  ;;  %v3317_v5 = vmax.f32 %v3061_v60, 0.0  ;;  %v3319_v6 = vmax.f32 %v3063_v61, 0.0  ;;  %v3189_v7 = vadd.f32 %v2933_v2, %v2677_v63  ;;  %v2550_v9 = vld [vmem:[%s10032_s21 + $0x330] sm:$0xff]  ;;  %v2804_v10 = vld [vmem:[%s10036_s24 + $0x320] sm:$0xff]  ;;  %v3633_v24 = vld [vmem:[%s12319_s2 + $0x508] sm:$0xff] }
 0x413   : > { %v3191_v8 = vadd.f32 %v2935_v3, %v2679_v0  ;;  %v2806_v11 = vld [vmem:[%s10036_s24 + $0x330] sm:$0xff]  ;;  %v3060_v14 = vadd.f32 %v2804_v10, %v2548_v4  ;;  %v2676_v16 = vld [vmem:[%s10032_s21 + $0x720] sm:$0xff]  ;;  %v3641_v25 = vld [vmem:[%s12319_s2 + $0x548] sm:$0xff] }
 0x414   : > { %4580 = vmatpush1.bf16.msra.mxu0 %v3968_v1  ;;  %v3062_v15 = vadd.f32 %v2806_v11, %v2550_v9  ;;  %v2678_v17 = vld [vmem:[%s10032_s21 + $0x730] sm:$0xff]  ;;  %v2932_v18 = vld [vmem:[%s10036_s24 + $0x720] sm:$0xff]  ;;  %v3907_v19 = vpack.c.bf16 %v3319_v6, %v3317_v5  ;;  %v3445_v20 = vmax.f32 %v3189_v7, 0.0  ;;  %v3809_v29 = vpack.c.bf16 %v3641_v25, %v3633_v24  ;;  %v3637_v30 = vld [vmem:[%s12319_s2 + $0x528] sm:$0xff] }
 0x415   : > { %v3447_v21 = vmax.f32 %v3191_v8, 0.0  ;;  %v2934_v22 = vld [vmem:[%s10036_s24 + $0x730] sm:$0xff]  ;;  %v3188_v23 = vadd.f32 %v2932_v18, %v2676_v16  ;;  %v3316_v26 = vmax.f32 %v3060_v14, 0.0  ;;  %v3645_v31 = vld [vmem:[%s12319_s2 + $0x568] sm:$0xff]  ;;  %v3632_v35 = vld [vmem:[%s12319_s2 + $0x500] sm:$0xff] }
 0x416   : > { %v3318_v27 = vmax.f32 %v3062_v15, 0.0  ;;  %v3190_v28 = vadd.f32 %v2934_v22, %v2678_v17  ;;  %4195 = vmatprep.subr.bf16.mxu1 %v3907_v19  ;;  %v3813_v34 = vpack.c.bf16 %v3645_v31, %v3637_v30  ;;  %v3640_v36 = vld [vmem:[%s12319_s2 + $0x540] sm:$0xff]  ;;  %v2553_v37 = vld [vmem:[%s10032_s21 + $0x348] sm:$0xff]  ;;  %v2555_v38 = vld [vmem:[%s10032_s21 + $0x358] sm:$0xff] }
 0x417   : > { %v3971_v32 = vpack.c.bf16 %v3447_v21, %v3445_v20  ;;  %v3444_v33 = vmax.f32 %v3188_v23, 0.0  ;;  %4107 = vmatmul.mubr.bf16.gmra.mrb[36].mxu1 %v3800_v12  ;;  %v2809_v41 = vld [vmem:[%s10036_s24 + $0x348] sm:$0xff]  ;;  %v2811_v42 = vld [vmem:[%s10036_s24 + $0x358] sm:$0xff]  ;;  %v10744_v43 = vld [vmem:[%s12319_s2 + $0x520] sm:$0xff]  ;;  %v3808_v60 = vpack.c.bf16 %v3640_v36, %v3632_v35 }
 0x418   : > { %v3906_v39 = vpack.c.bf16 %v3318_v27, %v3316_v26  ;;  %v3446_v40 = vmax.f32 %v3190_v28, 0.0  ;;  %4116 = vmatprep.mubr.bf16.mxu1 %v3809_v29  ;;  %v3065_v44 = vadd.f32 %v2809_v41, %v2553_v37  ;;  %v3067_v45 = vadd.f32 %v2811_v42, %v2555_v38  ;;  %v3644_v46 = vld [vmem:[%s12319_s2 + $0x560] sm:$0xff]  ;;  %v2681_v47 = vld [vmem:[%s10032_s21 + $0x748] sm:$0xff]  ;;  %v2683_v48 = vld [vmem:[%s10032_s21 + $0x758] sm:$0xff] }
 0x419   : > { %4581 = vmatprep.subr.bf16.mxu0 %v3971_v32  ;;  %4493 = vmatmul.mubr.bf16.gmra.mrb[36].mxu0 %v3804_v13  ;;  %v2937_v50 = vld [vmem:[%s10036_s24 + $0x748] sm:$0xff]  ;;  %v2939_v51 = vld [vmem:[%s10036_s24 + $0x758] sm:$0xff]  ;;  %v2552_v52 = vld [vmem:[%s10032_s21 + $0x340] sm:$0xff]  ;;  %v3812_v61 = vpack.c.bf16 %v3644_v46, %v10744_v43 }
 0x41a   : > { %4196 = vmatpush1.bf16.msra.mxu1 %v3906_v39  ;;  %v3970_v49 = vpack.c.bf16 %v3446_v40, %v3444_v33  ;;  %4502 = vmatprep.mubr.bf16.mxu0 %v3813_v34  ;;  %v3321_v53 = vmax.f32 %v3065_v44, 0.0  ;;  %v3323_v54 = vmax.f32 %v3067_v45, 0.0  ;;  %v3193_v55 = vadd.f32 %v2937_v50, %v2681_v47  ;;  %v2554_v57 = vld [vmem:[%s10032_s21 + $0x350] sm:$0xff]  ;;  %v2808_v58 = vld [vmem:[%s10036_s24 + $0x340] sm:$0xff]  ;;  %v3649_v8 = vld [vmem:[%s12319_s2 + $0x588] sm:$0xff] }
 0x41b   : > { %v3195_v56 = vadd.f32 %v2939_v51, %v2683_v48  ;;  %v2810_v59 = vld [vmem:[%s10036_s24 + $0x350] sm:$0xff]  ;;  %v3064_v62 = vadd.f32 %v2808_v58, %v2552_v52  ;;  %v2680_v0 = vld [vmem:[%s10032_s21 + $0x740] sm:$0xff]  ;;  %v3657_v9 = vld [vmem:[%s12319_s2 + $0x5c8] sm:$0xff] }
 0x41c   : > { %4582 = vmatpush1.bf16.msra.mxu0 %v3970_v49  ;;  %v3066_v63 = vadd.f32 %v2810_v59, %v2554_v57  ;;  %v2682_v1 = vld [vmem:[%s10032_s21 + $0x750] sm:$0xff]  ;;  %v2936_v2 = vld [vmem:[%s10036_s24 + $0x740] sm:$0xff]  ;;  %v3909_v3 = vpack.c.bf16 %v3323_v54, %v3321_v53  ;;  %v3449_v4 = vmax.f32 %v3193_v55, 0.0  ;;  %v3817_v13 = vpack.c.bf16 %v3657_v9, %v3649_v8  ;;  %v3653_v14 = vld [vmem:[%s12319_s2 + $0x5a8] sm:$0xff] }
 0x41d   : > { %v3451_v5 = vmax.f32 %v3195_v56, 0.0  ;;  %v2938_v6 = vld [vmem:[%s10036_s24 + $0x750] sm:$0xff]  ;;  %v3192_v7 = vadd.f32 %v2936_v2, %v2680_v0  ;;  %v3320_v10 = vmax.f32 %v3064_v62, 0.0  ;;  %v3661_v15 = vld [vmem:[%s12319_s2 + $0x5e8] sm:$0xff]  ;;  %v3648_v19 = vld [vmem:[%s12319_s2 + $0x580] sm:$0xff] }
 0x41e   : > { %v3322_v11 = vmax.f32 %v3066_v63, 0.0  ;;  %v3194_v12 = vadd.f32 %v2938_v6, %v2682_v1  ;;  %4197 = vmatprep.subr.bf16.mxu1 %v3909_v3  ;;  %v3821_v18 = vpack.c.bf16 %v3661_v15, %v3653_v14  ;;  %v3656_v20 = vld [vmem:[%s12319_s2 + $0x5c0] sm:$0xff]  ;;  %v2557_v21 = vld [vmem:[%s10032_s21 + $0x368] sm:$0xff]  ;;  %v2559_v22 = vld [vmem:[%s10032_s21 + $0x378] sm:$0xff] }
 0x41f   : > { %v3973_v16 = vpack.c.bf16 %v3451_v5, %v3449_v4  ;;  %v3448_v17 = vmax.f32 %v3192_v7, 0.0  ;;  %4117 = vmatmul.mubr.bf16.gmra.mrb[40].mxu1 %v3808_v60  ;;  %v2813_v25 = vld [vmem:[%s10036_s24 + $0x368] sm:$0xff]  ;;  %v2815_v26 = vld [vmem:[%s10036_s24 + $0x378] sm:$0xff]  ;;  %v10787_v27 = vld [vmem:[%s12319_s2 + $0x5a0] sm:$0xff]  ;;  %v3816_v44 = vpack.c.bf16 %v3656_v20, %v3648_v19 }
 0x420   : > { %v3908_v23 = vpack.c.bf16 %v3322_v11, %v3320_v10  ;;  %v3450_v24 = vmax.f32 %v3194_v12, 0.0  ;;  %4126 = vmatprep.mubr.bf16.mxu1 %v3817_v13  ;;  %v3069_v28 = vadd.f32 %v2813_v25, %v2557_v21  ;;  %v3071_v29 = vadd.f32 %v2815_v26, %v2559_v22  ;;  %v3660_v30 = vld [vmem:[%s12319_s2 + $0x5e0] sm:$0xff]  ;;  %v2685_v31 = vld [vmem:[%s10032_s21 + $0x768] sm:$0xff]  ;;  %v2687_v32 = vld [vmem:[%s10032_s21 + $0x778] sm:$0xff] }
 0x421   : > { %4583 = vmatprep.subr.bf16.mxu0 %v3973_v16  ;;  %4503 = vmatmul.mubr.bf16.gmra.mrb[40].mxu0 %v3812_v61  ;;  %v2941_v34 = vld [vmem:[%s10036_s24 + $0x768] sm:$0xff]  ;;  %v2943_v35 = vld [vmem:[%s10036_s24 + $0x778] sm:$0xff]  ;;  %v2556_v36 = vld [vmem:[%s10032_s21 + $0x360] sm:$0xff]  ;;  %v3820_v45 = vpack.c.bf16 %v3660_v30, %v10787_v27 }
 0x422   : > { %4198 = vmatpush1.bf16.msra.mxu1 %v3908_v23  ;;  %v3972_v33 = vpack.c.bf16 %v3450_v24, %v3448_v17  ;;  %4512 = vmatprep.mubr.bf16.mxu0 %v3821_v18  ;;  %v3325_v37 = vmax.f32 %v3069_v28, 0.0  ;;  %v3327_v38 = vmax.f32 %v3071_v29, 0.0  ;;  %v3197_v39 = vadd.f32 %v2941_v34, %v2685_v31  ;;  %v2558_v41 = vld [vmem:[%s10032_s21 + $0x370] sm:$0xff]  ;;  %v2812_v42 = vld [vmem:[%s10036_s24 + $0x360] sm:$0xff]  ;;  %v3665_v56 = vld [vmem:[%s12319_s2 + $0x608] sm:$0xff] }
 0x423   : > { %v3199_v40 = vadd.f32 %v2943_v35, %v2687_v32  ;;  %v2814_v43 = vld [vmem:[%s10036_s24 + $0x370] sm:$0xff]  ;;  %v3068_v46 = vadd.f32 %v2812_v42, %v2556_v36  ;;  %v2684_v48 = vld [vmem:[%s10032_s21 + $0x760] sm:$0xff]  ;;  %v3673_v57 = vld [vmem:[%s12319_s2 + $0x648] sm:$0xff] }
 0x424   : > { %4584 = vmatpush1.bf16.msra.mxu0 %v3972_v33  ;;  %v3070_v47 = vadd.f32 %v2814_v43, %v2558_v41  ;;  %v2686_v49 = vld [vmem:[%s10032_s21 + $0x770] sm:$0xff]  ;;  %v2940_v50 = vld [vmem:[%s10036_s24 + $0x760] sm:$0xff]  ;;  %v3911_v51 = vpack.c.bf16 %v3327_v38, %v3325_v37  ;;  %v3453_v52 = vmax.f32 %v3197_v39, 0.0  ;;  %v3825_v61 = vpack.c.bf16 %v3673_v57, %v3665_v56  ;;  %v3669_v62 = vld [vmem:[%s12319_s2 + $0x628] sm:$0xff] }
 0x425   : > { %v3455_v53 = vmax.f32 %v3199_v40, 0.0  ;;  %v2942_v54 = vld [vmem:[%s10036_s24 + $0x770] sm:$0xff]  ;;  %v3196_v55 = vadd.f32 %v2940_v50, %v2684_v48  ;;  %v3324_v58 = vmax.f32 %v3068_v46, 0.0  ;;  %v3677_v63 = vld [vmem:[%s12319_s2 + $0x668] sm:$0xff]  ;;  %v3664_v3 = vld [vmem:[%s12319_s2 + $0x600] sm:$0xff] }
 0x426   : > { %v3326_v59 = vmax.f32 %v3070_v47, 0.0  ;;  %v3198_v60 = vadd.f32 %v2942_v54, %v2686_v49  ;;  %4199 = vmatprep.subr.bf16.mxu1 %v3911_v51  ;;  %v3829_v2 = vpack.c.bf16 %v3677_v63, %v3669_v62  ;;  %v3672_v4 = vld [vmem:[%s12319_s2 + $0x640] sm:$0xff]  ;;  %v2561_v5 = vld [vmem:[%s10032_s21 + $0x388] sm:$0xff]  ;;  %v2563_v6 = vld [vmem:[%s10032_s21 + $0x398] sm:$0xff] }
 0x427   : > { %v3975_v0 = vpack.c.bf16 %v3455_v53, %v3453_v52  ;;  %v3452_v1 = vmax.f32 %v3196_v55, 0.0  ;;  %4127 = vmatmul.mubr.bf16.gmra.mrb[44].mxu1 %v3816_v44  ;;  %v2817_v9 = vld [vmem:[%s10036_s24 + $0x388] sm:$0xff]  ;;  %v2819_v10 = vld [vmem:[%s10036_s24 + $0x398] sm:$0xff]  ;;  %v10830_v11 = vld [vmem:[%s12319_s2 + $0x620] sm:$0xff]  ;;  %v3824_v28 = vpack.c.bf16 %v3672_v4, %v3664_v3 }
 0x428   : > { %v3910_v7 = vpack.c.bf16 %v3326_v59, %v3324_v58  ;;  %v3454_v8 = vmax.f32 %v3198_v60, 0.0  ;;  %4136 = vmatprep.mubr.bf16.mxu1 %v3825_v61  ;;  %v3073_v12 = vadd.f32 %v2817_v9, %v2561_v5  ;;  %v3075_v13 = vadd.f32 %v2819_v10, %v2563_v6  ;;  %v3676_v14 = vld [vmem:[%s12319_s2 + $0x660] sm:$0xff]  ;;  %v2689_v15 = vld [vmem:[%s10032_s21 + $0x788] sm:$0xff]  ;;  %v2691_v16 = vld [vmem:[%s10032_s21 + $0x798] sm:$0xff] }
 0x429   : > { %4585 = vmatprep.subr.bf16.mxu0 %v3975_v0  ;;  %4513 = vmatmul.mubr.bf16.gmra.mrb[44].mxu0 %v3820_v45  ;;  %v2945_v18 = vld [vmem:[%s10036_s24 + $0x788] sm:$0xff]  ;;  %v2947_v19 = vld [vmem:[%s10036_s24 + $0x798] sm:$0xff]  ;;  %v2560_v20 = vld [vmem:[%s10032_s21 + $0x380] sm:$0xff]  ;;  %v3828_v29 = vpack.c.bf16 %v3676_v14, %v10830_v11 }
 0x42a   : > { %4200 = vmatpush1.bf16.msra.mxu1 %v3910_v7  ;;  %v3974_v17 = vpack.c.bf16 %v3454_v8, %v3452_v1  ;;  %4522 = vmatprep.mubr.bf16.mxu0 %v3829_v2  ;;  %v3329_v21 = vmax.f32 %v3073_v12, 0.0  ;;  %v3331_v22 = vmax.f32 %v3075_v13, 0.0  ;;  %v3201_v23 = vadd.f32 %v2945_v18, %v2689_v15  ;;  %v2562_v25 = vld [vmem:[%s10032_s21 + $0x390] sm:$0xff]  ;;  %v2816_v26 = vld [vmem:[%s10036_s24 + $0x380] sm:$0xff]  ;;  %v3681_v40 = vld [vmem:[%s12319_s2 + $0x688] sm:$0xff] }
 0x42b   : > { %v3203_v24 = vadd.f32 %v2947_v19, %v2691_v16  ;;  %v2818_v27 = vld [vmem:[%s10036_s24 + $0x390] sm:$0xff]  ;;  %v3072_v30 = vadd.f32 %v2816_v26, %v2560_v20  ;;  %v2688_v32 = vld [vmem:[%s10032_s21 + $0x780] sm:$0xff]  ;;  %v3689_v41 = vld [vmem:[%s12319_s2 + $0x6c8] sm:$0xff] }
 0x42c   : > { %4586 = vmatpush1.bf16.msra.mxu0 %v3974_v17  ;;  %v3074_v31 = vadd.f32 %v2818_v27, %v2562_v25  ;;  %v2690_v33 = vld [vmem:[%s10032_s21 + $0x790] sm:$0xff]  ;;  %v2944_v34 = vld [vmem:[%s10036_s24 + $0x780] sm:$0xff]  ;;  %v3913_v35 = vpack.c.bf16 %v3331_v22, %v3329_v21  ;;  %v3457_v36 = vmax.f32 %v3201_v23, 0.0  ;;  %v3833_v45 = vpack.c.bf16 %v3689_v41, %v3681_v40  ;;  %v3685_v46 = vld [vmem:[%s12319_s2 + $0x6a8] sm:$0xff] }
 0x42d   : > { %v3459_v37 = vmax.f32 %v3203_v24, 0.0  ;;  %v2946_v38 = vld [vmem:[%s10036_s24 + $0x790] sm:$0xff]  ;;  %v3200_v39 = vadd.f32 %v2944_v34, %v2688_v32  ;;  %v3328_v42 = vmax.f32 %v3072_v30, 0.0  ;;  %v3693_v47 = vld [vmem:[%s12319_s2 + $0x6e8] sm:$0xff]  ;;  %v3680_v51 = vld [vmem:[%s12319_s2 + $0x680] sm:$0xff] }
 0x42e   : > { %v3330_v43 = vmax.f32 %v3074_v31, 0.0  ;;  %v3202_v44 = vadd.f32 %v2946_v38, %v2690_v33  ;;  %4201 = vmatprep.subr.bf16.mxu1 %v3913_v35  ;;  %v3837_v50 = vpack.c.bf16 %v3693_v47, %v3685_v46  ;;  %v3688_v52 = vld [vmem:[%s12319_s2 + $0x6c0] sm:$0xff]  ;;  %v2565_v53 = vld [vmem:[%s10032_s21 + $0x3a8] sm:$0xff]  ;;  %v2567_v54 = vld [vmem:[%s10032_s21 + $0x3b8] sm:$0xff] }
 0x42f   : > { %v3977_v48 = vpack.c.bf16 %v3459_v37, %v3457_v36  ;;  %v3456_v49 = vmax.f32 %v3200_v39, 0.0  ;;  %4137 = vmatmul.mubr.bf16.gmra.mrb[48].mxu1 %v3824_v28  ;;  %v2821_v57 = vld [vmem:[%s10036_s24 + $0x3a8] sm:$0xff]  ;;  %v2823_v58 = vld [vmem:[%s10036_s24 + $0x3b8] sm:$0xff]  ;;  %v10873_v59 = vld [vmem:[%s12319_s2 + $0x6a0] sm:$0xff]  ;;  %v3832_v12 = vpack.c.bf16 %v3688_v52, %v3680_v51 }
 0x430   : > { %v3912_v55 = vpack.c.bf16 %v3330_v43, %v3328_v42  ;;  %v3458_v56 = vmax.f32 %v3202_v44, 0.0  ;;  %4146 = vmatprep.mubr.bf16.mxu1 %v3833_v45  ;;  %v3077_v60 = vadd.f32 %v2821_v57, %v2565_v53  ;;  %v3079_v61 = vadd.f32 %v2823_v58, %v2567_v54  ;;  %v3692_v62 = vld [vmem:[%s12319_s2 + $0x6e0] sm:$0xff]  ;;  %v2693_v63 = vld [vmem:[%s10032_s21 + $0x7a8] sm:$0xff]  ;;  %v2695_v0 = vld [vmem:[%s10032_s21 + $0x7b8] sm:$0xff] }
 0x431   : > { %4587 = vmatprep.subr.bf16.mxu0 %v3977_v48  ;;  %4523 = vmatmul.mubr.bf16.gmra.mrb[48].mxu0 %v3828_v29  ;;  %v2949_v2 = vld [vmem:[%s10036_s24 + $0x7a8] sm:$0xff]  ;;  %v2951_v3 = vld [vmem:[%s10036_s24 + $0x7b8] sm:$0xff]  ;;  %v2564_v4 = vld [vmem:[%s10032_s21 + $0x3a0] sm:$0xff]  ;;  %v3836_v13 = vpack.c.bf16 %v3692_v62, %v10873_v59 }
 0x432   : > { %4202 = vmatpush1.bf16.msra.mxu1 %v3912_v55  ;;  %v3976_v1 = vpack.c.bf16 %v3458_v56, %v3456_v49  ;;  %4532 = vmatprep.mubr.bf16.mxu0 %v3837_v50  ;;  %v3333_v5 = vmax.f32 %v3077_v60, 0.0  ;;  %v3335_v6 = vmax.f32 %v3079_v61, 0.0  ;;  %v3205_v7 = vadd.f32 %v2949_v2, %v2693_v63  ;;  %v2566_v9 = vld [vmem:[%s10032_s21 + $0x3b0] sm:$0xff]  ;;  %v2820_v10 = vld [vmem:[%s10036_s24 + $0x3a0] sm:$0xff]  ;;  %v3697_v24 = vld [vmem:[%s12319_s2 + $0x708] sm:$0xff] }
 0x433   : > { %v3207_v8 = vadd.f32 %v2951_v3, %v2695_v0  ;;  %v2822_v11 = vld [vmem:[%s10036_s24 + $0x3b0] sm:$0xff]  ;;  %v3076_v14 = vadd.f32 %v2820_v10, %v2564_v4  ;;  %v2692_v16 = vld [vmem:[%s10032_s21 + $0x7a0] sm:$0xff]  ;;  %v3705_v25 = vld [vmem:[%s12319_s2 + $0x748] sm:$0xff] }
 0x434   : > { %4588 = vmatpush1.bf16.msra.mxu0 %v3976_v1  ;;  %v3078_v15 = vadd.f32 %v2822_v11, %v2566_v9  ;;  %v2694_v17 = vld [vmem:[%s10032_s21 + $0x7b0] sm:$0xff]  ;;  %v2948_v18 = vld [vmem:[%s10036_s24 + $0x7a0] sm:$0xff]  ;;  %v3915_v19 = vpack.c.bf16 %v3335_v6, %v3333_v5  ;;  %v3461_v20 = vmax.f32 %v3205_v7, 0.0  ;;  %v3841_v29 = vpack.c.bf16 %v3705_v25, %v3697_v24  ;;  %v3701_v30 = vld [vmem:[%s12319_s2 + $0x728] sm:$0xff] }
 0x435   : > { %v3463_v21 = vmax.f32 %v3207_v8, 0.0  ;;  %v2950_v22 = vld [vmem:[%s10036_s24 + $0x7b0] sm:$0xff]  ;;  %v3204_v23 = vadd.f32 %v2948_v18, %v2692_v16  ;;  %v3332_v26 = vmax.f32 %v3076_v14, 0.0  ;;  %v3709_v31 = vld [vmem:[%s12319_s2 + $0x768] sm:$0xff]  ;;  %v3696_v35 = vld [vmem:[%s12319_s2 + $0x700] sm:$0xff] }
 0x436   : > { %v3334_v27 = vmax.f32 %v3078_v15, 0.0  ;;  %v3206_v28 = vadd.f32 %v2950_v22, %v2694_v17  ;;  %4203 = vmatprep.subr.bf16.mxu1 %v3915_v19  ;;  %v3845_v34 = vpack.c.bf16 %v3709_v31, %v3701_v30  ;;  %v3704_v36 = vld [vmem:[%s12319_s2 + $0x740] sm:$0xff]  ;;  %v2569_v37 = vld [vmem:[%s10032_s21 + $0x3c8] sm:$0xff]  ;;  %v2571_v38 = vld [vmem:[%s10032_s21 + $0x3d8] sm:$0xff] }
 0x437   : > { %v3979_v32 = vpack.c.bf16 %v3463_v21, %v3461_v20  ;;  %v3460_v33 = vmax.f32 %v3204_v23, 0.0  ;;  %4147 = vmatmul.mubr.bf16.gmra.mrb[52].mxu1 %v3832_v12  ;;  %v2825_v41 = vld [vmem:[%s10036_s24 + $0x3c8] sm:$0xff]  ;;  %v2827_v42 = vld [vmem:[%s10036_s24 + $0x3d8] sm:$0xff]  ;;  %v10916_v43 = vld [vmem:[%s12319_s2 + $0x720] sm:$0xff]  ;;  %v3840_v60 = vpack.c.bf16 %v3704_v36, %v3696_v35 }
 0x438   : > { %v3914_v39 = vpack.c.bf16 %v3334_v27, %v3332_v26  ;;  %v3462_v40 = vmax.f32 %v3206_v28, 0.0  ;;  %4156 = vmatprep.mubr.bf16.mxu1 %v3841_v29  ;;  %v3081_v44 = vadd.f32 %v2825_v41, %v2569_v37  ;;  %v3083_v45 = vadd.f32 %v2827_v42, %v2571_v38  ;;  %v3708_v46 = vld [vmem:[%s12319_s2 + $0x760] sm:$0xff]  ;;  %v2697_v47 = vld [vmem:[%s10032_s21 + $0x7c8] sm:$0xff]  ;;  %v2699_v48 = vld [vmem:[%s10032_s21 + $0x7d8] sm:$0xff] }
 0x439   : > { %4589 = vmatprep.subr.bf16.mxu0 %v3979_v32  ;;  %4533 = vmatmul.mubr.bf16.gmra.mrb[52].mxu0 %v3836_v13  ;;  %v2953_v50 = vld [vmem:[%s10036_s24 + $0x7c8] sm:$0xff]  ;;  %v2955_v51 = vld [vmem:[%s10036_s24 + $0x7d8] sm:$0xff]  ;;  %v2568_v52 = vld [vmem:[%s10032_s21 + $0x3c0] sm:$0xff]  ;;  %v3844_v61 = vpack.c.bf16 %v3708_v46, %v10916_v43 }
 0x43a   : > { %4204 = vmatpush1.bf16.msra.mxu1 %v3914_v39  ;;  %v3978_v49 = vpack.c.bf16 %v3462_v40, %v3460_v33  ;;  %4542 = vmatprep.mubr.bf16.mxu0 %v3845_v34  ;;  %v3337_v53 = vmax.f32 %v3081_v44, 0.0  ;;  %v3339_v54 = vmax.f32 %v3083_v45, 0.0  ;;  %v3209_v55 = vadd.f32 %v2953_v50, %v2697_v47  ;;  %v2570_v57 = vld [vmem:[%s10032_s21 + $0x3d0] sm:$0xff]  ;;  %v2824_v58 = vld [vmem:[%s10036_s24 + $0x3c0] sm:$0xff]  ;;  %v3713_v8 = vld [vmem:[%s12319_s2 + $0x788] sm:$0xff] }
 0x43b   : > { %v3211_v56 = vadd.f32 %v2955_v51, %v2699_v48  ;;  %v2826_v59 = vld [vmem:[%s10036_s24 + $0x3d0] sm:$0xff]  ;;  %v3080_v62 = vadd.f32 %v2824_v58, %v2568_v52  ;;  %v2696_v0 = vld [vmem:[%s10032_s21 + $0x7c0] sm:$0xff]  ;;  %v3721_v9 = vld [vmem:[%s12319_s2 + $0x7c8] sm:$0xff] }
 0x43c   : > { %4590 = vmatpush1.bf16.msra.mxu0 %v3978_v49  ;;  %v3082_v63 = vadd.f32 %v2826_v59, %v2570_v57  ;;  %v2698_v1 = vld [vmem:[%s10032_s21 + $0x7d0] sm:$0xff]  ;;  %v2952_v2 = vld [vmem:[%s10036_s24 + $0x7c0] sm:$0xff]  ;;  %v3917_v3 = vpack.c.bf16 %v3339_v54, %v3337_v53  ;;  %v3465_v4 = vmax.f32 %v3209_v55, 0.0  ;;  %v3849_v13 = vpack.c.bf16 %v3721_v9, %v3713_v8  ;;  %v3717_v14 = vld [vmem:[%s12319_s2 + $0x7a8] sm:$0xff] }
 0x43d   : > { %v3467_v5 = vmax.f32 %v3211_v56, 0.0  ;;  %v2954_v6 = vld [vmem:[%s10036_s24 + $0x7d0] sm:$0xff]  ;;  %v3208_v7 = vadd.f32 %v2952_v2, %v2696_v0  ;;  %v3336_v10 = vmax.f32 %v3080_v62, 0.0  ;;  %v3725_v15 = vld [vmem:[%s12319_s2 + $0x7e8] sm:$0xff]  ;;  %v3712_v19 = vld [vmem:[%s12319_s2 + $0x780] sm:$0xff] }
 0x43e   : > { %v3338_v11 = vmax.f32 %v3082_v63, 0.0  ;;  %v3210_v12 = vadd.f32 %v2954_v6, %v2698_v1  ;;  %4205 = vmatprep.subr.bf16.mxu1 %v3917_v3  ;;  %v3853_v18 = vpack.c.bf16 %v3725_v15, %v3717_v14  ;;  %v3720_v20 = vld [vmem:[%s12319_s2 + $0x7c0] sm:$0xff]  ;;  %v2573_v21 = vld [vmem:[%s10032_s21 + $0x3e8] sm:$0xff]  ;;  %v2575_v22 = vld [vmem:[%s10032_s21 + $0x3f8] sm:$0xff] }
 0x43f   : > { %v3981_v16 = vpack.c.bf16 %v3467_v5, %v3465_v4  ;;  %v3464_v17 = vmax.f32 %v3208_v7, 0.0  ;;  %4157 = vmatmul.mubr.bf16.gmra.mrb[56].mxu1 %v3840_v60  ;;  %v2829_v25 = vld [vmem:[%s10036_s24 + $0x3e8] sm:$0xff]  ;;  %v2831_v26 = vld [vmem:[%s10036_s24 + $0x3f8] sm:$0xff]  ;;  %v3716_v27 = vld [vmem:[%s12319_s2 + $0x7a0] sm:$0xff]  ;;  %v3848_v44 = vpack.c.bf16 %v3720_v20, %v3712_v19 }
 0x440   : > { %v3916_v23 = vpack.c.bf16 %v3338_v11, %v3336_v10  ;;  %v3466_v24 = vmax.f32 %v3210_v12, 0.0  ;;  %4166 = vmatprep.mubr.bf16.mxu1 %v3849_v13  ;;  %v3085_v28 = vadd.f32 %v2829_v25, %v2573_v21  ;;  %v3087_v29 = vadd.f32 %v2831_v26, %v2575_v22  ;;  %v3724_v30 = vld [vmem:[%s12319_s2 + $0x7e0] sm:$0xff]  ;;  %v2701_v31 = vld [vmem:[%s10032_s21 + $0x7e8] sm:$0xff]  ;;  %v2703_v32 = vld [vmem:[%s10032_s21 + $0x7f8] sm:$0xff] }
 0x441   : > { %4591 = vmatprep.subr.bf16.mxu0 %v3981_v16  ;;  %4543 = vmatmul.mubr.bf16.gmra.mrb[56].mxu0 %v3844_v61  ;;  %v2957_v34 = vld [vmem:[%s10036_s24 + $0x7e8] sm:$0xff]  ;;  %v2959_v35 = vld [vmem:[%s10036_s24 + $0x7f8] sm:$0xff]  ;;  %v2572_v36 = vld [vmem:[%s10032_s21 + $0x3e0] sm:$0xff]  ;;  %v3852_v45 = vpack.c.bf16 %v3724_v30, %v3716_v27 }
 0x442   : > { %4206 = vmatpush1.bf16.msra.mxu1 %v3916_v23  ;;  %v3980_v33 = vpack.c.bf16 %v3466_v24, %v3464_v17  ;;  %4552 = vmatprep.mubr.bf16.mxu0 %v3853_v18  ;;  %v3341_v37 = vmax.f32 %v3085_v28, 0.0  ;;  %v3343_v38 = vmax.f32 %v3087_v29, 0.0  ;;  %v3213_v39 = vadd.f32 %v2957_v34, %v2701_v31  ;;  %v2574_v41 = vld [vmem:[%s10032_s21 + $0x3f0] sm:$0xff]  ;;  %v2828_v42 = vld [vmem:[%s10036_s24 + $0x3e0] sm:$0xff]  ;;  %v3475_v56 = vld [vmem:[%s12319_s2 + $0x18] sm:$0xff] }
 0x443   : > { %v3215_v40 = vadd.f32 %v2959_v35, %v2703_v32  ;;  %v2830_v43 = vld [vmem:[%s10036_s24 + $0x3f0] sm:$0xff]  ;;  %v3084_v46 = vadd.f32 %v2828_v42, %v2572_v36  ;;  %v2700_v48 = vld [vmem:[%s10032_s21 + $0x7e0] sm:$0xff]  ;;  %v3483_v57 = vld [vmem:[%s12319_s2 + $0x58] sm:$0xff] }
 0x444   : > { %4592 = vmatpush1.bf16.msra.mxu0 %v3980_v33  ;;  %v3086_v47 = vadd.f32 %v2830_v43, %v2574_v41  ;;  %v2702_v49 = vld [vmem:[%s10032_s21 + $0x7f0] sm:$0xff]  ;;  %v2956_v50 = vld [vmem:[%s10036_s24 + $0x7e0] sm:$0xff]  ;;  %v3919_v51 = vpack.c.bf16 %v3343_v38, %v3341_v37  ;;  %v3469_v52 = vmax.f32 %v3213_v39, 0.0  ;;  %v3731_v61 = vpack.c.bf16 %v3483_v57, %v3475_v56  ;;  %v3479_v62 = vld [vmem:[%s12319_s2 + $0x38] sm:$0xff]  ;;  %s11360_s21 = scalar_lea.vmem [#allocation4], %s5781_s9  }
 0x445   : > { %v3471_v53 = vmax.f32 %v3215_v40, 0.0  ;;  %v2958_v54 = vld [vmem:[%s10036_s24 + $0x7f0] sm:$0xff]  ;;  %v3212_v55 = vadd.f32 %v2956_v50, %v2700_v48  ;;  %v3340_v58 = vmax.f32 %v3084_v46, 0.0  ;;  %v3487_v63 = vld [vmem:[%s12319_s2 + $0x78] sm:$0xff] }
 0x446   : > { %v3342_v59 = vmax.f32 %v3086_v47, 0.0  ;;  %v3214_v60 = vadd.f32 %v2958_v54, %v2702_v49  ;;  %4207 = vmatprep.subr.bf16.mxu1 %v3919_v51  ;;  %v3735_v2 = vpack.c.bf16 %v3487_v63, %v3479_v62  ;;  %v3474_v5 = vld [vmem:[%s12319_s2 + $0x10] sm:$0xff]  ;;  %v3491_v8 = vld [vmem:[%s12319_s2 + $0x98] sm:$0xff] }
 0x447   : > { %v3983_v0 = vpack.c.bf16 %v3471_v53, %v3469_v52  ;;  %v3468_v1 = vmax.f32 %v3212_v55, 0.0  ;;  %4167 = vmatmul.mubr.bf16.gmra.mrb[60].mxu1 %v3848_v44  ;;  %v3482_v6 = vld [vmem:[%s12319_s2 + $0x50] sm:$0xff]  ;;  %v3499_v9 = vld [vmem:[%s12319_s2 + $0xd8] sm:$0xff] }
 0x448   : > { %v3918_v3 = vpack.c.bf16 %v3342_v59, %v3340_v58  ;;  %v3470_v4 = vmax.f32 %v3214_v60, 0.0  ;;  %4209 = vmatprep.mubr.bf16.mxu1 %v3731_v61  ;;  %v3478_v10 = vld [vmem:[%s12319_s2 + $0x30] sm:$0xff]  ;;  %v3730_v12 = vpack.c.bf16 %v3482_v6, %v3474_v5  ;;  %v3495_v13 = vld [vmem:[%s12319_s2 + $0xb8] sm:$0xff]  ;;  %v3739_v15 = vpack.c.bf16 %v3499_v9, %v3491_v8 }
 0x449   : > { %4593 = vmatprep.subr.bf16.mxu0 %v3983_v0  ;;  %4553 = vmatmul.mubr.bf16.gmra.mrb[60].mxu0 %v3852_v45  ;;  %v3486_v11 = vld [vmem:[%s12319_s2 + $0x70] sm:$0xff]  ;;  %v3503_v14 = vld [vmem:[%s12319_s2 + $0xf8] sm:$0xff] }
 0x44a   : > { %4208 = vmatpush1.bf16.msra.mxu1 %v3918_v3  ;;  %v3982_v7 = vpack.c.bf16 %v3470_v4, %v3468_v1  ;;  %4595 = vmatprep.mubr.bf16.mxu0 %v3735_v2  ;;  %v3734_v16 = vpack.c.bf16 %v3486_v11, %v3478_v10  ;;  %v3743_v17 = vpack.c.bf16 %v3503_v14, %v3495_v13  ;;  %v3490_v18 = vld [vmem:[%s12319_s2 + $0x90] sm:$0xff]  ;;  %v3507_v20 = vld [vmem:[%s12319_s2 + $0x118] sm:$0xff] }
 0x44b   : > { %v3498_v19 = vld [vmem:[%s12319_s2 + $0xd0] sm:$0xff]  ;;  %v3515_v21 = vld [vmem:[%s12319_s2 + $0x158] sm:$0xff] }
 0x44c   : > { %4594 = vmatpush1.bf16.msra.mxu0 %v3982_v7  ;;  %v3494_v22 = vld [vmem:[%s12319_s2 + $0xb0] sm:$0xff]  ;;  %v3738_v24 = vpack.c.bf16 %v3498_v19, %v3490_v18  ;;  %v3511_v25 = vld [vmem:[%s12319_s2 + $0x138] sm:$0xff]  ;;  %v3747_v27 = vpack.c.bf16 %v3515_v21, %v3507_v20 }
 0x44d   : > { %v3502_v23 = vld [vmem:[%s12319_s2 + $0xf0] sm:$0xff]  ;;  %v3519_v26 = vld [vmem:[%s12319_s2 + $0x178] sm:$0xff] }
 0x44e   : > { %v3742_v28 = vpack.c.bf16 %v3502_v23, %v3494_v22  ;;  %v3751_v29 = vpack.c.bf16 %v3519_v26, %v3511_v25  ;;  %v3506_v30 = vld [vmem:[%s12319_s2 + $0x110] sm:$0xff]  ;;  %v3523_v32 = vld [vmem:[%s12319_s2 + $0x198] sm:$0xff] }
 0x44f   : > { %4210 = vmatmul.mubr.bf16.vlgmr.msra.gmra.mrb[0].mxu1 %v3730_v12  ;;  %v3514_v31 = vld [vmem:[%s12319_s2 + $0x150] sm:$0xff]  ;;  %v3531_v33 = vld [vmem:[%s12319_s2 + $0x1d8] sm:$0xff] }
 0x450   : > { %4219 = vmatprep.mubr.bf16.mxu1 %v3739_v15  ;;  %v3510_v34 = vld [vmem:[%s12319_s2 + $0x130] sm:$0xff]  ;;  %v3746_v36 = vpack.c.bf16 %v3514_v31, %v3506_v30  ;;  %v3527_v37 = vld [vmem:[%s12319_s2 + $0x1b8] sm:$0xff]  ;;  %v3755_v39 = vpack.c.bf16 %v3531_v33, %v3523_v32 }
 0x451   : > { %4596 = vmatmul.mubr.bf16.vlgmr.msra.gmra.mrb[0].mxu0 %v3734_v16  ;;  %v3518_v35 = vld [vmem:[%s12319_s2 + $0x170] sm:$0xff]  ;;  %v3535_v38 = vld [vmem:[%s12319_s2 + $0x1f8] sm:$0xff] }
 0x452   : > { %4605 = vmatprep.mubr.bf16.mxu0 %v3743_v17  ;;  %v3750_v40 = vpack.c.bf16 %v3518_v35, %v3510_v34  ;;  %v3759_v41 = vpack.c.bf16 %v3535_v38, %v3527_v37  ;;  %v3522_v42 = vld [vmem:[%s12319_s2 + $0x190] sm:$0xff]  ;;  %v3539_v44 = vld [vmem:[%s12319_s2 + $0x218] sm:$0xff] }
 0x453   : > { %v3530_v43 = vld [vmem:[%s12319_s2 + $0x1d0] sm:$0xff]  ;;  %v3547_v45 = vld [vmem:[%s12319_s2 + $0x258] sm:$0xff] }
 0x454   : > { %v3526_v46 = vld [vmem:[%s12319_s2 + $0x1b0] sm:$0xff]  ;;  %v3754_v48 = vpack.c.bf16 %v3530_v43, %v3522_v42  ;;  %v3543_v49 = vld [vmem:[%s12319_s2 + $0x238] sm:$0xff]  ;;  %v3763_v51 = vpack.c.bf16 %v3547_v45, %v3539_v44 }
 0x455   : > { %v3534_v47 = vld [vmem:[%s12319_s2 + $0x1f0] sm:$0xff]  ;;  %v3551_v50 = vld [vmem:[%s12319_s2 + $0x278] sm:$0xff] }
 0x456   : > { %v3758_v52 = vpack.c.bf16 %v3534_v47, %v3526_v46  ;;  %v3767_v53 = vpack.c.bf16 %v3551_v50, %v3543_v49  ;;  %v3538_v54 = vld [vmem:[%s12319_s2 + $0x210] sm:$0xff]  ;;  %v3555_v56 = vld [vmem:[%s12319_s2 + $0x298] sm:$0xff] }
 0x457   : > { %4220 = vmatmul.mubr.bf16.gmra.mrb[4].mxu1 %v3738_v24  ;;  %v3546_v55 = vld [vmem:[%s12319_s2 + $0x250] sm:$0xff]  ;;  %v3563_v57 = vld [vmem:[%s12319_s2 + $0x2d8] sm:$0xff] }
 0x458   : > { %4229 = vmatprep.mubr.bf16.mxu1 %v3747_v27  ;;  %v3542_v58 = vld [vmem:[%s12319_s2 + $0x230] sm:$0xff]  ;;  %v3762_v60 = vpack.c.bf16 %v3546_v55, %v3538_v54  ;;  %v3559_v61 = vld [vmem:[%s12319_s2 + $0x2b8] sm:$0xff]  ;;  %v3771_v63 = vpack.c.bf16 %v3563_v57, %v3555_v56 }
 0x459   : > { %4606 = vmatmul.mubr.bf16.gmra.mrb[4].mxu0 %v3742_v28  ;;  %v3550_v59 = vld [vmem:[%s12319_s2 + $0x270] sm:$0xff]  ;;  %v3567_v62 = vld [vmem:[%s12319_s2 + $0x2f8] sm:$0xff] }
 0x45a   : > { %4615 = vmatprep.mubr.bf16.mxu0 %v3751_v29  ;;  %v3766_v0 = vpack.c.bf16 %v3550_v59, %v3542_v58  ;;  %v3775_v1 = vpack.c.bf16 %v3567_v62, %v3559_v61  ;;  %v3554_v2 = vld [vmem:[%s12319_s2 + $0x290] sm:$0xff]  ;;  %v3571_v4 = vld [vmem:[%s12319_s2 + $0x318] sm:$0xff] }
 0x45b   : > { %v3562_v3 = vld [vmem:[%s12319_s2 + $0x2d0] sm:$0xff]  ;;  %v3579_v5 = vld [vmem:[%s12319_s2 + $0x358] sm:$0xff] }
 0x45c   : > { %v3558_v6 = vld [vmem:[%s12319_s2 + $0x2b0] sm:$0xff]  ;;  %v3770_v8 = vpack.c.bf16 %v3562_v3, %v3554_v2  ;;  %v3575_v9 = vld [vmem:[%s12319_s2 + $0x338] sm:$0xff]  ;;  %v3779_v11 = vpack.c.bf16 %v3579_v5, %v3571_v4 }
 0x45d   : > { %v3566_v7 = vld [vmem:[%s12319_s2 + $0x2f0] sm:$0xff]  ;;  %v3583_v10 = vld [vmem:[%s12319_s2 + $0x378] sm:$0xff] }
 0x45e   : > { %v3774_v12 = vpack.c.bf16 %v3566_v7, %v3558_v6  ;;  %v3783_v13 = vpack.c.bf16 %v3583_v10, %v3575_v9  ;;  %v3570_v14 = vld [vmem:[%s12319_s2 + $0x310] sm:$0xff]  ;;  %v3587_v16 = vld [vmem:[%s12319_s2 + $0x398] sm:$0xff] }
 0x45f   : > { %4230 = vmatmul.mubr.bf16.gmra.mrb[8].mxu1 %v3746_v36  ;;  %v3578_v15 = vld [vmem:[%s12319_s2 + $0x350] sm:$0xff]  ;;  %v3595_v17 = vld [vmem:[%s12319_s2 + $0x3d8] sm:$0xff] }
 0x460   : > { %4239 = vmatprep.mubr.bf16.mxu1 %v3755_v39  ;;  %v3574_v18 = vld [vmem:[%s12319_s2 + $0x330] sm:$0xff]  ;;  %v3778_v20 = vpack.c.bf16 %v3578_v15, %v3570_v14  ;;  %v3591_v21 = vld [vmem:[%s12319_s2 + $0x3b8] sm:$0xff]  ;;  %v3787_v23 = vpack.c.bf16 %v3595_v17, %v3587_v16 }
 0x461   : > { %4616 = vmatmul.mubr.bf16.gmra.mrb[8].mxu0 %v3750_v40  ;;  %v3582_v19 = vld [vmem:[%s12319_s2 + $0x370] sm:$0xff]  ;;  %v3599_v22 = vld [vmem:[%s12319_s2 + $0x3f8] sm:$0xff] }
 0x462   : > { %4625 = vmatprep.mubr.bf16.mxu0 %v3759_v41  ;;  %v3782_v24 = vpack.c.bf16 %v3582_v19, %v3574_v18  ;;  %v3791_v25 = vpack.c.bf16 %v3599_v22, %v3591_v21  ;;  %v3586_v26 = vld [vmem:[%s12319_s2 + $0x390] sm:$0xff]  ;;  %v3603_v28 = vld [vmem:[%s12319_s2 + $0x418] sm:$0xff] }
 0x463   : > { %v3594_v27 = vld [vmem:[%s12319_s2 + $0x3d0] sm:$0xff]  ;;  %v3611_v29 = vld [vmem:[%s12319_s2 + $0x458] sm:$0xff] }
 0x464   : > { %v3590_v30 = vld [vmem:[%s12319_s2 + $0x3b0] sm:$0xff]  ;;  %v3786_v32 = vpack.c.bf16 %v3594_v27, %v3586_v26  ;;  %v3607_v33 = vld [vmem:[%s12319_s2 + $0x438] sm:$0xff]  ;;  %v3795_v35 = vpack.c.bf16 %v3611_v29, %v3603_v28 }
 0x465   : > { %v3598_v31 = vld [vmem:[%s12319_s2 + $0x3f0] sm:$0xff]  ;;  %v3615_v34 = vld [vmem:[%s12319_s2 + $0x478] sm:$0xff] }
 0x466   : > { %v3790_v36 = vpack.c.bf16 %v3598_v31, %v3590_v30  ;;  %v3799_v37 = vpack.c.bf16 %v3615_v34, %v3607_v33  ;;  %v3602_v38 = vld [vmem:[%s12319_s2 + $0x410] sm:$0xff]  ;;  %v3619_v40 = vld [vmem:[%s12319_s2 + $0x498] sm:$0xff] }
 0x467   : > { %4240 = vmatmul.mubr.bf16.gmra.mrb[12].mxu1 %v3754_v48  ;;  %v3610_v39 = vld [vmem:[%s12319_s2 + $0x450] sm:$0xff]  ;;  %v3627_v41 = vld [vmem:[%s12319_s2 + $0x4d8] sm:$0xff] }
 0x468   : > { %4249 = vmatprep.mubr.bf16.mxu1 %v3763_v51  ;;  %v3606_v42 = vld [vmem:[%s12319_s2 + $0x430] sm:$0xff]  ;;  %v3794_v44 = vpack.c.bf16 %v3610_v39, %v3602_v38  ;;  %v3623_v45 = vld [vmem:[%s12319_s2 + $0x4b8] sm:$0xff]  ;;  %v3803_v47 = vpack.c.bf16 %v3627_v41, %v3619_v40 }
 0x469   : > { %4626 = vmatmul.mubr.bf16.gmra.mrb[12].mxu0 %v3758_v52  ;;  %v3614_v43 = vld [vmem:[%s12319_s2 + $0x470] sm:$0xff]  ;;  %v3631_v46 = vld [vmem:[%s12319_s2 + $0x4f8] sm:$0xff] }
 0x46a   : > { %4635 = vmatprep.mubr.bf16.mxu0 %v3767_v53  ;;  %v3798_v48 = vpack.c.bf16 %v3614_v43, %v3606_v42  ;;  %v3807_v49 = vpack.c.bf16 %v3631_v46, %v3623_v45  ;;  %v3618_v50 = vld [vmem:[%s12319_s2 + $0x490] sm:$0xff]  ;;  %v3635_v52 = vld [vmem:[%s12319_s2 + $0x518] sm:$0xff] }
 0x46b   : > { %v3626_v51 = vld [vmem:[%s12319_s2 + $0x4d0] sm:$0xff]  ;;  %v3643_v53 = vld [vmem:[%s12319_s2 + $0x558] sm:$0xff] }
 0x46c   : > { %v3622_v54 = vld [vmem:[%s12319_s2 + $0x4b0] sm:$0xff]  ;;  %v3802_v56 = vpack.c.bf16 %v3626_v51, %v3618_v50  ;;  %v3639_v57 = vld [vmem:[%s12319_s2 + $0x538] sm:$0xff]  ;;  %v3811_v59 = vpack.c.bf16 %v3643_v53, %v3635_v52 }
 0x46d   : > { %v3630_v55 = vld [vmem:[%s12319_s2 + $0x4f0] sm:$0xff]  ;;  %v3647_v58 = vld [vmem:[%s12319_s2 + $0x578] sm:$0xff] }
 0x46e   : > { %v3815_v61 = vpack.c.bf16 %v3647_v58, %v3639_v57  ;;  %v3634_v62 = vld [vmem:[%s12319_s2 + $0x510] sm:$0xff]  ;;  %v3655_v5 = vld [vmem:[%s12319_s2 + $0x5b8] sm:$0xff] }
 0x46f   : > { %4250 = vmatmul.mubr.bf16.gmra.mrb[16].mxu1 %v3762_v60  ;;  %v3806_v60 = vpack.c.bf16 %v3630_v55, %v3622_v54  ;;  %v3638_v2 = vld [vmem:[%s12319_s2 + $0x530] sm:$0xff]  ;;  %v3663_v6 = vld [vmem:[%s12319_s2 + $0x5f8] sm:$0xff] }
 0x470   : > { %4259 = vmatprep.mubr.bf16.mxu1 %v3771_v63  ;;  %v3642_v63 = vld [vmem:[%s12319_s2 + $0x550] sm:$0xff]  ;;  %v3823_v9 = vpack.c.bf16 %v3663_v6, %v3655_v5  ;;  %v3671_v17 = vld [vmem:[%s12319_s2 + $0x638] sm:$0xff] }
 0x471   : > { %4636 = vmatmul.mubr.bf16.gmra.mrb[16].mxu0 %v3766_v0  ;;  %v3651_v0 = vld [vmem:[%s12319_s2 + $0x598] sm:$0xff]  ;;  %v3646_v3 = vld [vmem:[%s12319_s2 + $0x570] sm:$0xff]  ;;  %v3810_v4 = vpack.c.bf16 %v3642_v63, %v3634_v62 }
 0x472   : > { %4645 = vmatprep.mubr.bf16.mxu0 %v3775_v1  ;;  %v3659_v1 = vld [vmem:[%s12319_s2 + $0x5d8] sm:$0xff]  ;;  %v3650_v10 = vld [vmem:[%s12319_s2 + $0x590] sm:$0xff] }
 0x473   : > { %v3819_v7 = vpack.c.bf16 %v3659_v1, %v3651_v0  ;;  %v3654_v14 = vld [vmem:[%s12319_s2 + $0x5b0] sm:$0xff]  ;;  %v3679_v18 = vld [vmem:[%s12319_s2 + $0x678] sm:$0xff] }
 0x474   : > { %v3662_v15 = vld [vmem:[%s12319_s2 + $0x5f0] sm:$0xff]  ;;  %v3831_v21 = vpack.c.bf16 %v3679_v18, %v3671_v17  ;;  %v3687_v29 = vld [vmem:[%s12319_s2 + $0x6b8] sm:$0xff] }
 0x475   : > { %v3666_v22 = vld [vmem:[%s12319_s2 + $0x610] sm:$0xff]  ;;  %v3695_v30 = vld [vmem:[%s12319_s2 + $0x6f8] sm:$0xff] }
 0x476   : > { %v3670_v26 = vld [vmem:[%s12319_s2 + $0x630] sm:$0xff]  ;;  %v3839_v33 = vpack.c.bf16 %v3695_v30, %v3687_v29  ;;  %v3703_v41 = vld [vmem:[%s12319_s2 + $0x738] sm:$0xff] }
 0x477   : > { %4260 = vmatmul.mubr.bf16.gmra.mrb[20].mxu1 %v3770_v8  ;;  %v3814_v8 = vpack.c.bf16 %v3646_v3, %v3638_v2  ;;  %v3678_v27 = vld [vmem:[%s12319_s2 + $0x670] sm:$0xff]  ;;  %v3711_v42 = vld [vmem:[%s12319_s2 + $0x778] sm:$0xff] }
 0x478   : > { %4269 = vmatprep.mubr.bf16.mxu1 %v3779_v11  ;;  %v3658_v11 = vld [vmem:[%s12319_s2 + $0x5d0] sm:$0xff]  ;;  %v3847_v45 = vpack.c.bf16 %v3711_v42, %v3703_v41  ;;  %v3719_v53 = vld [vmem:[%s12319_s2 + $0x7b8] sm:$0xff] }
 0x479   : > { %4646 = vmatmul.mubr.bf16.gmra.mrb[20].mxu0 %v3774_v12  ;;  %v3667_v12 = vld [vmem:[%s12319_s2 + $0x618] sm:$0xff]  ;;  %v3818_v16 = vpack.c.bf16 %v3658_v11, %v3650_v10  ;;  %v3682_v34 = vld [vmem:[%s12319_s2 + $0x690] sm:$0xff] }
 0x47a   : > { %4655 = vmatprep.mubr.bf16.mxu0 %v3783_v13  ;;  %v3675_v13 = vld [vmem:[%s12319_s2 + $0x658] sm:$0xff]  ;;  %v3686_v38 = vld [vmem:[%s12319_s2 + $0x6b0] sm:$0xff] }
 0x47b   : > { %v3827_v19 = vpack.c.bf16 %v3675_v13, %v3667_v12  ;;  %v3694_v39 = vld [vmem:[%s12319_s2 + $0x6f0] sm:$0xff]  ;;  %v3727_v54 = vld [vmem:[%s12319_s2 + $0x7f8] sm:$0xff] }
 0x47c   : > { %v3698_v46 = vld [vmem:[%s12319_s2 + $0x710] sm:$0xff]  ;;  %v3855_v57 = vpack.c.bf16 %v3727_v54, %v3719_v53 }
 0x47d   : > { %v3702_v50 = vld [vmem:[%s12319_s2 + $0x730] sm:$0xff] }
 0x47e   : > { %v3710_v51 = vld [vmem:[%s12319_s2 + $0x770] sm:$0xff] }
 0x47f   : > { %4270 = vmatmul.mubr.bf16.gmra.mrb[24].mxu1 %v3778_v20  ;;  %v3822_v20 = vpack.c.bf16 %v3662_v15, %v3654_v14  ;;  %v3714_v58 = vld [vmem:[%s12319_s2 + $0x790] sm:$0xff] }
 0x480   : > { %4279 = vmatprep.mubr.bf16.mxu1 %v3787_v23  ;;  %v3674_v23 = vld [vmem:[%s12319_s2 + $0x650] sm:$0xff] }
 0x481   : > { %4656 = vmatmul.mubr.bf16.gmra.mrb[24].mxu0 %v3782_v24  ;;  %v3683_v24 = vld [vmem:[%s12319_s2 + $0x698] sm:$0xff]  ;;  %v3826_v28 = vpack.c.bf16 %v3674_v23, %v3666_v22 }
 0x482   : > { %4665 = vmatprep.mubr.bf16.mxu0 %v3791_v25  ;;  %v3691_v25 = vld [vmem:[%s12319_s2 + $0x6d8] sm:$0xff] }
 0x483   : > { %v3835_v31 = vpack.c.bf16 %v3691_v25, %v3683_v24 }
 0x487   : > { %4280 = vmatmul.mubr.bf16.gmra.mrb[28].mxu1 %v3786_v32  ;;  %v3830_v32 = vpack.c.bf16 %v3678_v27, %v3670_v26 }
 0x488   : > { %4289 = vmatprep.mubr.bf16.mxu1 %v3795_v35  ;;  %v3690_v35 = vld [vmem:[%s12319_s2 + $0x6d0] sm:$0xff] }
 0x489   : > { %4666 = vmatmul.mubr.bf16.gmra.mrb[28].mxu0 %v3790_v36  ;;  %v3699_v36 = vld [vmem:[%s12319_s2 + $0x718] sm:$0xff]  ;;  %v3834_v40 = vpack.c.bf16 %v3690_v35, %v3682_v34 }
 0x48a   : > { %4675 = vmatprep.mubr.bf16.mxu0 %v3799_v37  ;;  %v3707_v37 = vld [vmem:[%s12319_s2 + $0x758] sm:$0xff] }
 0x48b   : > { %v3843_v43 = vpack.c.bf16 %v3707_v37, %v3699_v36 }
 0x48f   : > { %4290 = vmatmul.mubr.bf16.gmra.mrb[32].mxu1 %v3794_v44  ;;  %v3838_v44 = vpack.c.bf16 %v3694_v39, %v3686_v38 }
 0x490   : > { %4299 = vmatprep.mubr.bf16.mxu1 %v3803_v47  ;;  %v3706_v47 = vld [vmem:[%s12319_s2 + $0x750] sm:$0xff] }
 0x491   : > { %4676 = vmatmul.mubr.bf16.gmra.mrb[32].mxu0 %v3798_v48  ;;  %v3715_v48 = vld [vmem:[%s12319_s2 + $0x798] sm:$0xff]  ;;  %v3842_v52 = vpack.c.bf16 %v3706_v47, %v3698_v46 }
 0x492   : > { %4685 = vmatprep.mubr.bf16.mxu0 %v3807_v49  ;;  %v3723_v49 = vld [vmem:[%s12319_s2 + $0x7d8] sm:$0xff] }
 0x493   : > { %v3851_v55 = vpack.c.bf16 %v3723_v49, %v3715_v48 }
 0x497   : > { %4300 = vmatmul.mubr.bf16.gmra.mrb[36].mxu1 %v3802_v56  ;;  %v3846_v56 = vpack.c.bf16 %v3710_v51, %v3702_v50 }
 0x498   : > { %4309 = vmatprep.mubr.bf16.mxu1 %v3811_v59  ;;  %v3722_v59 = vld [vmem:[%s12319_s2 + $0x7d0] sm:$0xff] }
 0x499   : > { %4686 = vmatmul.mubr.bf16.gmra.mrb[36].mxu0 %v3806_v60  ;;  %v3718_v60 = vld [vmem:[%s12319_s2 + $0x7b0] sm:$0xff]  ;;  %v3850_v62 = vpack.c.bf16 %v3722_v59, %v3714_v58 }
 0x49a   : > { %4695 = vmatprep.mubr.bf16.mxu0 %v3815_v61  ;;  %v3726_v61 = vld [vmem:[%s12319_s2 + $0x7f0] sm:$0xff] }
 0x49b   : > { %v3854_v63 = vpack.c.bf16 %v3726_v61, %v3718_v60 }
 0x49f   : > { %4310 = vmatmul.mubr.bf16.gmra.mrb[40].mxu1 %v3810_v4 }
 0x4a0   : > { %4319 = vmatprep.mubr.bf16.mxu1 %v3819_v7 }
 0x4a1   : > { %4696 = vmatmul.mubr.bf16.gmra.mrb[40].mxu0 %v3814_v8 }
 0x4a2   : > { %4705 = vmatprep.mubr.bf16.mxu0 %v3823_v9 }
 0x4a7   : > { %4320 = vmatmul.mubr.bf16.gmra.mrb[44].mxu1 %v3818_v16 }
 0x4a8   : > { %4329 = vmatprep.mubr.bf16.mxu1 %v3827_v19 }
 0x4a9   : > { %4706 = vmatmul.mubr.bf16.gmra.mrb[44].mxu0 %v3822_v20 }
 0x4aa   : > { %4715 = vmatprep.mubr.bf16.mxu0 %v3831_v21 }
 0x4af   : > { %4330 = vmatmul.mubr.bf16.gmra.mrb[48].mxu1 %v3826_v28 }
 0x4b0   : > { %4339 = vmatprep.mubr.bf16.mxu1 %v3835_v31 }
 0x4b1   : > { %4716 = vmatmul.mubr.bf16.gmra.mrb[48].mxu0 %v3830_v32 }
 0x4b2   : > { %4725 = vmatprep.mubr.bf16.mxu0 %v3839_v33 }
 0x4b7   : > { %4340 = vmatmul.mubr.bf16.gmra.mrb[52].mxu1 %v3834_v40 }
 0x4b8   : > { %4349 = vmatprep.mubr.bf16.mxu1 %v3843_v43 }
 0x4b9   : > { %4726 = vmatmul.mubr.bf16.gmra.mrb[52].mxu0 %v3838_v44 }
 0x4ba   : > { %4735 = vmatprep.mubr.bf16.mxu0 %v3847_v45 }
 0x4bf   : > { %4350 = vmatmul.mubr.bf16.gmra.mrb[56].mxu1 %v3842_v52 }
 0x4c0   : > { %4359 = vmatprep.mubr.bf16.mxu1 %v3851_v55 }
 0x4c1   : > { %4736 = vmatmul.mubr.bf16.gmra.mrb[56].mxu0 %v3846_v56 }
 0x4c2   : > { %4745 = vmatprep.mubr.bf16.mxu0 %v3855_v57 }
 0x4c7   : > { %4360 = vmatmul.mubr.bf16.gmra.mrb[60].mxu1 %v3850_v62 }
 0x4c9   : > { %4746 = vmatmul.mubr.bf16.gmra.mrb[60].mxu0 %v3854_v63 }
 0x522   : > { %v4211_v0 = vpop.f32.mrb[0].mxu1 }
 0x523   : > { %v4213_v1 = vpop.f32.mrb[1].mxu1 }
 0x524   : > { %v4597_v2 = vpop.f32.mrb[0].mxu0  ;;  %v4215_v3 = vpop.f32.mrb[2].mxu1 }
 0x525   : > { %v5818_v4 = vadd.f32 %v4597_v2, %v4211_v0  ;;  %v4599_v5 = vpop.f32.mrb[1].mxu0  ;;  %v4217_v6 = vpop.f32.mrb[3].mxu1 }
 0x526   : > { %v5819_v7 = vadd.f32 %v4599_v5, %v4213_v1  ;;  %v4601_v8 = vpop.f32.mrb[2].mxu0 }
 0x527   : > { %4756 = vst [vmem:[%s11360_s21] sm:$0xff] %v5818_v4  ;;  %v5820_v9 = vadd.f32 %v4601_v8, %v4215_v3  ;;  %v4603_v10 = vpop.f32.mrb[3].mxu0 }
 0x528   : > { %4757 = vst [vmem:[%s11360_s21 + $0x8] sm:$0xff] %v5819_v7  ;;  %v5821_v11 = vadd.f32 %v4603_v10, %v4217_v6 }
 0x529   : > { %4758 = vst [vmem:[%s11360_s21 + $0x10] sm:$0xff] %v5820_v9 }
 0x52a   : > { %4759 = vst [vmem:[%s11360_s21 + $0x18] sm:$0xff] %v5821_v11  ;;  %v4221_v12 = vpop.f32.mrb[4].mxu1 }
 0x52b   : > { %v4223_v13 = vpop.f32.mrb[5].mxu1 }
 0x52c   : > { %v4607_v14 = vpop.f32.mrb[4].mxu0  ;;  %v4225_v15 = vpop.f32.mrb[6].mxu1 }
 0x52d   : > { %v5822_v16 = vadd.f32 %v4607_v14, %v4221_v12  ;;  %v4609_v17 = vpop.f32.mrb[5].mxu0  ;;  %v4227_v18 = vpop.f32.mrb[7].mxu1 }
 0x52e   : > { %v5823_v19 = vadd.f32 %v4609_v17, %v4223_v13  ;;  %v4611_v20 = vpop.f32.mrb[6].mxu0 }
 0x52f   : > { %4760 = vst [vmem:[%s11360_s21 + $0x20] sm:$0xff] %v5822_v16  ;;  %v5824_v21 = vadd.f32 %v4611_v20, %v4225_v15  ;;  %v4613_v22 = vpop.f32.mrb[7].mxu0 }
 0x530   : > { %4761 = vst [vmem:[%s11360_s21 + $0x28] sm:$0xff] %v5823_v19  ;;  %v5825_v23 = vadd.f32 %v4613_v22, %v4227_v18 }
 0x531   : > { %4762 = vst [vmem:[%s11360_s21 + $0x30] sm:$0xff] %v5824_v21 }
 0x532   : > { %4763 = vst [vmem:[%s11360_s21 + $0x38] sm:$0xff] %v5825_v23  ;;  %v4231_v24 = vpop.f32.mrb[8].mxu1 }
 0x533   : > { %v4233_v25 = vpop.f32.mrb[9].mxu1 }
 0x534   : > { %v4617_v26 = vpop.f32.mrb[8].mxu0  ;;  %v4235_v27 = vpop.f32.mrb[10].mxu1 }
 0x535   : > { %v5826_v28 = vadd.f32 %v4617_v26, %v4231_v24  ;;  %v4619_v29 = vpop.f32.mrb[9].mxu0  ;;  %v4237_v30 = vpop.f32.mrb[11].mxu1 }
 0x536   : > { %v5827_v31 = vadd.f32 %v4619_v29, %v4233_v25  ;;  %v4621_v32 = vpop.f32.mrb[10].mxu0 }
 0x537   : > { %4764 = vst [vmem:[%s11360_s21 + $0x40] sm:$0xff] %v5826_v28  ;;  %v5828_v33 = vadd.f32 %v4621_v32, %v4235_v27  ;;  %v4623_v34 = vpop.f32.mrb[11].mxu0 }
 0x538   : > { %4765 = vst [vmem:[%s11360_s21 + $0x48] sm:$0xff] %v5827_v31  ;;  %v5829_v35 = vadd.f32 %v4623_v34, %v4237_v30 }
 0x539   : > { %4766 = vst [vmem:[%s11360_s21 + $0x50] sm:$0xff] %v5828_v33 }
 0x53a   : > { %4767 = vst [vmem:[%s11360_s21 + $0x58] sm:$0xff] %v5829_v35  ;;  %v4241_v36 = vpop.f32.mrb[12].mxu1 }
 0x53b   : > { %v4243_v37 = vpop.f32.mrb[13].mxu1 }
 0x53c   : > { %v4627_v38 = vpop.f32.mrb[12].mxu0  ;;  %v4245_v39 = vpop.f32.mrb[14].mxu1 }
 0x53d   : > { %v5830_v40 = vadd.f32 %v4627_v38, %v4241_v36  ;;  %v4629_v41 = vpop.f32.mrb[13].mxu0  ;;  %v4247_v42 = vpop.f32.mrb[15].mxu1 }
 0x53e   : > { %v5831_v43 = vadd.f32 %v4629_v41, %v4243_v37  ;;  %v4631_v44 = vpop.f32.mrb[14].mxu0 }
 0x53f   : > { %4768 = vst [vmem:[%s11360_s21 + $0x60] sm:$0xff] %v5830_v40  ;;  %v5832_v45 = vadd.f32 %v4631_v44, %v4245_v39  ;;  %v4633_v46 = vpop.f32.mrb[15].mxu0 }
 0x540   : > { %4769 = vst [vmem:[%s11360_s21 + $0x68] sm:$0xff] %v5831_v43  ;;  %v5833_v47 = vadd.f32 %v4633_v46, %v4247_v42 }
 0x541   : > { %4770 = vst [vmem:[%s11360_s21 + $0x70] sm:$0xff] %v5832_v45 }
 0x542   : > { %4771 = vst [vmem:[%s11360_s21 + $0x78] sm:$0xff] %v5833_v47  ;;  %v4251_v48 = vpop.f32.mrb[16].mxu1 }
 0x543   : > { %v4253_v49 = vpop.f32.mrb[17].mxu1 }
 0x544   : > { %v4637_v50 = vpop.f32.mrb[16].mxu0  ;;  %v4255_v51 = vpop.f32.mrb[18].mxu1 }
 0x545   : > { %v5834_v52 = vadd.f32 %v4637_v50, %v4251_v48  ;;  %v4639_v53 = vpop.f32.mrb[17].mxu0  ;;  %v4257_v54 = vpop.f32.mrb[19].mxu1 }
 0x546   : > { %v5835_v55 = vadd.f32 %v4639_v53, %v4253_v49  ;;  %v4641_v56 = vpop.f32.mrb[18].mxu0 }
 0x547   : > { %4772 = vst [vmem:[%s11360_s21 + $0x80] sm:$0xff] %v5834_v52  ;;  %v5836_v57 = vadd.f32 %v4641_v56, %v4255_v51  ;;  %v4643_v58 = vpop.f32.mrb[19].mxu0 }
 0x548   : > { %4773 = vst [vmem:[%s11360_s21 + $0x88] sm:$0xff] %v5835_v55  ;;  %v5837_v59 = vadd.f32 %v4643_v58, %v4257_v54 }
 0x549   : > { %4774 = vst [vmem:[%s11360_s21 + $0x90] sm:$0xff] %v5836_v57 }
 0x54a   : > { %4775 = vst [vmem:[%s11360_s21 + $0x98] sm:$0xff] %v5837_v59  ;;  %v4261_v60 = vpop.f32.mrb[20].mxu1 }
 0x54b   : > { %v4263_v61 = vpop.f32.mrb[21].mxu1 }
 0x54c   : > { %v4647_v62 = vpop.f32.mrb[20].mxu0  ;;  %v4265_v63 = vpop.f32.mrb[22].mxu1 }
 0x54d   : > { %v5838_v0 = vadd.f32 %v4647_v62, %v4261_v60  ;;  %v4649_v1 = vpop.f32.mrb[21].mxu0  ;;  %v4267_v2 = vpop.f32.mrb[23].mxu1 }
 0x54e   : > { %v5839_v3 = vadd.f32 %v4649_v1, %v4263_v61  ;;  %v4651_v4 = vpop.f32.mrb[22].mxu0 }
 0x54f   : > { %4776 = vst [vmem:[%s11360_s21 + $0xa0] sm:$0xff] %v5838_v0  ;;  %v5840_v5 = vadd.f32 %v4651_v4, %v4265_v63  ;;  %v4653_v6 = vpop.f32.mrb[23].mxu0 }
 0x550   : > { %4777 = vst [vmem:[%s11360_s21 + $0xa8] sm:$0xff] %v5839_v3  ;;  %v5841_v7 = vadd.f32 %v4653_v6, %v4267_v2 }
 0x551   : > { %4778 = vst [vmem:[%s11360_s21 + $0xb0] sm:$0xff] %v5840_v5 }
 0x552   : > { %4779 = vst [vmem:[%s11360_s21 + $0xb8] sm:$0xff] %v5841_v7  ;;  %v4271_v8 = vpop.f32.mrb[24].mxu1 }
 0x553   : > { %v4273_v9 = vpop.f32.mrb[25].mxu1 }
 0x554   : > { %v4657_v10 = vpop.f32.mrb[24].mxu0  ;;  %v4275_v11 = vpop.f32.mrb[26].mxu1 }
 0x555   : > { %v5842_v12 = vadd.f32 %v4657_v10, %v4271_v8  ;;  %v4659_v13 = vpop.f32.mrb[25].mxu0  ;;  %v4277_v14 = vpop.f32.mrb[27].mxu1 }
 0x556   : > { %v5843_v15 = vadd.f32 %v4659_v13, %v4273_v9  ;;  %v4661_v16 = vpop.f32.mrb[26].mxu0 }
 0x557   : > { %4780 = vst [vmem:[%s11360_s21 + $0xc0] sm:$0xff] %v5842_v12  ;;  %v5844_v17 = vadd.f32 %v4661_v16, %v4275_v11  ;;  %v4663_v18 = vpop.f32.mrb[27].mxu0 }
 0x558   : > { %4781 = vst [vmem:[%s11360_s21 + $0xc8] sm:$0xff] %v5843_v15  ;;  %v5845_v19 = vadd.f32 %v4663_v18, %v4277_v14 }
 0x559   : > { %4782 = vst [vmem:[%s11360_s21 + $0xd0] sm:$0xff] %v5844_v17 }
 0x55a   : > { %4783 = vst [vmem:[%s11360_s21 + $0xd8] sm:$0xff] %v5845_v19  ;;  %v4281_v20 = vpop.f32.mrb[28].mxu1 }
 0x55b   : > { %v4283_v21 = vpop.f32.mrb[29].mxu1 }
 0x55c   : > { %v4667_v22 = vpop.f32.mrb[28].mxu0  ;;  %v4285_v23 = vpop.f32.mrb[30].mxu1 }
 0x55d   : > { %v5846_v24 = vadd.f32 %v4667_v22, %v4281_v20  ;;  %v4669_v25 = vpop.f32.mrb[29].mxu0  ;;  %v4287_v26 = vpop.f32.mrb[31].mxu1 }
 0x55e   : > { %v5847_v27 = vadd.f32 %v4669_v25, %v4283_v21  ;;  %v4671_v28 = vpop.f32.mrb[30].mxu0 }
 0x55f   : > { %4784 = vst [vmem:[%s11360_s21 + $0xe0] sm:$0xff] %v5846_v24  ;;  %v5848_v29 = vadd.f32 %v4671_v28, %v4285_v23  ;;  %v4673_v30 = vpop.f32.mrb[31].mxu0 }
 0x560   : > { %4785 = vst [vmem:[%s11360_s21 + $0xe8] sm:$0xff] %v5847_v27  ;;  %v5849_v31 = vadd.f32 %v4673_v30, %v4287_v26 }
 0x561   : > { %4786 = vst [vmem:[%s11360_s21 + $0xf0] sm:$0xff] %v5848_v29 }
 0x562   : > { %4787 = vst [vmem:[%s11360_s21 + $0xf8] sm:$0xff] %v5849_v31  ;;  %v4291_v32 = vpop.f32.mrb[32].mxu1 }
 0x563   : > { %v4293_v33 = vpop.f32.mrb[33].mxu1 }
 0x564   : > { %v4677_v34 = vpop.f32.mrb[32].mxu0  ;;  %v4295_v35 = vpop.f32.mrb[34].mxu1 }
 0x565   : > { %v5850_v36 = vadd.f32 %v4677_v34, %v4291_v32  ;;  %v4679_v37 = vpop.f32.mrb[33].mxu0  ;;  %v4297_v38 = vpop.f32.mrb[35].mxu1 }
 0x566   : > { %v5851_v39 = vadd.f32 %v4679_v37, %v4293_v33  ;;  %v4681_v40 = vpop.f32.mrb[34].mxu0 }
 0x567   : > { %4788 = vst [vmem:[%s11360_s21 + $0x100] sm:$0xff] %v5850_v36  ;;  %v5852_v41 = vadd.f32 %v4681_v40, %v4295_v35  ;;  %v4683_v42 = vpop.f32.mrb[35].mxu0 }
 0x568   : > { %4789 = vst [vmem:[%s11360_s21 + $0x108] sm:$0xff] %v5851_v39  ;;  %v5853_v43 = vadd.f32 %v4683_v42, %v4297_v38 }
 0x569   : > { %4790 = vst [vmem:[%s11360_s21 + $0x110] sm:$0xff] %v5852_v41 }
 0x56a   : > { %4791 = vst [vmem:[%s11360_s21 + $0x118] sm:$0xff] %v5853_v43  ;;  %v4301_v44 = vpop.f32.mrb[36].mxu1 }
 0x56b   : > { %v4303_v45 = vpop.f32.mrb[37].mxu1 }
 0x56c   : > { %v4687_v46 = vpop.f32.mrb[36].mxu0  ;;  %v4305_v47 = vpop.f32.mrb[38].mxu1 }
 0x56d   : > { %v5854_v48 = vadd.f32 %v4687_v46, %v4301_v44  ;;  %v4689_v49 = vpop.f32.mrb[37].mxu0  ;;  %v4307_v50 = vpop.f32.mrb[39].mxu1 }
 0x56e   : > { %v5855_v51 = vadd.f32 %v4689_v49, %v4303_v45  ;;  %v4691_v52 = vpop.f32.mrb[38].mxu0 }
 0x56f   : > { %4792 = vst [vmem:[%s11360_s21 + $0x120] sm:$0xff] %v5854_v48  ;;  %v5856_v53 = vadd.f32 %v4691_v52, %v4305_v47  ;;  %v4693_v54 = vpop.f32.mrb[39].mxu0 }
 0x570   : > { %4793 = vst [vmem:[%s11360_s21 + $0x128] sm:$0xff] %v5855_v51  ;;  %v5857_v55 = vadd.f32 %v4693_v54, %v4307_v50 }
 0x571   : > { %4794 = vst [vmem:[%s11360_s21 + $0x130] sm:$0xff] %v5856_v53 }
 0x572   : > { %4795 = vst [vmem:[%s11360_s21 + $0x138] sm:$0xff] %v5857_v55  ;;  %v4311_v56 = vpop.f32.mrb[40].mxu1 }
 0x573   : > { %v4313_v57 = vpop.f32.mrb[41].mxu1 }
 0x574   : > { %v4697_v58 = vpop.f32.mrb[40].mxu0  ;;  %v4315_v59 = vpop.f32.mrb[42].mxu1 }
 0x575   : > { %v5858_v60 = vadd.f32 %v4697_v58, %v4311_v56  ;;  %v4699_v61 = vpop.f32.mrb[41].mxu0  ;;  %v4317_v62 = vpop.f32.mrb[43].mxu1 }
 0x576   : > { %v5859_v63 = vadd.f32 %v4699_v61, %v4313_v57  ;;  %v4701_v0 = vpop.f32.mrb[42].mxu0 }
 0x577   : > { %4796 = vst [vmem:[%s11360_s21 + $0x140] sm:$0xff] %v5858_v60  ;;  %v5860_v1 = vadd.f32 %v4701_v0, %v4315_v59  ;;  %v4703_v2 = vpop.f32.mrb[43].mxu0 }
 0x578   : > { %4797 = vst [vmem:[%s11360_s21 + $0x148] sm:$0xff] %v5859_v63  ;;  %v5861_v3 = vadd.f32 %v4703_v2, %v4317_v62 }
 0x579   : > { %4798 = vst [vmem:[%s11360_s21 + $0x150] sm:$0xff] %v5860_v1 }
 0x57a   : > { %4799 = vst [vmem:[%s11360_s21 + $0x158] sm:$0xff] %v5861_v3  ;;  %v4321_v4 = vpop.f32.mrb[44].mxu1 }
 0x57b   : > { %v4323_v5 = vpop.f32.mrb[45].mxu1 }
 0x57c   : > { %v4707_v6 = vpop.f32.mrb[44].mxu0  ;;  %v4325_v7 = vpop.f32.mrb[46].mxu1 }
 0x57d   : > { %v5862_v8 = vadd.f32 %v4707_v6, %v4321_v4  ;;  %v4709_v9 = vpop.f32.mrb[45].mxu0  ;;  %v4327_v10 = vpop.f32.mrb[47].mxu1 }
 0x57e   : > { %v5863_v11 = vadd.f32 %v4709_v9, %v4323_v5  ;;  %v4711_v12 = vpop.f32.mrb[46].mxu0 }
 0x57f   : > { %4800 = vst [vmem:[%s11360_s21 + $0x160] sm:$0xff] %v5862_v8  ;;  %v5864_v13 = vadd.f32 %v4711_v12, %v4325_v7  ;;  %v4713_v14 = vpop.f32.mrb[47].mxu0 }
 0x580   : > { %4801 = vst [vmem:[%s11360_s21 + $0x168] sm:$0xff] %v5863_v11  ;;  %v5865_v15 = vadd.f32 %v4713_v14, %v4327_v10 }
 0x581   : > { %4802 = vst [vmem:[%s11360_s21 + $0x170] sm:$0xff] %v5864_v13 }
 0x582   : > { %4803 = vst [vmem:[%s11360_s21 + $0x178] sm:$0xff] %v5865_v15  ;;  %v4331_v16 = vpop.f32.mrb[48].mxu1 }
 0x583   : > { %v4333_v17 = vpop.f32.mrb[49].mxu1 }
 0x584   : > { %v4717_v18 = vpop.f32.mrb[48].mxu0  ;;  %v4335_v19 = vpop.f32.mrb[50].mxu1 }
 0x585   : > { %v5866_v20 = vadd.f32 %v4717_v18, %v4331_v16  ;;  %v4719_v21 = vpop.f32.mrb[49].mxu0  ;;  %v4337_v22 = vpop.f32.mrb[51].mxu1 }
 0x586   : > { %v5867_v23 = vadd.f32 %v4719_v21, %v4333_v17  ;;  %v4721_v24 = vpop.f32.mrb[50].mxu0 }
 0x587   : > { %4804 = vst [vmem:[%s11360_s21 + $0x180] sm:$0xff] %v5866_v20  ;;  %v5868_v25 = vadd.f32 %v4721_v24, %v4335_v19  ;;  %v4723_v26 = vpop.f32.mrb[51].mxu0 }
 0x588   : > { %4805 = vst [vmem:[%s11360_s21 + $0x188] sm:$0xff] %v5867_v23  ;;  %v5869_v27 = vadd.f32 %v4723_v26, %v4337_v22 }
 0x589   : > { %4806 = vst [vmem:[%s11360_s21 + $0x190] sm:$0xff] %v5868_v25 }
 0x58a   : > { %4807 = vst [vmem:[%s11360_s21 + $0x198] sm:$0xff] %v5869_v27  ;;  %v4341_v28 = vpop.f32.mrb[52].mxu1 }
 0x58b   : > { %v4343_v29 = vpop.f32.mrb[53].mxu1 }
 0x58c   : > { %v4727_v30 = vpop.f32.mrb[52].mxu0  ;;  %v4345_v31 = vpop.f32.mrb[54].mxu1 }
 0x58d   : > { %v5870_v32 = vadd.f32 %v4727_v30, %v4341_v28  ;;  %v4729_v33 = vpop.f32.mrb[53].mxu0  ;;  %v4347_v34 = vpop.f32.mrb[55].mxu1 }
 0x58e   : > { %v5871_v35 = vadd.f32 %v4729_v33, %v4343_v29  ;;  %v4731_v36 = vpop.f32.mrb[54].mxu0 }
 0x58f   : > { %4808 = vst [vmem:[%s11360_s21 + $0x1a0] sm:$0xff] %v5870_v32  ;;  %v5872_v37 = vadd.f32 %v4731_v36, %v4345_v31  ;;  %v4733_v38 = vpop.f32.mrb[55].mxu0 }
 0x590   : > { %4809 = vst [vmem:[%s11360_s21 + $0x1a8] sm:$0xff] %v5871_v35  ;;  %v5873_v39 = vadd.f32 %v4733_v38, %v4347_v34 }
 0x591   : > { %4810 = vst [vmem:[%s11360_s21 + $0x1b0] sm:$0xff] %v5872_v37 }
 0x592   : > { %4811 = vst [vmem:[%s11360_s21 + $0x1b8] sm:$0xff] %v5873_v39  ;;  %v4351_v40 = vpop.f32.mrb[56].mxu1 }
 0x593   : > { %v4353_v41 = vpop.f32.mrb[57].mxu1 }
 0x594   : > { %v4737_v42 = vpop.f32.mrb[56].mxu0  ;;  %v4355_v43 = vpop.f32.mrb[58].mxu1 }
 0x595   : > { %v5874_v44 = vadd.f32 %v4737_v42, %v4351_v40  ;;  %v4739_v45 = vpop.f32.mrb[57].mxu0  ;;  %v4357_v46 = vpop.f32.mrb[59].mxu1 }
 0x596   : > { %v5875_v47 = vadd.f32 %v4739_v45, %v4353_v41  ;;  %v4741_v48 = vpop.f32.mrb[58].mxu0 }
 0x597   : > { %4812 = vst [vmem:[%s11360_s21 + $0x1c0] sm:$0xff] %v5874_v44  ;;  %v5876_v49 = vadd.f32 %v4741_v48, %v4355_v43  ;;  %v4743_v50 = vpop.f32.mrb[59].mxu0 }
 0x598   : > { %4813 = vst [vmem:[%s11360_s21 + $0x1c8] sm:$0xff] %v5875_v47  ;;  %v5877_v51 = vadd.f32 %v4743_v50, %v4357_v46 }
 0x599   : > { %4814 = vst [vmem:[%s11360_s21 + $0x1d0] sm:$0xff] %v5876_v49 }
 0x59a   : > { %4815 = vst [vmem:[%s11360_s21 + $0x1d8] sm:$0xff] %v5877_v51  ;;  %v4361_v52 = vpop.f32.mrb[60].mxu1 }
 0x59b   : > { %v4363_v53 = vpop.f32.mrb[61].mxu1 }
 0x59c   : > { %v4747_v54 = vpop.f32.mrb[60].mxu0  ;;  %v4365_v55 = vpop.f32.mrb[62].mxu1  ;;  %4826 = sbr.rel (!%p6677_p6) target bundleno = 1678 (0x68e), region = 140 }
 0x59d   : > { %v5878_v56 = vadd.f32 %v4747_v54, %v4361_v52  ;;  %v4749_v57 = vpop.f32.mrb[61].mxu0  ;;  %v4367_v58 = vpop.f32.mrb[63].mxu1 }
 0x59e   : > { %v5879_v59 = vadd.f32 %v4749_v57, %v4363_v53  ;;  %v4751_v60 = vpop.f32.mrb[62].mxu0 }
 0x59f   : > { %4816 = vst [vmem:[%s11360_s21 + $0x1e0] sm:$0xff] %v5878_v56  ;;  %v5880_v61 = vadd.f32 %v4751_v60, %v4365_v55  ;;  %v4753_v62 = vpop.f32.mrb[63].mxu0 }
 0x5a0   : > { %4817 = vst [vmem:[%s11360_s21 + $0x1e8] sm:$0xff] %v5879_v59  ;;  %v5881_v63 = vadd.f32 %v4753_v62, %v4367_v58 }
 0x5a1   : > { %4818 = vst [vmem:[%s11360_s21 + $0x1f0] sm:$0xff] %v5880_v61 }
 0x5a2   : > { %4819 = vst [vmem:[%s11360_s21 + $0x1f8] sm:$0xff] %v5881_v63 }
 0x5a3   : > { %s12382_s4 = smov (!%p4829_p5, %s4828_s4), 2 }
 0x5a4   : > { %s5784_s25 = sshll.u32 %s12382_s4, 12  ;;  %s11435_s26 = sshll.u32 %s12382_s4, 3 }
 0x5a5   : > { %p5788_p3 = scmp.eq.s32.totalorder %s5784_s25, 0 }
 0x5a6   : > { %p4841_p7 = scmp.lt.u32.totalorder (!%p5788_p3), %s11435_s26, 8 }
 0x5a7   : > { %4840 = sbr.rel (%p5788_p3) target bundleno = 1678 (0x68e), region = 144 }
 0x5ae   : > { %4844 = sbr.rel (%p4841_p7) target bundleno = 1643 (0x66b), region = 148  ;;  %s11439_s22 = sand.u32 (!%p4841_p7), 7, %s11435_s26  }
 0x5af   : > { %p4922_p6 = scmp.eq.s32.totalorder (!%p4841_p7), %s11439_s22, 0  ;;  %p5789_p8 = scmp.ne.s32.totalorder (!%p4841_p7), %s11439_s22, 0 }
 0x5b5   : > { %4925 = sbr.rel (%p5789_p8) target bundleno = 1535 (0x5ff), region = 163  ;;  %s4926_s14 = sshrl.u32 (!%p5789_p8), %s11435_s26, 3 }
 0x5b6   : > { %s11446_s8 = sshrl.u32 (!%p5789_p8), %s4926_s14, 1 }
 0x5b7   : > { %p5790_p9 = scmp.le.s32.totalorder (!%p5789_p8), %s11446_s8, 0 }
 0x5bc   : > { %5658 = sbr.rel (%p5790_p9) target bundleno = 1508 (0x5e4), region = 321  ;;  %s12343_s27 = smov (!%p5790_p9), %s11433_s20 }
 0x5bd   : > { %s12344_s6 = smov (!%p5790_p9), %s11360_s21  ;;  %s11455_s18 = smov (!%p5790_p9), 0  }
 0x5be   : > { %s11457_s28 = smov (!%p5790_p9), 0  }
 0x5c3 LB: >> { %v4939_v0 = vld [vmem:[%s6554_s6] sm:$0xff]  ;;  %v4941_v1 = vld [vmem:[%s6554_s6 + $0x8] sm:$0xff]  ;;  %v4943_v2 = vld [vmem:[%s6554_s6 + $0x10] sm:$0xff]  ;;  %s5067_s29 = sadd.s32 1, %s6558_s18  ;;  %s4933_s28 = sadd.s32 1, %s6562_s28   ;;  %s6562_s28 = sphi %s11457_s28, %s4933_s28   ;;  %s6558_s18 = sphi %s11455_s18, %s12347_s18   ;;  %s6554_s6 = sphi %s12344_s6, %s12346_s6   ;;  %s6550_s27 = sphi %s12343_s27, %s12345_s27  }
 0x5c4   : >> { %4940 = vst [vmem:[%s6550_s27] sm:$0xff] %v4939_v0  ;;  %4942 = vst [vmem:[%s6550_s27 + $0x8] sm:$0xff] %v4941_v1  ;;  %v4945_v3 = vld [vmem:[%s6554_s6 + $0x18] sm:$0xff]  ;;  %v4947_v4 = vld [vmem:[%s6554_s6 + $0x20] sm:$0xff]  ;;  %p5068_p10 = scmp.ge.s32.totalorder %s5067_s29, %s11446_s8  ;;  %p4932_p11 = scmp.ge.s32.totalorder %s4933_s28, %s11446_s8 }
 0x5c5   : >> { %4944 = vst [vmem:[%s6550_s27 + $0x38] sm:$0xff] %v4943_v2  ;;  %v4949_v5 = vld [vmem:[%s6554_s6 + $0x28] sm:$0xff]  ;;  %4946 = vst [vmem:[%s6550_s27 + $0x40] sm:$0xff] %v4945_v3  ;;  %v4951_v6 = vld [vmem:[%s6554_s6 + $0x30] sm:$0xff] }
 0x5c6   : >> { %4948 = vst [vmem:[%s6550_s27 + $0x70] sm:$0xff] %v4947_v4  ;;  %4950 = vst [vmem:[%s6550_s27 + $0x78] sm:$0xff] %v4949_v5  ;;  %v4953_v7 = vld [vmem:[%s6554_s6 + $0x38] sm:$0xff]  ;;  %v4955_v8 = vld [vmem:[%s6554_s6 + $0x40] sm:$0xff]  ;;  %s12384_s29 = smov (%p5068_p10, %s5067_s29), 0 }
 0x5c7   : >> { %4952 = vst [vmem:[%s6550_s27 + $0xa8] sm:$0xff] %v4951_v6  ;;  %4954 = vst [vmem:[%s6550_s27 + $0xb0] sm:$0xff] %v4953_v7  ;;  %v4957_v9 = vld [vmem:[%s6554_s6 + $0x48] sm:$0xff]  ;;  %v4959_v10 = vld [vmem:[%s6554_s6 + $0x50] sm:$0xff]  ;;  %s5791_s30 = sshll.u32 %s12384_s29, 4  ;;  %s12347_s18 = smov %s12384_s29 }
 0x5c8   : >> { %4956 = vst [vmem:[%s6550_s27 + $0xe0] sm:$0xff] %v4955_v8  ;;  %v4961_v11 = vld [vmem:[%s6554_s6 + $0x58] sm:$0xff]  ;;  %4958 = vst [vmem:[%s6550_s27 + $0xe8] sm:$0xff] %v4957_v9  ;;  %v4963_v12 = vld [vmem:[%s6554_s6 + $0x60] sm:$0xff]  ;;  %s11513_s7 = scalar_lea.vmem %s11360_s21, %s5791_s30 [#allocation4]   ;;  %s11516_s5 = scalar_lea.vmem %s11433_s20, %s5791_s30  }
 0x5c9   : >> { %4960 = vst [vmem:[%s6550_s27 + $0x118] sm:$0xff] %v4959_v10  ;;  %4962 = vst [vmem:[%s6550_s27 + $0x120] sm:$0xff] %v4961_v11  ;;  %v4965_v13 = vld [vmem:[%s6554_s6 + $0x68] sm:$0xff]  ;;  %v4967_v14 = vld [vmem:[%s6554_s6 + $0x70] sm:$0xff] }
 0x5ca   : >> { %4964 = vst [vmem:[%s6550_s27 + $0x150] sm:$0xff] %v4963_v12  ;;  %4966 = vst [vmem:[%s6550_s27 + $0x158] sm:$0xff] %v4965_v13  ;;  %v4969_v15 = vld [vmem:[%s6554_s6 + $0x78] sm:$0xff]  ;;  %v4971_v16 = vld [vmem:[%s6554_s6 + $0x80] sm:$0xff] }
 0x5cb   : >> { %4968 = vst [vmem:[%s6550_s27 + $0x188] sm:$0xff] %v4967_v14  ;;  %v4973_v17 = vld [vmem:[%s6554_s6 + $0x88] sm:$0xff]  ;;  %4970 = vst [vmem:[%s6550_s27 + $0x190] sm:$0xff] %v4969_v15  ;;  %v4975_v18 = vld [vmem:[%s6554_s6 + $0x90] sm:$0xff] }
 0x5cc   : >> { %4972 = vst [vmem:[%s6550_s27 + $0x1c0] sm:$0xff] %v4971_v16  ;;  %4974 = vst [vmem:[%s6550_s27 + $0x1c8] sm:$0xff] %v4973_v17  ;;  %v4977_v19 = vld [vmem:[%s6554_s6 + $0x98] sm:$0xff]  ;;  %v4979_v20 = vld [vmem:[%s6554_s6 + $0xa0] sm:$0xff] }
 0x5cd   : >> { %4976 = vst [vmem:[%s6550_s27 + $0x1f8] sm:$0xff] %v4975_v18  ;;  %4978 = vst [vmem:[%s6550_s27 + $0x200] sm:$0xff] %v4977_v19  ;;  %v4981_v21 = vld [vmem:[%s6554_s6 + $0xa8] sm:$0xff]  ;;  %v4983_v22 = vld [vmem:[%s6554_s6 + $0xb0] sm:$0xff] }
 0x5ce   : >> { %4980 = vst [vmem:[%s6550_s27 + $0x230] sm:$0xff] %v4979_v20  ;;  %v4985_v23 = vld [vmem:[%s6554_s6 + $0xb8] sm:$0xff]  ;;  %4982 = vst [vmem:[%s6550_s27 + $0x238] sm:$0xff] %v4981_v21  ;;  %v4987_v24 = vld [vmem:[%s6554_s6 + $0xc0] sm:$0xff] }
 0x5cf   : >> { %4984 = vst [vmem:[%s6550_s27 + $0x268] sm:$0xff] %v4983_v22  ;;  %4986 = vst [vmem:[%s6550_s27 + $0x270] sm:$0xff] %v4985_v23  ;;  %v4989_v25 = vld [vmem:[%s6554_s6 + $0xc8] sm:$0xff]  ;;  %v4991_v26 = vld [vmem:[%s6554_s6 + $0xd0] sm:$0xff] }
 0x5d0   : >> { %4988 = vst [vmem:[%s6550_s27 + $0x2a0] sm:$0xff] %v4987_v24  ;;  %4990 = vst [vmem:[%s6550_s27 + $0x2a8] sm:$0xff] %v4989_v25  ;;  %v4993_v27 = vld [vmem:[%s6554_s6 + $0xd8] sm:$0xff]  ;;  %v4995_v28 = vld [vmem:[%s6554_s6 + $0xe0] sm:$0xff] }
 0x5d1   : >> { %4992 = vst [vmem:[%s6550_s27 + $0x2d8] sm:$0xff] %v4991_v26  ;;  %v4997_v29 = vld [vmem:[%s6554_s6 + $0xe8] sm:$0xff]  ;;  %4994 = vst [vmem:[%s6550_s27 + $0x2e0] sm:$0xff] %v4993_v27  ;;  %v4999_v30 = vld [vmem:[%s6554_s6 + $0xf0] sm:$0xff] }
 0x5d2   : >> { %4996 = vst [vmem:[%s6550_s27 + $0x310] sm:$0xff] %v4995_v28  ;;  %4998 = vst [vmem:[%s6550_s27 + $0x318] sm:$0xff] %v4997_v29  ;;  %v5001_v31 = vld [vmem:[%s6554_s6 + $0xf8] sm:$0xff]  ;;  %v5003_v32 = vld [vmem:[%s6554_s6 + $0x100] sm:$0xff] }
 0x5d3   : >> { %5000 = vst [vmem:[%s6550_s27 + $0x348] sm:$0xff] %v4999_v30  ;;  %5002 = vst [vmem:[%s6550_s27 + $0x350] sm:$0xff] %v5001_v31  ;;  %v5005_v33 = vld [vmem:[%s6554_s6 + $0x108] sm:$0xff]  ;;  %v5007_v34 = vld [vmem:[%s6554_s6 + $0x110] sm:$0xff] }
 0x5d4   : >> { %5004 = vst [vmem:[%s6550_s27 + $0x380] sm:$0xff] %v5003_v32  ;;  %v5009_v35 = vld [vmem:[%s6554_s6 + $0x118] sm:$0xff]  ;;  %5006 = vst [vmem:[%s6550_s27 + $0x388] sm:$0xff] %v5005_v33  ;;  %v5011_v36 = vld [vmem:[%s6554_s6 + $0x120] sm:$0xff] }
 0x5d5   : >> { %5008 = vst [vmem:[%s6550_s27 + $0x3b8] sm:$0xff] %v5007_v34  ;;  %5010 = vst [vmem:[%s6550_s27 + $0x3c0] sm:$0xff] %v5009_v35  ;;  %v5013_v37 = vld [vmem:[%s6554_s6 + $0x128] sm:$0xff]  ;;  %v5015_v38 = vld [vmem:[%s6554_s6 + $0x130] sm:$0xff] }
 0x5d6   : >> { %5012 = vst [vmem:[%s6550_s27 + $0x3f0] sm:$0xff] %v5011_v36  ;;  %5014 = vst [vmem:[%s6550_s27 + $0x3f8] sm:$0xff] %v5013_v37  ;;  %v5017_v39 = vld [vmem:[%s6554_s6 + $0x138] sm:$0xff]  ;;  %v5019_v40 = vld [vmem:[%s6554_s6 + $0x140] sm:$0xff] }
 0x5d7   : >> { %5016 = vst [vmem:[%s6550_s27 + $0x428] sm:$0xff] %v5015_v38  ;;  %v5021_v41 = vld [vmem:[%s6554_s6 + $0x148] sm:$0xff]  ;;  %5018 = vst [vmem:[%s6550_s27 + $0x430] sm:$0xff] %v5017_v39  ;;  %v5023_v42 = vld [vmem:[%s6554_s6 + $0x150] sm:$0xff] }
 0x5d8   : >> { %5020 = vst [vmem:[%s6550_s27 + $0x460] sm:$0xff] %v5019_v40  ;;  %5022 = vst [vmem:[%s6550_s27 + $0x468] sm:$0xff] %v5021_v41  ;;  %v5025_v43 = vld [vmem:[%s6554_s6 + $0x158] sm:$0xff]  ;;  %v5027_v44 = vld [vmem:[%s6554_s6 + $0x160] sm:$0xff] }
 0x5d9   : >> { %5024 = vst [vmem:[%s6550_s27 + $0x498] sm:$0xff] %v5023_v42  ;;  %5026 = vst [vmem:[%s6550_s27 + $0x4a0] sm:$0xff] %v5025_v43  ;;  %v5029_v45 = vld [vmem:[%s6554_s6 + $0x168] sm:$0xff]  ;;  %v5031_v46 = vld [vmem:[%s6554_s6 + $0x170] sm:$0xff] }
 0x5da   : >> { %5028 = vst [vmem:[%s6550_s27 + $0x4d0] sm:$0xff] %v5027_v44  ;;  %v5033_v47 = vld [vmem:[%s6554_s6 + $0x178] sm:$0xff]  ;;  %5030 = vst [vmem:[%s6550_s27 + $0x4d8] sm:$0xff] %v5029_v45  ;;  %v5035_v48 = vld [vmem:[%s6554_s6 + $0x180] sm:$0xff] }
 0x5db   : >> { %5032 = vst [vmem:[%s6550_s27 + $0x508] sm:$0xff] %v5031_v46  ;;  %5034 = vst [vmem:[%s6550_s27 + $0x510] sm:$0xff] %v5033_v47  ;;  %v5037_v49 = vld [vmem:[%s6554_s6 + $0x188] sm:$0xff]  ;;  %v5039_v50 = vld [vmem:[%s6554_s6 + $0x190] sm:$0xff] }
 0x5dc   : >> { %5036 = vst [vmem:[%s6550_s27 + $0x540] sm:$0xff] %v5035_v48  ;;  %5038 = vst [vmem:[%s6550_s27 + $0x548] sm:$0xff] %v5037_v49  ;;  %v5041_v51 = vld [vmem:[%s6554_s6 + $0x198] sm:$0xff]  ;;  %v5043_v52 = vld [vmem:[%s6554_s6 + $0x1a0] sm:$0xff] }
 0x5dd   : >> { %5040 = vst [vmem:[%s6550_s27 + $0x578] sm:$0xff] %v5039_v50  ;;  %v5045_v53 = vld [vmem:[%s6554_s6 + $0x1a8] sm:$0xff]  ;;  %5042 = vst [vmem:[%s6550_s27 + $0x580] sm:$0xff] %v5041_v51  ;;  %v5047_v54 = vld [vmem:[%s6554_s6 + $0x1b0] sm:$0xff]  ;;  %4935 = sbr.rel (!%p4932_p11) target bundleno = 1475 (0x5c3), region = 327 }
 0x5de   : >> { %5044 = vst [vmem:[%s6550_s27 + $0x5b0] sm:$0xff] %v5043_v52  ;;  %5046 = vst [vmem:[%s6550_s27 + $0x5b8] sm:$0xff] %v5045_v53  ;;  %v5049_v55 = vld [vmem:[%s6554_s6 + $0x1b8] sm:$0xff]  ;;  %v5051_v56 = vld [vmem:[%s6554_s6 + $0x1c0] sm:$0xff] }
 0x5df   : >> { %5048 = vst [vmem:[%s6550_s27 + $0x5e8] sm:$0xff] %v5047_v54  ;;  %5050 = vst [vmem:[%s6550_s27 + $0x5f0] sm:$0xff] %v5049_v55  ;;  %v5053_v57 = vld [vmem:[%s6554_s6 + $0x1c8] sm:$0xff]  ;;  %v5055_v58 = vld [vmem:[%s6554_s6 + $0x1d0] sm:$0xff] }
 0x5e0   : >> { %5052 = vst [vmem:[%s6550_s27 + $0x620] sm:$0xff] %v5051_v56  ;;  %v5057_v59 = vld [vmem:[%s6554_s6 + $0x1d8] sm:$0xff]  ;;  %5054 = vst [vmem:[%s6550_s27 + $0x628] sm:$0xff] %v5053_v57  ;;  %v5059_v60 = vld [vmem:[%s6554_s6 + $0x1e0] sm:$0xff] }
 0x5e1   : >> { %5056 = vst [vmem:[%s6550_s27 + $0x658] sm:$0xff] %v5055_v58  ;;  %5058 = vst [vmem:[%s6550_s27 + $0x660] sm:$0xff] %v5057_v59  ;;  %v5061_v61 = vld [vmem:[%s6554_s6 + $0x1e8] sm:$0xff]  ;;  %v5063_v62 = vld [vmem:[%s6554_s6 + $0x1f0] sm:$0xff] }
 0x5e2   : >> { %5060 = vst [vmem:[%s6550_s27 + $0x690] sm:$0xff] %v5059_v60  ;;  %5062 = vst [vmem:[%s6550_s27 + $0x698] sm:$0xff] %v5061_v61  ;;  %v5065_v63 = vld [vmem:[%s6554_s6 + $0x1f8] sm:$0xff]  ;;  %s12346_s6 = smov %s11513_s7 }
 0x5e3   : >> { %5064 = vst [vmem:[%s6550_s27 + $0x6c8] sm:$0xff] %v5063_v62  ;;  %5066 = vst [vmem:[%s6550_s27 + $0x6d0] sm:$0xff] %v5065_v63  ;;  %s12345_s27 = smov %s11516_s5 }
 0x5e4 PF: > { %s11622_s19 = sand.u32 1, %s4926_s14   ;;  %s5814_s9 = sshll.u32 %s11446_s8, 8 }
 0x5e5   : > { %s5078_s12 = sshra.s32 %s5814_s9, 4  ;;  %p5796_p12 = scmp.le.s32.totalorder %s11622_s19, 0 }
 0x5e6   : > { %s11626_s11 = scalar_lea.vmem %s11360_s21, %s5078_s12 [#allocation4]   ;;  %s11629_s4 = scalar_lea.vmem %s11433_s20, %s5078_s12  }
 0x5e7   : > { %5672 = sbr.rel (%p5796_p12) target bundleno = 1535 (0x5ff), region = 332  ;;  %s12348_s10 = smov (!%p5796_p12), %s11629_s4 }
 0x5e8   : > { %s12349_s24 = smov (!%p5796_p12), %s11626_s11  ;;  %s11638_s25 = smov (!%p5796_p12), 0  }
 0x5e9   : > { %s11640_s27 = smov (!%p5796_p12), 0  }
 0x5ee LB: >> { %v5094_v0 = vld [vmem:[%s6570_s24] sm:$0xff]  ;;  %v5096_v1 = vld [vmem:[%s6570_s24 + $0x10] sm:$0xff]  ;;  %s5158_s14 = sadd.s32 1, %s6574_s25  ;;  %s5088_s27 = sadd.s32 1, %s6578_s27   ;;  %s6578_s27 = sphi %s11640_s27, %s5088_s27   ;;  %s6574_s25 = sphi %s11638_s25, %s12352_s25   ;;  %s6570_s24 = sphi %s12349_s24, %s12351_s24   ;;  %s6566_s10 = sphi %s12348_s10, %s12350_s10  }
 0x5ef   : >> { %v5098_v2 = vld [vmem:[%s6570_s24 + $0x20] sm:$0xff]  ;;  %5095 = vst [vmem:[%s6566_s10] sm:$0xff] %v5094_v0  ;;  %5097 = vst [vmem:[%s6566_s10 + $0x38] sm:$0xff] %v5096_v1  ;;  %v5100_v3 = vld [vmem:[%s6570_s24 + $0x30] sm:$0xff]  ;;  %p5159_p13 = scmp.ge.s32.totalorder %s5158_s14, %s11622_s19  ;;  %p5087_p0 = scmp.ge.s32.totalorder %s5088_s27, %s11622_s19 }
 0x5f0   : >> { %5099 = vst [vmem:[%s6566_s10 + $0x70] sm:$0xff] %v5098_v2  ;;  %v5102_v4 = vld [vmem:[%s6570_s24 + $0x40] sm:$0xff]  ;;  %v5104_v5 = vld [vmem:[%s6570_s24 + $0x50] sm:$0xff]  ;;  %5101 = vst [vmem:[%s6566_s10 + $0xa8] sm:$0xff] %v5100_v3 }
 0x5f1   : >> { %5103 = vst [vmem:[%s6566_s10 + $0xe0] sm:$0xff] %v5102_v4  ;;  %5105 = vst [vmem:[%s6566_s10 + $0x118] sm:$0xff] %v5104_v5  ;;  %v5106_v6 = vld [vmem:[%s6570_s24 + $0x60] sm:$0xff]  ;;  %v5108_v7 = vld [vmem:[%s6570_s24 + $0x70] sm:$0xff]  ;;  %s12386_s14 = smov (%p5159_p13, %s5158_s14), 0 }
 0x5f2   : >> { %v5110_v8 = vld [vmem:[%s6570_s24 + $0x80] sm:$0xff]  ;;  %5107 = vst [vmem:[%s6566_s10 + $0x150] sm:$0xff] %v5106_v6  ;;  %5109 = vst [vmem:[%s6566_s10 + $0x188] sm:$0xff] %v5108_v7  ;;  %v5112_v9 = vld [vmem:[%s6570_s24 + $0x90] sm:$0xff]  ;;  %s5797_s8 = sshll.u32 %s12386_s14, 3  ;;  %s12352_s25 = smov %s12386_s14 }
 0x5f3   : >> { %5111 = vst [vmem:[%s6566_s10 + $0x1c0] sm:$0xff] %v5110_v8  ;;  %v5114_v10 = vld [vmem:[%s6570_s24 + $0xa0] sm:$0xff]  ;;  %v5116_v11 = vld [vmem:[%s6570_s24 + $0xb0] sm:$0xff]  ;;  %5113 = vst [vmem:[%s6566_s10 + $0x1f8] sm:$0xff] %v5112_v9  ;;  %s11696_s6 = scalar_lea.vmem %s11626_s11, %s5797_s8 [#allocation4]   ;;  %s5164_s18 = scalar_lea.vmem %s11629_s4, %s5797_s8  }
 0x5f4   : >> { %5115 = vst [vmem:[%s6566_s10 + $0x230] sm:$0xff] %v5114_v10  ;;  %5117 = vst [vmem:[%s6566_s10 + $0x268] sm:$0xff] %v5116_v11  ;;  %v5118_v12 = vld [vmem:[%s6570_s24 + $0xc0] sm:$0xff]  ;;  %v5120_v13 = vld [vmem:[%s6570_s24 + $0xd0] sm:$0xff] }
 0x5f5   : >> { %v5122_v14 = vld [vmem:[%s6570_s24 + $0xe0] sm:$0xff]  ;;  %5119 = vst [vmem:[%s6566_s10 + $0x2a0] sm:$0xff] %v5118_v12  ;;  %5121 = vst [vmem:[%s6566_s10 + $0x2d8] sm:$0xff] %v5120_v13  ;;  %v5124_v15 = vld [vmem:[%s6570_s24 + $0xf0] sm:$0xff] }
 0x5f6   : >> { %5123 = vst [vmem:[%s6566_s10 + $0x310] sm:$0xff] %v5122_v14  ;;  %v5126_v16 = vld [vmem:[%s6570_s24 + $0x100] sm:$0xff]  ;;  %v5128_v17 = vld [vmem:[%s6570_s24 + $0x110] sm:$0xff]  ;;  %5125 = vst [vmem:[%s6566_s10 + $0x348] sm:$0xff] %v5124_v15 }
 0x5f7   : >> { %5127 = vst [vmem:[%s6566_s10 + $0x380] sm:$0xff] %v5126_v16  ;;  %5129 = vst [vmem:[%s6566_s10 + $0x3b8] sm:$0xff] %v5128_v17  ;;  %v5130_v18 = vld [vmem:[%s6570_s24 + $0x120] sm:$0xff]  ;;  %v5132_v19 = vld [vmem:[%s6570_s24 + $0x130] sm:$0xff] }
 0x5f8   : >> { %v5134_v20 = vld [vmem:[%s6570_s24 + $0x140] sm:$0xff]  ;;  %5131 = vst [vmem:[%s6566_s10 + $0x3f0] sm:$0xff] %v5130_v18  ;;  %5133 = vst [vmem:[%s6566_s10 + $0x428] sm:$0xff] %v5132_v19  ;;  %v5136_v21 = vld [vmem:[%s6570_s24 + $0x150] sm:$0xff]  ;;  %5090 = sbr.rel (!%p5087_p0) target bundleno = 1518 (0x5ee), region = 338 }
 0x5f9   : >> { %5135 = vst [vmem:[%s6566_s10 + $0x460] sm:$0xff] %v5134_v20  ;;  %v5138_v22 = vld [vmem:[%s6570_s24 + $0x160] sm:$0xff]  ;;  %v5140_v23 = vld [vmem:[%s6570_s24 + $0x170] sm:$0xff]  ;;  %5137 = vst [vmem:[%s6566_s10 + $0x498] sm:$0xff] %v5136_v21 }
 0x5fa   : >> { %5139 = vst [vmem:[%s6566_s10 + $0x4d0] sm:$0xff] %v5138_v22  ;;  %5141 = vst [vmem:[%s6566_s10 + $0x508] sm:$0xff] %v5140_v23  ;;  %v5142_v24 = vld [vmem:[%s6570_s24 + $0x180] sm:$0xff]  ;;  %v5144_v25 = vld [vmem:[%s6570_s24 + $0x190] sm:$0xff] }
 0x5fb   : >> { %v5146_v26 = vld [vmem:[%s6570_s24 + $0x1a0] sm:$0xff]  ;;  %5143 = vst [vmem:[%s6566_s10 + $0x540] sm:$0xff] %v5142_v24  ;;  %5145 = vst [vmem:[%s6566_s10 + $0x578] sm:$0xff] %v5144_v25  ;;  %v5148_v27 = vld [vmem:[%s6570_s24 + $0x1b0] sm:$0xff] }
 0x5fc   : >> { %5147 = vst [vmem:[%s6566_s10 + $0x5b0] sm:$0xff] %v5146_v26  ;;  %v5150_v28 = vld [vmem:[%s6570_s24 + $0x1c0] sm:$0xff]  ;;  %v5152_v29 = vld [vmem:[%s6570_s24 + $0x1d0] sm:$0xff]  ;;  %5149 = vst [vmem:[%s6566_s10 + $0x5e8] sm:$0xff] %v5148_v27 }
 0x5fd   : >> { %5151 = vst [vmem:[%s6566_s10 + $0x620] sm:$0xff] %v5150_v28  ;;  %5153 = vst [vmem:[%s6566_s10 + $0x658] sm:$0xff] %v5152_v29  ;;  %v5154_v30 = vld [vmem:[%s6570_s24 + $0x1e0] sm:$0xff]  ;;  %v5156_v31 = vld [vmem:[%s6570_s24 + $0x1f0] sm:$0xff]  ;;  %s12351_s24 = smov %s11696_s6 }
 0x5fe   : >> { %5155 = vst [vmem:[%s6566_s10 + $0x690] sm:$0xff] %v5154_v30  ;;  %5157 = vst [vmem:[%s6566_s10 + $0x6c8] sm:$0xff] %v5156_v31  ;;  %s12350_s10 = smov %s5164_s18 }
 0x5ff PF: > { %5167 = sbr.rel (%p4922_p6) target bundleno = 1643 (0x66b), region = 181  ;;  %s5169_s28 = ssub.s32 (!%p4922_p6), %s11435_s26, %s11439_s22 }
 0x600   : > { %s5173_s29 = sshrl.u32 (!%p4922_p6), %s11435_s26, 3  ;;  %s11742_s30 = scalar_lea.vmem (!%p4922_p6), %s11360_s21, %s5169_s28 [#allocation4] }
 0x601   : > { %s11745_s7 = scalar_lea.vmem (!%p4922_p6), %s11433_s20, %s5169_s28  ;;  %s11749_s5 = sshrl.u32 (!%p4922_p6), %s5173_s29, 1 }
 0x602   : > { %p5799_p1 = scmp.le.s32.totalorder (!%p4922_p6), %s11749_s5, 0 }
 0x606   : > { %5686 = sbr.rel (%p5799_p1) target bundleno = 1582 (0x62e), region = 343  ;;  %s12353_s19 = smov (!%p5799_p1), %s11433_s20 }
 0x607   : > { %s12354_s9 = smov (!%p5799_p1), %s11360_s21  ;;  %s11758_s12 = smov (!%p5799_p1), 0  }
 0x608   : > { %s11760_s11 = smov (!%p5799_p1), 0  }
 0x60d LB: >> { %v5186_v32 = vld [vmem:[%s6586_s9] sm:$0xff]  ;;  %v5188_v33 = vld [vmem:[%s6586_s9 + $0x8] sm:$0xff]  ;;  %v5190_v34 = vld [vmem:[%s6586_s9 + $0x10] sm:$0xff]  ;;  %s5314_s4 = sadd.s32 1, %s6590_s12  ;;  %s5180_s11 = sadd.s32 1, %s6594_s11   ;;  %s6594_s11 = sphi %s11760_s11, %s5180_s11   ;;  %s6590_s12 = sphi %s11758_s12, %s12357_s12   ;;  %s6586_s9 = sphi %s12354_s9, %s12356_s9   ;;  %s6582_s19 = sphi %s12353_s19, %s12355_s19  }
 0x60e   : >> { %5187 = vst [vmem:[%s6582_s19] sm:$0xff] %v5186_v32  ;;  %5189 = vst [vmem:[%s6582_s19 + $0x8] sm:$0xff] %v5188_v33  ;;  %v5192_v35 = vld [vmem:[%s6586_s9 + $0x18] sm:$0xff]  ;;  %v5194_v36 = vld [vmem:[%s6586_s9 + $0x20] sm:$0xff]  ;;  %p5315_p2 = scmp.ge.s32.totalorder %s5314_s4, %s11749_s5  ;;  %p5179_p4 = scmp.ge.s32.totalorder %s5180_s11, %s11749_s5 }
 0x60f   : >> { %5191 = vst [vmem:[%s6582_s19 + $0x38] sm:$0xff] %v5190_v34  ;;  %v5196_v37 = vld [vmem:[%s6586_s9 + $0x28] sm:$0xff]  ;;  %5193 = vst [vmem:[%s6582_s19 + $0x40] sm:$0xff] %v5192_v35  ;;  %v5198_v38 = vld [vmem:[%s6586_s9 + $0x30] sm:$0xff] }
 0x610   : >> { %5195 = vst [vmem:[%s6582_s19 + $0x70] sm:$0xff] %v5194_v36  ;;  %5197 = vst [vmem:[%s6582_s19 + $0x78] sm:$0xff] %v5196_v37  ;;  %v5200_v39 = vld [vmem:[%s6586_s9 + $0x38] sm:$0xff]  ;;  %v5202_v40 = vld [vmem:[%s6586_s9 + $0x40] sm:$0xff]  ;;  %s12388_s4 = smov (%p5315_p2, %s5314_s4), 0 }
 0x611   : >> { %5199 = vst [vmem:[%s6582_s19 + $0xa8] sm:$0xff] %v5198_v38  ;;  %5201 = vst [vmem:[%s6582_s19 + $0xb0] sm:$0xff] %v5200_v39  ;;  %v5204_v41 = vld [vmem:[%s6586_s9 + $0x48] sm:$0xff]  ;;  %v5206_v42 = vld [vmem:[%s6586_s9 + $0x50] sm:$0xff]  ;;  %s5800_s10 = sshll.u32 %s12388_s4, 4  ;;  %s12357_s12 = smov %s12388_s4 }
 0x612   : >> { %5203 = vst [vmem:[%s6582_s19 + $0xe0] sm:$0xff] %v5202_v40  ;;  %v5208_v43 = vld [vmem:[%s6586_s9 + $0x58] sm:$0xff]  ;;  %5205 = vst [vmem:[%s6582_s19 + $0xe8] sm:$0xff] %v5204_v41  ;;  %v5210_v44 = vld [vmem:[%s6586_s9 + $0x60] sm:$0xff]  ;;  %s11816_s24 = scalar_lea.vmem %s11360_s21, %s5800_s10 [#allocation4]   ;;  %s11819_s25 = scalar_lea.vmem %s11433_s20, %s5800_s10  }
 0x613   : >> { %5207 = vst [vmem:[%s6582_s19 + $0x118] sm:$0xff] %v5206_v42  ;;  %5209 = vst [vmem:[%s6582_s19 + $0x120] sm:$0xff] %v5208_v43  ;;  %v5212_v45 = vld [vmem:[%s6586_s9 + $0x68] sm:$0xff]  ;;  %v5214_v46 = vld [vmem:[%s6586_s9 + $0x70] sm:$0xff] }
 0x614   : >> { %5211 = vst [vmem:[%s6582_s19 + $0x150] sm:$0xff] %v5210_v44  ;;  %5213 = vst [vmem:[%s6582_s19 + $0x158] sm:$0xff] %v5212_v45  ;;  %v5216_v47 = vld [vmem:[%s6586_s9 + $0x78] sm:$0xff]  ;;  %v5218_v48 = vld [vmem:[%s6586_s9 + $0x80] sm:$0xff] }
 0x615   : >> { %5215 = vst [vmem:[%s6582_s19 + $0x188] sm:$0xff] %v5214_v46  ;;  %v5220_v49 = vld [vmem:[%s6586_s9 + $0x88] sm:$0xff]  ;;  %5217 = vst [vmem:[%s6582_s19 + $0x190] sm:$0xff] %v5216_v47  ;;  %v5222_v50 = vld [vmem:[%s6586_s9 + $0x90] sm:$0xff] }
 0x616   : >> { %5219 = vst [vmem:[%s6582_s19 + $0x1c0] sm:$0xff] %v5218_v48  ;;  %5221 = vst [vmem:[%s6582_s19 + $0x1c8] sm:$0xff] %v5220_v49  ;;  %v5224_v51 = vld [vmem:[%s6586_s9 + $0x98] sm:$0xff]  ;;  %v5226_v52 = vld [vmem:[%s6586_s9 + $0xa0] sm:$0xff] }
 0x617   : >> { %5223 = vst [vmem:[%s6582_s19 + $0x1f8] sm:$0xff] %v5222_v50  ;;  %5225 = vst [vmem:[%s6582_s19 + $0x200] sm:$0xff] %v5224_v51  ;;  %v5228_v53 = vld [vmem:[%s6586_s9 + $0xa8] sm:$0xff]  ;;  %v5230_v54 = vld [vmem:[%s6586_s9 + $0xb0] sm:$0xff] }
 0x618   : >> { %5227 = vst [vmem:[%s6582_s19 + $0x230] sm:$0xff] %v5226_v52  ;;  %v5232_v55 = vld [vmem:[%s6586_s9 + $0xb8] sm:$0xff]  ;;  %5229 = vst [vmem:[%s6582_s19 + $0x238] sm:$0xff] %v5228_v53  ;;  %v5234_v56 = vld [vmem:[%s6586_s9 + $0xc0] sm:$0xff] }
 0x619   : >> { %5231 = vst [vmem:[%s6582_s19 + $0x268] sm:$0xff] %v5230_v54  ;;  %5233 = vst [vmem:[%s6582_s19 + $0x270] sm:$0xff] %v5232_v55  ;;  %v5236_v57 = vld [vmem:[%s6586_s9 + $0xc8] sm:$0xff]  ;;  %v5238_v58 = vld [vmem:[%s6586_s9 + $0xd0] sm:$0xff] }
 0x61a   : >> { %5235 = vst [vmem:[%s6582_s19 + $0x2a0] sm:$0xff] %v5234_v56  ;;  %5237 = vst [vmem:[%s6582_s19 + $0x2a8] sm:$0xff] %v5236_v57  ;;  %v5240_v59 = vld [vmem:[%s6586_s9 + $0xd8] sm:$0xff]  ;;  %v5242_v60 = vld [vmem:[%s6586_s9 + $0xe0] sm:$0xff] }
 0x61b   : >> { %5239 = vst [vmem:[%s6582_s19 + $0x2d8] sm:$0xff] %v5238_v58  ;;  %v5244_v61 = vld [vmem:[%s6586_s9 + $0xe8] sm:$0xff]  ;;  %5241 = vst [vmem:[%s6582_s19 + $0x2e0] sm:$0xff] %v5240_v59  ;;  %v5246_v62 = vld [vmem:[%s6586_s9 + $0xf0] sm:$0xff] }
 0x61c   : >> { %5243 = vst [vmem:[%s6582_s19 + $0x310] sm:$0xff] %v5242_v60  ;;  %5245 = vst [vmem:[%s6582_s19 + $0x318] sm:$0xff] %v5244_v61  ;;  %v5248_v63 = vld [vmem:[%s6586_s9 + $0xf8] sm:$0xff]  ;;  %v5250_v0 = vld [vmem:[%s6586_s9 + $0x100] sm:$0xff] }
 0x61d   : >> { %5247 = vst [vmem:[%s6582_s19 + $0x348] sm:$0xff] %v5246_v62  ;;  %5249 = vst [vmem:[%s6582_s19 + $0x350] sm:$0xff] %v5248_v63  ;;  %v5252_v1 = vld [vmem:[%s6586_s9 + $0x108] sm:$0xff]  ;;  %v5254_v2 = vld [vmem:[%s6586_s9 + $0x110] sm:$0xff] }
 0x61e   : >> { %5251 = vst [vmem:[%s6582_s19 + $0x380] sm:$0xff] %v5250_v0  ;;  %v5256_v3 = vld [vmem:[%s6586_s9 + $0x118] sm:$0xff]  ;;  %5253 = vst [vmem:[%s6582_s19 + $0x388] sm:$0xff] %v5252_v1  ;;  %v5258_v4 = vld [vmem:[%s6586_s9 + $0x120] sm:$0xff] }
 0x61f   : >> { %5255 = vst [vmem:[%s6582_s19 + $0x3b8] sm:$0xff] %v5254_v2  ;;  %5257 = vst [vmem:[%s6582_s19 + $0x3c0] sm:$0xff] %v5256_v3  ;;  %v5260_v5 = vld [vmem:[%s6586_s9 + $0x128] sm:$0xff]  ;;  %v5262_v6 = vld [vmem:[%s6586_s9 + $0x130] sm:$0xff] }
 0x620   : >> { %5259 = vst [vmem:[%s6582_s19 + $0x3f0] sm:$0xff] %v5258_v4  ;;  %5261 = vst [vmem:[%s6582_s19 + $0x3f8] sm:$0xff] %v5260_v5  ;;  %v5264_v7 = vld [vmem:[%s6586_s9 + $0x138] sm:$0xff]  ;;  %v5266_v8 = vld [vmem:[%s6586_s9 + $0x140] sm:$0xff] }
 0x621   : >> { %5263 = vst [vmem:[%s6582_s19 + $0x428] sm:$0xff] %v5262_v6  ;;  %v5268_v9 = vld [vmem:[%s6586_s9 + $0x148] sm:$0xff]  ;;  %5265 = vst [vmem:[%s6582_s19 + $0x430] sm:$0xff] %v5264_v7  ;;  %v5270_v10 = vld [vmem:[%s6586_s9 + $0x150] sm:$0xff] }
 0x622   : >> { %5267 = vst [vmem:[%s6582_s19 + $0x460] sm:$0xff] %v5266_v8  ;;  %5269 = vst [vmem:[%s6582_s19 + $0x468] sm:$0xff] %v5268_v9  ;;  %v5272_v11 = vld [vmem:[%s6586_s9 + $0x158] sm:$0xff]  ;;  %v5274_v12 = vld [vmem:[%s6586_s9 + $0x160] sm:$0xff] }
 0x623   : >> { %5271 = vst [vmem:[%s6582_s19 + $0x498] sm:$0xff] %v5270_v10  ;;  %5273 = vst [vmem:[%s6582_s19 + $0x4a0] sm:$0xff] %v5272_v11  ;;  %v5276_v13 = vld [vmem:[%s6586_s9 + $0x168] sm:$0xff]  ;;  %v5278_v14 = vld [vmem:[%s6586_s9 + $0x170] sm:$0xff] }
 0x624   : >> { %5275 = vst [vmem:[%s6582_s19 + $0x4d0] sm:$0xff] %v5274_v12  ;;  %v5280_v15 = vld [vmem:[%s6586_s9 + $0x178] sm:$0xff]  ;;  %5277 = vst [vmem:[%s6582_s19 + $0x4d8] sm:$0xff] %v5276_v13  ;;  %v5282_v16 = vld [vmem:[%s6586_s9 + $0x180] sm:$0xff] }
 0x625   : >> { %5279 = vst [vmem:[%s6582_s19 + $0x508] sm:$0xff] %v5278_v14  ;;  %5281 = vst [vmem:[%s6582_s19 + $0x510] sm:$0xff] %v5280_v15  ;;  %v5284_v17 = vld [vmem:[%s6586_s9 + $0x188] sm:$0xff]  ;;  %v5286_v18 = vld [vmem:[%s6586_s9 + $0x190] sm:$0xff] }
 0x626   : >> { %5283 = vst [vmem:[%s6582_s19 + $0x540] sm:$0xff] %v5282_v16  ;;  %5285 = vst [vmem:[%s6582_s19 + $0x548] sm:$0xff] %v5284_v17  ;;  %v5288_v19 = vld [vmem:[%s6586_s9 + $0x198] sm:$0xff]  ;;  %v5290_v20 = vld [vmem:[%s6586_s9 + $0x1a0] sm:$0xff] }
 0x627   : >> { %5287 = vst [vmem:[%s6582_s19 + $0x578] sm:$0xff] %v5286_v18  ;;  %v5292_v21 = vld [vmem:[%s6586_s9 + $0x1a8] sm:$0xff]  ;;  %5289 = vst [vmem:[%s6582_s19 + $0x580] sm:$0xff] %v5288_v19  ;;  %v5294_v22 = vld [vmem:[%s6586_s9 + $0x1b0] sm:$0xff]  ;;  %5182 = sbr.rel (!%p5179_p4) target bundleno = 1549 (0x60d), region = 349 }
 0x628   : >> { %5291 = vst [vmem:[%s6582_s19 + $0x5b0] sm:$0xff] %v5290_v20  ;;  %5293 = vst [vmem:[%s6582_s19 + $0x5b8] sm:$0xff] %v5292_v21  ;;  %v5296_v23 = vld [vmem:[%s6586_s9 + $0x1b8] sm:$0xff]  ;;  %v5298_v24 = vld [vmem:[%s6586_s9 + $0x1c0] sm:$0xff] }
 0x629   : >> { %5295 = vst [vmem:[%s6582_s19 + $0x5e8] sm:$0xff] %v5294_v22  ;;  %5297 = vst [vmem:[%s6582_s19 + $0x5f0] sm:$0xff] %v5296_v23  ;;  %v5300_v25 = vld [vmem:[%s6586_s9 + $0x1c8] sm:$0xff]  ;;  %v5302_v26 = vld [vmem:[%s6586_s9 + $0x1d0] sm:$0xff] }
 0x62a   : >> { %5299 = vst [vmem:[%s6582_s19 + $0x620] sm:$0xff] %v5298_v24  ;;  %v5304_v27 = vld [vmem:[%s6586_s9 + $0x1d8] sm:$0xff]  ;;  %5301 = vst [vmem:[%s6582_s19 + $0x628] sm:$0xff] %v5300_v25  ;;  %v5306_v28 = vld [vmem:[%s6586_s9 + $0x1e0] sm:$0xff] }
 0x62b   : >> { %5303 = vst [vmem:[%s6582_s19 + $0x658] sm:$0xff] %v5302_v26  ;;  %5305 = vst [vmem:[%s6582_s19 + $0x660] sm:$0xff] %v5304_v27  ;;  %v5308_v29 = vld [vmem:[%s6586_s9 + $0x1e8] sm:$0xff]  ;;  %v5310_v30 = vld [vmem:[%s6586_s9 + $0x1f0] sm:$0xff] }
 0x62c   : >> { %5307 = vst [vmem:[%s6582_s19 + $0x690] sm:$0xff] %v5306_v28  ;;  %5309 = vst [vmem:[%s6582_s19 + $0x698] sm:$0xff] %v5308_v29  ;;  %v5312_v31 = vld [vmem:[%s6586_s9 + $0x1f8] sm:$0xff]  ;;  %s12356_s9 = smov %s11816_s24 }
 0x62d   : >> { %5311 = vst [vmem:[%s6582_s19 + $0x6c8] sm:$0xff] %v5310_v30  ;;  %5313 = vst [vmem:[%s6582_s19 + $0x6d0] sm:$0xff] %v5312_v31  ;;  %s12355_s19 = smov %s11819_s25 }
 0x62e PF: > { %s11925_s27 = sand.u32 1, %s5173_s29   ;;  %s5816_s14 = sshll.u32 %s11749_s5, 8 }
 0x62f   : > { %s5325_s8 = sshra.s32 %s5816_s14, 4  ;;  %p5805_p5 = scmp.le.s32.totalorder %s11925_s27, 0 }
 0x630   : > { %s11929_s6 = scalar_lea.vmem %s11360_s21, %s5325_s8 [#allocation4]   ;;  %s11932_s18 = scalar_lea.vmem %s11433_s20, %s5325_s8  }
 0x631   : > { %5700 = sbr.rel (%p5805_p5) target bundleno = 1609 (0x649), region = 354  ;;  %s12358_s28 = smov (!%p5805_p5), %s11932_s18 }
 0x632   : > { %s12359_s19 = smov (!%p5805_p5), %s11929_s6  ;;  %s11941_s9 = smov (!%p5805_p5), 0  }
 0x633   : > { %s11943_s12 = smov (!%p5805_p5), 0  }
 0x638 LB: >> { %v5341_v32 = vld [vmem:[%s6602_s19] sm:$0xff]  ;;  %v5343_v33 = vld [vmem:[%s6602_s19 + $0x10] sm:$0xff]  ;;  %s5405_s29 = sadd.s32 1, %s6606_s9  ;;  %s5335_s12 = sadd.s32 1, %s6610_s12   ;;  %s6610_s12 = sphi %s11943_s12, %s5335_s12   ;;  %s6606_s9 = sphi %s11941_s9, %s12362_s9   ;;  %s6602_s19 = sphi %s12359_s19, %s12361_s19   ;;  %s6598_s28 = sphi %s12358_s28, %s12360_s28  }
 0x639   : >> { %v5345_v34 = vld [vmem:[%s6602_s19 + $0x20] sm:$0xff]  ;;  %5342 = vst [vmem:[%s6598_s28] sm:$0xff] %v5341_v32  ;;  %5344 = vst [vmem:[%s6598_s28 + $0x38] sm:$0xff] %v5343_v33  ;;  %v5347_v35 = vld [vmem:[%s6602_s19 + $0x30] sm:$0xff]  ;;  %p5406_p3 = scmp.ge.s32.totalorder %s5405_s29, %s11925_s27  ;;  %p5334_p7 = scmp.ge.s32.totalorder %s5335_s12, %s11925_s27 }
 0x63a   : >> { %5346 = vst [vmem:[%s6598_s28 + $0x70] sm:$0xff] %v5345_v34  ;;  %v5349_v36 = vld [vmem:[%s6602_s19 + $0x40] sm:$0xff]  ;;  %v5351_v37 = vld [vmem:[%s6602_s19 + $0x50] sm:$0xff]  ;;  %5348 = vst [vmem:[%s6598_s28 + $0xa8] sm:$0xff] %v5347_v35 }
 0x63b   : >> { %5350 = vst [vmem:[%s6598_s28 + $0xe0] sm:$0xff] %v5349_v36  ;;  %5352 = vst [vmem:[%s6598_s28 + $0x118] sm:$0xff] %v5351_v37  ;;  %v5353_v38 = vld [vmem:[%s6602_s19 + $0x60] sm:$0xff]  ;;  %v5355_v39 = vld [vmem:[%s6602_s19 + $0x70] sm:$0xff]  ;;  %s12390_s29 = smov (%p5406_p3, %s5405_s29), 0 }
 0x63c   : >> { %v5357_v40 = vld [vmem:[%s6602_s19 + $0x80] sm:$0xff]  ;;  %5354 = vst [vmem:[%s6598_s28 + $0x150] sm:$0xff] %v5353_v38  ;;  %5356 = vst [vmem:[%s6598_s28 + $0x188] sm:$0xff] %v5355_v39  ;;  %v5359_v41 = vld [vmem:[%s6602_s19 + $0x90] sm:$0xff]  ;;  %s5806_s5 = sshll.u32 %s12390_s29, 3  ;;  %s12362_s9 = smov %s12390_s29 }
 0x63d   : >> { %5358 = vst [vmem:[%s6598_s28 + $0x1c0] sm:$0xff] %v5357_v40  ;;  %v5361_v42 = vld [vmem:[%s6602_s19 + $0xa0] sm:$0xff]  ;;  %v5363_v43 = vld [vmem:[%s6602_s19 + $0xb0] sm:$0xff]  ;;  %5360 = vst [vmem:[%s6598_s28 + $0x1f8] sm:$0xff] %v5359_v41  ;;  %s11999_s11 = scalar_lea.vmem %s11929_s6, %s5806_s5 [#allocation4]   ;;  %s5411_s4 = scalar_lea.vmem %s11932_s18, %s5806_s5  }
 0x63e   : >> { %5362 = vst [vmem:[%s6598_s28 + $0x230] sm:$0xff] %v5361_v42  ;;  %5364 = vst [vmem:[%s6598_s28 + $0x268] sm:$0xff] %v5363_v43  ;;  %v5365_v44 = vld [vmem:[%s6602_s19 + $0xc0] sm:$0xff]  ;;  %v5367_v45 = vld [vmem:[%s6602_s19 + $0xd0] sm:$0xff] }
 0x63f   : >> { %v5369_v46 = vld [vmem:[%s6602_s19 + $0xe0] sm:$0xff]  ;;  %5366 = vst [vmem:[%s6598_s28 + $0x2a0] sm:$0xff] %v5365_v44  ;;  %5368 = vst [vmem:[%s6598_s28 + $0x2d8] sm:$0xff] %v5367_v45  ;;  %v5371_v47 = vld [vmem:[%s6602_s19 + $0xf0] sm:$0xff] }
 0x640   : >> { %5370 = vst [vmem:[%s6598_s28 + $0x310] sm:$0xff] %v5369_v46  ;;  %v5373_v48 = vld [vmem:[%s6602_s19 + $0x100] sm:$0xff]  ;;  %v5375_v49 = vld [vmem:[%s6602_s19 + $0x110] sm:$0xff]  ;;  %5372 = vst [vmem:[%s6598_s28 + $0x348] sm:$0xff] %v5371_v47 }
 0x641   : >> { %5374 = vst [vmem:[%s6598_s28 + $0x380] sm:$0xff] %v5373_v48  ;;  %5376 = vst [vmem:[%s6598_s28 + $0x3b8] sm:$0xff] %v5375_v49  ;;  %v5377_v50 = vld [vmem:[%s6602_s19 + $0x120] sm:$0xff]  ;;  %v5379_v51 = vld [vmem:[%s6602_s19 + $0x130] sm:$0xff] }
 0x642   : >> { %v5381_v52 = vld [vmem:[%s6602_s19 + $0x140] sm:$0xff]  ;;  %5378 = vst [vmem:[%s6598_s28 + $0x3f0] sm:$0xff] %v5377_v50  ;;  %5380 = vst [vmem:[%s6598_s28 + $0x428] sm:$0xff] %v5379_v51  ;;  %v5383_v53 = vld [vmem:[%s6602_s19 + $0x150] sm:$0xff]  ;;  %5337 = sbr.rel (!%p5334_p7) target bundleno = 1592 (0x638), region = 360 }
 0x643   : >> { %5382 = vst [vmem:[%s6598_s28 + $0x460] sm:$0xff] %v5381_v52  ;;  %v5385_v54 = vld [vmem:[%s6602_s19 + $0x160] sm:$0xff]  ;;  %v5387_v55 = vld [vmem:[%s6602_s19 + $0x170] sm:$0xff]  ;;  %5384 = vst [vmem:[%s6598_s28 + $0x498] sm:$0xff] %v5383_v53 }
 0x644   : >> { %5386 = vst [vmem:[%s6598_s28 + $0x4d0] sm:$0xff] %v5385_v54  ;;  %5388 = vst [vmem:[%s6598_s28 + $0x508] sm:$0xff] %v5387_v55  ;;  %v5389_v56 = vld [vmem:[%s6602_s19 + $0x180] sm:$0xff]  ;;  %v5391_v57 = vld [vmem:[%s6602_s19 + $0x190] sm:$0xff] }
 0x645   : >> { %v5393_v58 = vld [vmem:[%s6602_s19 + $0x1a0] sm:$0xff]  ;;  %5390 = vst [vmem:[%s6598_s28 + $0x540] sm:$0xff] %v5389_v56  ;;  %5392 = vst [vmem:[%s6598_s28 + $0x578] sm:$0xff] %v5391_v57  ;;  %v5395_v59 = vld [vmem:[%s6602_s19 + $0x1b0] sm:$0xff] }
 0x646   : >> { %5394 = vst [vmem:[%s6598_s28 + $0x5b0] sm:$0xff] %v5393_v58  ;;  %v5397_v60 = vld [vmem:[%s6602_s19 + $0x1c0] sm:$0xff]  ;;  %v5399_v61 = vld [vmem:[%s6602_s19 + $0x1d0] sm:$0xff]  ;;  %5396 = vst [vmem:[%s6598_s28 + $0x5e8] sm:$0xff] %v5395_v59 }
 0x647   : >> { %5398 = vst [vmem:[%s6598_s28 + $0x620] sm:$0xff] %v5397_v60  ;;  %5400 = vst [vmem:[%s6598_s28 + $0x658] sm:$0xff] %v5399_v61  ;;  %v5401_v62 = vld [vmem:[%s6602_s19 + $0x1e0] sm:$0xff]  ;;  %v5403_v63 = vld [vmem:[%s6602_s19 + $0x1f0] sm:$0xff]  ;;  %s12361_s19 = smov %s11999_s11 }
 0x648   : >> { %5402 = vst [vmem:[%s6598_s28 + $0x690] sm:$0xff] %v5401_v62  ;;  %5404 = vst [vmem:[%s6598_s28 + $0x6c8] sm:$0xff] %v5403_v63  ;;  %s12360_s28 = smov %s5411_s4 }
 0x649 PF: > { %s6616_s10 = smov 0  }
 0x64a   : > { %s12040_s24 = sshllo.u32 %s6616_s10, %s11439_s22 }
 0x64b   : > { %v5421_v0 = vld [vmem:[%s11742_s30] sm:%s12040_s24]  ;;  %v5423_v1 = vld [vmem:[%s11742_s30 + $0x10] sm:%s12040_s24] }
 0x64c   : > { %5422 = vst [vmem:[%s11745_s7] sm:%s12040_s24] %v5421_v0  ;;  %5424 = vst [vmem:[%s11745_s7 + $0x38] sm:%s12040_s24] %v5423_v1 }
 0x64d   : > { %v5425_v2 = vld [vmem:[%s11742_s30 + $0x20] sm:%s12040_s24]  ;;  %v5427_v3 = vld [vmem:[%s11742_s30 + $0x30] sm:%s12040_s24] }
 0x64e   : > { %5426 = vst [vmem:[%s11745_s7 + $0x70] sm:%s12040_s24] %v5425_v2  ;;  %5428 = vst [vmem:[%s11745_s7 + $0xa8] sm:%s12040_s24] %v5427_v3 }
 0x64f   : > { %v5429_v4 = vld [vmem:[%s11742_s30 + $0x40] sm:%s12040_s24]  ;;  %v5431_v5 = vld [vmem:[%s11742_s30 + $0x50] sm:%s12040_s24] }
 0x650   : > { %5430 = vst [vmem:[%s11745_s7 + $0xe0] sm:%s12040_s24] %v5429_v4  ;;  %5432 = vst [vmem:[%s11745_s7 + $0x118] sm:%s12040_s24] %v5431_v5 }
 0x651   : > { %v5433_v6 = vld [vmem:[%s11742_s30 + $0x60] sm:%s12040_s24]  ;;  %v5435_v7 = vld [vmem:[%s11742_s30 + $0x70] sm:%s12040_s24] }
 0x652   : > { %5434 = vst [vmem:[%s11745_s7 + $0x150] sm:%s12040_s24] %v5433_v6  ;;  %5436 = vst [vmem:[%s11745_s7 + $0x188] sm:%s12040_s24] %v5435_v7 }
 0x653   : > { %v5437_v8 = vld [vmem:[%s11742_s30 + $0x80] sm:%s12040_s24]  ;;  %v5439_v9 = vld [vmem:[%s11742_s30 + $0x90] sm:%s12040_s24] }
 0x654   : > { %5438 = vst [vmem:[%s11745_s7 + $0x1c0] sm:%s12040_s24] %v5437_v8  ;;  %5440 = vst [vmem:[%s11745_s7 + $0x1f8] sm:%s12040_s24] %v5439_v9 }
 0x655   : > { %v5441_v10 = vld [vmem:[%s11742_s30 + $0xa0] sm:%s12040_s24]  ;;  %v5443_v11 = vld [vmem:[%s11742_s30 + $0xb0] sm:%s12040_s24] }
 0x656   : > { %5442 = vst [vmem:[%s11745_s7 + $0x230] sm:%s12040_s24] %v5441_v10  ;;  %5444 = vst [vmem:[%s11745_s7 + $0x268] sm:%s12040_s24] %v5443_v11 }
 0x657   : > { %v5445_v12 = vld [vmem:[%s11742_s30 + $0xc0] sm:%s12040_s24]  ;;  %v5447_v13 = vld [vmem:[%s11742_s30 + $0xd0] sm:%s12040_s24] }
 0x658   : > { %5446 = vst [vmem:[%s11745_s7 + $0x2a0] sm:%s12040_s24] %v5445_v12  ;;  %5448 = vst [vmem:[%s11745_s7 + $0x2d8] sm:%s12040_s24] %v5447_v13 }
 0x659   : > { %v5449_v14 = vld [vmem:[%s11742_s30 + $0xe0] sm:%s12040_s24]  ;;  %v5451_v15 = vld [vmem:[%s11742_s30 + $0xf0] sm:%s12040_s24] }
 0x65a   : > { %5450 = vst [vmem:[%s11745_s7 + $0x310] sm:%s12040_s24] %v5449_v14  ;;  %5452 = vst [vmem:[%s11745_s7 + $0x348] sm:%s12040_s24] %v5451_v15 }
 0x65b   : > { %v5453_v16 = vld [vmem:[%s11742_s30 + $0x100] sm:%s12040_s24]  ;;  %v5455_v17 = vld [vmem:[%s11742_s30 + $0x110] sm:%s12040_s24] }
 0x65c   : > { %5454 = vst [vmem:[%s11745_s7 + $0x380] sm:%s12040_s24] %v5453_v16  ;;  %5456 = vst [vmem:[%s11745_s7 + $0x3b8] sm:%s12040_s24] %v5455_v17 }
 0x65d   : > { %v5457_v18 = vld [vmem:[%s11742_s30 + $0x120] sm:%s12040_s24]  ;;  %v5459_v19 = vld [vmem:[%s11742_s30 + $0x130] sm:%s12040_s24] }
 0x65e   : > { %5458 = vst [vmem:[%s11745_s7 + $0x3f0] sm:%s12040_s24] %v5457_v18  ;;  %5460 = vst [vmem:[%s11745_s7 + $0x428] sm:%s12040_s24] %v5459_v19 }
 0x65f   : > { %v5461_v20 = vld [vmem:[%s11742_s30 + $0x140] sm:%s12040_s24]  ;;  %v5463_v21 = vld [vmem:[%s11742_s30 + $0x150] sm:%s12040_s24] }
 0x660   : > { %5462 = vst [vmem:[%s11745_s7 + $0x460] sm:%s12040_s24] %v5461_v20  ;;  %5464 = vst [vmem:[%s11745_s7 + $0x498] sm:%s12040_s24] %v5463_v21 }
 0x661   : > { %v5465_v22 = vld [vmem:[%s11742_s30 + $0x160] sm:%s12040_s24]  ;;  %v5467_v23 = vld [vmem:[%s11742_s30 + $0x170] sm:%s12040_s24] }
 0x662   : > { %5466 = vst [vmem:[%s11745_s7 + $0x4d0] sm:%s12040_s24] %v5465_v22  ;;  %5468 = vst [vmem:[%s11745_s7 + $0x508] sm:%s12040_s24] %v5467_v23 }
 0x663   : > { %v5469_v24 = vld [vmem:[%s11742_s30 + $0x180] sm:%s12040_s24]  ;;  %v5471_v25 = vld [vmem:[%s11742_s30 + $0x190] sm:%s12040_s24] }
 0x664   : > { %5470 = vst [vmem:[%s11745_s7 + $0x540] sm:%s12040_s24] %v5469_v24  ;;  %5472 = vst [vmem:[%s11745_s7 + $0x578] sm:%s12040_s24] %v5471_v25 }
 0x665   : > { %v5473_v26 = vld [vmem:[%s11742_s30 + $0x1a0] sm:%s12040_s24]  ;;  %v5475_v27 = vld [vmem:[%s11742_s30 + $0x1b0] sm:%s12040_s24] }
 0x666   : > { %5474 = vst [vmem:[%s11745_s7 + $0x5b0] sm:%s12040_s24] %v5473_v26  ;;  %5476 = vst [vmem:[%s11745_s7 + $0x5e8] sm:%s12040_s24] %v5475_v27 }
 0x667   : > { %v5477_v28 = vld [vmem:[%s11742_s30 + $0x1c0] sm:%s12040_s24]  ;;  %v5479_v29 = vld [vmem:[%s11742_s30 + $0x1d0] sm:%s12040_s24] }
 0x668   : > { %5478 = vst [vmem:[%s11745_s7 + $0x620] sm:%s12040_s24] %v5477_v28  ;;  %5480 = vst [vmem:[%s11745_s7 + $0x658] sm:%s12040_s24] %v5479_v29 }
 0x669   : > { %v5481_v30 = vld [vmem:[%s11742_s30 + $0x1e0] sm:%s12040_s24]  ;;  %v5483_v31 = vld [vmem:[%s11742_s30 + $0x1f0] sm:%s12040_s24] }
 0x66a   : > { %5482 = vst [vmem:[%s11745_s7 + $0x690] sm:%s12040_s24] %v5481_v30  ;;  %5484 = vst [vmem:[%s11745_s7 + $0x6c8] sm:%s12040_s24] %v5483_v31 }
 0x66b PF: > { %p5808_p6 = scmp.ge.u32.totalorder %s11435_s26, 8 }
 0x66c   : > { %s6617_s22 = smov (!%p5808_p6), 0  }
 0x66d   : > { %4847 = sbr.rel (%p5808_p6) target bundleno = 1678 (0x68e), region = 152  ;;  %s12172_s30 = sshllo.u32 (!%p5808_p6), %s6617_s22, %s11435_s26 }
 0x66e   : > { %v4857_v32 = vld [vmem:[%s11360_s21] sm:%s12172_s30] (!%p5808_p6)  ;;  %v4859_v33 = vld [vmem:[%s11360_s21 + $0x10] sm:%s12172_s30] (!%p5808_p6) }
 0x66f   : > { %4858 = vst [vmem:[%s11433_s20] sm:%s12172_s30] (!%p5808_p6), %v4857_v32  ;;  %4860 = vst [vmem:[%s11433_s20 + $0x38] sm:%s12172_s30] (!%p5808_p6), %v4859_v33 }
 0x670   : > { %v4861_v34 = vld [vmem:[%s11360_s21 + $0x20] sm:%s12172_s30] (!%p5808_p6)  ;;  %v4863_v35 = vld [vmem:[%s11360_s21 + $0x30] sm:%s12172_s30] (!%p5808_p6) }
 0x671   : > { %4862 = vst [vmem:[%s11433_s20 + $0x70] sm:%s12172_s30] (!%p5808_p6), %v4861_v34  ;;  %4864 = vst [vmem:[%s11433_s20 + $0xa8] sm:%s12172_s30] (!%p5808_p6), %v4863_v35 }
 0x672   : > { %v4865_v36 = vld [vmem:[%s11360_s21 + $0x40] sm:%s12172_s30] (!%p5808_p6)  ;;  %v4867_v37 = vld [vmem:[%s11360_s21 + $0x50] sm:%s12172_s30] (!%p5808_p6) }
 0x673   : > { %4866 = vst [vmem:[%s11433_s20 + $0xe0] sm:%s12172_s30] (!%p5808_p6), %v4865_v36  ;;  %4868 = vst [vmem:[%s11433_s20 + $0x118] sm:%s12172_s30] (!%p5808_p6), %v4867_v37 }
 0x674   : > { %v4869_v38 = vld [vmem:[%s11360_s21 + $0x60] sm:%s12172_s30]  ;;  %v4871_v39 = vld [vmem:[%s11360_s21 + $0x70] sm:%s12172_s30] }
 0x675   : > { %4870 = vst [vmem:[%s11433_s20 + $0x150] sm:%s12172_s30] %v4869_v38  ;;  %4872 = vst [vmem:[%s11433_s20 + $0x188] sm:%s12172_s30] %v4871_v39 }
 0x676   : > { %v4873_v40 = vld [vmem:[%s11360_s21 + $0x80] sm:%s12172_s30]  ;;  %v4875_v41 = vld [vmem:[%s11360_s21 + $0x90] sm:%s12172_s30] }
 0x677   : > { %4874 = vst [vmem:[%s11433_s20 + $0x1c0] sm:%s12172_s30] %v4873_v40  ;;  %4876 = vst [vmem:[%s11433_s20 + $0x1f8] sm:%s12172_s30] %v4875_v41 }
 0x678   : > { %v4877_v42 = vld [vmem:[%s11360_s21 + $0xa0] sm:%s12172_s30]  ;;  %v4879_v43 = vld [vmem:[%s11360_s21 + $0xb0] sm:%s12172_s30] }
 0x679   : > { %4878 = vst [vmem:[%s11433_s20 + $0x230] sm:%s12172_s30] %v4877_v42  ;;  %4880 = vst [vmem:[%s11433_s20 + $0x268] sm:%s12172_s30] %v4879_v43 }
 0x67a   : > { %v4881_v44 = vld [vmem:[%s11360_s21 + $0xc0] sm:%s12172_s30]  ;;  %v4883_v45 = vld [vmem:[%s11360_s21 + $0xd0] sm:%s12172_s30] }
 0x67b   : > { %4882 = vst [vmem:[%s11433_s20 + $0x2a0] sm:%s12172_s30] %v4881_v44  ;;  %4884 = vst [vmem:[%s11433_s20 + $0x2d8] sm:%s12172_s30] %v4883_v45 }
 0x67c   : > { %v4885_v46 = vld [vmem:[%s11360_s21 + $0xe0] sm:%s12172_s30]  ;;  %v4887_v47 = vld [vmem:[%s11360_s21 + $0xf0] sm:%s12172_s30] }
 0x67d   : > { %4886 = vst [vmem:[%s11433_s20 + $0x310] sm:%s12172_s30] %v4885_v46  ;;  %4888 = vst [vmem:[%s11433_s20 + $0x348] sm:%s12172_s30] %v4887_v47 }
 0x67e   : > { %v4889_v48 = vld [vmem:[%s11360_s21 + $0x100] sm:%s12172_s30]  ;;  %v4891_v49 = vld [vmem:[%s11360_s21 + $0x110] sm:%s12172_s30] }
 0x67f   : > { %4890 = vst [vmem:[%s11433_s20 + $0x380] sm:%s12172_s30] %v4889_v48  ;;  %4892 = vst [vmem:[%s11433_s20 + $0x3b8] sm:%s12172_s30] %v4891_v49 }
 0x680   : > { %v4893_v50 = vld [vmem:[%s11360_s21 + $0x120] sm:%s12172_s30]  ;;  %v4895_v51 = vld [vmem:[%s11360_s21 + $0x130] sm:%s12172_s30] }
 0x681   : > { %4894 = vst [vmem:[%s11433_s20 + $0x3f0] sm:%s12172_s30] %v4893_v50  ;;  %4896 = vst [vmem:[%s11433_s20 + $0x428] sm:%s12172_s30] %v4895_v51 }
 0x682   : > { %v4897_v52 = vld [vmem:[%s11360_s21 + $0x140] sm:%s12172_s30]  ;;  %v4899_v53 = vld [vmem:[%s11360_s21 + $0x150] sm:%s12172_s30] }
 0x683   : > { %4898 = vst [vmem:[%s11433_s20 + $0x460] sm:%s12172_s30] %v4897_v52  ;;  %4900 = vst [vmem:[%s11433_s20 + $0x498] sm:%s12172_s30] %v4899_v53 }
 0x684   : > { %v4901_v54 = vld [vmem:[%s11360_s21 + $0x160] sm:%s12172_s30]  ;;  %v4903_v55 = vld [vmem:[%s11360_s21 + $0x170] sm:%s12172_s30] }
 0x685   : > { %4902 = vst [vmem:[%s11433_s20 + $0x4d0] sm:%s12172_s30] %v4901_v54  ;;  %4904 = vst [vmem:[%s11433_s20 + $0x508] sm:%s12172_s30] %v4903_v55 }
 0x686   : > { %v4905_v56 = vld [vmem:[%s11360_s21 + $0x180] sm:%s12172_s30]  ;;  %v4907_v57 = vld [vmem:[%s11360_s21 + $0x190] sm:%s12172_s30] }
 0x687   : > { %4906 = vst [vmem:[%s11433_s20 + $0x540] sm:%s12172_s30] %v4905_v56  ;;  %4908 = vst [vmem:[%s11433_s20 + $0x578] sm:%s12172_s30] %v4907_v57 }
 0x688   : > { %v4909_v58 = vld [vmem:[%s11360_s21 + $0x1a0] sm:%s12172_s30]  ;;  %v4911_v59 = vld [vmem:[%s11360_s21 + $0x1b0] sm:%s12172_s30] }
 0x689   : > { %4910 = vst [vmem:[%s11433_s20 + $0x5b0] sm:%s12172_s30] %v4909_v58  ;;  %4912 = vst [vmem:[%s11433_s20 + $0x5e8] sm:%s12172_s30] %v4911_v59 }
 0x68a   : > { %v4913_v60 = vld [vmem:[%s11360_s21 + $0x1c0] sm:%s12172_s30]  ;;  %v4915_v61 = vld [vmem:[%s11360_s21 + $0x1d0] sm:%s12172_s30] }
 0x68b   : > { %4914 = vst [vmem:[%s11433_s20 + $0x620] sm:%s12172_s30] %v4913_v60  ;;  %4916 = vst [vmem:[%s11433_s20 + $0x658] sm:%s12172_s30] %v4915_v61 }
 0x68c   : > { %v4917_v62 = vld [vmem:[%s11360_s21 + $0x1e0] sm:%s12172_s30]  ;;  %v4919_v63 = vld [vmem:[%s11360_s21 + $0x1f0] sm:%s12172_s30] }
 0x68d   : > { %4918 = vst [vmem:[%s11433_s20 + $0x690] sm:%s12172_s30] %v4917_v62  ;;  %4920 = vst [vmem:[%s11433_s20 + $0x6c8] sm:%s12172_s30] %v4919_v63 }
 0x68e PF: > { %s13_s16 = sadd.s32 1, %s6482_s16   ;;  %s12363_s12 = smov %s6470_s13 }
 0x68f   : > { %p10_p8 = scmp.ge.s32.totalorder %s13_s16, 6   ;;  %s12364_s13 = smov %s6682_s23 }
 0x690   : > { %s12365_s14 = smov %s6478_s15  ;;  %s12366_s15 = smov %s12368_s17 }
 0x691   :  { %12 = sbr.rel (!%p10_p8) target bundleno = 3 (0x3), region = 371 }

</bundles_post_ra>
